<compile_context>
chip_gen: v6e
topology: v6e:2x2x1
jax: 0.10.0
libtpu: 0.0.40
codegen_flags: <defaults>
</compile_context>

<pallas_src>
import functools
import math

import jax
import jax.numpy as jnp
from jax.experimental import pallas as pl
from jax.experimental.pallas import tpu as pltpu


def _conv2d_eq_kernel(w_ref, b_ref, x_ref, o_ref, *,
                      K, stride, HO, WO, w_scale):
    # w_ref : VMEM (C_in*K*K, C_out, 1, 1) raw (unscaled) weights, tap-major
    # b_ref : VMEM (1, C_out, 1, 1)        raw (unscaled) bias
    # x_ref : VMEM (TN, C_in, Hp, Wp)      spatially padded input block
    # o_ref : VMEM (TN, C_out, HO, WO)     output block
    TN = o_ref.shape[0]
    C_out = o_ref.shape[1]
    C_in = x_ref.shape[1]

    acc = jnp.zeros((TN, C_out, HO, WO), jnp.float32)
    # Static tap loop (C_in*K*K iterations); every iteration is a single fused
    # vector FMA over the full (TN, C_out, HO, WO) block.
    for ci in range(C_in):
        for kh in range(K):
            for kw in range(K):
                t = (ci * K + kh) * K + kw
                if stride == 1:
                    patch = x_ref[:, ci, kh:kh + HO, kw:kw + WO]
                else:
                    patch = x_ref[:, ci,
                                  pl.ds(kh, HO, stride),
                                  pl.ds(kw, WO, stride)]
                # (C_out,1,1) * (TN,1,HO,WO) -> (TN,C_out,HO,WO)
                acc = acc + (w_ref[t].astype(jnp.float32)
                             * patch[:, None, :, :].astype(jnp.float32))

    out = w_scale * (acc + b_ref[...].astype(jnp.float32))
    o_ref[...] = out.astype(o_ref.dtype)


def conv2d_equalized(x, weight, bias=None, *, stride=1, padding=0,
                     gain=2 ** 0.5, batch_tile=None):
    """Forward pass of Conv2dEqualized.  x: (N, C_in, H, W) NCHW, f32."""
    N, C_in, H, W = x.shape
    C_out, C_in_w, KH, KW = weight.shape
    assert C_in_w == C_in and KH == KW, "square kernel, matching in-channels"
    K = KH
    w_scale = float(gain) / math.sqrt(C_in * K * K)

    # Spatial zero-padding (wrapper-side layout plumbing).
    if padding:
        x = jnp.pad(x, ((0, 0), (0, 0), (padding, padding), (padding, padding)))
    Hp, Wp = H + 2 * padding, W + 2 * padding
    HO = (Hp - K) // stride + 1
    WO = (Wp - K) // stride + 1

    # Weight presented tap-major as (C_in*K*K, C_out, 1, 1): each tap is a
    # (C_out, 1, 1) slab that broadcasts against a (TN, 1, HO, WO) patch with
    # no in-kernel transpose / relayout.
    w_t = jnp.transpose(weight, (1, 2, 3, 0)).reshape(C_in * K * K, C_out, 1, 1)
    if bias is None:
        bias = jnp.zeros((C_out,), x.dtype)
    b = bias.reshape(1, C_out, 1, 1)

    # Batch tile: largest divisor of N whose in+out block stays under ~4 MiB
    # (double-buffered blocks then stay well inside scoped VMEM on all gens).
    if batch_tile is None:
        bytes_per_n = (C_in * Hp * Wp + C_out * HO * WO) * x.dtype.itemsize
        budget = 4 * 1024 * 1024
        batch_tile = 1
        for t in range(1, N + 1):
            if N % t == 0 and t * bytes_per_n <= budget:
                batch_tile = t
    TN = batch_tile
    assert N % TN == 0

    kernel = functools.partial(
        _conv2d_eq_kernel, K=K, stride=stride, HO=HO, WO=WO, w_scale=w_scale)

    return pl.pallas_call(
        kernel,
        out_shape=jax.ShapeDtypeStruct((N, C_out, HO, WO), x.dtype),
        grid_spec=pltpu.PrefetchScalarGridSpec(
            num_scalar_prefetch=0,
            grid=(N // TN,),
            in_specs=[
                pl.BlockSpec((C_in * K * K, C_out, 1, 1),
                             lambda n: (0, 0, 0, 0)),        # weight (resident)
                pl.BlockSpec((1, C_out, 1, 1),
                             lambda n: (0, 0, 0, 0)),        # bias   (resident)
                pl.BlockSpec((TN, C_in, Hp, Wp),
                             lambda n: (n, 0, 0, 0)),        # x batch tile
            ],
            out_specs=pl.BlockSpec((TN, C_out, HO, WO),
                                   lambda n: (n, 0, 0, 0)),
        ),
        compiler_params=pltpu.CompilerParams(
            # Batch tiles are independent -> shard across both TCs on v7x.
            dimension_semantics=("parallel",),
        ),
    )(w_t, b, x)


if __name__ == "__main__":
    key = jax.random.PRNGKey(0)
    kx, kw, kb = jax.random.split(key, 3)

    N, C_in, C_out, K, H, W = 2, 4, 8, 3, 16, 16
    stride, padding, gain = 1, 1, 2 ** 0.5

    x = jax.random.normal(kx, (N, C_in, H, W), dtype=jnp.float32)
    weight = jax.random.normal(kw, (C_out, C_in, K, K), dtype=jnp.float32)
    # NOTE: the PyTorch module initializes bias to zeros; use a non-zero bias
    # here so the bias path is actually exercised.
    bias = jax.random.normal(kb, (C_out,), dtype=jnp.float32)

    out = conv2d_equalized(x, weight, bias, stride=stride, padding=padding,
                           gain=gain)
    out = jax.block_until_ready(out)

    # Reference: XLA conv with the equalized-LR scaling applied as in PyTorch.
    w_scale = gain / math.sqrt(C_in * K * K)
    ref = jax.lax.conv_general_dilated(
        x, w_scale * weight, window_strides=(stride, stride),
        padding=((padding, padding), (padding, padding)),
        dimension_numbers=("NCHW", "OIHW", "NCHW"))
    ref = ref + (w_scale * bias)[None, :, None, None]

    assert out.shape == ref.shape == (N, C_out, H, W)
    assert out.dtype == jnp.float32
    max_err = float(jnp.max(jnp.abs(out - ref)))
    assert jnp.allclose(out, ref, rtol=1e-4, atol=1e-4), max_err

    print("KERNEL_OK")
</pallas_src>

<mosaic_0001>
module attributes {stable_mosaic.version = 11 : i64} {
  func.func @_conv2d_eq_kernel(%arg0: i32, %arg1: memref<36x8x1x1xf32, #tpu.memory_space<vmem>>, %arg2: memref<1x8x1x1xf32, #tpu.memory_space<vmem>>, %arg3: memref<2x4x18x18xf32, #tpu.memory_space<vmem>>, %arg4: memref<2x8x16x16xf32, #tpu.memory_space<vmem>>) attributes {dimension_semantics = [#tpu.dimension_semantics<parallel>], iteration_bounds = array<i64: 1>, scalar_prefetch = 0 : i64, scratch_operands = 0 : i64, tpu.core_type = #tpu.core_type<tc>, window_params = [{pipeline_mode = #tpu.pipeline_mode<synchronous>, transform_indices = @transform_0, window_bounds = array<i64: 36, 8, 1, 1>}, {pipeline_mode = #tpu.pipeline_mode<synchronous>, transform_indices = @transform_1, window_bounds = array<i64: 1, 8, 1, 1>}, {transform_indices = @transform_2, window_bounds = array<i64: 2, 4, 18, 18>}, {transform_indices = @transform_3, window_bounds = array<i64: 2, 8, 16, 16>}]} {
    %cst = arith.constant 0.000000e+00 : f32
    %0 = vector.broadcast %cst : f32 to vector<2x8x16x16xf32>
    %c0 = arith.constant 0 : index
    %c0_0 = arith.constant 0 : index
    %c0_1 = arith.constant 0 : index
    %c0_2 = arith.constant 0 : index
    %1 = vector.load %arg3[%c0, %c0_0, %c0_1, %c0_2] : memref<2x4x18x18xf32, #tpu.memory_space<vmem>>, vector<2x1x16x16xf32>
    %2 = vector.shape_cast %1 : vector<2x1x16x16xf32> to vector<2x16x16xf32>
    %c0_3 = arith.constant 0 : index
    %c0_4 = arith.constant 0 : index
    %c0_5 = arith.constant 0 : index
    %c0_6 = arith.constant 0 : index
    %3 = vector.load %arg1[%c0_3, %c0_4, %c0_5, %c0_6] : memref<36x8x1x1xf32, #tpu.memory_space<vmem>>, vector<1x8x1x1xf32>
    %4 = vector.shape_cast %3 : vector<1x8x1x1xf32> to vector<8x1x1xf32>
    %5 = vector.shape_cast %2 : vector<2x16x16xf32> to vector<2x1x16x16xf32>
    %6 = vector.shape_cast %4 : vector<8x1x1xf32> to vector<1x8x1x1xf32>
    %7 = vector.broadcast %6 : vector<1x8x1x1xf32> to vector<2x8x16x16xf32>
    %8 = vector.broadcast %5 : vector<2x1x16x16xf32> to vector<2x8x16x16xf32>
    %9 = arith.mulf %7, %8 : vector<2x8x16x16xf32>
    %10 = arith.addf %0, %9 : vector<2x8x16x16xf32>
    %c0_7 = arith.constant 0 : index
    %c0_8 = arith.constant 0 : index
    %c0_9 = arith.constant 0 : index
    %c1 = arith.constant 1 : index
    %11 = vector.load %arg3[%c0_7, %c0_8, %c0_9, %c1] : memref<2x4x18x18xf32, #tpu.memory_space<vmem>>, vector<2x1x16x16xf32>
    %12 = vector.shape_cast %11 : vector<2x1x16x16xf32> to vector<2x16x16xf32>
    %c1_10 = arith.constant 1 : index
    %c0_11 = arith.constant 0 : index
    %c0_12 = arith.constant 0 : index
    %c0_13 = arith.constant 0 : index
    %13 = vector.load %arg1[%c1_10, %c0_11, %c0_12, %c0_13] : memref<36x8x1x1xf32, #tpu.memory_space<vmem>>, vector<1x8x1x1xf32>
    %14 = vector.shape_cast %13 : vector<1x8x1x1xf32> to vector<8x1x1xf32>
    %15 = vector.shape_cast %12 : vector<2x16x16xf32> to vector<2x1x16x16xf32>
    %16 = vector.shape_cast %14 : vector<8x1x1xf32> to vector<1x8x1x1xf32>
    %17 = vector.broadcast %16 : vector<1x8x1x1xf32> to vector<2x8x16x16xf32>
    %18 = vector.broadcast %15 : vector<2x1x16x16xf32> to vector<2x8x16x16xf32>
    %19 = arith.mulf %17, %18 : vector<2x8x16x16xf32>
    %20 = arith.addf %10, %19 : vector<2x8x16x16xf32>
    %c0_14 = arith.constant 0 : index
    %c0_15 = arith.constant 0 : index
    %c0_16 = arith.constant 0 : index
    %c2 = arith.constant 2 : index
    %21 = vector.load %arg3[%c0_14, %c0_15, %c0_16, %c2] : memref<2x4x18x18xf32, #tpu.memory_space<vmem>>, vector<2x1x16x16xf32>
    %22 = vector.shape_cast %21 : vector<2x1x16x16xf32> to vector<2x16x16xf32>
    %c2_17 = arith.constant 2 : index
    %c0_18 = arith.constant 0 : index
    %c0_19 = arith.constant 0 : index
    %c0_20 = arith.constant 0 : index
    %23 = vector.load %arg1[%c2_17, %c0_18, %c0_19, %c0_20] : memref<36x8x1x1xf32, #tpu.memory_space<vmem>>, vector<1x8x1x1xf32>
    %24 = vector.shape_cast %23 : vector<1x8x1x1xf32> to vector<8x1x1xf32>
    %25 = vector.shape_cast %22 : vector<2x16x16xf32> to vector<2x1x16x16xf32>
    %26 = vector.shape_cast %24 : vector<8x1x1xf32> to vector<1x8x1x1xf32>
    %27 = vector.broadcast %26 : vector<1x8x1x1xf32> to vector<2x8x16x16xf32>
    %28 = vector.broadcast %25 : vector<2x1x16x16xf32> to vector<2x8x16x16xf32>
    %29 = arith.mulf %27, %28 : vector<2x8x16x16xf32>
    %30 = arith.addf %20, %29 : vector<2x8x16x16xf32>
    %c0_21 = arith.constant 0 : index
    %c0_22 = arith.constant 0 : index
    %c1_23 = arith.constant 1 : index
    %c0_24 = arith.constant 0 : index
    %31 = vector.load %arg3[%c0_21, %c0_22, %c1_23, %c0_24] : memref<2x4x18x18xf32, #tpu.memory_space<vmem>>, vector<2x1x16x16xf32>
    %32 = vector.shape_cast %31 : vector<2x1x16x16xf32> to vector<2x16x16xf32>
    %c3 = arith.constant 3 : index
    %c0_25 = arith.constant 0 : index
    %c0_26 = arith.constant 0 : index
    %c0_27 = arith.constant 0 : index
    %33 = vector.load %arg1[%c3, %c0_25, %c0_26, %c0_27] : memref<36x8x1x1xf32, #tpu.memory_space<vmem>>, vector<1x8x1x1xf32>
    %34 = vector.shape_cast %33 : vector<1x8x1x1xf32> to vector<8x1x1xf32>
    %35 = vector.shape_cast %32 : vector<2x16x16xf32> to vector<2x1x16x16xf32>
    %36 = vector.shape_cast %34 : vector<8x1x1xf32> to vector<1x8x1x1xf32>
    %37 = vector.broadcast %36 : vector<1x8x1x1xf32> to vector<2x8x16x16xf32>
    %38 = vector.broadcast %35 : vector<2x1x16x16xf32> to vector<2x8x16x16xf32>
    %39 = arith.mulf %37, %38 : vector<2x8x16x16xf32>
    %40 = arith.addf %30, %39 : vector<2x8x16x16xf32>
    %c0_28 = arith.constant 0 : index
    %c0_29 = arith.constant 0 : index
    %c1_30 = arith.constant 1 : index
    %c1_31 = arith.constant 1 : index
    %41 = vector.load %arg3[%c0_28, %c0_29, %c1_30, %c1_31] : memref<2x4x18x18xf32, #tpu.memory_space<vmem>>, vector<2x1x16x16xf32>
    %42 = vector.shape_cast %41 : vector<2x1x16x16xf32> to vector<2x16x16xf32>
    %c4 = arith.constant 4 : index
    %c0_32 = arith.constant 0 : index
    %c0_33 = arith.constant 0 : index
    %c0_34 = arith.constant 0 : index
    %43 = vector.load %arg1[%c4, %c0_32, %c0_33, %c0_34] : memref<36x8x1x1xf32, #tpu.memory_space<vmem>>, vector<1x8x1x1xf32>
    %44 = vector.shape_cast %43 : vector<1x8x1x1xf32> to vector<8x1x1xf32>
    %45 = vector.shape_cast %42 : vector<2x16x16xf32> to vector<2x1x16x16xf32>
    %46 = vector.shape_cast %44 : vector<8x1x1xf32> to vector<1x8x1x1xf32>
    %47 = vector.broadcast %46 : vector<1x8x1x1xf32> to vector<2x8x16x16xf32>
    %48 = vector.broadcast %45 : vector<2x1x16x16xf32> to vector<2x8x16x16xf32>
    %49 = arith.mulf %47, %48 : vector<2x8x16x16xf32>
    %50 = arith.addf %40, %49 : vector<2x8x16x16xf32>
    %c0_35 = arith.constant 0 : index
    %c0_36 = arith.constant 0 : index
    %c1_37 = arith.constant 1 : index
    %c2_38 = arith.constant 2 : index
    %51 = vector.load %arg3[%c0_35, %c0_36, %c1_37, %c2_38] : memref<2x4x18x18xf32, #tpu.memory_space<vmem>>, vector<2x1x16x16xf32>
    %52 = vector.shape_cast %51 : vector<2x1x16x16xf32> to vector<2x16x16xf32>
    %c5 = arith.constant 5 : index
    %c0_39 = arith.constant 0 : index
    %c0_40 = arith.constant 0 : index
    %c0_41 = arith.constant 0 : index
    %53 = vector.load %arg1[%c5, %c0_39, %c0_40, %c0_41] : memref<36x8x1x1xf32, #tpu.memory_space<vmem>>, vector<1x8x1x1xf32>
    %54 = vector.shape_cast %53 : vector<1x8x1x1xf32> to vector<8x1x1xf32>
    %55 = vector.shape_cast %52 : vector<2x16x16xf32> to vector<2x1x16x16xf32>
    %56 = vector.shape_cast %54 : vector<8x1x1xf32> to vector<1x8x1x1xf32>
    %57 = vector.broadcast %56 : vector<1x8x1x1xf32> to vector<2x8x16x16xf32>
    %58 = vector.broadcast %55 : vector<2x1x16x16xf32> to vector<2x8x16x16xf32>
    %59 = arith.mulf %57, %58 : vector<2x8x16x16xf32>
    %60 = arith.addf %50, %59 : vector<2x8x16x16xf32>
    %c0_42 = arith.constant 0 : index
    %c0_43 = arith.constant 0 : index
    %c2_44 = arith.constant 2 : index
    %c0_45 = arith.constant 0 : index
    %61 = vector.load %arg3[%c0_42, %c0_43, %c2_44, %c0_45] : memref<2x4x18x18xf32, #tpu.memory_space<vmem>>, vector<2x1x16x16xf32>
    %62 = vector.shape_cast %61 : vector<2x1x16x16xf32> to vector<2x16x16xf32>
    %c6 = arith.constant 6 : index
    %c0_46 = arith.constant 0 : index
    %c0_47 = arith.constant 0 : index
    %c0_48 = arith.constant 0 : index
    %63 = vector.load %arg1[%c6, %c0_46, %c0_47, %c0_48] : memref<36x8x1x1xf32, #tpu.memory_space<vmem>>, vector<1x8x1x1xf32>
    %64 = vector.shape_cast %63 : vector<1x8x1x1xf32> to vector<8x1x1xf32>
    %65 = vector.shape_cast %62 : vector<2x16x16xf32> to vector<2x1x16x16xf32>
    %66 = vector.shape_cast %64 : vector<8x1x1xf32> to vector<1x8x1x1xf32>
    %67 = vector.broadcast %66 : vector<1x8x1x1xf32> to vector<2x8x16x16xf32>
    %68 = vector.broadcast %65 : vector<2x1x16x16xf32> to vector<2x8x16x16xf32>
    %69 = arith.mulf %67, %68 : vector<2x8x16x16xf32>
    %70 = arith.addf %60, %69 : vector<2x8x16x16xf32>
    %c0_49 = arith.constant 0 : index
    %c0_50 = arith.constant 0 : index
    %c2_51 = arith.constant 2 : index
    %c1_52 = arith.constant 1 : index
    %71 = vector.load %arg3[%c0_49, %c0_50, %c2_51, %c1_52] : memref<2x4x18x18xf32, #tpu.memory_space<vmem>>, vector<2x1x16x16xf32>
    %72 = vector.shape_cast %71 : vector<2x1x16x16xf32> to vector<2x16x16xf32>
    %c7 = arith.constant 7 : index
    %c0_53 = arith.constant 0 : index
    %c0_54 = arith.constant 0 : index
    %c0_55 = arith.constant 0 : index
    %73 = vector.load %arg1[%c7, %c0_53, %c0_54, %c0_55] : memref<36x8x1x1xf32, #tpu.memory_space<vmem>>, vector<1x8x1x1xf32>
    %74 = vector.shape_cast %73 : vector<1x8x1x1xf32> to vector<8x1x1xf32>
    %75 = vector.shape_cast %72 : vector<2x16x16xf32> to vector<2x1x16x16xf32>
    %76 = vector.shape_cast %74 : vector<8x1x1xf32> to vector<1x8x1x1xf32>
    %77 = vector.broadcast %76 : vector<1x8x1x1xf32> to vector<2x8x16x16xf32>
    %78 = vector.broadcast %75 : vector<2x1x16x16xf32> to vector<2x8x16x16xf32>
    %79 = arith.mulf %77, %78 : vector<2x8x16x16xf32>
    %80 = arith.addf %70, %79 : vector<2x8x16x16xf32>
    %c0_56 = arith.constant 0 : index
    %c0_57 = arith.constant 0 : index
    %c2_58 = arith.constant 2 : index
    %c2_59 = arith.constant 2 : index
    %81 = vector.load %arg3[%c0_56, %c0_57, %c2_58, %c2_59] : memref<2x4x18x18xf32, #tpu.memory_space<vmem>>, vector<2x1x16x16xf32>
    %82 = vector.shape_cast %81 : vector<2x1x16x16xf32> to vector<2x16x16xf32>
    %c8 = arith.constant 8 : index
    %c0_60 = arith.constant 0 : index
    %c0_61 = arith.constant 0 : index
    %c0_62 = arith.constant 0 : index
    %83 = vector.load %arg1[%c8, %c0_60, %c0_61, %c0_62] : memref<36x8x1x1xf32, #tpu.memory_space<vmem>>, vector<1x8x1x1xf32>
    %84 = vector.shape_cast %83 : vector<1x8x1x1xf32> to vector<8x1x1xf32>
    %85 = vector.shape_cast %82 : vector<2x16x16xf32> to vector<2x1x16x16xf32>
    %86 = vector.shape_cast %84 : vector<8x1x1xf32> to vector<1x8x1x1xf32>
    %87 = vector.broadcast %86 : vector<1x8x1x1xf32> to vector<2x8x16x16xf32>
    %88 = vector.broadcast %85 : vector<2x1x16x16xf32> to vector<2x8x16x16xf32>
    %89 = arith.mulf %87, %88 : vector<2x8x16x16xf32>
    %90 = arith.addf %80, %89 : vector<2x8x16x16xf32>
    %c0_63 = arith.constant 0 : index
    %c1_64 = arith.constant 1 : index
    %c0_65 = arith.constant 0 : index
    %c0_66 = arith.constant 0 : index
    %91 = vector.load %arg3[%c0_63, %c1_64, %c0_65, %c0_66] : memref<2x4x18x18xf32, #tpu.memory_space<vmem>>, vector<2x1x16x16xf32>
    %92 = vector.shape_cast %91 : vector<2x1x16x16xf32> to vector<2x16x16xf32>
    %c9 = arith.constant 9 : index
    %c0_67 = arith.constant 0 : index
    %c0_68 = arith.constant 0 : index
    %c0_69 = arith.constant 0 : index
    %93 = vector.load %arg1[%c9, %c0_67, %c0_68, %c0_69] : memref<36x8x1x1xf32, #tpu.memory_space<vmem>>, vector<1x8x1x1xf32>
    %94 = vector.shape_cast %93 : vector<1x8x1x1xf32> to vector<8x1x1xf32>
    %95 = vector.shape_cast %92 : vector<2x16x16xf32> to vector<2x1x16x16xf32>
    %96 = vector.shape_cast %94 : vector<8x1x1xf32> to vector<1x8x1x1xf32>
    %97 = vector.broadcast %96 : vector<1x8x1x1xf32> to vector<2x8x16x16xf32>
    %98 = vector.broadcast %95 : vector<2x1x16x16xf32> to vector<2x8x16x16xf32>
    %99 = arith.mulf %97, %98 : vector<2x8x16x16xf32>
    %100 = arith.addf %90, %99 : vector<2x8x16x16xf32>
    %c0_70 = arith.constant 0 : index
    %c1_71 = arith.constant 1 : index
    %c0_72 = arith.constant 0 : index
    %c1_73 = arith.constant 1 : index
    %101 = vector.load %arg3[%c0_70, %c1_71, %c0_72, %c1_73] : memref<2x4x18x18xf32, #tpu.memory_space<vmem>>, vector<2x1x16x16xf32>
    %102 = vector.shape_cast %101 : vector<2x1x16x16xf32> to vector<2x16x16xf32>
    %c10 = arith.constant 10 : index
    %c0_74 = arith.constant 0 : index
    %c0_75 = arith.constant 0 : index
    %c0_76 = arith.constant 0 : index
    %103 = vector.load %arg1[%c10, %c0_74, %c0_75, %c0_76] : memref<36x8x1x1xf32, #tpu.memory_space<vmem>>, vector<1x8x1x1xf32>
    %104 = vector.shape_cast %103 : vector<1x8x1x1xf32> to vector<8x1x1xf32>
    %105 = vector.shape_cast %102 : vector<2x16x16xf32> to vector<2x1x16x16xf32>
    %106 = vector.shape_cast %104 : vector<8x1x1xf32> to vector<1x8x1x1xf32>
    %107 = vector.broadcast %106 : vector<1x8x1x1xf32> to vector<2x8x16x16xf32>
    %108 = vector.broadcast %105 : vector<2x1x16x16xf32> to vector<2x8x16x16xf32>
    %109 = arith.mulf %107, %108 : vector<2x8x16x16xf32>
    %110 = arith.addf %100, %109 : vector<2x8x16x16xf32>
    %c0_77 = arith.constant 0 : index
    %c1_78 = arith.constant 1 : index
    %c0_79 = arith.constant 0 : index
    %c2_80 = arith.constant 2 : index
    %111 = vector.load %arg3[%c0_77, %c1_78, %c0_79, %c2_80] : memref<2x4x18x18xf32, #tpu.memory_space<vmem>>, vector<2x1x16x16xf32>
    %112 = vector.shape_cast %111 : vector<2x1x16x16xf32> to vector<2x16x16xf32>
    %c11 = arith.constant 11 : index
    %c0_81 = arith.constant 0 : index
    %c0_82 = arith.constant 0 : index
    %c0_83 = arith.constant 0 : index
    %113 = vector.load %arg1[%c11, %c0_81, %c0_82, %c0_83] : memref<36x8x1x1xf32, #tpu.memory_space<vmem>>, vector<1x8x1x1xf32>
    %114 = vector.shape_cast %113 : vector<1x8x1x1xf32> to vector<8x1x1xf32>
    %115 = vector.shape_cast %112 : vector<2x16x16xf32> to vector<2x1x16x16xf32>
    %116 = vector.shape_cast %114 : vector<8x1x1xf32> to vector<1x8x1x1xf32>
    %117 = vector.broadcast %116 : vector<1x8x1x1xf32> to vector<2x8x16x16xf32>
    %118 = vector.broadcast %115 : vector<2x1x16x16xf32> to vector<2x8x16x16xf32>
    %119 = arith.mulf %117, %118 : vector<2x8x16x16xf32>
    %120 = arith.addf %110, %119 : vector<2x8x16x16xf32>
    %c0_84 = arith.constant 0 : index
    %c1_85 = arith.constant 1 : index
    %c1_86 = arith.constant 1 : index
    %c0_87 = arith.constant 0 : index
    %121 = vector.load %arg3[%c0_84, %c1_85, %c1_86, %c0_87] : memref<2x4x18x18xf32, #tpu.memory_space<vmem>>, vector<2x1x16x16xf32>
    %122 = vector.shape_cast %121 : vector<2x1x16x16xf32> to vector<2x16x16xf32>
    %c12 = arith.constant 12 : index
    %c0_88 = arith.constant 0 : index
    %c0_89 = arith.constant 0 : index
    %c0_90 = arith.constant 0 : index
    %123 = vector.load %arg1[%c12, %c0_88, %c0_89, %c0_90] : memref<36x8x1x1xf32, #tpu.memory_space<vmem>>, vector<1x8x1x1xf32>
    %124 = vector.shape_cast %123 : vector<1x8x1x1xf32> to vector<8x1x1xf32>
    %125 = vector.shape_cast %122 : vector<2x16x16xf32> to vector<2x1x16x16xf32>
    %126 = vector.shape_cast %124 : vector<8x1x1xf32> to vector<1x8x1x1xf32>
    %127 = vector.broadcast %126 : vector<1x8x1x1xf32> to vector<2x8x16x16xf32>
    %128 = vector.broadcast %125 : vector<2x1x16x16xf32> to vector<2x8x16x16xf32>
    %129 = arith.mulf %127, %128 : vector<2x8x16x16xf32>
    %130 = arith.addf %120, %129 : vector<2x8x16x16xf32>
    %c0_91 = arith.constant 0 : index
    %c1_92 = arith.constant 1 : index
    %c1_93 = arith.constant 1 : index
    %c1_94 = arith.constant 1 : index
    %131 = vector.load %arg3[%c0_91, %c1_92, %c1_93, %c1_94] : memref<2x4x18x18xf32, #tpu.memory_space<vmem>>, vector<2x1x16x16xf32>
    %132 = vector.shape_cast %131 : vector<2x1x16x16xf32> to vector<2x16x16xf32>
    %c13 = arith.constant 13 : index
    %c0_95 = arith.constant 0 : index
    %c0_96 = arith.constant 0 : index
    %c0_97 = arith.constant 0 : index
    %133 = vector.load %arg1[%c13, %c0_95, %c0_96, %c0_97] : memref<36x8x1x1xf32, #tpu.memory_space<vmem>>, vector<1x8x1x1xf32>
    %134 = vector.shape_cast %133 : vector<1x8x1x1xf32> to vector<8x1x1xf32>
    %135 = vector.shape_cast %132 : vector<2x16x16xf32> to vector<2x1x16x16xf32>
    %136 = vector.shape_cast %134 : vector<8x1x1xf32> to vector<1x8x1x1xf32>
    %137 = vector.broadcast %136 : vector<1x8x1x1xf32> to vector<2x8x16x16xf32>
    %138 = vector.broadcast %135 : vector<2x1x16x16xf32> to vector<2x8x16x16xf32>
    %139 = arith.mulf %137, %138 : vector<2x8x16x16xf32>
    %140 = arith.addf %130, %139 : vector<2x8x16x16xf32>
    %c0_98 = arith.constant 0 : index
    %c1_99 = arith.constant 1 : index
    %c1_100 = arith.constant 1 : index
    %c2_101 = arith.constant 2 : index
    %141 = vector.load %arg3[%c0_98, %c1_99, %c1_100, %c2_101] : memref<2x4x18x18xf32, #tpu.memory_space<vmem>>, vector<2x1x16x16xf32>
    %142 = vector.shape_cast %141 : vector<2x1x16x16xf32> to vector<2x16x16xf32>
    %c14 = arith.constant 14 : index
    %c0_102 = arith.constant 0 : index
    %c0_103 = arith.constant 0 : index
    %c0_104 = arith.constant 0 : index
    %143 = vector.load %arg1[%c14, %c0_102, %c0_103, %c0_104] : memref<36x8x1x1xf32, #tpu.memory_space<vmem>>, vector<1x8x1x1xf32>
    %144 = vector.shape_cast %143 : vector<1x8x1x1xf32> to vector<8x1x1xf32>
    %145 = vector.shape_cast %142 : vector<2x16x16xf32> to vector<2x1x16x16xf32>
    %146 = vector.shape_cast %144 : vector<8x1x1xf32> to vector<1x8x1x1xf32>
    %147 = vector.broadcast %146 : vector<1x8x1x1xf32> to vector<2x8x16x16xf32>
    %148 = vector.broadcast %145 : vector<2x1x16x16xf32> to vector<2x8x16x16xf32>
    %149 = arith.mulf %147, %148 : vector<2x8x16x16xf32>
    %150 = arith.addf %140, %149 : vector<2x8x16x16xf32>
    %c0_105 = arith.constant 0 : index
    %c1_106 = arith.constant 1 : index
    %c2_107 = arith.constant 2 : index
    %c0_108 = arith.constant 0 : index
    %151 = vector.load %arg3[%c0_105, %c1_106, %c2_107, %c0_108] : memref<2x4x18x18xf32, #tpu.memory_space<vmem>>, vector<2x1x16x16xf32>
    %152 = vector.shape_cast %151 : vector<2x1x16x16xf32> to vector<2x16x16xf32>
    %c15 = arith.constant 15 : index
    %c0_109 = arith.constant 0 : index
    %c0_110 = arith.constant 0 : index
    %c0_111 = arith.constant 0 : index
    %153 = vector.load %arg1[%c15, %c0_109, %c0_110, %c0_111] : memref<36x8x1x1xf32, #tpu.memory_space<vmem>>, vector<1x8x1x1xf32>
    %154 = vector.shape_cast %153 : vector<1x8x1x1xf32> to vector<8x1x1xf32>
    %155 = vector.shape_cast %152 : vector<2x16x16xf32> to vector<2x1x16x16xf32>
    %156 = vector.shape_cast %154 : vector<8x1x1xf32> to vector<1x8x1x1xf32>
    %157 = vector.broadcast %156 : vector<1x8x1x1xf32> to vector<2x8x16x16xf32>
    %158 = vector.broadcast %155 : vector<2x1x16x16xf32> to vector<2x8x16x16xf32>
    %159 = arith.mulf %157, %158 : vector<2x8x16x16xf32>
    %160 = arith.addf %150, %159 : vector<2x8x16x16xf32>
    %c0_112 = arith.constant 0 : index
    %c1_113 = arith.constant 1 : index
    %c2_114 = arith.constant 2 : index
    %c1_115 = arith.constant 1 : index
    %161 = vector.load %arg3[%c0_112, %c1_113, %c2_114, %c1_115] : memref<2x4x18x18xf32, #tpu.memory_space<vmem>>, vector<2x1x16x16xf32>
    %162 = vector.shape_cast %161 : vector<2x1x16x16xf32> to vector<2x16x16xf32>
    %c16 = arith.constant 16 : index
    %c0_116 = arith.constant 0 : index
    %c0_117 = arith.constant 0 : index
    %c0_118 = arith.constant 0 : index
    %163 = vector.load %arg1[%c16, %c0_116, %c0_117, %c0_118] : memref<36x8x1x1xf32, #tpu.memory_space<vmem>>, vector<1x8x1x1xf32>
    %164 = vector.shape_cast %163 : vector<1x8x1x1xf32> to vector<8x1x1xf32>
    %165 = vector.shape_cast %162 : vector<2x16x16xf32> to vector<2x1x16x16xf32>
    %166 = vector.shape_cast %164 : vector<8x1x1xf32> to vector<1x8x1x1xf32>
    %167 = vector.broadcast %166 : vector<1x8x1x1xf32> to vector<2x8x16x16xf32>
    %168 = vector.broadcast %165 : vector<2x1x16x16xf32> to vector<2x8x16x16xf32>
    %169 = arith.mulf %167, %168 : vector<2x8x16x16xf32>
    %170 = arith.addf %160, %169 : vector<2x8x16x16xf32>
    %c0_119 = arith.constant 0 : index
    %c1_120 = arith.constant 1 : index
    %c2_121 = arith.constant 2 : index
    %c2_122 = arith.constant 2 : index
    %171 = vector.load %arg3[%c0_119, %c1_120, %c2_121, %c2_122] : memref<2x4x18x18xf32, #tpu.memory_space<vmem>>, vector<2x1x16x16xf32>
    %172 = vector.shape_cast %171 : vector<2x1x16x16xf32> to vector<2x16x16xf32>
    %c17 = arith.constant 17 : index
    %c0_123 = arith.constant 0 : index
    %c0_124 = arith.constant 0 : index
    %c0_125 = arith.constant 0 : index
    %173 = vector.load %arg1[%c17, %c0_123, %c0_124, %c0_125] : memref<36x8x1x1xf32, #tpu.memory_space<vmem>>, vector<1x8x1x1xf32>
    %174 = vector.shape_cast %173 : vector<1x8x1x1xf32> to vector<8x1x1xf32>
    %175 = vector.shape_cast %172 : vector<2x16x16xf32> to vector<2x1x16x16xf32>
    %176 = vector.shape_cast %174 : vector<8x1x1xf32> to vector<1x8x1x1xf32>
    %177 = vector.broadcast %176 : vector<1x8x1x1xf32> to vector<2x8x16x16xf32>
    %178 = vector.broadcast %175 : vector<2x1x16x16xf32> to vector<2x8x16x16xf32>
    %179 = arith.mulf %177, %178 : vector<2x8x16x16xf32>
    %180 = arith.addf %170, %179 : vector<2x8x16x16xf32>
    %c0_126 = arith.constant 0 : index
    %c2_127 = arith.constant 2 : index
    %c0_128 = arith.constant 0 : index
    %c0_129 = arith.constant 0 : index
    %181 = vector.load %arg3[%c0_126, %c2_127, %c0_128, %c0_129] : memref<2x4x18x18xf32, #tpu.memory_space<vmem>>, vector<2x1x16x16xf32>
    %182 = vector.shape_cast %181 : vector<2x1x16x16xf32> to vector<2x16x16xf32>
    %c18 = arith.constant 18 : index
    %c0_130 = arith.constant 0 : index
    %c0_131 = arith.constant 0 : index
    %c0_132 = arith.constant 0 : index
    %183 = vector.load %arg1[%c18, %c0_130, %c0_131, %c0_132] : memref<36x8x1x1xf32, #tpu.memory_space<vmem>>, vector<1x8x1x1xf32>
    %184 = vector.shape_cast %183 : vector<1x8x1x1xf32> to vector<8x1x1xf32>
    %185 = vector.shape_cast %182 : vector<2x16x16xf32> to vector<2x1x16x16xf32>
    %186 = vector.shape_cast %184 : vector<8x1x1xf32> to vector<1x8x1x1xf32>
    %187 = vector.broadcast %186 : vector<1x8x1x1xf32> to vector<2x8x16x16xf32>
    %188 = vector.broadcast %185 : vector<2x1x16x16xf32> to vector<2x8x16x16xf32>
    %189 = arith.mulf %187, %188 : vector<2x8x16x16xf32>
    %190 = arith.addf %180, %189 : vector<2x8x16x16xf32>
    %c0_133 = arith.constant 0 : index
    %c2_134 = arith.constant 2 : index
    %c0_135 = arith.constant 0 : index
    %c1_136 = arith.constant 1 : index
    %191 = vector.load %arg3[%c0_133, %c2_134, %c0_135, %c1_136] : memref<2x4x18x18xf32, #tpu.memory_space<vmem>>, vector<2x1x16x16xf32>
    %192 = vector.shape_cast %191 : vector<2x1x16x16xf32> to vector<2x16x16xf32>
    %c19 = arith.constant 19 : index
    %c0_137 = arith.constant 0 : index
    %c0_138 = arith.constant 0 : index
    %c0_139 = arith.constant 0 : index
    %193 = vector.load %arg1[%c19, %c0_137, %c0_138, %c0_139] : memref<36x8x1x1xf32, #tpu.memory_space<vmem>>, vector<1x8x1x1xf32>
    %194 = vector.shape_cast %193 : vector<1x8x1x1xf32> to vector<8x1x1xf32>
    %195 = vector.shape_cast %192 : vector<2x16x16xf32> to vector<2x1x16x16xf32>
    %196 = vector.shape_cast %194 : vector<8x1x1xf32> to vector<1x8x1x1xf32>
    %197 = vector.broadcast %196 : vector<1x8x1x1xf32> to vector<2x8x16x16xf32>
    %198 = vector.broadcast %195 : vector<2x1x16x16xf32> to vector<2x8x16x16xf32>
    %199 = arith.mulf %197, %198 : vector<2x8x16x16xf32>
    %200 = arith.addf %190, %199 : vector<2x8x16x16xf32>
    %c0_140 = arith.constant 0 : index
    %c2_141 = arith.constant 2 : index
    %c0_142 = arith.constant 0 : index
    %c2_143 = arith.constant 2 : index
    %201 = vector.load %arg3[%c0_140, %c2_141, %c0_142, %c2_143] : memref<2x4x18x18xf32, #tpu.memory_space<vmem>>, vector<2x1x16x16xf32>
    %202 = vector.shape_cast %201 : vector<2x1x16x16xf32> to vector<2x16x16xf32>
    %c20 = arith.constant 20 : index
    %c0_144 = arith.constant 0 : index
    %c0_145 = arith.constant 0 : index
    %c0_146 = arith.constant 0 : index
    %203 = vector.load %arg1[%c20, %c0_144, %c0_145, %c0_146] : memref<36x8x1x1xf32, #tpu.memory_space<vmem>>, vector<1x8x1x1xf32>
    %204 = vector.shape_cast %203 : vector<1x8x1x1xf32> to vector<8x1x1xf32>
    %205 = vector.shape_cast %202 : vector<2x16x16xf32> to vector<2x1x16x16xf32>
    %206 = vector.shape_cast %204 : vector<8x1x1xf32> to vector<1x8x1x1xf32>
    %207 = vector.broadcast %206 : vector<1x8x1x1xf32> to vector<2x8x16x16xf32>
    %208 = vector.broadcast %205 : vector<2x1x16x16xf32> to vector<2x8x16x16xf32>
    %209 = arith.mulf %207, %208 : vector<2x8x16x16xf32>
    %210 = arith.addf %200, %209 : vector<2x8x16x16xf32>
    %c0_147 = arith.constant 0 : index
    %c2_148 = arith.constant 2 : index
    %c1_149 = arith.constant 1 : index
    %c0_150 = arith.constant 0 : index
    %211 = vector.load %arg3[%c0_147, %c2_148, %c1_149, %c0_150] : memref<2x4x18x18xf32, #tpu.memory_space<vmem>>, vector<2x1x16x16xf32>
    %212 = vector.shape_cast %211 : vector<2x1x16x16xf32> to vector<2x16x16xf32>
    %c21 = arith.constant 21 : index
    %c0_151 = arith.constant 0 : index
    %c0_152 = arith.constant 0 : index
    %c0_153 = arith.constant 0 : index
    %213 = vector.load %arg1[%c21, %c0_151, %c0_152, %c0_153] : memref<36x8x1x1xf32, #tpu.memory_space<vmem>>, vector<1x8x1x1xf32>
    %214 = vector.shape_cast %213 : vector<1x8x1x1xf32> to vector<8x1x1xf32>
    %215 = vector.shape_cast %212 : vector<2x16x16xf32> to vector<2x1x16x16xf32>
    %216 = vector.shape_cast %214 : vector<8x1x1xf32> to vector<1x8x1x1xf32>
    %217 = vector.broadcast %216 : vector<1x8x1x1xf32> to vector<2x8x16x16xf32>
    %218 = vector.broadcast %215 : vector<2x1x16x16xf32> to vector<2x8x16x16xf32>
    %219 = arith.mulf %217, %218 : vector<2x8x16x16xf32>
    %220 = arith.addf %210, %219 : vector<2x8x16x16xf32>
    %c0_154 = arith.constant 0 : index
    %c2_155 = arith.constant 2 : index
    %c1_156 = arith.constant 1 : index
    %c1_157 = arith.constant 1 : index
    %221 = vector.load %arg3[%c0_154, %c2_155, %c1_156, %c1_157] : memref<2x4x18x18xf32, #tpu.memory_space<vmem>>, vector<2x1x16x16xf32>
    %222 = vector.shape_cast %221 : vector<2x1x16x16xf32> to vector<2x16x16xf32>
    %c22 = arith.constant 22 : index
    %c0_158 = arith.constant 0 : index
    %c0_159 = arith.constant 0 : index
    %c0_160 = arith.constant 0 : index
    %223 = vector.load %arg1[%c22, %c0_158, %c0_159, %c0_160] : memref<36x8x1x1xf32, #tpu.memory_space<vmem>>, vector<1x8x1x1xf32>
    %224 = vector.shape_cast %223 : vector<1x8x1x1xf32> to vector<8x1x1xf32>
    %225 = vector.shape_cast %222 : vector<2x16x16xf32> to vector<2x1x16x16xf32>
    %226 = vector.shape_cast %224 : vector<8x1x1xf32> to vector<1x8x1x1xf32>
    %227 = vector.broadcast %226 : vector<1x8x1x1xf32> to vector<2x8x16x16xf32>
    %228 = vector.broadcast %225 : vector<2x1x16x16xf32> to vector<2x8x16x16xf32>
    %229 = arith.mulf %227, %228 : vector<2x8x16x16xf32>
    %230 = arith.addf %220, %229 : vector<2x8x16x16xf32>
    %c0_161 = arith.constant 0 : index
    %c2_162 = arith.constant 2 : index
    %c1_163 = arith.constant 1 : index
    %c2_164 = arith.constant 2 : index
    %231 = vector.load %arg3[%c0_161, %c2_162, %c1_163, %c2_164] : memref<2x4x18x18xf32, #tpu.memory_space<vmem>>, vector<2x1x16x16xf32>
    %232 = vector.shape_cast %231 : vector<2x1x16x16xf32> to vector<2x16x16xf32>
    %c23 = arith.constant 23 : index
    %c0_165 = arith.constant 0 : index
    %c0_166 = arith.constant 0 : index
    %c0_167 = arith.constant 0 : index
    %233 = vector.load %arg1[%c23, %c0_165, %c0_166, %c0_167] : memref<36x8x1x1xf32, #tpu.memory_space<vmem>>, vector<1x8x1x1xf32>
    %234 = vector.shape_cast %233 : vector<1x8x1x1xf32> to vector<8x1x1xf32>
    %235 = vector.shape_cast %232 : vector<2x16x16xf32> to vector<2x1x16x16xf32>
    %236 = vector.shape_cast %234 : vector<8x1x1xf32> to vector<1x8x1x1xf32>
    %237 = vector.broadcast %236 : vector<1x8x1x1xf32> to vector<2x8x16x16xf32>
    %238 = vector.broadcast %235 : vector<2x1x16x16xf32> to vector<2x8x16x16xf32>
    %239 = arith.mulf %237, %238 : vector<2x8x16x16xf32>
    %240 = arith.addf %230, %239 : vector<2x8x16x16xf32>
    %c0_168 = arith.constant 0 : index
    %c2_169 = arith.constant 2 : index
    %c2_170 = arith.constant 2 : index
    %c0_171 = arith.constant 0 : index
    %241 = vector.load %arg3[%c0_168, %c2_169, %c2_170, %c0_171] : memref<2x4x18x18xf32, #tpu.memory_space<vmem>>, vector<2x1x16x16xf32>
    %242 = vector.shape_cast %241 : vector<2x1x16x16xf32> to vector<2x16x16xf32>
    %c24 = arith.constant 24 : index
    %c0_172 = arith.constant 0 : index
    %c0_173 = arith.constant 0 : index
    %c0_174 = arith.constant 0 : index
    %243 = vector.load %arg1[%c24, %c0_172, %c0_173, %c0_174] : memref<36x8x1x1xf32, #tpu.memory_space<vmem>>, vector<1x8x1x1xf32>
    %244 = vector.shape_cast %243 : vector<1x8x1x1xf32> to vector<8x1x1xf32>
    %245 = vector.shape_cast %242 : vector<2x16x16xf32> to vector<2x1x16x16xf32>
    %246 = vector.shape_cast %244 : vector<8x1x1xf32> to vector<1x8x1x1xf32>
    %247 = vector.broadcast %246 : vector<1x8x1x1xf32> to vector<2x8x16x16xf32>
    %248 = vector.broadcast %245 : vector<2x1x16x16xf32> to vector<2x8x16x16xf32>
    %249 = arith.mulf %247, %248 : vector<2x8x16x16xf32>
    %250 = arith.addf %240, %249 : vector<2x8x16x16xf32>
    %c0_175 = arith.constant 0 : index
    %c2_176 = arith.constant 2 : index
    %c2_177 = arith.constant 2 : index
    %c1_178 = arith.constant 1 : index
    %251 = vector.load %arg3[%c0_175, %c2_176, %c2_177, %c1_178] : memref<2x4x18x18xf32, #tpu.memory_space<vmem>>, vector<2x1x16x16xf32>
    %252 = vector.shape_cast %251 : vector<2x1x16x16xf32> to vector<2x16x16xf32>
    %c25 = arith.constant 25 : index
    %c0_179 = arith.constant 0 : index
    %c0_180 = arith.constant 0 : index
    %c0_181 = arith.constant 0 : index
    %253 = vector.load %arg1[%c25, %c0_179, %c0_180, %c0_181] : memref<36x8x1x1xf32, #tpu.memory_space<vmem>>, vector<1x8x1x1xf32>
    %254 = vector.shape_cast %253 : vector<1x8x1x1xf32> to vector<8x1x1xf32>
    %255 = vector.shape_cast %252 : vector<2x16x16xf32> to vector<2x1x16x16xf32>
    %256 = vector.shape_cast %254 : vector<8x1x1xf32> to vector<1x8x1x1xf32>
    %257 = vector.broadcast %256 : vector<1x8x1x1xf32> to vector<2x8x16x16xf32>
    %258 = vector.broadcast %255 : vector<2x1x16x16xf32> to vector<2x8x16x16xf32>
    %259 = arith.mulf %257, %258 : vector<2x8x16x16xf32>
    %260 = arith.addf %250, %259 : vector<2x8x16x16xf32>
    %c0_182 = arith.constant 0 : index
    %c2_183 = arith.constant 2 : index
    %c2_184 = arith.constant 2 : index
    %c2_185 = arith.constant 2 : index
    %261 = vector.load %arg3[%c0_182, %c2_183, %c2_184, %c2_185] : memref<2x4x18x18xf32, #tpu.memory_space<vmem>>, vector<2x1x16x16xf32>
    %262 = vector.shape_cast %261 : vector<2x1x16x16xf32> to vector<2x16x16xf32>
    %c26 = arith.constant 26 : index
    %c0_186 = arith.constant 0 : index
    %c0_187 = arith.constant 0 : index
    %c0_188 = arith.constant 0 : index
    %263 = vector.load %arg1[%c26, %c0_186, %c0_187, %c0_188] : memref<36x8x1x1xf32, #tpu.memory_space<vmem>>, vector<1x8x1x1xf32>
    %264 = vector.shape_cast %263 : vector<1x8x1x1xf32> to vector<8x1x1xf32>
    %265 = vector.shape_cast %262 : vector<2x16x16xf32> to vector<2x1x16x16xf32>
    %266 = vector.shape_cast %264 : vector<8x1x1xf32> to vector<1x8x1x1xf32>
    %267 = vector.broadcast %266 : vector<1x8x1x1xf32> to vector<2x8x16x16xf32>
    %268 = vector.broadcast %265 : vector<2x1x16x16xf32> to vector<2x8x16x16xf32>
    %269 = arith.mulf %267, %268 : vector<2x8x16x16xf32>
    %270 = arith.addf %260, %269 : vector<2x8x16x16xf32>
    %c0_189 = arith.constant 0 : index
    %c3_190 = arith.constant 3 : index
    %c0_191 = arith.constant 0 : index
    %c0_192 = arith.constant 0 : index
    %271 = vector.load %arg3[%c0_189, %c3_190, %c0_191, %c0_192] : memref<2x4x18x18xf32, #tpu.memory_space<vmem>>, vector<2x1x16x16xf32>
    %272 = vector.shape_cast %271 : vector<2x1x16x16xf32> to vector<2x16x16xf32>
    %c27 = arith.constant 27 : index
    %c0_193 = arith.constant 0 : index
    %c0_194 = arith.constant 0 : index
    %c0_195 = arith.constant 0 : index
    %273 = vector.load %arg1[%c27, %c0_193, %c0_194, %c0_195] : memref<36x8x1x1xf32, #tpu.memory_space<vmem>>, vector<1x8x1x1xf32>
    %274 = vector.shape_cast %273 : vector<1x8x1x1xf32> to vector<8x1x1xf32>
    %275 = vector.shape_cast %272 : vector<2x16x16xf32> to vector<2x1x16x16xf32>
    %276 = vector.shape_cast %274 : vector<8x1x1xf32> to vector<1x8x1x1xf32>
    %277 = vector.broadcast %276 : vector<1x8x1x1xf32> to vector<2x8x16x16xf32>
    %278 = vector.broadcast %275 : vector<2x1x16x16xf32> to vector<2x8x16x16xf32>
    %279 = arith.mulf %277, %278 : vector<2x8x16x16xf32>
    %280 = arith.addf %270, %279 : vector<2x8x16x16xf32>
    %c0_196 = arith.constant 0 : index
    %c3_197 = arith.constant 3 : index
    %c0_198 = arith.constant 0 : index
    %c1_199 = arith.constant 1 : index
    %281 = vector.load %arg3[%c0_196, %c3_197, %c0_198, %c1_199] : memref<2x4x18x18xf32, #tpu.memory_space<vmem>>, vector<2x1x16x16xf32>
    %282 = vector.shape_cast %281 : vector<2x1x16x16xf32> to vector<2x16x16xf32>
    %c28 = arith.constant 28 : index
    %c0_200 = arith.constant 0 : index
    %c0_201 = arith.constant 0 : index
    %c0_202 = arith.constant 0 : index
    %283 = vector.load %arg1[%c28, %c0_200, %c0_201, %c0_202] : memref<36x8x1x1xf32, #tpu.memory_space<vmem>>, vector<1x8x1x1xf32>
    %284 = vector.shape_cast %283 : vector<1x8x1x1xf32> to vector<8x1x1xf32>
    %285 = vector.shape_cast %282 : vector<2x16x16xf32> to vector<2x1x16x16xf32>
    %286 = vector.shape_cast %284 : vector<8x1x1xf32> to vector<1x8x1x1xf32>
    %287 = vector.broadcast %286 : vector<1x8x1x1xf32> to vector<2x8x16x16xf32>
    %288 = vector.broadcast %285 : vector<2x1x16x16xf32> to vector<2x8x16x16xf32>
    %289 = arith.mulf %287, %288 : vector<2x8x16x16xf32>
    %290 = arith.addf %280, %289 : vector<2x8x16x16xf32>
    %c0_203 = arith.constant 0 : index
    %c3_204 = arith.constant 3 : index
    %c0_205 = arith.constant 0 : index
    %c2_206 = arith.constant 2 : index
    %291 = vector.load %arg3[%c0_203, %c3_204, %c0_205, %c2_206] : memref<2x4x18x18xf32, #tpu.memory_space<vmem>>, vector<2x1x16x16xf32>
    %292 = vector.shape_cast %291 : vector<2x1x16x16xf32> to vector<2x16x16xf32>
    %c29 = arith.constant 29 : index
    %c0_207 = arith.constant 0 : index
    %c0_208 = arith.constant 0 : index
    %c0_209 = arith.constant 0 : index
    %293 = vector.load %arg1[%c29, %c0_207, %c0_208, %c0_209] : memref<36x8x1x1xf32, #tpu.memory_space<vmem>>, vector<1x8x1x1xf32>
    %294 = vector.shape_cast %293 : vector<1x8x1x1xf32> to vector<8x1x1xf32>
    %295 = vector.shape_cast %292 : vector<2x16x16xf32> to vector<2x1x16x16xf32>
    %296 = vector.shape_cast %294 : vector<8x1x1xf32> to vector<1x8x1x1xf32>
    %297 = vector.broadcast %296 : vector<1x8x1x1xf32> to vector<2x8x16x16xf32>
    %298 = vector.broadcast %295 : vector<2x1x16x16xf32> to vector<2x8x16x16xf32>
    %299 = arith.mulf %297, %298 : vector<2x8x16x16xf32>
    %300 = arith.addf %290, %299 : vector<2x8x16x16xf32>
    %c0_210 = arith.constant 0 : index
    %c3_211 = arith.constant 3 : index
    %c1_212 = arith.constant 1 : index
    %c0_213 = arith.constant 0 : index
    %301 = vector.load %arg3[%c0_210, %c3_211, %c1_212, %c0_213] : memref<2x4x18x18xf32, #tpu.memory_space<vmem>>, vector<2x1x16x16xf32>
    %302 = vector.shape_cast %301 : vector<2x1x16x16xf32> to vector<2x16x16xf32>
    %c30 = arith.constant 30 : index
    %c0_214 = arith.constant 0 : index
    %c0_215 = arith.constant 0 : index
    %c0_216 = arith.constant 0 : index
    %303 = vector.load %arg1[%c30, %c0_214, %c0_215, %c0_216] : memref<36x8x1x1xf32, #tpu.memory_space<vmem>>, vector<1x8x1x1xf32>
    %304 = vector.shape_cast %303 : vector<1x8x1x1xf32> to vector<8x1x1xf32>
    %305 = vector.shape_cast %302 : vector<2x16x16xf32> to vector<2x1x16x16xf32>
    %306 = vector.shape_cast %304 : vector<8x1x1xf32> to vector<1x8x1x1xf32>
    %307 = vector.broadcast %306 : vector<1x8x1x1xf32> to vector<2x8x16x16xf32>
    %308 = vector.broadcast %305 : vector<2x1x16x16xf32> to vector<2x8x16x16xf32>
    %309 = arith.mulf %307, %308 : vector<2x8x16x16xf32>
    %310 = arith.addf %300, %309 : vector<2x8x16x16xf32>
    %c0_217 = arith.constant 0 : index
    %c3_218 = arith.constant 3 : index
    %c1_219 = arith.constant 1 : index
    %c1_220 = arith.constant 1 : index
    %311 = vector.load %arg3[%c0_217, %c3_218, %c1_219, %c1_220] : memref<2x4x18x18xf32, #tpu.memory_space<vmem>>, vector<2x1x16x16xf32>
    %312 = vector.shape_cast %311 : vector<2x1x16x16xf32> to vector<2x16x16xf32>
    %c31 = arith.constant 31 : index
    %c0_221 = arith.constant 0 : index
    %c0_222 = arith.constant 0 : index
    %c0_223 = arith.constant 0 : index
    %313 = vector.load %arg1[%c31, %c0_221, %c0_222, %c0_223] : memref<36x8x1x1xf32, #tpu.memory_space<vmem>>, vector<1x8x1x1xf32>
    %314 = vector.shape_cast %313 : vector<1x8x1x1xf32> to vector<8x1x1xf32>
    %315 = vector.shape_cast %312 : vector<2x16x16xf32> to vector<2x1x16x16xf32>
    %316 = vector.shape_cast %314 : vector<8x1x1xf32> to vector<1x8x1x1xf32>
    %317 = vector.broadcast %316 : vector<1x8x1x1xf32> to vector<2x8x16x16xf32>
    %318 = vector.broadcast %315 : vector<2x1x16x16xf32> to vector<2x8x16x16xf32>
    %319 = arith.mulf %317, %318 : vector<2x8x16x16xf32>
    %320 = arith.addf %310, %319 : vector<2x8x16x16xf32>
    %c0_224 = arith.constant 0 : index
    %c3_225 = arith.constant 3 : index
    %c1_226 = arith.constant 1 : index
    %c2_227 = arith.constant 2 : index
    %321 = vector.load %arg3[%c0_224, %c3_225, %c1_226, %c2_227] : memref<2x4x18x18xf32, #tpu.memory_space<vmem>>, vector<2x1x16x16xf32>
    %322 = vector.shape_cast %321 : vector<2x1x16x16xf32> to vector<2x16x16xf32>
    %c32 = arith.constant 32 : index
    %c0_228 = arith.constant 0 : index
    %c0_229 = arith.constant 0 : index
    %c0_230 = arith.constant 0 : index
    %323 = vector.load %arg1[%c32, %c0_228, %c0_229, %c0_230] : memref<36x8x1x1xf32, #tpu.memory_space<vmem>>, vector<1x8x1x1xf32>
    %324 = vector.shape_cast %323 : vector<1x8x1x1xf32> to vector<8x1x1xf32>
    %325 = vector.shape_cast %322 : vector<2x16x16xf32> to vector<2x1x16x16xf32>
    %326 = vector.shape_cast %324 : vector<8x1x1xf32> to vector<1x8x1x1xf32>
    %327 = vector.broadcast %326 : vector<1x8x1x1xf32> to vector<2x8x16x16xf32>
    %328 = vector.broadcast %325 : vector<2x1x16x16xf32> to vector<2x8x16x16xf32>
    %329 = arith.mulf %327, %328 : vector<2x8x16x16xf32>
    %330 = arith.addf %320, %329 : vector<2x8x16x16xf32>
    %c0_231 = arith.constant 0 : index
    %c3_232 = arith.constant 3 : index
    %c2_233 = arith.constant 2 : index
    %c0_234 = arith.constant 0 : index
    %331 = vector.load %arg3[%c0_231, %c3_232, %c2_233, %c0_234] : memref<2x4x18x18xf32, #tpu.memory_space<vmem>>, vector<2x1x16x16xf32>
    %332 = vector.shape_cast %331 : vector<2x1x16x16xf32> to vector<2x16x16xf32>
    %c33 = arith.constant 33 : index
    %c0_235 = arith.constant 0 : index
    %c0_236 = arith.constant 0 : index
    %c0_237 = arith.constant 0 : index
    %333 = vector.load %arg1[%c33, %c0_235, %c0_236, %c0_237] : memref<36x8x1x1xf32, #tpu.memory_space<vmem>>, vector<1x8x1x1xf32>
    %334 = vector.shape_cast %333 : vector<1x8x1x1xf32> to vector<8x1x1xf32>
    %335 = vector.shape_cast %332 : vector<2x16x16xf32> to vector<2x1x16x16xf32>
    %336 = vector.shape_cast %334 : vector<8x1x1xf32> to vector<1x8x1x1xf32>
    %337 = vector.broadcast %336 : vector<1x8x1x1xf32> to vector<2x8x16x16xf32>
    %338 = vector.broadcast %335 : vector<2x1x16x16xf32> to vector<2x8x16x16xf32>
    %339 = arith.mulf %337, %338 : vector<2x8x16x16xf32>
    %340 = arith.addf %330, %339 : vector<2x8x16x16xf32>
    %c0_238 = arith.constant 0 : index
    %c3_239 = arith.constant 3 : index
    %c2_240 = arith.constant 2 : index
    %c1_241 = arith.constant 1 : index
    %341 = vector.load %arg3[%c0_238, %c3_239, %c2_240, %c1_241] : memref<2x4x18x18xf32, #tpu.memory_space<vmem>>, vector<2x1x16x16xf32>
    %342 = vector.shape_cast %341 : vector<2x1x16x16xf32> to vector<2x16x16xf32>
    %c34 = arith.constant 34 : index
    %c0_242 = arith.constant 0 : index
    %c0_243 = arith.constant 0 : index
    %c0_244 = arith.constant 0 : index
    %343 = vector.load %arg1[%c34, %c0_242, %c0_243, %c0_244] : memref<36x8x1x1xf32, #tpu.memory_space<vmem>>, vector<1x8x1x1xf32>
    %344 = vector.shape_cast %343 : vector<1x8x1x1xf32> to vector<8x1x1xf32>
    %345 = vector.shape_cast %342 : vector<2x16x16xf32> to vector<2x1x16x16xf32>
    %346 = vector.shape_cast %344 : vector<8x1x1xf32> to vector<1x8x1x1xf32>
    %347 = vector.broadcast %346 : vector<1x8x1x1xf32> to vector<2x8x16x16xf32>
    %348 = vector.broadcast %345 : vector<2x1x16x16xf32> to vector<2x8x16x16xf32>
    %349 = arith.mulf %347, %348 : vector<2x8x16x16xf32>
    %350 = arith.addf %340, %349 : vector<2x8x16x16xf32>
    %c0_245 = arith.constant 0 : index
    %c3_246 = arith.constant 3 : index
    %c2_247 = arith.constant 2 : index
    %c2_248 = arith.constant 2 : index
    %351 = vector.load %arg3[%c0_245, %c3_246, %c2_247, %c2_248] : memref<2x4x18x18xf32, #tpu.memory_space<vmem>>, vector<2x1x16x16xf32>
    %352 = vector.shape_cast %351 : vector<2x1x16x16xf32> to vector<2x16x16xf32>
    %c35 = arith.constant 35 : index
    %c0_249 = arith.constant 0 : index
    %c0_250 = arith.constant 0 : index
    %c0_251 = arith.constant 0 : index
    %353 = vector.load %arg1[%c35, %c0_249, %c0_250, %c0_251] : memref<36x8x1x1xf32, #tpu.memory_space<vmem>>, vector<1x8x1x1xf32>
    %354 = vector.shape_cast %353 : vector<1x8x1x1xf32> to vector<8x1x1xf32>
    %355 = vector.shape_cast %352 : vector<2x16x16xf32> to vector<2x1x16x16xf32>
    %356 = vector.shape_cast %354 : vector<8x1x1xf32> to vector<1x8x1x1xf32>
    %357 = vector.broadcast %356 : vector<1x8x1x1xf32> to vector<2x8x16x16xf32>
    %358 = vector.broadcast %355 : vector<2x1x16x16xf32> to vector<2x8x16x16xf32>
    %359 = arith.mulf %357, %358 : vector<2x8x16x16xf32>
    %360 = arith.addf %350, %359 : vector<2x8x16x16xf32>
    %c0_252 = arith.constant 0 : index
    %c0_253 = arith.constant 0 : index
    %c0_254 = arith.constant 0 : index
    %c0_255 = arith.constant 0 : index
    %361 = vector.load %arg2[%c0_252, %c0_253, %c0_254, %c0_255] : memref<1x8x1x1xf32, #tpu.memory_space<vmem>>, vector<1x8x1x1xf32>
    %362 = vector.broadcast %361 : vector<1x8x1x1xf32> to vector<2x8x16x16xf32>
    %363 = arith.addf %360, %362 : vector<2x8x16x16xf32>
    %cst_256 = arith.constant 0.235702261 : f32
    %364 = vector.broadcast %cst_256 : f32 to vector<2x8x16x16xf32>
    %365 = arith.mulf %364, %363 : vector<2x8x16x16xf32>
    %c0_257 = arith.constant 0 : index
    %c0_258 = arith.constant 0 : index
    %c0_259 = arith.constant 0 : index
    %c0_260 = arith.constant 0 : index
    %366 = vector.load %arg4[%c0_257, %c0_258, %c0_259, %c0_260] : memref<2x8x16x16xf32, #tpu.memory_space<vmem>>, vector<2x8x16x16xf32>
    tpu.vector_store %arg4[%c0_257, %c0_258, %c0_259, %c0_260], %365 {strides = array<i32>} : memref<2x8x16x16xf32, #tpu.memory_space<vmem>>, vector<2x8x16x16xf32>,
    return
  }
  func.func @transform_0(%arg0: i32) -> (i32, i32, i32, i32) {
    %c0_i32 = arith.constant 0 : i32
    %c0_i32_0 = arith.constant 0 : i32
    %c0_i32_1 = arith.constant 0 : i32
    %c0_i32_2 = arith.constant 0 : i32
    %c0_i32_3 = arith.constant 0 : i32
    return %c0_i32, %c0_i32_0, %c0_i32_1, %c0_i32_2 : i32, i32, i32, i32
  }
  func.func @transform_1(%arg0: i32) -> (i32, i32, i32, i32) {
    %c0_i32 = arith.constant 0 : i32
    %c0_i32_0 = arith.constant 0 : i32
    %c0_i32_1 = arith.constant 0 : i32
    %c0_i32_2 = arith.constant 0 : i32
    %c0_i32_3 = arith.constant 0 : i32
    return %c0_i32, %c0_i32_0, %c0_i32_1, %c0_i32_2 : i32, i32, i32, i32
  }
  func.func @transform_2(%arg0: i32) -> (i32, i32, i32, i32) {
    %c0_i32 = arith.constant 0 : i32
    %c0_i32_0 = arith.constant 0 : i32
    %c0_i32_1 = arith.constant 0 : i32
    %c0_i32_2 = arith.constant 0 : i32
    return %arg0, %c0_i32, %c0_i32_0, %c0_i32_1 : i32, i32, i32, i32
  }
  func.func @transform_3(%arg0: i32) -> (i32, i32, i32, i32) {
    %c0_i32 = arith.constant 0 : i32
    %c0_i32_0 = arith.constant 0 : i32
    %c0_i32_1 = arith.constant 0 : i32
    %c0_i32_2 = arith.constant 0 : i32
    return %arg0, %c0_i32, %c0_i32_0, %c0_i32_1 : i32, i32, i32, i32
  }
}

</mosaic_0001>

<bundles_post_ra>
// kernel: tpu_custom_call.1
= control target key start
LH: loop header
LB: loop body
LE: loop exit
PB: predicated region body
PF: predicated region fallthrough
CT: control target
= control target key end

     0   :  { %v9240_v2 = vmov 0   ;;  %s16008_s0 = inlined_call_operand.vmem [shape: f32[36,8,1,1], index: 0, kind: input, shape index: {}]   ;;  %s16009_s1 = inlined_call_operand.vmem [shape: f32[1,8,1,1], index: 1, kind: input, shape index: {}]   ;;  %s16010_s2 = inlined_call_operand.vmem [shape: f32[2,4,18,18], index: 2, kind: input, shape index: {}]   ;;  %s16011_s3 = inlined_call_operand.hbm [shape: f32[2,8,16,16], index: 3, kind: output, shape index: {}]  }
   0x1   :  { %v8552_v0 = vld [vmem:[%s16008_s0 + $0x2] ss:$0 sm:$0xff]  ;;  %v8550_v1 = vld [vmem:[%s16008_s0] ss:$0 sm:$0xff]  ;;  %9169 = vset.pattern.permute.xlu1 %v9240_v2  ;;  %9168 = vset.pattern.permute.xlu0 %v9240_v2  ;;  %v8553_v3 = vld [vmem:[%s16008_s0 + $0x3] ss:$0 sm:$0xff] }
   0x2   :  { %76 = vperm.xlu1 %9169, %v8552_v0   ;;  %68 = vperm.xlu0 %9168, %v8550_v1   ;;  %v8551_v4 = vld [vmem:[%s16008_s0 + $0x1] ss:$0 sm:$0xff]  ;;  %v8555_v5 = vld [vmem:[%s16008_s0 + $0x5] ss:$0 sm:$0xff]  ;;  %v8554_v6 = vld [vmem:[%s16008_s0 + $0x4] ss:$0 sm:$0xff] }
   0x6   :  { %80 = vperm.xlu1 %9169, %v8553_v3   ;;  %72 = vperm.xlu0 %9168, %v8551_v4  }
   0x7   :  { %8 = vsyncpa [#allocation3], 0  ;;  %v8557_v7 = vld [vmem:[%s16008_s0 + $0x7] ss:$0 sm:$0xff]  ;;  %v8556_v8 = vld [vmem:[%s16008_s0 + $0x6] ss:$0 sm:$0xff] }
   0x8   :  { %v8567_v9 = vld [vmem:[%s16008_s0 + $0x9] ss:$0 sm:$0xff]  ;;  %v8566_v10 = vld [vmem:[%s16008_s0 + $0x8] ss:$0 sm:$0xff]  ;;  %v8569_v11 = vld [vmem:[%s16008_s0 + $0xb] ss:$0 sm:$0xff] }
   0x9   :  { %v8568_v12 = vld [vmem:[%s16008_s0 + $0xa] ss:$0 sm:$0xff]  ;;  %v8571_v13 = vld [vmem:[%s16008_s0 + $0xd] ss:$0 sm:$0xff]  ;;  %v8570_v14 = vld [vmem:[%s16008_s0 + $0xc] ss:$0 sm:$0xff] }
   0xa   :  { %88 = vperm.xlu1 %9169, %v8555_v5   ;;  %84 = vperm.xlu0 %9168, %v8554_v6   ;;  %v8573_v15 = vld [vmem:[%s16008_s0 + $0xf] ss:$0 sm:$0xff]  ;;  %v8572_v16 = vld [vmem:[%s16008_s0 + $0xe] ss:$0 sm:$0xff]  ;;  %v8583_v17 = vld [vmem:[%s16008_s0 + $0x11] ss:$0 sm:$0xff] }
   0xb   :  { %v8582_v18 = vld [vmem:[%s16008_s0 + $0x10] ss:$0 sm:$0xff]  ;;  %v8585_v19 = vld [vmem:[%s16008_s0 + $0x13] ss:$0 sm:$0xff]  ;;  %v8584_v20 = vld [vmem:[%s16008_s0 + $0x12] ss:$0 sm:$0xff] }
   0xc   :  { %v8587_v21 = vld [vmem:[%s16008_s0 + $0x15] ss:$0 sm:$0xff]  ;;  %v8586_v22 = vld [vmem:[%s16008_s0 + $0x14] ss:$0 sm:$0xff]  ;;  %v8589_v23 = vld [vmem:[%s16008_s0 + $0x17] ss:$0 sm:$0xff] }
   0xd   :  { %v8588_v24 = vld [vmem:[%s16008_s0 + $0x16] ss:$0 sm:$0xff]  ;;  %v9357_v34 = vld [vmem:[%s16010_s2 + $0x8] sm:$0xff]  ;;  %v9362_v35 = vld [vmem:[%s16010_s2] sm:$0xff]  ;;  %s9241_s10 = smov 127   ;;  %s9242_s15 = smov 126  }
   0xe   :  { %96 = vperm.xlu1 %9169, %v8557_v7   ;;  %92 = vperm.xlu0 %9168, %v8556_v8   ;;  %v9399_v59 = vld [vmem:[%s16010_s2 + $0x68] sm:$0xff]  ;;  %v9404_v60 = vld [vmem:[%s16010_s2 + $0x60] sm:$0xff]  ;;  %vm8501_vm0 = vcmask 130048  }
  0x12   :  { %217 = vperm.xlu1 %9169, %v8567_v9   ;;  %213 = vperm.xlu0 %9168, %v8566_v10  }
  0x16   :  { %225 = vperm.xlu1 %9169, %v8569_v11   ;;  %221 = vperm.xlu0 %9168, %v8568_v12  }
  0x1a   :  { %233 = vperm.xlu1 %9169, %v8571_v13   ;;  %229 = vperm.xlu0 %9168, %v8570_v14  }
  0x1e   :  { %241 = vperm.xlu1 %9169, %v8573_v15   ;;  %237 = vperm.xlu0 %9168, %v8572_v16  }
  0x22   :  { %490 = vperm.xlu1 %9169, %v8583_v17   ;;  %486 = vperm.xlu0 %9168, %v8582_v18  }
  0x26   :  { %498 = vperm.xlu1 %9169, %v8585_v19   ;;  %494 = vperm.xlu0 %9168, %v8584_v20  }
  0x2a   :  { %506 = vperm.xlu1 %9169, %v8587_v21   ;;  %502 = vperm.xlu0 %9168, %v8586_v22  }
  0x2e   :  { %514 = vperm.xlu1 %9169, %v8589_v23   ;;  %510 = vperm.xlu0 %9168, %v8588_v24  }
  0x7d   :  { %v9338_v25 = vpop.permute.xlu1 %76  ;;  %v9340_v26 = vpop.permute.xlu0 %68 }
  0x81   :  { %v9342_v27 = vpop.permute.xlu1 %80  ;;  %v9344_v28 = vpop.permute.xlu0 %72 }
  0x85   :  { %v9346_v29 = vpop.permute.xlu1 %88  ;;  %v9348_v30 = vpop.permute.xlu0 %84 }
  0x89   :  { %v9350_v31 = vpop.permute.xlu1 %96  ;;  %v9352_v32 = vpop.permute.xlu0 %92 }
  0x8d   :  { %v214_v33 = vpop.permute.xlu0 %213  ;;  %v218_v38 = vpop.permute.xlu1 %217 }
  0x8e   :  { %v245_v36 = vmul.f32 %v214_v33, %v9357_v34  ;;  %v244_v37 = vmul.f32 %v214_v33, %v9362_v35  ;;  %v247_v39 = vmul.f32 %v218_v38, %v9357_v34  ;;  %v246_v40 = vmul.f32 %v218_v38, %v9362_v35 }
  0x8f   :  { %v261_v61 = vmul.f32 %v214_v33, %v9399_v59  ;;  %v260_v62 = vmul.f32 %v214_v33, %v9404_v60  ;;  %v263_v63 = vmul.f32 %v218_v38, %v9399_v59  ;;  %v262_v0 = vmul.f32 %v218_v38, %v9404_v60 }
  0x90   :  { %310 = vrot.lane.b32.xlu1 %v245_v36, %s9241_s10  ;;  %308 = vrot.lane.b32.xlu0 %v244_v37, %s9241_s10 }
  0x91   :  { %v222_v41 = vpop.permute.xlu0 %221  ;;  %v226_v44 = vpop.permute.xlu1 %225 }
  0x92   :  { %v249_v42 = vmul.f32 %v222_v41, %v9357_v34  ;;  %v248_v43 = vmul.f32 %v222_v41, %v9362_v35  ;;  %v251_v45 = vmul.f32 %v226_v44, %v9357_v34  ;;  %v250_v46 = vmul.f32 %v226_v44, %v9362_v35 }
  0x93   :  { %v265_v1 = vmul.f32 %v222_v41, %v9399_v59  ;;  %v264_v2 = vmul.f32 %v222_v41, %v9404_v60  ;;  %v267_v3 = vmul.f32 %v226_v44, %v9399_v59  ;;  %v266_v4 = vmul.f32 %v226_v44, %v9404_v60 }
  0x94   :  { %314 = vrot.lane.b32.xlu1 %v247_v39, %s9241_s10  ;;  %312 = vrot.lane.b32.xlu0 %v246_v40, %s9241_s10 }
  0x95   :  { %v230_v47 = vpop.permute.xlu0 %229  ;;  %v234_v50 = vpop.permute.xlu1 %233 }
  0x96   :  { %v253_v48 = vmul.f32 %v230_v47, %v9357_v34  ;;  %v252_v49 = vmul.f32 %v230_v47, %v9362_v35  ;;  %v255_v51 = vmul.f32 %v234_v50, %v9357_v34  ;;  %v254_v52 = vmul.f32 %v234_v50, %v9362_v35 }
  0x97   :  { %v269_v5 = vmul.f32 %v230_v47, %v9399_v59  ;;  %v268_v6 = vmul.f32 %v230_v47, %v9404_v60  ;;  %v271_v7 = vmul.f32 %v234_v50, %v9399_v59  ;;  %v270_v8 = vmul.f32 %v234_v50, %v9404_v60 }
  0x98   :  { %318 = vrot.lane.b32.xlu1 %v249_v42, %s9241_s10  ;;  %316 = vrot.lane.b32.xlu0 %v248_v43, %s9241_s10 }
  0x99   :  { %v238_v53 = vpop.permute.xlu0 %237  ;;  %v242_v56 = vpop.permute.xlu1 %241 }
  0x9a   :  { %v257_v54 = vmul.f32 %v238_v53, %v9357_v34  ;;  %v256_v55 = vmul.f32 %v238_v53, %v9362_v35  ;;  %v259_v57 = vmul.f32 %v242_v56, %v9357_v34  ;;  %v258_v58 = vmul.f32 %v242_v56, %v9362_v35 }
  0x9b   :  { %v273_v9 = vmul.f32 %v238_v53, %v9399_v59  ;;  %v272_v10 = vmul.f32 %v238_v53, %v9404_v60  ;;  %v275_v11 = vmul.f32 %v242_v56, %v9399_v59  ;;  %v274_v12 = vmul.f32 %v242_v56, %v9404_v60 }
  0x9c   :  { %322 = vrot.lane.b32.xlu1 %v251_v45, %s9241_s10  ;;  %320 = vrot.lane.b32.xlu0 %v250_v46, %s9241_s10 }
  0x9d   :  { %v487_v13 = vpop.permute.xlu0 %486  ;;  %v491_v16 = vpop.permute.xlu1 %490 }
  0x9e   :  { %v518_v14 = vmul.f32 %v487_v13, %v9357_v34  ;;  %v517_v15 = vmul.f32 %v487_v13, %v9362_v35  ;;  %v520_v17 = vmul.f32 %v491_v16, %v9357_v34  ;;  %v519_v18 = vmul.f32 %v491_v16, %v9362_v35 }
  0x9f   :  { %v534_v47 = vmul.f32 %v487_v13, %v9399_v59  ;;  %v535_v50 = vmul.f32 %v491_v16, %v9404_v60 }
  0xa0   :  { %326 = vrot.lane.b32.xlu1 %v253_v48, %s9241_s10  ;;  %324 = vrot.lane.b32.xlu0 %v252_v49, %s9241_s10  ;;  %v533_v48 = vmul.f32 %v487_v13, %v9404_v60  ;;  %v536_v49 = vmul.f32 %v491_v16, %v9399_v59  ;;  %v8604_v16 = vld [vmem:[%s16008_s0 + $0x1e] ss:$0 sm:$0xff] }
  0xa1   :  { %v495_v19 = vpop.permute.xlu0 %494  ;;  %v499_v22 = vpop.permute.xlu1 %498 }
  0xa2   :  { %v522_v20 = vmul.f32 %v495_v19, %v9357_v34  ;;  %v521_v21 = vmul.f32 %v495_v19, %v9362_v35  ;;  %v524_v23 = vmul.f32 %v499_v22, %v9357_v34  ;;  %v523_v24 = vmul.f32 %v499_v22, %v9362_v35 }
  0xa4   :  { %330 = vrot.lane.b32.xlu1 %v255_v51, %s9241_s10  ;;  %328 = vrot.lane.b32.xlu0 %v254_v52, %s9241_s10  ;;  %v540_v51 = vmul.f32 %v499_v22, %v9399_v59  ;;  %v539_v52 = vmul.f32 %v499_v22, %v9404_v60 }
  0xa5   :  { %v503_v33 = vpop.permute.xlu0 %502  ;;  %v507_v38 = vpop.permute.xlu1 %506 }
  0xa6   :  { %v526_v36 = vmul.f32 %v503_v33, %v9357_v34  ;;  %v525_v37 = vmul.f32 %v503_v33, %v9362_v35  ;;  %v528_v39 = vmul.f32 %v507_v38, %v9357_v34  ;;  %v527_v40 = vmul.f32 %v507_v38, %v9362_v35 }
  0xa7   :  { %v542_v53 = vmul.f32 %v503_v33, %v9399_v59 }
  0xa8   :  { %334 = vrot.lane.b32.xlu1 %v257_v54, %s9241_s10  ;;  %332 = vrot.lane.b32.xlu0 %v256_v55, %s9241_s10  ;;  %v541_v54 = vmul.f32 %v503_v33, %v9404_v60 }
  0xa9   :  { %v511_v41 = vpop.permute.xlu0 %510  ;;  %v515_v44 = vpop.permute.xlu1 %514 }
  0xaa   :  { %v530_v42 = vmul.f32 %v511_v41, %v9357_v34  ;;  %v529_v43 = vmul.f32 %v511_v41, %v9362_v35  ;;  %v532_v45 = vmul.f32 %v515_v44, %v9357_v34  ;;  %v531_v46 = vmul.f32 %v515_v44, %v9362_v35 }
  0xab   :  { %v538_v34 = vmul.f32 %v495_v19, %v9399_v59  ;;  %v537_v35 = vmul.f32 %v495_v19, %v9404_v60  ;;  %v8615_v19 = vld [vmem:[%s16008_s0 + $0x21] ss:$0 sm:$0xff] }
  0xac   :  { %338 = vrot.lane.b32.xlu1 %v259_v57, %s9241_s10  ;;  %336 = vrot.lane.b32.xlu0 %v258_v58, %s9241_s10  ;;  %v544_v57 = vmul.f32 %v507_v38, %v9399_v59  ;;  %v543_v58 = vmul.f32 %v507_v38, %v9404_v60  ;;  %v8618_v38 = vld [vmem:[%s16008_s0 + $0x24] ss:$0 sm:$0xff] }
  0xb0   :  { %342 = vrot.lane.b32.xlu1 %v261_v61, %s9241_s10  ;;  %340 = vrot.lane.b32.xlu0 %v260_v62, %s9241_s10 }
  0xb4   :  { %346 = vrot.lane.b32.xlu1 %v263_v63, %s9241_s10  ;;  %344 = vrot.lane.b32.xlu0 %v262_v0, %s9241_s10  ;;  %v546_v63 = vmul.f32 %v511_v41, %v9399_v59  ;;  %v545_v0 = vmul.f32 %v511_v41, %v9404_v60  ;;  %v8621_v41 = vld [vmem:[%s16008_s0 + $0x27] ss:$0 sm:$0xff] }
  0xb8   :  { %350 = vrot.lane.b32.xlu1 %v265_v1, %s9241_s10  ;;  %348 = vrot.lane.b32.xlu0 %v264_v2, %s9241_s10 }
  0xbc   :  { %354 = vrot.lane.b32.xlu1 %v267_v3, %s9241_s10  ;;  %352 = vrot.lane.b32.xlu0 %v266_v4, %s9241_s10  ;;  %v548_v3 = vmul.f32 %v515_v44, %v9399_v59  ;;  %v547_v4 = vmul.f32 %v515_v44, %v9404_v60  ;;  %v8601_v59 = vld [vmem:[%s16008_s0 + $0x1b] ss:$0 sm:$0xff]  ;;  %v8600_v60 = vld [vmem:[%s16008_s0 + $0x1a] ss:$0 sm:$0xff] }
  0xc0   :  { %358 = vrot.lane.b32.xlu1 %v269_v5, %s9241_s10  ;;  %356 = vrot.lane.b32.xlu0 %v268_v6, %s9241_s10  ;;  %v8599_v5 = vld [vmem:[%s16008_s0 + $0x19] ss:$0 sm:$0xff]  ;;  %v8598_v6 = vld [vmem:[%s16008_s0 + $0x18] ss:$0 sm:$0xff] }
  0xc4   :  { %362 = vrot.lane.b32.xlu1 %v271_v7, %s9241_s10  ;;  %360 = vrot.lane.b32.xlu0 %v270_v8, %s9241_s10 }
  0xc8   :  { %366 = vrot.lane.b32.xlu1 %v273_v9, %s9241_s10  ;;  %364 = vrot.lane.b32.xlu0 %v272_v10, %s9241_s10 }
  0xcc   :  { %370 = vrot.lane.b32.xlu1 %v275_v11, %s9241_s10  ;;  %368 = vrot.lane.b32.xlu0 %v274_v12, %s9241_s10  ;;  %v8603_v11 = vld [vmem:[%s16008_s0 + $0x1d] ss:$0 sm:$0xff]  ;;  %v8602_v12 = vld [vmem:[%s16008_s0 + $0x1c] ss:$0 sm:$0xff] }
  0xd0   :  { %583 = vrot.lane.b32.xlu1 %v518_v14, %s9242_s15  ;;  %581 = vrot.lane.b32.xlu0 %v517_v15, %s9242_s15  ;;  %v8605_v15 = vld [vmem:[%s16008_s0 + $0x1f] ss:$0 sm:$0xff] }
  0xd4   :  { %587 = vrot.lane.b32.xlu1 %v520_v17, %s9242_s15  ;;  %585 = vrot.lane.b32.xlu0 %v519_v18, %s9242_s15 }
  0xd8   :  { %591 = vrot.lane.b32.xlu1 %v522_v20, %s9242_s15  ;;  %589 = vrot.lane.b32.xlu0 %v521_v21, %s9242_s15  ;;  %v8614_v20 = vld [vmem:[%s16008_s0 + $0x20] ss:$0 sm:$0xff] }
  0xdc   :  { %595 = vrot.lane.b32.xlu1 %v524_v23, %s9242_s15  ;;  %593 = vrot.lane.b32.xlu0 %v523_v24, %s9242_s15  ;;  %v8617_v23 = vld [vmem:[%s16008_s0 + $0x23] ss:$0 sm:$0xff]  ;;  %v8616_v24 = vld [vmem:[%s16008_s0 + $0x22] ss:$0 sm:$0xff] }
  0xe0   :  { %599 = vrot.lane.b32.xlu1 %v526_v36, %s9242_s15  ;;  %597 = vrot.lane.b32.xlu0 %v525_v37, %s9242_s15  ;;  %v8619_v37 = vld [vmem:[%s16008_s0 + $0x25] ss:$0 sm:$0xff] }
  0xe4   :  { %603 = vrot.lane.b32.xlu1 %v528_v39, %s9242_s15  ;;  %601 = vrot.lane.b32.xlu0 %v527_v40, %s9242_s15 }
  0xe8   :  { %607 = vrot.lane.b32.xlu1 %v530_v42, %s9242_s15  ;;  %605 = vrot.lane.b32.xlu0 %v529_v43, %s9242_s15  ;;  %v8620_v42 = vld [vmem:[%s16008_s0 + $0x26] ss:$0 sm:$0xff] }
  0xec   :  { %611 = vrot.lane.b32.xlu1 %v532_v45, %s9242_s15  ;;  %609 = vrot.lane.b32.xlu0 %v531_v46, %s9242_s15 }
  0xf0   :  { %615 = vrot.lane.b32.xlu1 %v534_v47, %s9242_s15  ;;  %613 = vrot.lane.b32.xlu0 %v533_v48, %s9242_s15 }
  0xf4   :  { %619 = vrot.lane.b32.xlu1 %v536_v49, %s9242_s15  ;;  %617 = vrot.lane.b32.xlu0 %v535_v50, %s9242_s15 }
  0xf8   :  { %623 = vrot.lane.b32.xlu1 %v538_v34, %s9242_s15  ;;  %621 = vrot.lane.b32.xlu0 %v537_v35, %s9242_s15 }
  0xfc   :  { %627 = vrot.lane.b32.xlu1 %v540_v51, %s9242_s15  ;;  %625 = vrot.lane.b32.xlu0 %v539_v52, %s9242_s15 }
 0x100   :  { %631 = vrot.lane.b32.xlu1 %v542_v53, %s9242_s15  ;;  %629 = vrot.lane.b32.xlu0 %v541_v54, %s9242_s15 }
 0x102   :  { %v9490_v55 = vpop.permute.xlu1 %310  ;;  %v9492_v56 = vpop.permute.xlu0 %308 }
 0x104   :  { %635 = vrot.lane.b32.xlu1 %v544_v57, %s9242_s15  ;;  %633 = vrot.lane.b32.xlu0 %v543_v58, %s9242_s15 }
 0x106   :  { %v9498_v61 = vpop.permute.xlu1 %314  ;;  %v9500_v62 = vpop.permute.xlu0 %312 }
 0x108   :  { %639 = vrot.lane.b32.xlu1 %v546_v63, %s9242_s15  ;;  %637 = vrot.lane.b32.xlu0 %v545_v0, %s9242_s15 }
 0x10a   :  { %v9506_v1 = vpop.permute.xlu1 %318  ;;  %v9508_v2 = vpop.permute.xlu0 %316 }
 0x10c   :  { %643 = vrot.lane.b32.xlu1 %v548_v3, %s9242_s15  ;;  %641 = vrot.lane.b32.xlu0 %v547_v4, %s9242_s15 }
 0x10e   :  { %v9520_v7 = vpop.permute.xlu1 %322  ;;  %v9522_v8 = vpop.permute.xlu0 %320 }
 0x110   :  { %767 = vperm.xlu1 %9169, %v8599_v5   ;;  %763 = vperm.xlu0 %9168, %v8598_v6  }
 0x112   :  { %v9530_v9 = vpop.permute.xlu1 %326  ;;  %v9532_v10 = vpop.permute.xlu0 %324 }
 0x114   :  { %775 = vperm.xlu1 %9169, %v8601_v59   ;;  %771 = vperm.xlu0 %9168, %v8600_v60  }
 0x116   :  { %v9540_v13 = vpop.permute.xlu1 %330  ;;  %v9542_v14 = vpop.permute.xlu0 %328 }
 0x118   :  { %783 = vperm.xlu1 %9169, %v8603_v11   ;;  %779 = vperm.xlu0 %9168, %v8602_v12  }
 0x11a   :  { %v9550_v17 = vpop.permute.xlu1 %334  ;;  %v9552_v18 = vpop.permute.xlu0 %332 }
 0x11c   :  { %791 = vperm.xlu1 %9169, %v8605_v15   ;;  %787 = vperm.xlu0 %9168, %v8604_v16  }
 0x11e   :  { %v9560_v21 = vpop.permute.xlu1 %338  ;;  %v9562_v22 = vpop.permute.xlu0 %336 }
 0x120   :  { %912 = vperm.xlu1 %9169, %v8615_v19   ;;  %908 = vperm.xlu0 %9168, %v8614_v20  }
 0x122   :  { %v9570_v33 = vpop.permute.xlu1 %342  ;;  %v9572_v36 = vpop.permute.xlu0 %340 }
 0x124   :  { %920 = vperm.xlu1 %9169, %v8617_v23   ;;  %916 = vperm.xlu0 %9168, %v8616_v24  }
 0x126   :  { %v9580_v39 = vpop.permute.xlu1 %346  ;;  %v9582_v40 = vpop.permute.xlu0 %344 }
 0x128   :  { %928 = vperm.xlu1 %9169, %v8619_v37   ;;  %924 = vperm.xlu0 %9168, %v8618_v38  }
 0x12a   :  { %v9590_v43 = vpop.permute.xlu1 %350  ;;  %v9592_v44 = vpop.permute.xlu0 %348 }
 0x12b   :  { %16104 = vst [vmem:[#allocation5_spill] sm:$0xff] %v9590_v43  ;;  %16105 = vst [vmem:[#allocation6_spill] sm:$0xff] %v9592_v44 }
 0x12c   :  { %936 = vperm.xlu1 %9169, %v8621_v41   ;;  %932 = vperm.xlu0 %9168, %v8620_v42  }
 0x12e   :  { %v9594_v45 = vpop.permute.xlu1 %354  ;;  %v9596_v46 = vpop.permute.xlu0 %352 }
 0x12f   :  { %16106 = vst [vmem:[#allocation7_spill] sm:$0xff] %v9594_v45  ;;  %16107 = vst [vmem:[#allocation8_spill] sm:$0xff] %v9596_v46 }
 0x132   :  { %v9598_v47 = vpop.permute.xlu1 %358  ;;  %v9600_v48 = vpop.permute.xlu0 %356 }
 0x133   :  { %16108 = vst [vmem:[#allocation9_spill] sm:$0xff] %v9598_v47  ;;  %16109 = vst [vmem:[#allocation10_spill] sm:$0xff] %v9600_v48 }
 0x136   :  { %v9602_v49 = vpop.permute.xlu1 %362  ;;  %v9604_v50 = vpop.permute.xlu0 %360 }
 0x137   :  { %16110 = vst [vmem:[#allocation11_spill] sm:$0xff] %v9602_v49  ;;  %16111 = vst [vmem:[#allocation12_spill] sm:$0xff] %v9604_v50 }
 0x13a   :  { %v9606_v34 = vpop.permute.xlu1 %366  ;;  %v9608_v35 = vpop.permute.xlu0 %364 }
 0x13b   :  { %16112 = vst [vmem:[#allocation13_spill] sm:$0xff] %v9606_v34  ;;  %16113 = vst [vmem:[#allocation14_spill] sm:$0xff] %v9608_v35 }
 0x13e   :  { %v9610_v51 = vpop.permute.xlu1 %370  ;;  %v9612_v52 = vpop.permute.xlu0 %368 }
 0x13f   :  { %16114 = vst [vmem:[#allocation15_spill] sm:$0xff] %v9610_v51  ;;  %16115 = vst [vmem:[#allocation16_spill] sm:$0xff] %v9612_v52 }
 0x142   :  { %v9614_v53 = vpop.permute.xlu1 %583  ;;  %v9616_v54 = vpop.permute.xlu0 %581 }
 0x143   :  { %16116 = vst [vmem:[#allocation17_spill] sm:$0xff] %v9614_v53  ;;  %16117 = vst [vmem:[#allocation18_spill] sm:$0xff] %v9616_v54 }
 0x146   :  { %v9618_v57 = vpop.permute.xlu1 %587  ;;  %v9620_v58 = vpop.permute.xlu0 %585 }
 0x147   :  { %16118 = vst [vmem:[#allocation19_spill] sm:$0xff] %v9618_v57  ;;  %16119 = vst [vmem:[#allocation20_spill] sm:$0xff] %v9620_v58 }
 0x14a   :  { %v9622_v63 = vpop.permute.xlu1 %591  ;;  %v9624_v0 = vpop.permute.xlu0 %589 }
 0x14b   :  { %16120 = vst [vmem:[#allocation21_spill] sm:$0xff] %v9622_v63  ;;  %16121 = vst [vmem:[#allocation22_spill] sm:$0xff] %v9624_v0 }
 0x14e   :  { %v9626_v3 = vpop.permute.xlu1 %595  ;;  %v9628_v4 = vpop.permute.xlu0 %593 }
 0x14f   :  { %16122 = vst [vmem:[#allocation23_spill] sm:$0xff] %v9626_v3  ;;  %16123 = vst [vmem:[#allocation24_spill] sm:$0xff] %v9628_v4 }
 0x152   :  { %v9630_v5 = vpop.permute.xlu1 %599  ;;  %v9632_v6 = vpop.permute.xlu0 %597 }
 0x153   :  { %16124 = vst [vmem:[#allocation25_spill] sm:$0xff] %v9630_v5  ;;  %16125 = vst [vmem:[#allocation26_spill] sm:$0xff] %v9632_v6 }
 0x156   :  { %v9634_v59 = vpop.permute.xlu1 %603  ;;  %v9636_v60 = vpop.permute.xlu0 %601 }
 0x157   :  { %16126 = vst [vmem:[#allocation27_spill] sm:$0xff] %v9634_v59  ;;  %16127 = vst [vmem:[#allocation28_spill] sm:$0xff] %v9636_v60 }
 0x15a   :  { %v9638_v11 = vpop.permute.xlu1 %607  ;;  %v9640_v12 = vpop.permute.xlu0 %605 }
 0x15b   :  { %16128 = vst [vmem:[#allocation29_spill] sm:$0xff] %v9638_v11  ;;  %16129 = vst [vmem:[#allocation30_spill] sm:$0xff] %v9640_v12 }
 0x15e   :  { %v9642_v15 = vpop.permute.xlu1 %611  ;;  %v9644_v16 = vpop.permute.xlu0 %609 }
 0x15f   :  { %16130 = vst [vmem:[#allocation31_spill] sm:$0xff] %v9642_v15  ;;  %16131 = vst [vmem:[#allocation32_spill] sm:$0xff] %v9644_v16 }
 0x162   :  { %v9646_v19 = vpop.permute.xlu1 %615  ;;  %v9648_v20 = vpop.permute.xlu0 %613 }
 0x163   :  { %16132 = vst [vmem:[#allocation33_spill] sm:$0xff] %v9646_v19  ;;  %16133 = vst [vmem:[#allocation34_spill] sm:$0xff] %v9648_v20 }
 0x166   :  { %v9650_v23 = vpop.permute.xlu1 %619  ;;  %v9652_v24 = vpop.permute.xlu0 %617 }
 0x167   :  { %16134 = vst [vmem:[#allocation35_spill] sm:$0xff] %v9650_v23  ;;  %16135 = vst [vmem:[#allocation36_spill] sm:$0xff] %v9652_v24 }
 0x16a   :  { %v9654_v37 = vpop.permute.xlu1 %623  ;;  %v9656_v38 = vpop.permute.xlu0 %621 }
 0x16b   :  { %16136 = vst [vmem:[#allocation37_spill] sm:$0xff] %v9654_v37  ;;  %16137 = vst [vmem:[#allocation38_spill] sm:$0xff] %v9656_v38 }
 0x16e   :  { %v9658_v41 = vpop.permute.xlu1 %627  ;;  %v9660_v42 = vpop.permute.xlu0 %625 }
 0x16f   :  { %16138 = vst [vmem:[#allocation39_spill] sm:$0xff] %v9658_v41  ;;  %16139 = vst [vmem:[#allocation40_spill] sm:$0xff] %v9660_v42 }
 0x172   :  { %v9662_v12 = vpop.permute.xlu1 %631  ;;  %v9664_v15 = vpop.permute.xlu0 %629 }
 0x173   :  { %16140 = vst [vmem:[#allocation41_spill] sm:$0xff] %v9662_v12  ;;  %16141 = vst [vmem:[#allocation42_spill] sm:$0xff] %v9664_v15 }
 0x176   :  { %v9666_v16 = vpop.permute.xlu1 %635  ;;  %v9668_v19 = vpop.permute.xlu0 %633 }
 0x177   :  { %16142 = vst [vmem:[#allocation43_spill] sm:$0xff] %v9666_v16  ;;  %16143 = vst [vmem:[#allocation44_spill] sm:$0xff] %v9668_v19 }
 0x17a   :  { %v9670_v20 = vpop.permute.xlu1 %639  ;;  %v9672_v23 = vpop.permute.xlu0 %637 }
 0x17b   :  { %16144 = vst [vmem:[#allocation45_spill] sm:$0xff] %v9670_v20  ;;  %16145 = vst [vmem:[#allocation46_spill] sm:$0xff] %v9672_v23 }
 0x17e   :  { %v9674_v24 = vpop.permute.xlu1 %643  ;;  %v9676_v37 = vpop.permute.xlu0 %641 }
 0x17f   :  { %16146 = vst [vmem:[#allocation47_spill] sm:$0xff] %v9674_v24  ;;  %16147 = vst [vmem:[#allocation48_spill] sm:$0xff] %v9676_v37  ;;  %v9697_v37 = vld [vmem:[%s16010_s2 + $0x9] sm:$0xff] }
 0x18b   :  { %v9678_v38 = vpop.permute.xlu1 %767  ;;  %v9680_v41 = vpop.permute.xlu0 %763 }
 0x18c   :  { %16148 = vst [vmem:[#allocation49_spill] sm:$0xff] %v9678_v38  ;;  %16149 = vst [vmem:[#allocation50_spill] sm:$0xff] %v9680_v41 }
 0x18f   :  { %v9682_v42 = vpop.permute.xlu1 %775  ;;  %v9684_v12 = vpop.permute.xlu0 %771 }
 0x190   :  { %16150 = vst [vmem:[#allocation51_spill] sm:$0xff] %v9682_v42  ;;  %16151 = vst [vmem:[#allocation52_spill] sm:$0xff] %v9684_v12  ;;  %v9702_v42 = vld [vmem:[%s16010_s2 + $0x1] sm:$0xff] }
 0x193   :  { %v9686_v15 = vpop.permute.xlu1 %783  ;;  %v9688_v16 = vpop.permute.xlu0 %779 }
 0x194   :  { %16152 = vst [vmem:[#allocation53_spill] sm:$0xff] %v9686_v15  ;;  %16153 = vst [vmem:[#allocation54_spill] sm:$0xff] %v9688_v16 }
 0x197   :  { %v9690_v19 = vpop.permute.xlu1 %791  ;;  %v9692_v20 = vpop.permute.xlu0 %787 }
 0x198   :  { %16154 = vst [vmem:[#allocation55_spill] sm:$0xff] %v9690_v19  ;;  %16155 = vst [vmem:[#allocation56_spill] sm:$0xff] %v9692_v20 }
 0x19b   :  { %v909_v23 = vpop.permute.xlu0 %908  ;;  %v913_v16 = vpop.permute.xlu1 %912 }
 0x19c   :  { %v940_v12 = vmul.f32 %v909_v23, %v9697_v37  ;;  %v939_v15 = vmul.f32 %v909_v23, %v9702_v42  ;;  %v942_v19 = vmul.f32 %v913_v16, %v9697_v37  ;;  %v941_v20 = vmul.f32 %v913_v16, %v9702_v42 }
 0x19e   :  { %1005 = vrot.lane.b32.xlu1 %v940_v12, %s9241_s10  ;;  %1003 = vrot.lane.b32.xlu0 %v939_v15, %s9241_s10 }
 0x19f   :  { %v917_v24 = vpop.permute.xlu0 %916  ;;  %v921_v11 = vpop.permute.xlu1 %920 }
 0x1a0   :  { %v944_v38 = vmul.f32 %v917_v24, %v9697_v37  ;;  %v943_v41 = vmul.f32 %v917_v24, %v9702_v42  ;;  %v946_v12 = vmul.f32 %v921_v11, %v9697_v37  ;;  %v945_v15 = vmul.f32 %v921_v11, %v9702_v42 }
 0x1a2   :  { %1009 = vrot.lane.b32.xlu1 %v942_v19, %s9241_s10  ;;  %1007 = vrot.lane.b32.xlu0 %v941_v20, %s9241_s10 }
 0x1a3   :  { %v925_v60 = vpop.permute.xlu0 %924  ;;  %v929_v59 = vpop.permute.xlu1 %928 }
 0x1a4   :  { %v948_v19 = vmul.f32 %v925_v60, %v9697_v37  ;;  %v947_v20 = vmul.f32 %v925_v60, %v9702_v42 }
 0x1a6   :  { %1013 = vrot.lane.b32.xlu1 %v944_v38, %s9241_s10  ;;  %1011 = vrot.lane.b32.xlu0 %v943_v41, %s9241_s10  ;;  %v950_v38 = vmul.f32 %v929_v59, %v9697_v37  ;;  %v949_v41 = vmul.f32 %v929_v59, %v9702_v42 }
 0x1a7   :  { %v933_v6 = vpop.permute.xlu0 %932  ;;  %v937_v5 = vpop.permute.xlu1 %936 }
 0x1aa   :  { %1017 = vrot.lane.b32.xlu1 %v946_v12, %s9241_s10  ;;  %1015 = vrot.lane.b32.xlu0 %v945_v15, %s9241_s10  ;;  %v952_v12 = vmul.f32 %v933_v6, %v9697_v37  ;;  %v951_v15 = vmul.f32 %v933_v6, %v9702_v42 }
 0x1ae   :  { %1021 = vrot.lane.b32.xlu1 %v948_v19, %s9241_s10  ;;  %1019 = vrot.lane.b32.xlu0 %v947_v20, %s9241_s10  ;;  %v954_v19 = vmul.f32 %v937_v5, %v9697_v37  ;;  %v953_v20 = vmul.f32 %v937_v5, %v9702_v42 }
 0x1b2   :  { %1025 = vrot.lane.b32.xlu1 %v950_v38, %s9241_s10  ;;  %1023 = vrot.lane.b32.xlu0 %v949_v41, %s9241_s10  ;;  %v9739_v38 = vld [vmem:[%s16010_s2 + $0x69] sm:$0xff]  ;;  %v9744_v41 = vld [vmem:[%s16010_s2 + $0x61] sm:$0xff] }
 0x1b3   :  { %v960_v4 = vmul.f32 %v917_v24, %v9739_v38  ;;  %v959_v3 = vmul.f32 %v917_v24, %v9744_v41  ;;  %v967_v24 = vmul.f32 %v933_v6, %v9744_v41 }
 0x1b6   :  { %1029 = vrot.lane.b32.xlu1 %v952_v12, %s9241_s10  ;;  %1027 = vrot.lane.b32.xlu0 %v951_v15, %s9241_s10  ;;  %v956_v12 = vmul.f32 %v909_v23, %v9739_v38  ;;  %v955_v15 = vmul.f32 %v909_v23, %v9744_v41  ;;  %v962_v23 = vmul.f32 %v921_v11, %v9739_v38 }
 0x1ba   :  { %1033 = vrot.lane.b32.xlu1 %v954_v19, %s9241_s10  ;;  %1031 = vrot.lane.b32.xlu0 %v953_v20, %s9241_s10  ;;  %v958_v19 = vmul.f32 %v913_v16, %v9739_v38  ;;  %v957_v20 = vmul.f32 %v913_v16, %v9744_v41  ;;  %v964_v16 = vmul.f32 %v925_v60, %v9739_v38 }
 0x1be   :  { %1037 = vrot.lane.b32.xlu1 %v956_v12, %s9241_s10  ;;  %1035 = vrot.lane.b32.xlu0 %v955_v15, %s9241_s10  ;;  %v961_v12 = vmul.f32 %v921_v11, %v9744_v41  ;;  %v963_v15 = vmul.f32 %v925_v60, %v9744_v41  ;;  %v968_v11 = vmul.f32 %v933_v6, %v9739_v38  ;;  %v8630_v6 = vld [vmem:[%s16008_s0 + $0x28] ss:$0 sm:$0xff] }
 0x1bf   :  { %v970_v60 = vmul.f32 %v937_v5, %v9739_v38 }
 0x1c2   :  { %1041 = vrot.lane.b32.xlu1 %v958_v19, %s9241_s10  ;;  %1039 = vrot.lane.b32.xlu0 %v957_v20, %s9241_s10  ;;  %v969_v19 = vmul.f32 %v937_v5, %v9744_v41  ;;  %v8633_v20 = vld [vmem:[%s16008_s0 + $0x2b] ss:$0 sm:$0xff]  ;;  %v8632_v5 = vld [vmem:[%s16008_s0 + $0x2a] ss:$0 sm:$0xff] }
 0x1c6   :  { %1045 = vrot.lane.b32.xlu1 %v960_v4, %s9241_s10  ;;  %1043 = vrot.lane.b32.xlu0 %v959_v3, %s9241_s10  ;;  %v966_v4 = vmul.f32 %v929_v59, %v9739_v38  ;;  %v965_v3 = vmul.f32 %v929_v59, %v9744_v41  ;;  %v8631_v59 = vld [vmem:[%s16008_s0 + $0x29] ss:$0 sm:$0xff] }
 0x1ca   :  { %1049 = vrot.lane.b32.xlu1 %v962_v23, %s9241_s10  ;;  %1047 = vrot.lane.b32.xlu0 %v961_v12, %s9241_s10  ;;  %v8635_v23 = vld [vmem:[%s16008_s0 + $0x2d] ss:$0 sm:$0xff]  ;;  %v8634_v12 = vld [vmem:[%s16008_s0 + $0x2c] ss:$0 sm:$0xff] }
 0x1ce   :  { %1053 = vrot.lane.b32.xlu1 %v964_v16, %s9241_s10  ;;  %1051 = vrot.lane.b32.xlu0 %v963_v15, %s9241_s10  ;;  %v8637_v16 = vld [vmem:[%s16008_s0 + $0x2f] ss:$0 sm:$0xff]  ;;  %v8636_v15 = vld [vmem:[%s16008_s0 + $0x2e] ss:$0 sm:$0xff] }
 0x1d2   :  { %1057 = vrot.lane.b32.xlu1 %v966_v4, %s9241_s10  ;;  %1055 = vrot.lane.b32.xlu0 %v965_v3, %s9241_s10 }
 0x1d6   :  { %1061 = vrot.lane.b32.xlu1 %v968_v11, %s9241_s10  ;;  %1059 = vrot.lane.b32.xlu0 %v967_v24, %s9241_s10 }
 0x1da   :  { %1065 = vrot.lane.b32.xlu1 %v970_v60, %s9241_s10  ;;  %1063 = vrot.lane.b32.xlu0 %v969_v19, %s9241_s10 }
 0x1de   :  { %1185 = vperm.xlu1 %9169, %v8631_v59   ;;  %1181 = vperm.xlu0 %9168, %v8630_v6  }
 0x1e2   :  { %1193 = vperm.xlu1 %9169, %v8633_v20   ;;  %1189 = vperm.xlu0 %9168, %v8632_v5  }
 0x1e6   :  { %1201 = vperm.xlu1 %9169, %v8635_v23   ;;  %1197 = vperm.xlu0 %9168, %v8634_v12  }
 0x1ea   :  { %1209 = vperm.xlu1 %9169, %v8637_v16   ;;  %1205 = vperm.xlu0 %9168, %v8636_v15  }
 0x210   :  { %v9802_v4 = vpop.permute.xlu1 %1005  ;;  %v9804_v3 = vpop.permute.xlu0 %1003 }
 0x211   :  { %16156 = vst [vmem:[#allocation57_spill] sm:$0xff] %v9802_v4  ;;  %16157 = vst [vmem:[#allocation58_spill] sm:$0xff] %v9804_v3 }
 0x214   :  { %v9806_v11 = vpop.permute.xlu1 %1009  ;;  %v9808_v24 = vpop.permute.xlu0 %1007 }
 0x215   :  { %16158 = vst [vmem:[#allocation59_spill] sm:$0xff] %v9806_v11  ;;  %16159 = vst [vmem:[#allocation60_spill] sm:$0xff] %v9808_v24 }
 0x218   :  { %v9810_v60 = vpop.permute.xlu1 %1013  ;;  %v9812_v19 = vpop.permute.xlu0 %1011 }
 0x219   :  { %16160 = vst [vmem:[#allocation61_spill] sm:$0xff] %v9810_v60  ;;  %16161 = vst [vmem:[#allocation62_spill] sm:$0xff] %v9812_v19 }
 0x21c   :  { %v9814_v59 = vpop.permute.xlu1 %1017  ;;  %v9816_v6 = vpop.permute.xlu0 %1015 }
 0x21d   :  { %16162 = vst [vmem:[#allocation63_spill] sm:$0xff] %v9814_v59  ;;  %16163 = vst [vmem:[#allocation64_spill] sm:$0xff] %v9816_v6 }
 0x220   :  { %v9818_v20 = vpop.permute.xlu1 %1021  ;;  %v9820_v5 = vpop.permute.xlu0 %1019 }
 0x221   :  { %16164 = vst [vmem:[#allocation65_spill] sm:$0xff] %v9818_v20  ;;  %16165 = vst [vmem:[#allocation66_spill] sm:$0xff] %v9820_v5 }
 0x224   :  { %v9822_v23 = vpop.permute.xlu1 %1025  ;;  %v9824_v12 = vpop.permute.xlu0 %1023 }
 0x225   :  { %16166 = vst [vmem:[#allocation67_spill] sm:$0xff] %v9822_v23  ;;  %16167 = vst [vmem:[#allocation68_spill] sm:$0xff] %v9824_v12 }
 0x228   :  { %v9826_v16 = vpop.permute.xlu1 %1029  ;;  %v9828_v15 = vpop.permute.xlu0 %1027 }
 0x229   :  { %16168 = vst [vmem:[#allocation69_spill] sm:$0xff] %v9826_v16  ;;  %16169 = vst [vmem:[#allocation70_spill] sm:$0xff] %v9828_v15 }
 0x22c   :  { %v9830_v24 = vpop.permute.xlu1 %1033  ;;  %v9832_v60 = vpop.permute.xlu0 %1031 }
 0x22d   :  { %16170 = vst [vmem:[#allocation71_spill] sm:$0xff] %v9830_v24  ;;  %16171 = vst [vmem:[#allocation72_spill] sm:$0xff] %v9832_v60 }
 0x230   :  { %v9834_v19 = vpop.permute.xlu1 %1037  ;;  %v9836_v59 = vpop.permute.xlu0 %1035 }
 0x231   :  { %16172 = vst [vmem:[#allocation73_spill] sm:$0xff] %v9834_v19  ;;  %16173 = vst [vmem:[#allocation74_spill] sm:$0xff] %v9836_v59 }
 0x234   :  { %v9838_v6 = vpop.permute.xlu1 %1041  ;;  %v9840_v20 = vpop.permute.xlu0 %1039 }
 0x235   :  { %16174 = vst [vmem:[#allocation75_spill] sm:$0xff] %v9838_v6  ;;  %16175 = vst [vmem:[#allocation76_spill] sm:$0xff] %v9840_v20 }
 0x238   :  { %v9842_v5 = vpop.permute.xlu0 %1043  ;;  %v9844_v23 = vpop.permute.xlu1 %1045 }
 0x239   :  { %16176 = vst [vmem:[#allocation77_spill] sm:$0xff] %v9842_v5  ;;  %16177 = vst [vmem:[#allocation78_spill] sm:$0xff] %v9844_v23 }
 0x23c   :  { %v9846_v12 = vpop.permute.xlu0 %1047  ;;  %v9848_v16 = vpop.permute.xlu1 %1049 }
 0x23d   :  { %16178 = vst [vmem:[#allocation79_spill] sm:$0xff] %v9846_v12  ;;  %16179 = vst [vmem:[#allocation80_spill] sm:$0xff] %v9848_v16 }
 0x240   :  { %v9850_v15 = vpop.permute.xlu0 %1051  ;;  %v9852_v24 = vpop.permute.xlu1 %1053 }
 0x241   :  { %16180 = vst [vmem:[#allocation81_spill] sm:$0xff] %v9850_v15  ;;  %16181 = vst [vmem:[#allocation82_spill] sm:$0xff] %v9852_v24 }
 0x244   :  { %v9854_v60 = vpop.permute.xlu0 %1055  ;;  %v9856_v19 = vpop.permute.xlu1 %1057 }
 0x245   :  { %16182 = vst [vmem:[#allocation83_spill] sm:$0xff] %v9854_v60  ;;  %16183 = vst [vmem:[#allocation84_spill] sm:$0xff] %v9856_v19 }
 0x248   :  { %v9858_v59 = vpop.permute.xlu0 %1059  ;;  %v9860_v6 = vpop.permute.xlu1 %1061 }
 0x249   :  { %16184 = vst [vmem:[#allocation85_spill] sm:$0xff] %v9858_v59  ;;  %16185 = vst [vmem:[#allocation86_spill] sm:$0xff] %v9860_v6 }
 0x24c   :  { %v9862_v20 = vpop.permute.xlu0 %1063  ;;  %v9864_v5 = vpop.permute.xlu1 %1065 }
 0x24d   :  { %16186 = vst [vmem:[#allocation87_spill] sm:$0xff] %v9862_v20  ;;  %16187 = vst [vmem:[#allocation88_spill] sm:$0xff] %v9864_v5 }
 0x259   :  { %v1182_v23 = vpop.permute.xlu0 %1181  ;;  %v1186_v15 = vpop.permute.xlu1 %1185 }
 0x25a   :  { %v1213_v12 = vmul.f32 %v1182_v23, %v9697_v37  ;;  %v1212_v16 = vmul.f32 %v1182_v23, %v9702_v42  ;;  %v1215_v60 = vmul.f32 %v1186_v15, %v9697_v37  ;;  %v1214_v59 = vmul.f32 %v1186_v15, %v9702_v42 }
 0x25c   :  { %1278 = vrot.lane.b32.xlu1 %v1213_v12, %s9242_s15  ;;  %1276 = vrot.lane.b32.xlu0 %v1212_v16, %s9242_s15 }
 0x25d   :  { %v1190_v19 = vpop.permute.xlu0 %1189  ;;  %v1194_v6 = vpop.permute.xlu1 %1193 }
 0x25e   :  { %v1217_v20 = vmul.f32 %v1190_v19, %v9697_v37  ;;  %v1216_v5 = vmul.f32 %v1190_v19, %v9702_v42  ;;  %v1219_v12 = vmul.f32 %v1194_v6, %v9697_v37  ;;  %v1218_v16 = vmul.f32 %v1194_v6, %v9702_v42 }
 0x260   :  { %1282 = vrot.lane.b32.xlu1 %v1215_v60, %s9242_s15  ;;  %1280 = vrot.lane.b32.xlu0 %v1214_v59, %s9242_s15 }
 0x261   :  { %v1198_v24 = vpop.permute.xlu0 %1197  ;;  %v1202_v11 = vpop.permute.xlu1 %1201 }
 0x262   :  { %v1221_v60 = vmul.f32 %v1198_v24, %v9697_v37  ;;  %v1220_v59 = vmul.f32 %v1198_v24, %v9702_v42 }
 0x264   :  { %1286 = vrot.lane.b32.xlu1 %v1217_v20, %s9242_s15  ;;  %1284 = vrot.lane.b32.xlu0 %v1216_v5, %s9242_s15  ;;  %v1223_v20 = vmul.f32 %v1202_v11, %v9697_v37  ;;  %v1222_v5 = vmul.f32 %v1202_v11, %v9702_v42 }
 0x265   :  { %v1206_v3 = vpop.permute.xlu0 %1205  ;;  %v1210_v4 = vpop.permute.xlu1 %1209 }
 0x268   :  { %1290 = vrot.lane.b32.xlu1 %v1219_v12, %s9242_s15  ;;  %1288 = vrot.lane.b32.xlu0 %v1218_v16, %s9242_s15  ;;  %v1225_v12 = vmul.f32 %v1206_v3, %v9697_v37  ;;  %v1224_v16 = vmul.f32 %v1206_v3, %v9702_v42 }
 0x26c   :  { %1294 = vrot.lane.b32.xlu1 %v1221_v60, %s9242_s15  ;;  %1292 = vrot.lane.b32.xlu0 %v1220_v59, %s9242_s15  ;;  %v1227_v60 = vmul.f32 %v1210_v4, %v9697_v37  ;;  %v1226_v59 = vmul.f32 %v1210_v4, %v9702_v42  ;;  %v1233_v37 = vmul.f32 %v1190_v19, %v9739_v38 }
 0x26d   :  { %v1232_v42 = vmul.f32 %v1190_v19, %v9744_v41  ;;  %v1239_v19 = vmul.f32 %v1202_v11, %v9739_v38 }
 0x270   :  { %1298 = vrot.lane.b32.xlu1 %v1223_v20, %s9242_s15  ;;  %1296 = vrot.lane.b32.xlu0 %v1222_v5, %s9242_s15  ;;  %v1229_v20 = vmul.f32 %v1182_v23, %v9739_v38  ;;  %v1228_v5 = vmul.f32 %v1182_v23, %v9744_v41  ;;  %v1235_v23 = vmul.f32 %v1194_v6, %v9739_v38 }
 0x274   :  { %1302 = vrot.lane.b32.xlu1 %v1225_v12, %s9242_s15  ;;  %1300 = vrot.lane.b32.xlu0 %v1224_v16, %s9242_s15  ;;  %v1231_v12 = vmul.f32 %v1186_v15, %v9739_v38  ;;  %v1230_v16 = vmul.f32 %v1186_v15, %v9744_v41  ;;  %v1237_v15 = vmul.f32 %v1198_v24, %v9739_v38 }
 0x278   :  { %1306 = vrot.lane.b32.xlu1 %v1227_v60, %s9242_s15  ;;  %1304 = vrot.lane.b32.xlu0 %v1226_v59, %s9242_s15  ;;  %v1234_v60 = vmul.f32 %v1194_v6, %v9744_v41  ;;  %v1236_v59 = vmul.f32 %v1198_v24, %v9744_v41  ;;  %v1241_v6 = vmul.f32 %v1206_v3, %v9739_v38 }
 0x279   :  { %v1243_v24 = vmul.f32 %v1210_v4, %v9739_v38  ;;  %v8649_v38 = vld [vmem:[%s16008_s0 + $0x33] ss:$0 sm:$0xff] }
 0x27c   :  { %1310 = vrot.lane.b32.xlu1 %v1229_v20, %s9242_s15  ;;  %1308 = vrot.lane.b32.xlu0 %v1228_v5, %s9242_s15  ;;  %v1238_v20 = vmul.f32 %v1202_v11, %v9744_v41  ;;  %v1240_v5 = vmul.f32 %v1206_v3, %v9744_v41  ;;  %v8647_v11 = vld [vmem:[%s16008_s0 + $0x31] ss:$0 sm:$0xff]  ;;  %v8646_v3 = vld [vmem:[%s16008_s0 + $0x30] ss:$0 sm:$0xff] }
 0x280   :  { %1314 = vrot.lane.b32.xlu1 %v1231_v12, %s9242_s15  ;;  %1312 = vrot.lane.b32.xlu0 %v1230_v16, %s9242_s15  ;;  %v1242_v12 = vmul.f32 %v1210_v4, %v9744_v41  ;;  %v8648_v41 = vld [vmem:[%s16008_s0 + $0x32] ss:$0 sm:$0xff]  ;;  %v8651_v4 = vld [vmem:[%s16008_s0 + $0x35] ss:$0 sm:$0xff] }
 0x281   :  { %v8650_v16 = vld [vmem:[%s16008_s0 + $0x34] ss:$0 sm:$0xff] }
 0x284   :  { %1318 = vrot.lane.b32.xlu1 %v1233_v37, %s9242_s15  ;;  %1316 = vrot.lane.b32.xlu0 %v1232_v42, %s9242_s15  ;;  %v8653_v37 = vld [vmem:[%s16008_s0 + $0x37] ss:$0 sm:$0xff]  ;;  %v8652_v42 = vld [vmem:[%s16008_s0 + $0x36] ss:$0 sm:$0xff] }
 0x288   :  { %1322 = vrot.lane.b32.xlu1 %v1235_v23, %s9242_s15  ;;  %1320 = vrot.lane.b32.xlu0 %v1234_v60, %s9242_s15  ;;  %v8663_v23 = vld [vmem:[%s16008_s0 + $0x39] ss:$0 sm:$0xff]  ;;  %v8662_v60 = vld [vmem:[%s16008_s0 + $0x38] ss:$0 sm:$0xff] }
 0x28c   :  { %1326 = vrot.lane.b32.xlu1 %v1237_v15, %s9242_s15  ;;  %1324 = vrot.lane.b32.xlu0 %v1236_v59, %s9242_s15  ;;  %v8665_v15 = vld [vmem:[%s16008_s0 + $0x3b] ss:$0 sm:$0xff]  ;;  %v8664_v59 = vld [vmem:[%s16008_s0 + $0x3a] ss:$0 sm:$0xff] }
 0x290   :  { %1330 = vrot.lane.b32.xlu1 %v1239_v19, %s9242_s15  ;;  %1328 = vrot.lane.b32.xlu0 %v1238_v20, %s9242_s15  ;;  %v8667_v19 = vld [vmem:[%s16008_s0 + $0x3d] ss:$0 sm:$0xff]  ;;  %v8666_v20 = vld [vmem:[%s16008_s0 + $0x3c] ss:$0 sm:$0xff] }
 0x294   :  { %1334 = vrot.lane.b32.xlu1 %v1241_v6, %s9242_s15  ;;  %1332 = vrot.lane.b32.xlu0 %v1240_v5, %s9242_s15  ;;  %v8669_v6 = vld [vmem:[%s16008_s0 + $0x3f] ss:$0 sm:$0xff]  ;;  %v8668_v5 = vld [vmem:[%s16008_s0 + $0x3e] ss:$0 sm:$0xff] }
 0x298   :  { %1338 = vrot.lane.b32.xlu1 %v1243_v24, %s9242_s15  ;;  %1336 = vrot.lane.b32.xlu0 %v1242_v12, %s9242_s15 }
 0x29c   :  { %1462 = vperm.xlu1 %9169, %v8647_v11   ;;  %1458 = vperm.xlu0 %9168, %v8646_v3  }
 0x2a0   :  { %1470 = vperm.xlu1 %9169, %v8649_v38   ;;  %1466 = vperm.xlu0 %9168, %v8648_v41  }
 0x2a4   :  { %1478 = vperm.xlu1 %9169, %v8651_v4   ;;  %1474 = vperm.xlu0 %9168, %v8650_v16  }
 0x2a8   :  { %1486 = vperm.xlu1 %9169, %v8653_v37   ;;  %1482 = vperm.xlu0 %9168, %v8652_v42  }
 0x2ac   :  { %1607 = vperm.xlu1 %9169, %v8663_v23   ;;  %1603 = vperm.xlu0 %9168, %v8662_v60  }
 0x2b0   :  { %1615 = vperm.xlu1 %9169, %v8665_v15   ;;  %1611 = vperm.xlu0 %9168, %v8664_v59  }
 0x2b4   :  { %1623 = vperm.xlu1 %9169, %v8667_v19   ;;  %1619 = vperm.xlu0 %9168, %v8666_v20  }
 0x2b8   :  { %1631 = vperm.xlu1 %9169, %v8669_v6   ;;  %1627 = vperm.xlu0 %9168, %v8668_v5  }
 0x2ce   :  { %v9978_v24 = vpop.permute.xlu1 %1278  ;;  %v9980_v12 = vpop.permute.xlu0 %1276 }
 0x2cf   :  { %16188 = vst [vmem:[#allocation89_spill] sm:$0xff] %v9978_v24  ;;  %16189 = vst [vmem:[#allocation90_spill] sm:$0xff] %v9980_v12 }
 0x2d2   :  { %v9982_v11 = vpop.permute.xlu1 %1282  ;;  %v9984_v3 = vpop.permute.xlu0 %1280 }
 0x2d3   :  { %16190 = vst [vmem:[#allocation91_spill] sm:$0xff] %v9982_v11  ;;  %16191 = vst [vmem:[#allocation92_spill] sm:$0xff] %v9984_v3 }
 0x2d6   :  { %v9986_v38 = vpop.permute.xlu1 %1286  ;;  %v9988_v41 = vpop.permute.xlu0 %1284 }
 0x2d7   :  { %16192 = vst [vmem:[#allocation93_spill] sm:$0xff] %v9986_v38  ;;  %16193 = vst [vmem:[#allocation94_spill] sm:$0xff] %v9988_v41 }
 0x2da   :  { %v9990_v4 = vpop.permute.xlu1 %1290  ;;  %v9992_v16 = vpop.permute.xlu0 %1288 }
 0x2db   :  { %16194 = vst [vmem:[#allocation95_spill] sm:$0xff] %v9990_v4  ;;  %16195 = vst [vmem:[#allocation96_spill] sm:$0xff] %v9992_v16 }
 0x2de   :  { %v9994_v37 = vpop.permute.xlu1 %1294  ;;  %v9996_v42 = vpop.permute.xlu0 %1292 }
 0x2df   :  { %16196 = vst [vmem:[#allocation97_spill] sm:$0xff] %v9994_v37  ;;  %16197 = vst [vmem:[#allocation98_spill] sm:$0xff] %v9996_v42 }
 0x2e2   :  { %v9998_v23 = vpop.permute.xlu1 %1298  ;;  %v10000_v60 = vpop.permute.xlu0 %1296 }
 0x2e3   :  { %16198 = vst [vmem:[#allocation99_spill] sm:$0xff] %v9998_v23  ;;  %16199 = vst [vmem:[#allocation100_spill] sm:$0xff] %v10000_v60 }
 0x2e6   :  { %v10002_v15 = vpop.permute.xlu1 %1302  ;;  %v10004_v59 = vpop.permute.xlu0 %1300 }
 0x2e7   :  { %16200 = vst [vmem:[#allocation101_spill] sm:$0xff] %v10002_v15  ;;  %16201 = vst [vmem:[#allocation102_spill] sm:$0xff] %v10004_v59 }
 0x2ea   :  { %v10006_v19 = vpop.permute.xlu1 %1306  ;;  %v10008_v20 = vpop.permute.xlu0 %1304 }
 0x2eb   :  { %16202 = vst [vmem:[#allocation103_spill] sm:$0xff] %v10006_v19  ;;  %16203 = vst [vmem:[#allocation104_spill] sm:$0xff] %v10008_v20 }
 0x2ee   :  { %v10010_v6 = vpop.permute.xlu1 %1310  ;;  %v10012_v5 = vpop.permute.xlu0 %1308 }
 0x2ef   :  { %16204 = vst [vmem:[#allocation105_spill] sm:$0xff] %v10010_v6  ;;  %16205 = vst [vmem:[#allocation106_spill] sm:$0xff] %v10012_v5 }
 0x2f2   :  { %v10014_v16 = vpop.permute.xlu1 %1314  ;;  %v10016_v37 = vpop.permute.xlu0 %1312 }
 0x2f3   :  { %16206 = vst [vmem:[#allocation107_spill] sm:$0xff] %v10014_v16  ;;  %16207 = vst [vmem:[#allocation108_spill] sm:$0xff] %v10016_v37 }
 0x2f6   :  { %v10018_v42 = vpop.permute.xlu1 %1318  ;;  %v10020_v23 = vpop.permute.xlu0 %1316 }
 0x2f7   :  { %16208 = vst [vmem:[#allocation109_spill] sm:$0xff] %v10018_v42  ;;  %16209 = vst [vmem:[#allocation110_spill] sm:$0xff] %v10020_v23 }
 0x2fa   :  { %v10022_v60 = vpop.permute.xlu1 %1322  ;;  %v10024_v15 = vpop.permute.xlu0 %1320 }
 0x2fb   :  { %16210 = vst [vmem:[#allocation111_spill] sm:$0xff] %v10022_v60  ;;  %16211 = vst [vmem:[#allocation112_spill] sm:$0xff] %v10024_v15 }
 0x2fe   :  { %v10026_v59 = vpop.permute.xlu1 %1326  ;;  %v10028_v19 = vpop.permute.xlu0 %1324 }
 0x2ff   :  { %16212 = vst [vmem:[#allocation113_spill] sm:$0xff] %v10026_v59  ;;  %16213 = vst [vmem:[#allocation114_spill] sm:$0xff] %v10028_v19 }
 0x302   :  { %v10030_v20 = vpop.permute.xlu1 %1330  ;;  %v10032_v6 = vpop.permute.xlu0 %1328 }
 0x303   :  { %16214 = vst [vmem:[#allocation115_spill] sm:$0xff] %v10030_v20  ;;  %16215 = vst [vmem:[#allocation116_spill] sm:$0xff] %v10032_v6 }
 0x306   :  { %v10034_v5 = vpop.permute.xlu1 %1334  ;;  %v10036_v16 = vpop.permute.xlu0 %1332 }
 0x307   :  { %16216 = vst [vmem:[#allocation117_spill] sm:$0xff] %v10034_v5  ;;  %16217 = vst [vmem:[#allocation118_spill] sm:$0xff] %v10036_v16 }
 0x30a   :  { %v10038_v37 = vpop.permute.xlu1 %1338  ;;  %v10040_v42 = vpop.permute.xlu0 %1336 }
 0x30b   :  { %16218 = vst [vmem:[#allocation119_spill] sm:$0xff] %v10038_v37  ;;  %16219 = vst [vmem:[#allocation120_spill] sm:$0xff] %v10040_v42  ;;  %v10061_v42 = vld [vmem:[%s16010_s2 + $0xa] sm:$0xff] }
 0x317   :  { %v10042_v23 = vpop.permute.xlu1 %1462  ;;  %v10044_v60 = vpop.permute.xlu0 %1458 }
 0x318   :  { %16220 = vst [vmem:[#allocation121_spill] sm:$0xff] %v10042_v23  ;;  %16221 = vst [vmem:[#allocation122_spill] sm:$0xff] %v10044_v60 }
 0x31b   :  { %v10046_v15 = vpop.permute.xlu1 %1470  ;;  %v10048_v59 = vpop.permute.xlu0 %1466 }
 0x31c   :  { %16222 = vst [vmem:[#allocation123_spill] sm:$0xff] %v10046_v15  ;;  %16223 = vst [vmem:[#allocation124_spill] sm:$0xff] %v10048_v59  ;;  %v10066_v15 = vld [vmem:[%s16010_s2 + $0x2] sm:$0xff] }
 0x31f   :  { %v10050_v19 = vpop.permute.xlu1 %1478  ;;  %v10052_v20 = vpop.permute.xlu0 %1474 }
 0x320   :  { %16224 = vst [vmem:[#allocation125_spill] sm:$0xff] %v10050_v19  ;;  %16225 = vst [vmem:[#allocation126_spill] sm:$0xff] %v10052_v20 }
 0x323   :  { %v10054_v6 = vpop.permute.xlu1 %1486  ;;  %v10056_v5 = vpop.permute.xlu0 %1482 }
 0x324   :  { %16226 = vst [vmem:[#allocation127_spill] sm:$0xff] %v10054_v6  ;;  %16227 = vst [vmem:[#allocation128_spill] sm:$0xff] %v10056_v5 }
 0x327   :  { %v1604_v16 = vpop.permute.xlu0 %1603  ;;  %v1608_v20 = vpop.permute.xlu1 %1607 }
 0x328   :  { %v1635_v59 = vmul.f32 %v1604_v16, %v10061_v42  ;;  %v1634_v19 = vmul.f32 %v1604_v16, %v10066_v15  ;;  %v1637_v6 = vmul.f32 %v1608_v20, %v10061_v42  ;;  %v1636_v5 = vmul.f32 %v1608_v20, %v10066_v15 }
 0x32a   :  { %1700 = vrot.lane.b32.xlu1 %v1635_v59, %s9241_s10  ;;  %1698 = vrot.lane.b32.xlu0 %v1634_v19, %s9241_s10 }
 0x32b   :  { %v1612_v23 = vpop.permute.xlu0 %1611  ;;  %v1616_v4 = vpop.permute.xlu1 %1615 }
 0x32c   :  { %v1639_v60 = vmul.f32 %v1612_v23, %v10061_v42  ;;  %v1638_v37 = vmul.f32 %v1612_v23, %v10066_v15  ;;  %v1641_v59 = vmul.f32 %v1616_v4, %v10061_v42  ;;  %v1640_v19 = vmul.f32 %v1616_v4, %v10066_v15 }
 0x32e   :  { %1704 = vrot.lane.b32.xlu1 %v1637_v6, %s9241_s10  ;;  %1702 = vrot.lane.b32.xlu0 %v1636_v5, %s9241_s10 }
 0x32f   :  { %v1620_v41 = vpop.permute.xlu0 %1619  ;;  %v1624_v38 = vpop.permute.xlu1 %1623 }
 0x330   :  { %v1643_v6 = vmul.f32 %v1620_v41, %v10061_v42  ;;  %v1642_v5 = vmul.f32 %v1620_v41, %v10066_v15 }
 0x332   :  { %1708 = vrot.lane.b32.xlu1 %v1639_v60, %s9241_s10  ;;  %1706 = vrot.lane.b32.xlu0 %v1638_v37, %s9241_s10  ;;  %v1645_v37 = vmul.f32 %v1624_v38, %v10061_v42  ;;  %v1644_v60 = vmul.f32 %v1624_v38, %v10066_v15 }
 0x333   :  { %v1628_v3 = vpop.permute.xlu0 %1627  ;;  %v1632_v11 = vpop.permute.xlu1 %1631 }
 0x336   :  { %1712 = vrot.lane.b32.xlu1 %v1641_v59, %s9241_s10  ;;  %1710 = vrot.lane.b32.xlu0 %v1640_v19, %s9241_s10  ;;  %v1647_v59 = vmul.f32 %v1628_v3, %v10061_v42  ;;  %v1646_v19 = vmul.f32 %v1628_v3, %v10066_v15 }
 0x33a   :  { %1716 = vrot.lane.b32.xlu1 %v1643_v6, %s9241_s10  ;;  %1714 = vrot.lane.b32.xlu0 %v1642_v5, %s9241_s10  ;;  %v1649_v6 = vmul.f32 %v1632_v11, %v10061_v42  ;;  %v1648_v5 = vmul.f32 %v1632_v11, %v10066_v15 }
 0x33e   :  { %1720 = vrot.lane.b32.xlu1 %v1645_v37, %s9241_s10  ;;  %1718 = vrot.lane.b32.xlu0 %v1644_v60, %s9241_s10  ;;  %v10103_v37 = vld [vmem:[%s16010_s2 + $0x6a] sm:$0xff]  ;;  %v10108_v60 = vld [vmem:[%s16010_s2 + $0x62] sm:$0xff] }
 0x33f   :  { %v1655_v12 = vmul.f32 %v1612_v23, %v10103_v37  ;;  %v1654_v24 = vmul.f32 %v1612_v23, %v10108_v60  ;;  %v1662_v23 = vmul.f32 %v1628_v3, %v10108_v60 }
 0x342   :  { %1724 = vrot.lane.b32.xlu1 %v1647_v59, %s9241_s10  ;;  %1722 = vrot.lane.b32.xlu0 %v1646_v19, %s9241_s10  ;;  %v1651_v59 = vmul.f32 %v1604_v16, %v10103_v37  ;;  %v1650_v19 = vmul.f32 %v1604_v16, %v10108_v60  ;;  %v1657_v16 = vmul.f32 %v1616_v4, %v10103_v37 }
 0x346   :  { %1728 = vrot.lane.b32.xlu1 %v1649_v6, %s9241_s10  ;;  %1726 = vrot.lane.b32.xlu0 %v1648_v5, %s9241_s10  ;;  %v1653_v6 = vmul.f32 %v1608_v20, %v10103_v37  ;;  %v1652_v5 = vmul.f32 %v1608_v20, %v10108_v60  ;;  %v1659_v20 = vmul.f32 %v1620_v41, %v10103_v37 }
 0x34a   :  { %1732 = vrot.lane.b32.xlu1 %v1651_v59, %s9241_s10  ;;  %1730 = vrot.lane.b32.xlu0 %v1650_v19, %s9241_s10  ;;  %v1656_v59 = vmul.f32 %v1616_v4, %v10108_v60  ;;  %v1658_v19 = vmul.f32 %v1620_v41, %v10108_v60  ;;  %v1663_v4 = vmul.f32 %v1628_v3, %v10103_v37  ;;  %v8678_v3 = vld [vmem:[%s16008_s0 + $0x40] ss:$0 sm:$0xff] }
 0x34b   :  { %v1665_v41 = vmul.f32 %v1632_v11, %v10103_v37 }
 0x34e   :  { %1736 = vrot.lane.b32.xlu1 %v1653_v6, %s9241_s10  ;;  %1734 = vrot.lane.b32.xlu0 %v1652_v5, %s9241_s10  ;;  %v1664_v6 = vmul.f32 %v1632_v11, %v10108_v60  ;;  %v8681_v5 = vld [vmem:[%s16008_s0 + $0x43] ss:$0 sm:$0xff]  ;;  %v8680_v11 = vld [vmem:[%s16008_s0 + $0x42] ss:$0 sm:$0xff] }
 0x352   :  { %1740 = vrot.lane.b32.xlu1 %v1655_v12, %s9241_s10  ;;  %1738 = vrot.lane.b32.xlu0 %v1654_v24, %s9241_s10  ;;  %v1661_v12 = vmul.f32 %v1624_v38, %v10103_v37  ;;  %v1660_v24 = vmul.f32 %v1624_v38, %v10108_v60  ;;  %v8679_v38 = vld [vmem:[%s16008_s0 + $0x41] ss:$0 sm:$0xff] }
 0x356   :  { %1744 = vrot.lane.b32.xlu1 %v1657_v16, %s9241_s10  ;;  %1742 = vrot.lane.b32.xlu0 %v1656_v59, %s9241_s10  ;;  %v8683_v16 = vld [vmem:[%s16008_s0 + $0x45] ss:$0 sm:$0xff]  ;;  %v8682_v59 = vld [vmem:[%s16008_s0 + $0x44] ss:$0 sm:$0xff] }
 0x35a   :  { %1748 = vrot.lane.b32.xlu1 %v1659_v20, %s9241_s10  ;;  %1746 = vrot.lane.b32.xlu0 %v1658_v19, %s9241_s10  ;;  %v8685_v20 = vld [vmem:[%s16008_s0 + $0x47] ss:$0 sm:$0xff]  ;;  %v8684_v19 = vld [vmem:[%s16008_s0 + $0x46] ss:$0 sm:$0xff] }
 0x35e   :  { %1752 = vrot.lane.b32.xlu1 %v1661_v12, %s9241_s10  ;;  %1750 = vrot.lane.b32.xlu0 %v1660_v24, %s9241_s10 }
 0x362   :  { %1756 = vrot.lane.b32.xlu1 %v1663_v4, %s9241_s10  ;;  %1754 = vrot.lane.b32.xlu0 %v1662_v23, %s9241_s10 }
 0x366   :  { %1760 = vrot.lane.b32.xlu1 %v1665_v41, %s9241_s10  ;;  %1758 = vrot.lane.b32.xlu0 %v1664_v6, %s9241_s10 }
 0x36a   :  { %1880 = vperm.xlu1 %9169, %v8679_v38   ;;  %1876 = vperm.xlu0 %9168, %v8678_v3  }
 0x36e   :  { %1888 = vperm.xlu1 %9169, %v8681_v5   ;;  %1884 = vperm.xlu0 %9168, %v8680_v11  }
 0x372   :  { %1896 = vperm.xlu1 %9169, %v8683_v16   ;;  %1892 = vperm.xlu0 %9168, %v8682_v59  }
 0x376   :  { %1904 = vperm.xlu1 %9169, %v8685_v20   ;;  %1900 = vperm.xlu0 %9168, %v8684_v19  }
 0x39c   :  { %v10166_v12 = vpop.permute.xlu1 %1700  ;;  %v10168_v24 = vpop.permute.xlu0 %1698 }
 0x39d   :  { %16228 = vst [vmem:[#allocation129_spill] sm:$0xff] %v10166_v12  ;;  %16229 = vst [vmem:[#allocation130_spill] sm:$0xff] %v10168_v24 }
 0x3a0   :  { %v10170_v4 = vpop.permute.xlu1 %1704  ;;  %v10172_v23 = vpop.permute.xlu0 %1702 }
 0x3a1   :  { %16230 = vst [vmem:[#allocation131_spill] sm:$0xff] %v10170_v4  ;;  %16231 = vst [vmem:[#allocation132_spill] sm:$0xff] %v10172_v23 }
 0x3a4   :  { %v10174_v41 = vpop.permute.xlu1 %1708  ;;  %v10176_v6 = vpop.permute.xlu0 %1706 }
 0x3a5   :  { %16232 = vst [vmem:[#allocation133_spill] sm:$0xff] %v10174_v41  ;;  %16233 = vst [vmem:[#allocation134_spill] sm:$0xff] %v10176_v6 }
 0x3a8   :  { %v10178_v38 = vpop.permute.xlu1 %1712  ;;  %v10180_v3 = vpop.permute.xlu0 %1710 }
 0x3a9   :  { %16234 = vst [vmem:[#allocation135_spill] sm:$0xff] %v10178_v38  ;;  %16235 = vst [vmem:[#allocation136_spill] sm:$0xff] %v10180_v3 }
 0x3ac   :  { %v10182_v5 = vpop.permute.xlu1 %1716  ;;  %v10184_v11 = vpop.permute.xlu0 %1714 }
 0x3ad   :  { %16236 = vst [vmem:[#allocation137_spill] sm:$0xff] %v10182_v5  ;;  %16237 = vst [vmem:[#allocation138_spill] sm:$0xff] %v10184_v11 }
 0x3b0   :  { %v10186_v16 = vpop.permute.xlu1 %1720  ;;  %v10188_v59 = vpop.permute.xlu0 %1718 }
 0x3b1   :  { %16238 = vst [vmem:[#allocation139_spill] sm:$0xff] %v10186_v16  ;;  %16239 = vst [vmem:[#allocation140_spill] sm:$0xff] %v10188_v59 }
 0x3b4   :  { %v10190_v20 = vpop.permute.xlu1 %1724  ;;  %v10192_v19 = vpop.permute.xlu0 %1722 }
 0x3b5   :  { %16240 = vst [vmem:[#allocation141_spill] sm:$0xff] %v10190_v20  ;;  %16241 = vst [vmem:[#allocation142_spill] sm:$0xff] %v10192_v19 }
 0x3b8   :  { %v10194_v23 = vpop.permute.xlu1 %1728  ;;  %v10196_v41 = vpop.permute.xlu0 %1726 }
 0x3b9   :  { %16242 = vst [vmem:[#allocation143_spill] sm:$0xff] %v10194_v23  ;;  %16243 = vst [vmem:[#allocation144_spill] sm:$0xff] %v10196_v41 }
 0x3bc   :  { %v10198_v6 = vpop.permute.xlu1 %1732  ;;  %v10200_v38 = vpop.permute.xlu0 %1730 }
 0x3bd   :  { %16244 = vst [vmem:[#allocation145_spill] sm:$0xff] %v10198_v6  ;;  %16245 = vst [vmem:[#allocation146_spill] sm:$0xff] %v10200_v38 }
 0x3c0   :  { %v10202_v3 = vpop.permute.xlu1 %1736  ;;  %v10204_v5 = vpop.permute.xlu0 %1734 }
 0x3c1   :  { %16246 = vst [vmem:[#allocation147_spill] sm:$0xff] %v10202_v3  ;;  %16247 = vst [vmem:[#allocation148_spill] sm:$0xff] %v10204_v5 }
 0x3c4   :  { %v10206_v11 = vpop.permute.xlu0 %1738  ;;  %v10208_v16 = vpop.permute.xlu1 %1740 }
 0x3c5   :  { %16248 = vst [vmem:[#allocation149_spill] sm:$0xff] %v10206_v11  ;;  %16249 = vst [vmem:[#allocation150_spill] sm:$0xff] %v10208_v16 }
 0x3c8   :  { %v10210_v59 = vpop.permute.xlu0 %1742  ;;  %v10212_v20 = vpop.permute.xlu1 %1744 }
 0x3c9   :  { %16250 = vst [vmem:[#allocation151_spill] sm:$0xff] %v10210_v59  ;;  %16251 = vst [vmem:[#allocation152_spill] sm:$0xff] %v10212_v20 }
 0x3cc   :  { %v10214_v19 = vpop.permute.xlu0 %1746  ;;  %v10216_v23 = vpop.permute.xlu1 %1748 }
 0x3cd   :  { %16252 = vst [vmem:[#allocation153_spill] sm:$0xff] %v10214_v19  ;;  %16253 = vst [vmem:[#allocation154_spill] sm:$0xff] %v10216_v23 }
 0x3d0   :  { %v10218_v41 = vpop.permute.xlu0 %1750  ;;  %v10220_v6 = vpop.permute.xlu1 %1752 }
 0x3d1   :  { %16254 = vst [vmem:[#allocation155_spill] sm:$0xff] %v10218_v41  ;;  %16255 = vst [vmem:[#allocation156_spill] sm:$0xff] %v10220_v6 }
 0x3d4   :  { %v10222_v38 = vpop.permute.xlu0 %1754  ;;  %v10224_v3 = vpop.permute.xlu1 %1756 }
 0x3d5   :  { %16256 = vst [vmem:[#allocation157_spill] sm:$0xff] %v10222_v38  ;;  %16257 = vst [vmem:[#allocation158_spill] sm:$0xff] %v10224_v3 }
 0x3d8   :  { %v10226_v5 = vpop.permute.xlu0 %1758  ;;  %v10228_v11 = vpop.permute.xlu1 %1760 }
 0x3d9   :  { %16258 = vst [vmem:[#allocation159_spill] sm:$0xff] %v10226_v5  ;;  %16259 = vst [vmem:[#allocation160_spill] sm:$0xff] %v10228_v11 }
 0x3e5   :  { %v1877_v16 = vpop.permute.xlu0 %1876  ;;  %v1881_v19 = vpop.permute.xlu1 %1880 }
 0x3e6   :  { %v1908_v59 = vmul.f32 %v1877_v16, %v10061_v42  ;;  %v1907_v20 = vmul.f32 %v1877_v16, %v10066_v15  ;;  %v1910_v41 = vmul.f32 %v1881_v19, %v10061_v42  ;;  %v1909_v38 = vmul.f32 %v1881_v19, %v10066_v15 }
 0x3e8   :  { %1973 = vrot.lane.b32.xlu1 %v1908_v59, %s9242_s15  ;;  %1971 = vrot.lane.b32.xlu0 %v1907_v20, %s9242_s15 }
 0x3e9   :  { %v1885_v6 = vpop.permute.xlu0 %1884  ;;  %v1889_v3 = vpop.permute.xlu1 %1888 }
 0x3ea   :  { %v1912_v5 = vmul.f32 %v1885_v6, %v10061_v42  ;;  %v1911_v11 = vmul.f32 %v1885_v6, %v10066_v15  ;;  %v1914_v59 = vmul.f32 %v1889_v3, %v10061_v42  ;;  %v1913_v20 = vmul.f32 %v1889_v3, %v10066_v15 }
 0x3ec   :  { %1977 = vrot.lane.b32.xlu1 %v1910_v41, %s9242_s15  ;;  %1975 = vrot.lane.b32.xlu0 %v1909_v38, %s9242_s15 }
 0x3ed   :  { %v1893_v23 = vpop.permute.xlu0 %1892  ;;  %v1897_v4 = vpop.permute.xlu1 %1896 }
 0x3ee   :  { %v1916_v41 = vmul.f32 %v1893_v23, %v10061_v42  ;;  %v1915_v38 = vmul.f32 %v1893_v23, %v10066_v15 }
 0x3f0   :  { %1981 = vrot.lane.b32.xlu1 %v1912_v5, %s9242_s15  ;;  %1979 = vrot.lane.b32.xlu0 %v1911_v11, %s9242_s15  ;;  %v1918_v5 = vmul.f32 %v1897_v4, %v10061_v42  ;;  %v1917_v11 = vmul.f32 %v1897_v4, %v10066_v15 }
 0x3f1   :  { %v1901_v24 = vpop.permute.xlu0 %1900  ;;  %v1905_v12 = vpop.permute.xlu1 %1904 }
 0x3f4   :  { %1985 = vrot.lane.b32.xlu1 %v1914_v59, %s9242_s15  ;;  %1983 = vrot.lane.b32.xlu0 %v1913_v20, %s9242_s15  ;;  %v1920_v59 = vmul.f32 %v1901_v24, %v10061_v42  ;;  %v1919_v20 = vmul.f32 %v1901_v24, %v10066_v15 }
 0x3f8   :  { %1989 = vrot.lane.b32.xlu1 %v1916_v41, %s9242_s15  ;;  %1987 = vrot.lane.b32.xlu0 %v1915_v38, %s9242_s15  ;;  %v1922_v41 = vmul.f32 %v1905_v12, %v10061_v42  ;;  %v1921_v38 = vmul.f32 %v1905_v12, %v10066_v15  ;;  %v1928_v42 = vmul.f32 %v1885_v6, %v10103_v37 }
 0x3f9   :  { %v1927_v15 = vmul.f32 %v1885_v6, %v10108_v60  ;;  %v1934_v6 = vmul.f32 %v1897_v4, %v10103_v37 }
 0x3fc   :  { %1993 = vrot.lane.b32.xlu1 %v1918_v5, %s9242_s15  ;;  %1991 = vrot.lane.b32.xlu0 %v1917_v11, %s9242_s15  ;;  %v1924_v5 = vmul.f32 %v1877_v16, %v10103_v37  ;;  %v1923_v11 = vmul.f32 %v1877_v16, %v10108_v60  ;;  %v1930_v16 = vmul.f32 %v1889_v3, %v10103_v37 }
 0x400   :  { %1997 = vrot.lane.b32.xlu1 %v1920_v59, %s9242_s15  ;;  %1995 = vrot.lane.b32.xlu0 %v1919_v20, %s9242_s15  ;;  %v1926_v59 = vmul.f32 %v1881_v19, %v10103_v37  ;;  %v1925_v20 = vmul.f32 %v1881_v19, %v10108_v60  ;;  %v1932_v19 = vmul.f32 %v1893_v23, %v10103_v37 }
 0x404   :  { %2001 = vrot.lane.b32.xlu1 %v1922_v41, %s9242_s15  ;;  %1999 = vrot.lane.b32.xlu0 %v1921_v38, %s9242_s15  ;;  %v1929_v41 = vmul.f32 %v1889_v3, %v10108_v60  ;;  %v1931_v38 = vmul.f32 %v1893_v23, %v10108_v60  ;;  %v1936_v3 = vmul.f32 %v1901_v24, %v10103_v37 }
 0x405   :  { %v1938_v23 = vmul.f32 %v1905_v12, %v10103_v37  ;;  %v8701_v37 = vld [vmem:[%s16008_s0 + $0x4b] ss:$0 sm:$0xff] }
 0x408   :  { %2005 = vrot.lane.b32.xlu1 %v1924_v5, %s9242_s15  ;;  %2003 = vrot.lane.b32.xlu0 %v1923_v11, %s9242_s15  ;;  %v1933_v5 = vmul.f32 %v1897_v4, %v10108_v60  ;;  %v1935_v11 = vmul.f32 %v1901_v24, %v10108_v60  ;;  %v8699_v4 = vld [vmem:[%s16008_s0 + $0x49] ss:$0 sm:$0xff]  ;;  %v8698_v24 = vld [vmem:[%s16008_s0 + $0x48] ss:$0 sm:$0xff] }
 0x40c   :  { %2009 = vrot.lane.b32.xlu1 %v1926_v59, %s9242_s15  ;;  %2007 = vrot.lane.b32.xlu0 %v1925_v20, %s9242_s15  ;;  %v1937_v59 = vmul.f32 %v1905_v12, %v10108_v60  ;;  %v8700_v60 = vld [vmem:[%s16008_s0 + $0x4a] ss:$0 sm:$0xff]  ;;  %v8703_v12 = vld [vmem:[%s16008_s0 + $0x4d] ss:$0 sm:$0xff] }
 0x40d   :  { %v8702_v20 = vld [vmem:[%s16008_s0 + $0x4c] ss:$0 sm:$0xff] }
 0x410   :  { %2013 = vrot.lane.b32.xlu1 %v1928_v42, %s9242_s15  ;;  %2011 = vrot.lane.b32.xlu0 %v1927_v15, %s9242_s15  ;;  %v8705_v42 = vld [vmem:[%s16008_s0 + $0x4f] ss:$0 sm:$0xff]  ;;  %v8704_v15 = vld [vmem:[%s16008_s0 + $0x4e] ss:$0 sm:$0xff] }
 0x414   :  { %2017 = vrot.lane.b32.xlu1 %v1930_v16, %s9242_s15  ;;  %2015 = vrot.lane.b32.xlu0 %v1929_v41, %s9242_s15  ;;  %v8715_v16 = vld [vmem:[%s16008_s0 + $0x51] ss:$0 sm:$0xff]  ;;  %v8714_v41 = vld [vmem:[%s16008_s0 + $0x50] ss:$0 sm:$0xff] }
 0x418   :  { %2021 = vrot.lane.b32.xlu1 %v1932_v19, %s9242_s15  ;;  %2019 = vrot.lane.b32.xlu0 %v1931_v38, %s9242_s15  ;;  %v8717_v19 = vld [vmem:[%s16008_s0 + $0x53] ss:$0 sm:$0xff]  ;;  %v8716_v38 = vld [vmem:[%s16008_s0 + $0x52] ss:$0 sm:$0xff] }
 0x41c   :  { %2025 = vrot.lane.b32.xlu1 %v1934_v6, %s9242_s15  ;;  %2023 = vrot.lane.b32.xlu0 %v1933_v5, %s9242_s15  ;;  %v8719_v6 = vld [vmem:[%s16008_s0 + $0x55] ss:$0 sm:$0xff]  ;;  %v8718_v5 = vld [vmem:[%s16008_s0 + $0x54] ss:$0 sm:$0xff] }
 0x420   :  { %2029 = vrot.lane.b32.xlu1 %v1936_v3, %s9242_s15  ;;  %2027 = vrot.lane.b32.xlu0 %v1935_v11, %s9242_s15  ;;  %v8721_v3 = vld [vmem:[%s16008_s0 + $0x57] ss:$0 sm:$0xff]  ;;  %v8720_v11 = vld [vmem:[%s16008_s0 + $0x56] ss:$0 sm:$0xff] }
 0x424   :  { %2033 = vrot.lane.b32.xlu1 %v1938_v23, %s9242_s15  ;;  %2031 = vrot.lane.b32.xlu0 %v1937_v59, %s9242_s15 }
 0x428   :  { %2158 = vperm.xlu1 %9169, %v8699_v4   ;;  %2154 = vperm.xlu0 %9168, %v8698_v24  }
 0x42c   :  { %2166 = vperm.xlu1 %9169, %v8701_v37   ;;  %2162 = vperm.xlu0 %9168, %v8700_v60  }
 0x430   :  { %2174 = vperm.xlu1 %9169, %v8703_v12   ;;  %2170 = vperm.xlu0 %9168, %v8702_v20  }
 0x434   :  { %2182 = vperm.xlu1 %9169, %v8705_v42   ;;  %2178 = vperm.xlu0 %9168, %v8704_v15  }
 0x438   :  { %2303 = vperm.xlu1 %9169, %v8715_v16   ;;  %2299 = vperm.xlu0 %9168, %v8714_v41  }
 0x43c   :  { %2311 = vperm.xlu1 %9169, %v8717_v19   ;;  %2307 = vperm.xlu0 %9168, %v8716_v38  }
 0x440   :  { %2319 = vperm.xlu1 %9169, %v8719_v6   ;;  %2315 = vperm.xlu0 %9168, %v8718_v5  }
 0x444   :  { %2327 = vperm.xlu1 %9169, %v8721_v3   ;;  %2323 = vperm.xlu0 %9168, %v8720_v11  }
 0x45a   :  { %v10342_v23 = vpop.permute.xlu1 %1973  ;;  %v10344_v59 = vpop.permute.xlu0 %1971 }
 0x45b   :  { %16260 = vst [vmem:[#allocation161_spill] sm:$0xff] %v10342_v23  ;;  %16261 = vst [vmem:[#allocation162_spill] sm:$0xff] %v10344_v59 }
 0x45e   :  { %v10346_v4 = vpop.permute.xlu1 %1977  ;;  %v10348_v24 = vpop.permute.xlu0 %1975 }
 0x45f   :  { %16262 = vst [vmem:[#allocation163_spill] sm:$0xff] %v10346_v4  ;;  %16263 = vst [vmem:[#allocation164_spill] sm:$0xff] %v10348_v24 }
 0x462   :  { %v10350_v37 = vpop.permute.xlu1 %1981  ;;  %v10352_v60 = vpop.permute.xlu0 %1979 }
 0x463   :  { %16264 = vst [vmem:[#allocation165_spill] sm:$0xff] %v10350_v37  ;;  %16265 = vst [vmem:[#allocation166_spill] sm:$0xff] %v10352_v60 }
 0x466   :  { %v10354_v12 = vpop.permute.xlu1 %1985  ;;  %v10356_v20 = vpop.permute.xlu0 %1983 }
 0x467   :  { %16266 = vst [vmem:[#allocation167_spill] sm:$0xff] %v10354_v12  ;;  %16267 = vst [vmem:[#allocation168_spill] sm:$0xff] %v10356_v20 }
 0x46a   :  { %v10358_v42 = vpop.permute.xlu1 %1989  ;;  %v10360_v15 = vpop.permute.xlu0 %1987 }
 0x46b   :  { %16268 = vst [vmem:[#allocation169_spill] sm:$0xff] %v10358_v42  ;;  %16269 = vst [vmem:[#allocation170_spill] sm:$0xff] %v10360_v15 }
 0x46e   :  { %v10362_v16 = vpop.permute.xlu1 %1993  ;;  %v10364_v41 = vpop.permute.xlu0 %1991 }
 0x46f   :  { %16270 = vst [vmem:[#allocation171_spill] sm:$0xff] %v10362_v16  ;;  %16271 = vst [vmem:[#allocation172_spill] sm:$0xff] %v10364_v41 }
 0x472   :  { %v10366_v19 = vpop.permute.xlu1 %1997  ;;  %v10368_v38 = vpop.permute.xlu0 %1995 }
 0x473   :  { %16272 = vst [vmem:[#allocation173_spill] sm:$0xff] %v10366_v19  ;;  %16273 = vst [vmem:[#allocation174_spill] sm:$0xff] %v10368_v38 }
 0x476   :  { %v10370_v6 = vpop.permute.xlu1 %2001  ;;  %v10372_v5 = vpop.permute.xlu0 %1999 }
 0x477   :  { %16274 = vst [vmem:[#allocation175_spill] sm:$0xff] %v10370_v6  ;;  %16275 = vst [vmem:[#allocation176_spill] sm:$0xff] %v10372_v5 }
 0x47a   :  { %v10374_v3 = vpop.permute.xlu1 %2005  ;;  %v10376_v11 = vpop.permute.xlu0 %2003 }
 0x47b   :  { %16276 = vst [vmem:[#allocation177_spill] sm:$0xff] %v10374_v3  ;;  %16277 = vst [vmem:[#allocation178_spill] sm:$0xff] %v10376_v11 }
 0x47e   :  { %v10378_v20 = vpop.permute.xlu1 %2009  ;;  %v10380_v42 = vpop.permute.xlu0 %2007 }
 0x47f   :  { %16278 = vst [vmem:[#allocation179_spill] sm:$0xff] %v10378_v20  ;;  %16279 = vst [vmem:[#allocation180_spill] sm:$0xff] %v10380_v42 }
 0x482   :  { %v10382_v15 = vpop.permute.xlu1 %2013  ;;  %v10384_v16 = vpop.permute.xlu0 %2011 }
 0x483   :  { %16280 = vst [vmem:[#allocation181_spill] sm:$0xff] %v10382_v15  ;;  %16281 = vst [vmem:[#allocation182_spill] sm:$0xff] %v10384_v16 }
 0x486   :  { %v10386_v41 = vpop.permute.xlu1 %2017  ;;  %v10388_v19 = vpop.permute.xlu0 %2015 }
 0x487   :  { %16282 = vst [vmem:[#allocation183_spill] sm:$0xff] %v10386_v41  ;;  %16283 = vst [vmem:[#allocation184_spill] sm:$0xff] %v10388_v19 }
 0x48a   :  { %v10390_v38 = vpop.permute.xlu1 %2021  ;;  %v10392_v6 = vpop.permute.xlu0 %2019 }
 0x48b   :  { %16284 = vst [vmem:[#allocation185_spill] sm:$0xff] %v10390_v38  ;;  %16285 = vst [vmem:[#allocation186_spill] sm:$0xff] %v10392_v6 }
 0x48e   :  { %v10394_v5 = vpop.permute.xlu1 %2025  ;;  %v10396_v3 = vpop.permute.xlu0 %2023 }
 0x48f   :  { %16286 = vst [vmem:[#allocation187_spill] sm:$0xff] %v10394_v5  ;;  %16287 = vst [vmem:[#allocation188_spill] sm:$0xff] %v10396_v3 }
 0x492   :  { %v10398_v11 = vpop.permute.xlu1 %2029  ;;  %v10400_v20 = vpop.permute.xlu0 %2027 }
 0x493   :  { %16288 = vst [vmem:[#allocation189_spill] sm:$0xff] %v10398_v11  ;;  %16289 = vst [vmem:[#allocation190_spill] sm:$0xff] %v10400_v20 }
 0x496   :  { %v10402_v42 = vpop.permute.xlu1 %2033  ;;  %v10404_v15 = vpop.permute.xlu0 %2031 }
 0x497   :  { %16290 = vst [vmem:[#allocation191_spill] sm:$0xff] %v10402_v42  ;;  %16291 = vst [vmem:[#allocation192_spill] sm:$0xff] %v10404_v15  ;;  %v10425_v15 = vld [vmem:[%s16010_s2 + $0x20] sm:$0xff] }
 0x4a3   :  { %v10406_v16 = vpop.permute.xlu1 %2158  ;;  %v10408_v41 = vpop.permute.xlu0 %2154 }
 0x4a4   :  { %16292 = vst [vmem:[#allocation193_spill] sm:$0xff] %v10406_v16  ;;  %16293 = vst [vmem:[#allocation194_spill] sm:$0xff] %v10408_v41 }
 0x4a7   :  { %v10410_v19 = vpop.permute.xlu1 %2166  ;;  %v10412_v38 = vpop.permute.xlu0 %2162 }
 0x4a8   :  { %16294 = vst [vmem:[#allocation195_spill] sm:$0xff] %v10410_v19  ;;  %16295 = vst [vmem:[#allocation196_spill] sm:$0xff] %v10412_v38  ;;  %v10430_v19 = vld [vmem:[%s16010_s2 + $0x18] sm:$0xff] }
 0x4ab   :  { %v10414_v6 = vpop.permute.xlu1 %2174  ;;  %v10416_v5 = vpop.permute.xlu0 %2170 }
 0x4ac   :  { %16296 = vst [vmem:[#allocation197_spill] sm:$0xff] %v10414_v6  ;;  %16297 = vst [vmem:[#allocation198_spill] sm:$0xff] %v10416_v5 }
 0x4af   :  { %v10418_v3 = vpop.permute.xlu1 %2182  ;;  %v10420_v11 = vpop.permute.xlu0 %2178 }
 0x4b0   :  { %16298 = vst [vmem:[#allocation199_spill] sm:$0xff] %v10418_v3  ;;  %16299 = vst [vmem:[#allocation200_spill] sm:$0xff] %v10420_v11 }
 0x4b3   :  { %v2300_v20 = vpop.permute.xlu0 %2299  ;;  %v2304_v5 = vpop.permute.xlu1 %2303 }
 0x4b4   :  { %v2331_v38 = vmul.f32 %v10425_v15, %v2300_v20  ;;  %v2330_v6 = vmul.f32 %v10430_v19, %v2300_v20  ;;  %v2333_v3 = vmul.f32 %v10425_v15, %v2304_v5  ;;  %v2332_v11 = vmul.f32 %v10430_v19, %v2304_v5 }
 0x4b6   :  { %2396 = vrot.lane.b32.xlu1 %v2331_v38, %s9241_s10  ;;  %2394 = vrot.lane.b32.xlu0 %v2330_v6, %s9241_s10 }
 0x4b7   :  { %v2308_v16 = vpop.permute.xlu0 %2307  ;;  %v2312_v12 = vpop.permute.xlu1 %2311 }
 0x4b8   :  { %v2335_v41 = vmul.f32 %v10425_v15, %v2308_v16  ;;  %v2334_v42 = vmul.f32 %v10430_v19, %v2308_v16  ;;  %v2337_v38 = vmul.f32 %v10425_v15, %v2312_v12  ;;  %v2336_v6 = vmul.f32 %v10430_v19, %v2312_v12 }
 0x4ba   :  { %2400 = vrot.lane.b32.xlu1 %v2333_v3, %s9241_s10  ;;  %2398 = vrot.lane.b32.xlu0 %v2332_v11, %s9241_s10 }
 0x4bb   :  { %v2316_v60 = vpop.permute.xlu0 %2315  ;;  %v2320_v37 = vpop.permute.xlu1 %2319 }
 0x4bc   :  { %v2339_v3 = vmul.f32 %v10425_v15, %v2316_v60  ;;  %v2338_v11 = vmul.f32 %v10430_v19, %v2316_v60 }
 0x4be   :  { %2404 = vrot.lane.b32.xlu1 %v2335_v41, %s9241_s10  ;;  %2402 = vrot.lane.b32.xlu0 %v2334_v42, %s9241_s10  ;;  %v2341_v42 = vmul.f32 %v10425_v15, %v2320_v37  ;;  %v2340_v41 = vmul.f32 %v10430_v19, %v2320_v37 }
 0x4bf   :  { %v2324_v24 = vpop.permute.xlu0 %2323  ;;  %v2328_v4 = vpop.permute.xlu1 %2327 }
 0x4c2   :  { %2408 = vrot.lane.b32.xlu1 %v2337_v38, %s9241_s10  ;;  %2406 = vrot.lane.b32.xlu0 %v2336_v6, %s9241_s10  ;;  %v2343_v38 = vmul.f32 %v10425_v15, %v2324_v24  ;;  %v2342_v6 = vmul.f32 %v10430_v19, %v2324_v24 }
 0x4c6   :  { %2412 = vrot.lane.b32.xlu1 %v2339_v3, %s9241_s10  ;;  %2410 = vrot.lane.b32.xlu0 %v2338_v11, %s9241_s10  ;;  %v2345_v3 = vmul.f32 %v10425_v15, %v2328_v4  ;;  %v2344_v11 = vmul.f32 %v10430_v19, %v2328_v4 }
 0x4ca   :  { %2416 = vrot.lane.b32.xlu1 %v2341_v42, %s9241_s10  ;;  %2414 = vrot.lane.b32.xlu0 %v2340_v41, %s9241_s10  ;;  %v10467_v42 = vld [vmem:[%s16010_s2 + $0x80] sm:$0xff]  ;;  %v10472_v41 = vld [vmem:[%s16010_s2 + $0x78] sm:$0xff] }
 0x4cb   :  { %v2351_v59 = vmul.f32 %v10467_v42, %v2308_v16  ;;  %v2350_v23 = vmul.f32 %v10472_v41, %v2308_v16  ;;  %v2358_v16 = vmul.f32 %v10472_v41, %v2324_v24 }
 0x4ce   :  { %2420 = vrot.lane.b32.xlu1 %v2343_v38, %s9241_s10  ;;  %2418 = vrot.lane.b32.xlu0 %v2342_v6, %s9241_s10  ;;  %v2347_v38 = vmul.f32 %v10467_v42, %v2300_v20  ;;  %v2346_v6 = vmul.f32 %v10472_v41, %v2300_v20  ;;  %v2353_v20 = vmul.f32 %v10467_v42, %v2312_v12 }
 0x4d2   :  { %2424 = vrot.lane.b32.xlu1 %v2345_v3, %s9241_s10  ;;  %2422 = vrot.lane.b32.xlu0 %v2344_v11, %s9241_s10  ;;  %v2349_v3 = vmul.f32 %v10467_v42, %v2304_v5  ;;  %v2348_v11 = vmul.f32 %v10472_v41, %v2304_v5  ;;  %v2355_v5 = vmul.f32 %v10467_v42, %v2316_v60 }
 0x4d6   :  { %2428 = vrot.lane.b32.xlu1 %v2347_v38, %s9241_s10  ;;  %2426 = vrot.lane.b32.xlu0 %v2346_v6, %s9241_s10  ;;  %v2352_v38 = vmul.f32 %v10472_v41, %v2312_v12  ;;  %v2354_v6 = vmul.f32 %v10472_v41, %v2316_v60  ;;  %v2359_v12 = vmul.f32 %v10467_v42, %v2324_v24  ;;  %v8730_v24 = vld [vmem:[%s16008_s0 + $0x58] ss:$0 sm:$0xff] }
 0x4d7   :  { %v2361_v60 = vmul.f32 %v10467_v42, %v2328_v4 }
 0x4da   :  { %2432 = vrot.lane.b32.xlu1 %v2349_v3, %s9241_s10  ;;  %2430 = vrot.lane.b32.xlu0 %v2348_v11, %s9241_s10  ;;  %v2360_v3 = vmul.f32 %v10472_v41, %v2328_v4  ;;  %v8733_v11 = vld [vmem:[%s16008_s0 + $0x5b] ss:$0 sm:$0xff]  ;;  %v8732_v4 = vld [vmem:[%s16008_s0 + $0x5a] ss:$0 sm:$0xff] }
 0x4de   :  { %2436 = vrot.lane.b32.xlu1 %v2351_v59, %s9241_s10  ;;  %2434 = vrot.lane.b32.xlu0 %v2350_v23, %s9241_s10  ;;  %v2357_v59 = vmul.f32 %v10467_v42, %v2320_v37  ;;  %v2356_v23 = vmul.f32 %v10472_v41, %v2320_v37  ;;  %v8731_v37 = vld [vmem:[%s16008_s0 + $0x59] ss:$0 sm:$0xff] }
 0x4e2   :  { %2440 = vrot.lane.b32.xlu1 %v2353_v20, %s9241_s10  ;;  %2438 = vrot.lane.b32.xlu0 %v2352_v38, %s9241_s10  ;;  %v8735_v20 = vld [vmem:[%s16008_s0 + $0x5d] ss:$0 sm:$0xff]  ;;  %v8734_v38 = vld [vmem:[%s16008_s0 + $0x5c] ss:$0 sm:$0xff] }
 0x4e6   :  { %2444 = vrot.lane.b32.xlu1 %v2355_v5, %s9241_s10  ;;  %2442 = vrot.lane.b32.xlu0 %v2354_v6, %s9241_s10  ;;  %v8737_v5 = vld [vmem:[%s16008_s0 + $0x5f] ss:$0 sm:$0xff]  ;;  %v8736_v6 = vld [vmem:[%s16008_s0 + $0x5e] ss:$0 sm:$0xff] }
 0x4ea   :  { %2448 = vrot.lane.b32.xlu1 %v2357_v59, %s9241_s10  ;;  %2446 = vrot.lane.b32.xlu0 %v2356_v23, %s9241_s10 }
 0x4ee   :  { %2452 = vrot.lane.b32.xlu1 %v2359_v12, %s9241_s10  ;;  %2450 = vrot.lane.b32.xlu0 %v2358_v16, %s9241_s10 }
 0x4f2   :  { %2456 = vrot.lane.b32.xlu1 %v2361_v60, %s9241_s10  ;;  %2454 = vrot.lane.b32.xlu0 %v2360_v3, %s9241_s10 }
 0x4f6   :  { %2576 = vperm.xlu1 %9169, %v8731_v37   ;;  %2572 = vperm.xlu0 %9168, %v8730_v24  }
 0x4fa   :  { %2584 = vperm.xlu1 %9169, %v8733_v11   ;;  %2580 = vperm.xlu0 %9168, %v8732_v4  }
 0x4fe   :  { %2592 = vperm.xlu1 %9169, %v8735_v20   ;;  %2588 = vperm.xlu0 %9168, %v8734_v38  }
 0x502   :  { %2600 = vperm.xlu1 %9169, %v8737_v5   ;;  %2596 = vperm.xlu0 %9168, %v8736_v6  }
 0x528   :  { %v10530_v59 = vpop.permute.xlu1 %2396  ;;  %v10532_v23 = vpop.permute.xlu0 %2394 }
 0x529   :  { %16300 = vst [vmem:[#allocation201_spill] sm:$0xff] %v10530_v59  ;;  %16301 = vst [vmem:[#allocation202_spill] sm:$0xff] %v10532_v23 }
 0x52c   :  { %v10534_v12 = vpop.permute.xlu1 %2400  ;;  %v10536_v16 = vpop.permute.xlu0 %2398 }
 0x52d   :  { %16302 = vst [vmem:[#allocation203_spill] sm:$0xff] %v10534_v12  ;;  %16303 = vst [vmem:[#allocation204_spill] sm:$0xff] %v10536_v16 }
 0x530   :  { %v10538_v60 = vpop.permute.xlu1 %2404  ;;  %v10540_v3 = vpop.permute.xlu0 %2402 }
 0x531   :  { %16304 = vst [vmem:[#allocation205_spill] sm:$0xff] %v10538_v60  ;;  %16305 = vst [vmem:[#allocation206_spill] sm:$0xff] %v10540_v3 }
 0x534   :  { %v10542_v37 = vpop.permute.xlu1 %2408  ;;  %v10544_v24 = vpop.permute.xlu0 %2406 }
 0x535   :  { %16306 = vst [vmem:[#allocation207_spill] sm:$0xff] %v10542_v37  ;;  %16307 = vst [vmem:[#allocation208_spill] sm:$0xff] %v10544_v24 }
 0x538   :  { %v10546_v11 = vpop.permute.xlu1 %2412  ;;  %v10548_v4 = vpop.permute.xlu0 %2410 }
 0x539   :  { %16308 = vst [vmem:[#allocation209_spill] sm:$0xff] %v10546_v11  ;;  %16309 = vst [vmem:[#allocation210_spill] sm:$0xff] %v10548_v4 }
 0x53c   :  { %v10550_v20 = vpop.permute.xlu1 %2416  ;;  %v10552_v38 = vpop.permute.xlu0 %2414 }
 0x53d   :  { %16310 = vst [vmem:[#allocation211_spill] sm:$0xff] %v10550_v20  ;;  %16311 = vst [vmem:[#allocation212_spill] sm:$0xff] %v10552_v38 }
 0x540   :  { %v10554_v5 = vpop.permute.xlu1 %2420  ;;  %v10556_v6 = vpop.permute.xlu0 %2418 }
 0x541   :  { %16312 = vst [vmem:[#allocation213_spill] sm:$0xff] %v10554_v5  ;;  %16313 = vst [vmem:[#allocation214_spill] sm:$0xff] %v10556_v6 }
 0x544   :  { %v10558_v16 = vpop.permute.xlu1 %2424  ;;  %v10560_v60 = vpop.permute.xlu0 %2422 }
 0x545   :  { %16314 = vst [vmem:[#allocation215_spill] sm:$0xff] %v10558_v16  ;;  %16315 = vst [vmem:[#allocation216_spill] sm:$0xff] %v10560_v60 }
 0x548   :  { %v10562_v3 = vpop.permute.xlu1 %2428  ;;  %v10564_v37 = vpop.permute.xlu0 %2426 }
 0x549   :  { %16316 = vst [vmem:[#allocation217_spill] sm:$0xff] %v10562_v3  ;;  %16317 = vst [vmem:[#allocation218_spill] sm:$0xff] %v10564_v37 }
 0x54c   :  { %v10566_v24 = vpop.permute.xlu1 %2432  ;;  %v10568_v11 = vpop.permute.xlu0 %2430 }
 0x54d   :  { %16318 = vst [vmem:[#allocation219_spill] sm:$0xff] %v10566_v24  ;;  %16319 = vst [vmem:[#allocation220_spill] sm:$0xff] %v10568_v11 }
 0x550   :  { %v10570_v4 = vpop.permute.xlu0 %2434  ;;  %v10572_v20 = vpop.permute.xlu1 %2436 }
 0x551   :  { %16320 = vst [vmem:[#allocation221_spill] sm:$0xff] %v10570_v4  ;;  %16321 = vst [vmem:[#allocation222_spill] sm:$0xff] %v10572_v20 }
 0x554   :  { %v10574_v38 = vpop.permute.xlu0 %2438  ;;  %v10576_v5 = vpop.permute.xlu1 %2440 }
 0x555   :  { %16322 = vst [vmem:[#allocation223_spill] sm:$0xff] %v10574_v38  ;;  %16323 = vst [vmem:[#allocation224_spill] sm:$0xff] %v10576_v5 }
 0x558   :  { %v10578_v6 = vpop.permute.xlu0 %2442  ;;  %v10580_v16 = vpop.permute.xlu1 %2444 }
 0x559   :  { %16324 = vst [vmem:[#allocation225_spill] sm:$0xff] %v10578_v6  ;;  %16325 = vst [vmem:[#allocation226_spill] sm:$0xff] %v10580_v16 }
 0x55c   :  { %v10582_v60 = vpop.permute.xlu0 %2446  ;;  %v10584_v3 = vpop.permute.xlu1 %2448 }
 0x55d   :  { %16326 = vst [vmem:[#allocation227_spill] sm:$0xff] %v10582_v60  ;;  %16327 = vst [vmem:[#allocation228_spill] sm:$0xff] %v10584_v3 }
 0x560   :  { %v10586_v37 = vpop.permute.xlu0 %2450  ;;  %v10588_v24 = vpop.permute.xlu1 %2452 }
 0x561   :  { %16328 = vst [vmem:[#allocation229_spill] sm:$0xff] %v10586_v37  ;;  %16329 = vst [vmem:[#allocation230_spill] sm:$0xff] %v10588_v24 }
 0x564   :  { %v10590_v11 = vpop.permute.xlu0 %2454  ;;  %v10592_v4 = vpop.permute.xlu1 %2456 }
 0x565   :  { %16330 = vst [vmem:[#allocation231_spill] sm:$0xff] %v10590_v11  ;;  %16331 = vst [vmem:[#allocation232_spill] sm:$0xff] %v10592_v4 }
 0x571   :  { %v2573_v20 = vpop.permute.xlu0 %2572  ;;  %v2577_v6 = vpop.permute.xlu1 %2576 }
 0x572   :  { %v2604_v38 = vmul.f32 %v10425_v15, %v2573_v20  ;;  %v2603_v5 = vmul.f32 %v10430_v19, %v2573_v20  ;;  %v2606_v60 = vmul.f32 %v10425_v15, %v2577_v6  ;;  %v2605_v37 = vmul.f32 %v10430_v19, %v2577_v6 }
 0x574   :  { %2669 = vrot.lane.b32.xlu1 %v2604_v38, %s9242_s15  ;;  %2667 = vrot.lane.b32.xlu0 %v2603_v5, %s9242_s15 }
 0x575   :  { %v2581_v3 = vpop.permute.xlu0 %2580  ;;  %v2585_v24 = vpop.permute.xlu1 %2584 }
 0x576   :  { %v2608_v11 = vmul.f32 %v10425_v15, %v2581_v3  ;;  %v2607_v4 = vmul.f32 %v10430_v19, %v2581_v3  ;;  %v2610_v38 = vmul.f32 %v10425_v15, %v2585_v24  ;;  %v2609_v5 = vmul.f32 %v10430_v19, %v2585_v24 }
 0x578   :  { %2673 = vrot.lane.b32.xlu1 %v2606_v60, %s9242_s15  ;;  %2671 = vrot.lane.b32.xlu0 %v2605_v37, %s9242_s15 }
 0x579   :  { %v2589_v16 = vpop.permute.xlu0 %2588  ;;  %v2593_v12 = vpop.permute.xlu1 %2592 }
 0x57a   :  { %v2612_v60 = vmul.f32 %v10425_v15, %v2589_v16  ;;  %v2611_v37 = vmul.f32 %v10430_v19, %v2589_v16 }
 0x57c   :  { %2677 = vrot.lane.b32.xlu1 %v2608_v11, %s9242_s15  ;;  %2675 = vrot.lane.b32.xlu0 %v2607_v4, %s9242_s15  ;;  %v2614_v11 = vmul.f32 %v10425_v15, %v2593_v12  ;;  %v2613_v4 = vmul.f32 %v10430_v19, %v2593_v12 }
 0x57d   :  { %v2597_v23 = vpop.permute.xlu0 %2596  ;;  %v2601_v59 = vpop.permute.xlu1 %2600 }
 0x580   :  { %2681 = vrot.lane.b32.xlu1 %v2610_v38, %s9242_s15  ;;  %2679 = vrot.lane.b32.xlu0 %v2609_v5, %s9242_s15  ;;  %v2616_v38 = vmul.f32 %v10425_v15, %v2597_v23  ;;  %v2615_v5 = vmul.f32 %v10430_v19, %v2597_v23 }
 0x584   :  { %2685 = vrot.lane.b32.xlu1 %v2612_v60, %s9242_s15  ;;  %2683 = vrot.lane.b32.xlu0 %v2611_v37, %s9242_s15  ;;  %v2618_v60 = vmul.f32 %v10425_v15, %v2601_v59  ;;  %v2617_v37 = vmul.f32 %v10430_v19, %v2601_v59  ;;  %v2624_v15 = vmul.f32 %v10467_v42, %v2581_v3 }
 0x585   :  { %v2623_v19 = vmul.f32 %v10472_v41, %v2581_v3  ;;  %v2630_v3 = vmul.f32 %v10467_v42, %v2593_v12 }
 0x588   :  { %2689 = vrot.lane.b32.xlu1 %v2614_v11, %s9242_s15  ;;  %2687 = vrot.lane.b32.xlu0 %v2613_v4, %s9242_s15  ;;  %v2620_v11 = vmul.f32 %v10467_v42, %v2573_v20  ;;  %v2619_v4 = vmul.f32 %v10472_v41, %v2573_v20  ;;  %v2626_v20 = vmul.f32 %v10467_v42, %v2585_v24 }
 0x58c   :  { %2693 = vrot.lane.b32.xlu1 %v2616_v38, %s9242_s15  ;;  %2691 = vrot.lane.b32.xlu0 %v2615_v5, %s9242_s15  ;;  %v2622_v38 = vmul.f32 %v10467_v42, %v2577_v6  ;;  %v2621_v5 = vmul.f32 %v10472_v41, %v2577_v6  ;;  %v2628_v6 = vmul.f32 %v10467_v42, %v2589_v16 }
 0x590   :  { %2697 = vrot.lane.b32.xlu1 %v2618_v60, %s9242_s15  ;;  %2695 = vrot.lane.b32.xlu0 %v2617_v37, %s9242_s15  ;;  %v2625_v60 = vmul.f32 %v10472_v41, %v2585_v24  ;;  %v2627_v37 = vmul.f32 %v10472_v41, %v2589_v16  ;;  %v2632_v24 = vmul.f32 %v10467_v42, %v2597_v23 }
 0x591   :  { %v2634_v16 = vmul.f32 %v10467_v42, %v2601_v59  ;;  %v8753_v42 = vld [vmem:[%s16008_s0 + $0x63] ss:$0 sm:$0xff] }
 0x594   :  { %2701 = vrot.lane.b32.xlu1 %v2620_v11, %s9242_s15  ;;  %2699 = vrot.lane.b32.xlu0 %v2619_v4, %s9242_s15  ;;  %v2629_v11 = vmul.f32 %v10472_v41, %v2593_v12  ;;  %v2631_v4 = vmul.f32 %v10472_v41, %v2597_v23  ;;  %v8751_v12 = vld [vmem:[%s16008_s0 + $0x61] ss:$0 sm:$0xff]  ;;  %v8750_v23 = vld [vmem:[%s16008_s0 + $0x60] ss:$0 sm:$0xff] }
 0x598   :  { %2705 = vrot.lane.b32.xlu1 %v2622_v38, %s9242_s15  ;;  %2703 = vrot.lane.b32.xlu0 %v2621_v5, %s9242_s15  ;;  %v2633_v38 = vmul.f32 %v10472_v41, %v2601_v59  ;;  %v8752_v41 = vld [vmem:[%s16008_s0 + $0x62] ss:$0 sm:$0xff]  ;;  %v8755_v59 = vld [vmem:[%s16008_s0 + $0x65] ss:$0 sm:$0xff] }
 0x599   :  { %v8754_v5 = vld [vmem:[%s16008_s0 + $0x64] ss:$0 sm:$0xff] }
 0x59c   :  { %2709 = vrot.lane.b32.xlu1 %v2624_v15, %s9242_s15  ;;  %2707 = vrot.lane.b32.xlu0 %v2623_v19, %s9242_s15  ;;  %v8757_v15 = vld [vmem:[%s16008_s0 + $0x67] ss:$0 sm:$0xff]  ;;  %v8756_v19 = vld [vmem:[%s16008_s0 + $0x66] ss:$0 sm:$0xff] }
 0x5a0   :  { %2713 = vrot.lane.b32.xlu1 %v2626_v20, %s9242_s15  ;;  %2711 = vrot.lane.b32.xlu0 %v2625_v60, %s9242_s15  ;;  %v8767_v20 = vld [vmem:[%s16008_s0 + $0x69] ss:$0 sm:$0xff]  ;;  %v8766_v60 = vld [vmem:[%s16008_s0 + $0x68] ss:$0 sm:$0xff] }
 0x5a4   :  { %2717 = vrot.lane.b32.xlu1 %v2628_v6, %s9242_s15  ;;  %2715 = vrot.lane.b32.xlu0 %v2627_v37, %s9242_s15  ;;  %v8769_v6 = vld [vmem:[%s16008_s0 + $0x6b] ss:$0 sm:$0xff]  ;;  %v8768_v37 = vld [vmem:[%s16008_s0 + $0x6a] ss:$0 sm:$0xff] }
 0x5a8   :  { %2721 = vrot.lane.b32.xlu1 %v2630_v3, %s9242_s15  ;;  %2719 = vrot.lane.b32.xlu0 %v2629_v11, %s9242_s15  ;;  %v8771_v3 = vld [vmem:[%s16008_s0 + $0x6d] ss:$0 sm:$0xff]  ;;  %v8770_v11 = vld [vmem:[%s16008_s0 + $0x6c] ss:$0 sm:$0xff] }
 0x5ac   :  { %2725 = vrot.lane.b32.xlu1 %v2632_v24, %s9242_s15  ;;  %2723 = vrot.lane.b32.xlu0 %v2631_v4, %s9242_s15  ;;  %v8773_v24 = vld [vmem:[%s16008_s0 + $0x6f] ss:$0 sm:$0xff]  ;;  %v8772_v4 = vld [vmem:[%s16008_s0 + $0x6e] ss:$0 sm:$0xff] }
 0x5b0   :  { %2729 = vrot.lane.b32.xlu1 %v2634_v16, %s9242_s15  ;;  %2727 = vrot.lane.b32.xlu0 %v2633_v38, %s9242_s15 }
 0x5b4   :  { %2853 = vperm.xlu1 %9169, %v8751_v12   ;;  %2849 = vperm.xlu0 %9168, %v8750_v23  }
 0x5b8   :  { %2861 = vperm.xlu1 %9169, %v8753_v42   ;;  %2857 = vperm.xlu0 %9168, %v8752_v41  }
 0x5bc   :  { %2869 = vperm.xlu1 %9169, %v8755_v59   ;;  %2865 = vperm.xlu0 %9168, %v8754_v5  }
 0x5c0   :  { %2877 = vperm.xlu1 %9169, %v8757_v15   ;;  %2873 = vperm.xlu0 %9168, %v8756_v19  }
 0x5c4   :  { %2998 = vperm.xlu1 %9169, %v8767_v20   ;;  %2994 = vperm.xlu0 %9168, %v8766_v60  }
 0x5c8   :  { %3006 = vperm.xlu1 %9169, %v8769_v6   ;;  %3002 = vperm.xlu0 %9168, %v8768_v37  }
 0x5cc   :  { %3014 = vperm.xlu1 %9169, %v8771_v3   ;;  %3010 = vperm.xlu0 %9168, %v8770_v11  }
 0x5d0   :  { %3022 = vperm.xlu1 %9169, %v8773_v24   ;;  %3018 = vperm.xlu0 %9168, %v8772_v4  }
 0x5e6   :  { %v10706_v16 = vpop.permute.xlu1 %2669  ;;  %v10708_v38 = vpop.permute.xlu0 %2667 }
 0x5e7   :  { %16332 = vst [vmem:[#allocation233_spill] sm:$0xff] %v10706_v16  ;;  %16333 = vst [vmem:[#allocation234_spill] sm:$0xff] %v10708_v38 }
 0x5ea   :  { %v10710_v12 = vpop.permute.xlu1 %2673  ;;  %v10712_v23 = vpop.permute.xlu0 %2671 }
 0x5eb   :  { %16334 = vst [vmem:[#allocation235_spill] sm:$0xff] %v10710_v12  ;;  %16335 = vst [vmem:[#allocation236_spill] sm:$0xff] %v10712_v23 }
 0x5ee   :  { %v10714_v42 = vpop.permute.xlu1 %2677  ;;  %v10716_v41 = vpop.permute.xlu0 %2675 }
 0x5ef   :  { %16336 = vst [vmem:[#allocation237_spill] sm:$0xff] %v10714_v42  ;;  %16337 = vst [vmem:[#allocation238_spill] sm:$0xff] %v10716_v41 }
 0x5f2   :  { %v10718_v59 = vpop.permute.xlu1 %2681  ;;  %v10720_v5 = vpop.permute.xlu0 %2679 }
 0x5f3   :  { %16338 = vst [vmem:[#allocation239_spill] sm:$0xff] %v10718_v59  ;;  %16339 = vst [vmem:[#allocation240_spill] sm:$0xff] %v10720_v5 }
 0x5f6   :  { %v10722_v15 = vpop.permute.xlu1 %2685  ;;  %v10724_v19 = vpop.permute.xlu0 %2683 }
 0x5f7   :  { %16340 = vst [vmem:[#allocation241_spill] sm:$0xff] %v10722_v15  ;;  %16341 = vst [vmem:[#allocation242_spill] sm:$0xff] %v10724_v19 }
 0x5fa   :  { %v10726_v20 = vpop.permute.xlu1 %2689  ;;  %v10728_v60 = vpop.permute.xlu0 %2687 }
 0x5fb   :  { %16342 = vst [vmem:[#allocation243_spill] sm:$0xff] %v10726_v20  ;;  %16343 = vst [vmem:[#allocation244_spill] sm:$0xff] %v10728_v60 }
 0x5fe   :  { %v10730_v6 = vpop.permute.xlu1 %2693  ;;  %v10732_v37 = vpop.permute.xlu0 %2691 }
 0x5ff   :  { %16344 = vst [vmem:[#allocation245_spill] sm:$0xff] %v10730_v6  ;;  %16345 = vst [vmem:[#allocation246_spill] sm:$0xff] %v10732_v37 }
 0x602   :  { %v10734_v3 = vpop.permute.xlu1 %2697  ;;  %v10736_v11 = vpop.permute.xlu0 %2695 }
 0x603   :  { %16346 = vst [vmem:[#allocation247_spill] sm:$0xff] %v10734_v3  ;;  %16347 = vst [vmem:[#allocation248_spill] sm:$0xff] %v10736_v11 }
 0x606   :  { %v10738_v24 = vpop.permute.xlu1 %2701  ;;  %v10740_v4 = vpop.permute.xlu0 %2699 }
 0x607   :  { %16348 = vst [vmem:[#allocation249_spill] sm:$0xff] %v10738_v24  ;;  %16349 = vst [vmem:[#allocation250_spill] sm:$0xff] %v10740_v4 }
 0x60a   :  { %v10742_v5 = vpop.permute.xlu1 %2705  ;;  %v10744_v15 = vpop.permute.xlu0 %2703 }
 0x60b   :  { %16350 = vst [vmem:[#allocation251_spill] sm:$0xff] %v10742_v5  ;;  %16351 = vst [vmem:[#allocation252_spill] sm:$0xff] %v10744_v15 }
 0x60e   :  { %v10746_v19 = vpop.permute.xlu1 %2709  ;;  %v10748_v20 = vpop.permute.xlu0 %2707 }
 0x60f   :  { %16352 = vst [vmem:[#allocation253_spill] sm:$0xff] %v10746_v19  ;;  %16353 = vst [vmem:[#allocation254_spill] sm:$0xff] %v10748_v20 }
 0x612   :  { %v10750_v60 = vpop.permute.xlu1 %2713  ;;  %v10752_v6 = vpop.permute.xlu0 %2711 }
 0x613   :  { %16354 = vst [vmem:[#allocation255_spill] sm:$0xff] %v10750_v60  ;;  %16355 = vst [vmem:[#allocation256_spill] sm:$0xff] %v10752_v6 }
 0x616   :  { %v10754_v37 = vpop.permute.xlu1 %2717  ;;  %v10756_v3 = vpop.permute.xlu0 %2715 }
 0x617   :  { %16356 = vst [vmem:[#allocation257_spill] sm:$0xff] %v10754_v37  ;;  %16357 = vst [vmem:[#allocation258_spill] sm:$0xff] %v10756_v3 }
 0x61a   :  { %v10758_v11 = vpop.permute.xlu1 %2721  ;;  %v10760_v24 = vpop.permute.xlu0 %2719 }
 0x61b   :  { %16358 = vst [vmem:[#allocation259_spill] sm:$0xff] %v10758_v11  ;;  %16359 = vst [vmem:[#allocation260_spill] sm:$0xff] %v10760_v24 }
 0x61e   :  { %v10762_v4 = vpop.permute.xlu1 %2725  ;;  %v10764_v5 = vpop.permute.xlu0 %2723 }
 0x61f   :  { %16360 = vst [vmem:[#allocation261_spill] sm:$0xff] %v10762_v4  ;;  %16361 = vst [vmem:[#allocation262_spill] sm:$0xff] %v10764_v5 }
 0x622   :  { %v10766_v15 = vpop.permute.xlu1 %2729  ;;  %v10768_v19 = vpop.permute.xlu0 %2727 }
 0x623   :  { %16362 = vst [vmem:[#allocation263_spill] sm:$0xff] %v10766_v15  ;;  %16363 = vst [vmem:[#allocation264_spill] sm:$0xff] %v10768_v19  ;;  %v10789_v19 = vld [vmem:[%s16010_s2 + $0x21] sm:$0xff] }
 0x62f   :  { %v10770_v20 = vpop.permute.xlu1 %2853  ;;  %v10772_v60 = vpop.permute.xlu0 %2849 }
 0x630   :  { %16364 = vst [vmem:[#allocation265_spill] sm:$0xff] %v10770_v20  ;;  %16365 = vst [vmem:[#allocation266_spill] sm:$0xff] %v10772_v60 }
 0x633   :  { %v10774_v6 = vpop.permute.xlu1 %2861  ;;  %v10776_v37 = vpop.permute.xlu0 %2857 }
 0x634   :  { %16366 = vst [vmem:[#allocation267_spill] sm:$0xff] %v10774_v6  ;;  %16367 = vst [vmem:[#allocation268_spill] sm:$0xff] %v10776_v37  ;;  %v10794_v6 = vld [vmem:[%s16010_s2 + $0x19] sm:$0xff] }
 0x637   :  { %v10778_v3 = vpop.permute.xlu1 %2869  ;;  %v10780_v11 = vpop.permute.xlu0 %2865 }
 0x638   :  { %16368 = vst [vmem:[#allocation269_spill] sm:$0xff] %v10778_v3  ;;  %16369 = vst [vmem:[#allocation270_spill] sm:$0xff] %v10780_v11 }
 0x63b   :  { %v10782_v24 = vpop.permute.xlu1 %2877  ;;  %v10784_v4 = vpop.permute.xlu0 %2873 }
 0x63c   :  { %16370 = vst [vmem:[#allocation271_spill] sm:$0xff] %v10782_v24  ;;  %16371 = vst [vmem:[#allocation272_spill] sm:$0xff] %v10784_v4 }
 0x63f   :  { %v2995_v5 = vpop.permute.xlu0 %2994  ;;  %v2999_v11 = vpop.permute.xlu1 %2998 }
 0x640   :  { %v3026_v37 = vmul.f32 %v10789_v19, %v2995_v5  ;;  %v3025_v3 = vmul.f32 %v10794_v6, %v2995_v5  ;;  %v3028_v24 = vmul.f32 %v10789_v19, %v2999_v11  ;;  %v3027_v4 = vmul.f32 %v10794_v6, %v2999_v11 }
 0x642   :  { %3091 = vrot.lane.b32.xlu1 %v3026_v37, %s9241_s10  ;;  %3089 = vrot.lane.b32.xlu0 %v3025_v3, %s9241_s10 }
 0x643   :  { %v3003_v20 = vpop.permute.xlu0 %3002  ;;  %v3007_v59 = vpop.permute.xlu1 %3006 }
 0x644   :  { %v3030_v60 = vmul.f32 %v10789_v19, %v3003_v20  ;;  %v3029_v15 = vmul.f32 %v10794_v6, %v3003_v20  ;;  %v3032_v37 = vmul.f32 %v10789_v19, %v3007_v59  ;;  %v3031_v3 = vmul.f32 %v10794_v6, %v3007_v59 }
 0x646   :  { %3095 = vrot.lane.b32.xlu1 %v3028_v24, %s9241_s10  ;;  %3093 = vrot.lane.b32.xlu0 %v3027_v4, %s9241_s10 }
 0x647   :  { %v3011_v41 = vpop.permute.xlu0 %3010  ;;  %v3015_v42 = vpop.permute.xlu1 %3014 }
 0x648   :  { %v3034_v24 = vmul.f32 %v10789_v19, %v3011_v41  ;;  %v3033_v4 = vmul.f32 %v10794_v6, %v3011_v41 }
 0x64a   :  { %3099 = vrot.lane.b32.xlu1 %v3030_v60, %s9241_s10  ;;  %3097 = vrot.lane.b32.xlu0 %v3029_v15, %s9241_s10  ;;  %v3036_v15 = vmul.f32 %v10789_v19, %v3015_v42  ;;  %v3035_v60 = vmul.f32 %v10794_v6, %v3015_v42 }
 0x64b   :  { %v3019_v23 = vpop.permute.xlu0 %3018  ;;  %v3023_v12 = vpop.permute.xlu1 %3022 }
 0x64e   :  { %3103 = vrot.lane.b32.xlu1 %v3032_v37, %s9241_s10  ;;  %3101 = vrot.lane.b32.xlu0 %v3031_v3, %s9241_s10  ;;  %v3038_v37 = vmul.f32 %v10789_v19, %v3019_v23  ;;  %v3037_v3 = vmul.f32 %v10794_v6, %v3019_v23 }
 0x652   :  { %3107 = vrot.lane.b32.xlu1 %v3034_v24, %s9241_s10  ;;  %3105 = vrot.lane.b32.xlu0 %v3033_v4, %s9241_s10  ;;  %v3040_v24 = vmul.f32 %v10789_v19, %v3023_v12  ;;  %v3039_v4 = vmul.f32 %v10794_v6, %v3023_v12 }
 0x656   :  { %3111 = vrot.lane.b32.xlu1 %v3036_v15, %s9241_s10  ;;  %3109 = vrot.lane.b32.xlu0 %v3035_v60, %s9241_s10  ;;  %v10831_v15 = vld [vmem:[%s16010_s2 + $0x81] sm:$0xff]  ;;  %v10836_v60 = vld [vmem:[%s16010_s2 + $0x79] sm:$0xff] }
 0x657   :  { %v3046_v38 = vmul.f32 %v10831_v15, %v3003_v20  ;;  %v3045_v16 = vmul.f32 %v10836_v60, %v3003_v20  ;;  %v3053_v20 = vmul.f32 %v10836_v60, %v3019_v23 }
 0x65a   :  { %3115 = vrot.lane.b32.xlu1 %v3038_v37, %s9241_s10  ;;  %3113 = vrot.lane.b32.xlu0 %v3037_v3, %s9241_s10  ;;  %v3042_v37 = vmul.f32 %v10831_v15, %v2995_v5  ;;  %v3041_v3 = vmul.f32 %v10836_v60, %v2995_v5  ;;  %v3048_v5 = vmul.f32 %v10831_v15, %v3007_v59 }
 0x65e   :  { %3119 = vrot.lane.b32.xlu1 %v3040_v24, %s9241_s10  ;;  %3117 = vrot.lane.b32.xlu0 %v3039_v4, %s9241_s10  ;;  %v3044_v24 = vmul.f32 %v10831_v15, %v2999_v11  ;;  %v3043_v4 = vmul.f32 %v10836_v60, %v2999_v11  ;;  %v3050_v11 = vmul.f32 %v10831_v15, %v3011_v41 }
 0x662   :  { %3123 = vrot.lane.b32.xlu1 %v3042_v37, %s9241_s10  ;;  %3121 = vrot.lane.b32.xlu0 %v3041_v3, %s9241_s10  ;;  %v3047_v37 = vmul.f32 %v10836_v60, %v3007_v59  ;;  %v3049_v3 = vmul.f32 %v10836_v60, %v3011_v41  ;;  %v3054_v59 = vmul.f32 %v10831_v15, %v3019_v23  ;;  %v8782_v23 = vld [vmem:[%s16008_s0 + $0x70] ss:$0 sm:$0xff] }
 0x663   :  { %v3056_v41 = vmul.f32 %v10831_v15, %v3023_v12 }
 0x666   :  { %3127 = vrot.lane.b32.xlu1 %v3044_v24, %s9241_s10  ;;  %3125 = vrot.lane.b32.xlu0 %v3043_v4, %s9241_s10  ;;  %v3055_v24 = vmul.f32 %v10836_v60, %v3023_v12  ;;  %v8785_v4 = vld [vmem:[%s16008_s0 + $0x73] ss:$0 sm:$0xff]  ;;  %v8784_v12 = vld [vmem:[%s16008_s0 + $0x72] ss:$0 sm:$0xff] }
 0x66a   :  { %3131 = vrot.lane.b32.xlu1 %v3046_v38, %s9241_s10  ;;  %3129 = vrot.lane.b32.xlu0 %v3045_v16, %s9241_s10  ;;  %v3052_v38 = vmul.f32 %v10831_v15, %v3015_v42  ;;  %v3051_v16 = vmul.f32 %v10836_v60, %v3015_v42  ;;  %v8783_v42 = vld [vmem:[%s16008_s0 + $0x71] ss:$0 sm:$0xff] }
 0x66e   :  { %3135 = vrot.lane.b32.xlu1 %v3048_v5, %s9241_s10  ;;  %3133 = vrot.lane.b32.xlu0 %v3047_v37, %s9241_s10  ;;  %v8787_v5 = vld [vmem:[%s16008_s0 + $0x75] ss:$0 sm:$0xff]  ;;  %v8786_v37 = vld [vmem:[%s16008_s0 + $0x74] ss:$0 sm:$0xff] }
 0x672   :  { %3139 = vrot.lane.b32.xlu1 %v3050_v11, %s9241_s10  ;;  %3137 = vrot.lane.b32.xlu0 %v3049_v3, %s9241_s10  ;;  %v8789_v11 = vld [vmem:[%s16008_s0 + $0x77] ss:$0 sm:$0xff]  ;;  %v8788_v3 = vld [vmem:[%s16008_s0 + $0x76] ss:$0 sm:$0xff] }
 0x676   :  { %3143 = vrot.lane.b32.xlu1 %v3052_v38, %s9241_s10  ;;  %3141 = vrot.lane.b32.xlu0 %v3051_v16, %s9241_s10 }
 0x67a   :  { %3147 = vrot.lane.b32.xlu1 %v3054_v59, %s9241_s10  ;;  %3145 = vrot.lane.b32.xlu0 %v3053_v20, %s9241_s10 }
 0x67e   :  { %3151 = vrot.lane.b32.xlu1 %v3056_v41, %s9241_s10  ;;  %3149 = vrot.lane.b32.xlu0 %v3055_v24, %s9241_s10 }
 0x682   :  { %3271 = vperm.xlu1 %9169, %v8783_v42   ;;  %3267 = vperm.xlu0 %9168, %v8782_v23  }
 0x686   :  { %3279 = vperm.xlu1 %9169, %v8785_v4   ;;  %3275 = vperm.xlu0 %9168, %v8784_v12  }
 0x68a   :  { %3287 = vperm.xlu1 %9169, %v8787_v5   ;;  %3283 = vperm.xlu0 %9168, %v8786_v37  }
 0x68e   :  { %3295 = vperm.xlu1 %9169, %v8789_v11   ;;  %3291 = vperm.xlu0 %9168, %v8788_v3  }
 0x6b4   :  { %v10894_v38 = vpop.permute.xlu1 %3091  ;;  %v10896_v16 = vpop.permute.xlu0 %3089 }
 0x6b5   :  { %16372 = vst [vmem:[#allocation273_spill] sm:$0xff] %v10894_v38  ;;  %16373 = vst [vmem:[#allocation274_spill] sm:$0xff] %v10896_v16 }
 0x6b8   :  { %v10898_v59 = vpop.permute.xlu1 %3095  ;;  %v10900_v20 = vpop.permute.xlu0 %3093 }
 0x6b9   :  { %16374 = vst [vmem:[#allocation275_spill] sm:$0xff] %v10898_v59  ;;  %16375 = vst [vmem:[#allocation276_spill] sm:$0xff] %v10900_v20 }
 0x6bc   :  { %v10902_v41 = vpop.permute.xlu1 %3099  ;;  %v10904_v24 = vpop.permute.xlu0 %3097 }
 0x6bd   :  { %16376 = vst [vmem:[#allocation277_spill] sm:$0xff] %v10902_v41  ;;  %16377 = vst [vmem:[#allocation278_spill] sm:$0xff] %v10904_v24 }
 0x6c0   :  { %v10906_v42 = vpop.permute.xlu1 %3103  ;;  %v10908_v23 = vpop.permute.xlu0 %3101 }
 0x6c1   :  { %16378 = vst [vmem:[#allocation279_spill] sm:$0xff] %v10906_v42  ;;  %16379 = vst [vmem:[#allocation280_spill] sm:$0xff] %v10908_v23 }
 0x6c4   :  { %v10910_v4 = vpop.permute.xlu1 %3107  ;;  %v10912_v12 = vpop.permute.xlu0 %3105 }
 0x6c5   :  { %16380 = vst [vmem:[#allocation281_spill] sm:$0xff] %v10910_v4  ;;  %16381 = vst [vmem:[#allocation282_spill] sm:$0xff] %v10912_v12 }
 0x6c8   :  { %v10914_v5 = vpop.permute.xlu1 %3111  ;;  %v10916_v37 = vpop.permute.xlu0 %3109 }
 0x6c9   :  { %16382 = vst [vmem:[#allocation283_spill] sm:$0xff] %v10914_v5  ;;  %16383 = vst [vmem:[#allocation284_spill] sm:$0xff] %v10916_v37 }
 0x6cc   :  { %v10918_v11 = vpop.permute.xlu1 %3115  ;;  %v10920_v3 = vpop.permute.xlu0 %3113 }
 0x6cd   :  { %16384 = vst [vmem:[#allocation285_spill] sm:$0xff] %v10918_v11  ;;  %16385 = vst [vmem:[#allocation286_spill] sm:$0xff] %v10920_v3 }
 0x6d0   :  { %v10922_v20 = vpop.permute.xlu1 %3119  ;;  %v10924_v41 = vpop.permute.xlu0 %3117 }
 0x6d1   :  { %16386 = vst [vmem:[#allocation287_spill] sm:$0xff] %v10922_v20  ;;  %16387 = vst [vmem:[#allocation288_spill] sm:$0xff] %v10924_v41 }
 0x6d4   :  { %v10926_v24 = vpop.permute.xlu1 %3123  ;;  %v10928_v42 = vpop.permute.xlu0 %3121 }
 0x6d5   :  { %16388 = vst [vmem:[#allocation289_spill] sm:$0xff] %v10926_v24  ;;  %16389 = vst [vmem:[#allocation290_spill] sm:$0xff] %v10928_v42 }
 0x6d8   :  { %v10930_v23 = vpop.permute.xlu1 %3127  ;;  %v10932_v4 = vpop.permute.xlu0 %3125 }
 0x6d9   :  { %16390 = vst [vmem:[#allocation291_spill] sm:$0xff] %v10930_v23  ;;  %16391 = vst [vmem:[#allocation292_spill] sm:$0xff] %v10932_v4 }
 0x6dc   :  { %v10934_v12 = vpop.permute.xlu0 %3129  ;;  %v10936_v5 = vpop.permute.xlu1 %3131 }
 0x6dd   :  { %16392 = vst [vmem:[#allocation293_spill] sm:$0xff] %v10934_v12  ;;  %16393 = vst [vmem:[#allocation294_spill] sm:$0xff] %v10936_v5 }
 0x6e0   :  { %v10938_v37 = vpop.permute.xlu0 %3133  ;;  %v10940_v11 = vpop.permute.xlu1 %3135 }
 0x6e1   :  { %16394 = vst [vmem:[#allocation295_spill] sm:$0xff] %v10938_v37  ;;  %16395 = vst [vmem:[#allocation296_spill] sm:$0xff] %v10940_v11 }
 0x6e4   :  { %v10942_v3 = vpop.permute.xlu0 %3137  ;;  %v10944_v20 = vpop.permute.xlu1 %3139 }
 0x6e5   :  { %16396 = vst [vmem:[#allocation297_spill] sm:$0xff] %v10942_v3  ;;  %16397 = vst [vmem:[#allocation298_spill] sm:$0xff] %v10944_v20 }
 0x6e8   :  { %v10946_v41 = vpop.permute.xlu0 %3141  ;;  %v10948_v24 = vpop.permute.xlu1 %3143 }
 0x6e9   :  { %16398 = vst [vmem:[#allocation299_spill] sm:$0xff] %v10946_v41  ;;  %16399 = vst [vmem:[#allocation300_spill] sm:$0xff] %v10948_v24 }
 0x6ec   :  { %v10950_v42 = vpop.permute.xlu0 %3145  ;;  %v10952_v23 = vpop.permute.xlu1 %3147 }
 0x6ed   :  { %16400 = vst [vmem:[#allocation301_spill] sm:$0xff] %v10950_v42  ;;  %16401 = vst [vmem:[#allocation302_spill] sm:$0xff] %v10952_v23 }
 0x6f0   :  { %v10954_v4 = vpop.permute.xlu0 %3149  ;;  %v10956_v12 = vpop.permute.xlu1 %3151 }
 0x6f1   :  { %16402 = vst [vmem:[#allocation303_spill] sm:$0xff] %v10954_v4  ;;  %16403 = vst [vmem:[#allocation304_spill] sm:$0xff] %v10956_v12 }
 0x6fd   :  { %v3268_v5 = vpop.permute.xlu0 %3267  ;;  %v3272_v3 = vpop.permute.xlu1 %3271 }
 0x6fe   :  { %v3299_v37 = vmul.f32 %v10789_v19, %v3268_v5  ;;  %v3298_v11 = vmul.f32 %v10794_v6, %v3268_v5  ;;  %v3301_v41 = vmul.f32 %v10789_v19, %v3272_v3  ;;  %v3300_v42 = vmul.f32 %v10794_v6, %v3272_v3 }
 0x700   :  { %3364 = vrot.lane.b32.xlu1 %v3299_v37, %s9242_s15  ;;  %3362 = vrot.lane.b32.xlu0 %v3298_v11, %s9242_s15 }
 0x701   :  { %v3276_v24 = vpop.permute.xlu0 %3275  ;;  %v3280_v23 = vpop.permute.xlu1 %3279 }
 0x702   :  { %v3303_v4 = vmul.f32 %v10789_v19, %v3276_v24  ;;  %v3302_v12 = vmul.f32 %v10794_v6, %v3276_v24  ;;  %v3305_v37 = vmul.f32 %v10789_v19, %v3280_v23  ;;  %v3304_v11 = vmul.f32 %v10794_v6, %v3280_v23 }
 0x704   :  { %3368 = vrot.lane.b32.xlu1 %v3301_v41, %s9242_s15  ;;  %3366 = vrot.lane.b32.xlu0 %v3300_v42, %s9242_s15 }
 0x705   :  { %v3284_v20 = vpop.permute.xlu0 %3283  ;;  %v3288_v59 = vpop.permute.xlu1 %3287 }
 0x706   :  { %v3307_v41 = vmul.f32 %v10789_v19, %v3284_v20  ;;  %v3306_v42 = vmul.f32 %v10794_v6, %v3284_v20 }
 0x708   :  { %3372 = vrot.lane.b32.xlu1 %v3303_v4, %s9242_s15  ;;  %3370 = vrot.lane.b32.xlu0 %v3302_v12, %s9242_s15  ;;  %v3309_v4 = vmul.f32 %v10789_v19, %v3288_v59  ;;  %v3308_v12 = vmul.f32 %v10794_v6, %v3288_v59 }
 0x709   :  { %v3292_v16 = vpop.permute.xlu0 %3291  ;;  %v3296_v38 = vpop.permute.xlu1 %3295 }
 0x70c   :  { %3376 = vrot.lane.b32.xlu1 %v3305_v37, %s9242_s15  ;;  %3374 = vrot.lane.b32.xlu0 %v3304_v11, %s9242_s15  ;;  %v3311_v37 = vmul.f32 %v10789_v19, %v3292_v16  ;;  %v3310_v11 = vmul.f32 %v10794_v6, %v3292_v16 }
 0x710   :  { %3380 = vrot.lane.b32.xlu1 %v3307_v41, %s9242_s15  ;;  %3378 = vrot.lane.b32.xlu0 %v3306_v42, %s9242_s15  ;;  %v3313_v41 = vmul.f32 %v10789_v19, %v3296_v38  ;;  %v3312_v42 = vmul.f32 %v10794_v6, %v3296_v38  ;;  %v3319_v19 = vmul.f32 %v10831_v15, %v3276_v24 }
 0x711   :  { %v3318_v6 = vmul.f32 %v10836_v60, %v3276_v24  ;;  %v3325_v24 = vmul.f32 %v10831_v15, %v3288_v59 }
 0x714   :  { %3384 = vrot.lane.b32.xlu1 %v3309_v4, %s9242_s15  ;;  %3382 = vrot.lane.b32.xlu0 %v3308_v12, %s9242_s15  ;;  %v3315_v4 = vmul.f32 %v10831_v15, %v3268_v5  ;;  %v3314_v12 = vmul.f32 %v10836_v60, %v3268_v5  ;;  %v3321_v5 = vmul.f32 %v10831_v15, %v3280_v23 }
 0x718   :  { %3388 = vrot.lane.b32.xlu1 %v3311_v37, %s9242_s15  ;;  %3386 = vrot.lane.b32.xlu0 %v3310_v11, %s9242_s15  ;;  %v3317_v37 = vmul.f32 %v10831_v15, %v3272_v3  ;;  %v3316_v11 = vmul.f32 %v10836_v60, %v3272_v3  ;;  %v3323_v3 = vmul.f32 %v10831_v15, %v3284_v20 }
 0x71c   :  { %3392 = vrot.lane.b32.xlu1 %v3313_v41, %s9242_s15  ;;  %3390 = vrot.lane.b32.xlu0 %v3312_v42, %s9242_s15  ;;  %v3320_v41 = vmul.f32 %v10836_v60, %v3280_v23  ;;  %v3322_v42 = vmul.f32 %v10836_v60, %v3284_v20  ;;  %v3327_v23 = vmul.f32 %v10831_v15, %v3292_v16 }
 0x71d   :  { %v3329_v20 = vmul.f32 %v10831_v15, %v3296_v38  ;;  %v8805_v15 = vld [vmem:[%s16008_s0 + $0x7b] ss:$0 sm:$0xff] }
 0x720   :  { %3396 = vrot.lane.b32.xlu1 %v3315_v4, %s9242_s15  ;;  %3394 = vrot.lane.b32.xlu0 %v3314_v12, %s9242_s15  ;;  %v3324_v4 = vmul.f32 %v10836_v60, %v3288_v59  ;;  %v3326_v12 = vmul.f32 %v10836_v60, %v3292_v16  ;;  %v8803_v59 = vld [vmem:[%s16008_s0 + $0x79] ss:$0 sm:$0xff]  ;;  %v8802_v16 = vld [vmem:[%s16008_s0 + $0x78] ss:$0 sm:$0xff] }
 0x724   :  { %3400 = vrot.lane.b32.xlu1 %v3317_v37, %s9242_s15  ;;  %3398 = vrot.lane.b32.xlu0 %v3316_v11, %s9242_s15  ;;  %v3328_v37 = vmul.f32 %v10836_v60, %v3296_v38  ;;  %v8804_v60 = vld [vmem:[%s16008_s0 + $0x7a] ss:$0 sm:$0xff]  ;;  %v8807_v38 = vld [vmem:[%s16008_s0 + $0x7d] ss:$0 sm:$0xff] }
 0x725   :  { %v8806_v11 = vld [vmem:[%s16008_s0 + $0x7c] ss:$0 sm:$0xff] }
 0x728   :  { %3404 = vrot.lane.b32.xlu1 %v3319_v19, %s9242_s15  ;;  %3402 = vrot.lane.b32.xlu0 %v3318_v6, %s9242_s15  ;;  %v8809_v19 = vld [vmem:[%s16008_s0 + $0x7f] ss:$0 sm:$0xff]  ;;  %v8808_v6 = vld [vmem:[%s16008_s0 + $0x7e] ss:$0 sm:$0xff] }
 0x72c   :  { %3408 = vrot.lane.b32.xlu1 %v3321_v5, %s9242_s15  ;;  %3406 = vrot.lane.b32.xlu0 %v3320_v41, %s9242_s15  ;;  %v8819_v5 = vld [vmem:[%s16008_s0 + $0x81] ss:$0 sm:$0xff]  ;;  %v8818_v41 = vld [vmem:[%s16008_s0 + $0x80] ss:$0 sm:$0xff] }
 0x730   :  { %3412 = vrot.lane.b32.xlu1 %v3323_v3, %s9242_s15  ;;  %3410 = vrot.lane.b32.xlu0 %v3322_v42, %s9242_s15  ;;  %v8821_v3 = vld [vmem:[%s16008_s0 + $0x83] ss:$0 sm:$0xff]  ;;  %v8820_v42 = vld [vmem:[%s16008_s0 + $0x82] ss:$0 sm:$0xff] }
 0x734   :  { %3416 = vrot.lane.b32.xlu1 %v3325_v24, %s9242_s15  ;;  %3414 = vrot.lane.b32.xlu0 %v3324_v4, %s9242_s15  ;;  %v8823_v24 = vld [vmem:[%s16008_s0 + $0x85] ss:$0 sm:$0xff]  ;;  %v8822_v4 = vld [vmem:[%s16008_s0 + $0x84] ss:$0 sm:$0xff] }
 0x738   :  { %3420 = vrot.lane.b32.xlu1 %v3327_v23, %s9242_s15  ;;  %3418 = vrot.lane.b32.xlu0 %v3326_v12, %s9242_s15  ;;  %v8825_v23 = vld [vmem:[%s16008_s0 + $0x87] ss:$0 sm:$0xff]  ;;  %v8824_v12 = vld [vmem:[%s16008_s0 + $0x86] ss:$0 sm:$0xff] }
 0x73c   :  { %3424 = vrot.lane.b32.xlu1 %v3329_v20, %s9242_s15  ;;  %3422 = vrot.lane.b32.xlu0 %v3328_v37, %s9242_s15 }
 0x740   :  { %3548 = vperm.xlu1 %9169, %v8803_v59   ;;  %3544 = vperm.xlu0 %9168, %v8802_v16  }
 0x744   :  { %3556 = vperm.xlu1 %9169, %v8805_v15   ;;  %3552 = vperm.xlu0 %9168, %v8804_v60  }
 0x748   :  { %3564 = vperm.xlu1 %9169, %v8807_v38   ;;  %3560 = vperm.xlu0 %9168, %v8806_v11  }
 0x74c   :  { %3572 = vperm.xlu1 %9169, %v8809_v19   ;;  %3568 = vperm.xlu0 %9168, %v8808_v6  }
 0x750   :  { %3693 = vperm.xlu1 %9169, %v8819_v5   ;;  %3689 = vperm.xlu0 %9168, %v8818_v41  }
 0x754   :  { %3701 = vperm.xlu1 %9169, %v8821_v3   ;;  %3697 = vperm.xlu0 %9168, %v8820_v42  }
 0x758   :  { %3709 = vperm.xlu1 %9169, %v8823_v24   ;;  %3705 = vperm.xlu0 %9168, %v8822_v4  }
 0x75c   :  { %3717 = vperm.xlu1 %9169, %v8825_v23   ;;  %3713 = vperm.xlu0 %9168, %v8824_v12  }
 0x772   :  { %v11070_v20 = vpop.permute.xlu1 %3364  ;;  %v11072_v37 = vpop.permute.xlu0 %3362 }
 0x773   :  { %16404 = vst [vmem:[#allocation305_spill] sm:$0xff] %v11070_v20  ;;  %16405 = vst [vmem:[#allocation306_spill] sm:$0xff] %v11072_v37 }
 0x776   :  { %v11074_v59 = vpop.permute.xlu1 %3368  ;;  %v11076_v16 = vpop.permute.xlu0 %3366 }
 0x777   :  { %16406 = vst [vmem:[#allocation307_spill] sm:$0xff] %v11074_v59  ;;  %16407 = vst [vmem:[#allocation308_spill] sm:$0xff] %v11076_v16 }
 0x77a   :  { %v11078_v15 = vpop.permute.xlu1 %3372  ;;  %v11080_v60 = vpop.permute.xlu0 %3370 }
 0x77b   :  { %16408 = vst [vmem:[#allocation309_spill] sm:$0xff] %v11078_v15  ;;  %16409 = vst [vmem:[#allocation310_spill] sm:$0xff] %v11080_v60 }
 0x77e   :  { %v11082_v38 = vpop.permute.xlu1 %3376  ;;  %v11084_v11 = vpop.permute.xlu0 %3374 }
 0x77f   :  { %16410 = vst [vmem:[#allocation311_spill] sm:$0xff] %v11082_v38  ;;  %16411 = vst [vmem:[#allocation312_spill] sm:$0xff] %v11084_v11 }
 0x782   :  { %v11086_v19 = vpop.permute.xlu1 %3380  ;;  %v11088_v6 = vpop.permute.xlu0 %3378 }
 0x783   :  { %16412 = vst [vmem:[#allocation313_spill] sm:$0xff] %v11086_v19  ;;  %16413 = vst [vmem:[#allocation314_spill] sm:$0xff] %v11088_v6 }
 0x786   :  { %v11090_v5 = vpop.permute.xlu1 %3384  ;;  %v11092_v41 = vpop.permute.xlu0 %3382 }
 0x787   :  { %16414 = vst [vmem:[#allocation315_spill] sm:$0xff] %v11090_v5  ;;  %16415 = vst [vmem:[#allocation316_spill] sm:$0xff] %v11092_v41 }
 0x78a   :  { %v11094_v3 = vpop.permute.xlu1 %3388  ;;  %v11096_v42 = vpop.permute.xlu0 %3386 }
 0x78b   :  { %16416 = vst [vmem:[#allocation317_spill] sm:$0xff] %v11094_v3  ;;  %16417 = vst [vmem:[#allocation318_spill] sm:$0xff] %v11096_v42 }
 0x78e   :  { %v11098_v24 = vpop.permute.xlu1 %3392  ;;  %v11100_v4 = vpop.permute.xlu0 %3390 }
 0x78f   :  { %16418 = vst [vmem:[#allocation319_spill] sm:$0xff] %v11098_v24  ;;  %16419 = vst [vmem:[#allocation320_spill] sm:$0xff] %v11100_v4 }
 0x792   :  { %v11102_v23 = vpop.permute.xlu1 %3396  ;;  %v11104_v12 = vpop.permute.xlu0 %3394 }
 0x793   :  { %16420 = vst [vmem:[#allocation321_spill] sm:$0xff] %v11102_v23  ;;  %16421 = vst [vmem:[#allocation322_spill] sm:$0xff] %v11104_v12 }
 0x796   :  { %v11106_v11 = vpop.permute.xlu1 %3400  ;;  %v11108_v19 = vpop.permute.xlu0 %3398 }
 0x797   :  { %16422 = vst [vmem:[#allocation323_spill] sm:$0xff] %v11106_v11  ;;  %16423 = vst [vmem:[#allocation324_spill] sm:$0xff] %v11108_v19 }
 0x79a   :  { %v11110_v6 = vpop.permute.xlu1 %3404  ;;  %v11112_v5 = vpop.permute.xlu0 %3402 }
 0x79b   :  { %16424 = vst [vmem:[#allocation325_spill] sm:$0xff] %v11110_v6  ;;  %16425 = vst [vmem:[#allocation326_spill] sm:$0xff] %v11112_v5 }
 0x79e   :  { %v11114_v41 = vpop.permute.xlu1 %3408  ;;  %v11116_v3 = vpop.permute.xlu0 %3406 }
 0x79f   :  { %16426 = vst [vmem:[#allocation327_spill] sm:$0xff] %v11114_v41  ;;  %16427 = vst [vmem:[#allocation328_spill] sm:$0xff] %v11116_v3 }
 0x7a2   :  { %v11118_v42 = vpop.permute.xlu1 %3412  ;;  %v11120_v24 = vpop.permute.xlu0 %3410 }
 0x7a3   :  { %16428 = vst [vmem:[#allocation329_spill] sm:$0xff] %v11118_v42  ;;  %16429 = vst [vmem:[#allocation330_spill] sm:$0xff] %v11120_v24 }
 0x7a6   :  { %v11122_v4 = vpop.permute.xlu1 %3416  ;;  %v11124_v23 = vpop.permute.xlu0 %3414 }
 0x7a7   :  { %16430 = vst [vmem:[#allocation331_spill] sm:$0xff] %v11122_v4  ;;  %16431 = vst [vmem:[#allocation332_spill] sm:$0xff] %v11124_v23 }
 0x7aa   :  { %v11126_v12 = vpop.permute.xlu1 %3420  ;;  %v11128_v11 = vpop.permute.xlu0 %3418 }
 0x7ab   :  { %16432 = vst [vmem:[#allocation333_spill] sm:$0xff] %v11126_v12  ;;  %16433 = vst [vmem:[#allocation334_spill] sm:$0xff] %v11128_v11 }
 0x7ae   :  { %v11130_v19 = vpop.permute.xlu1 %3424  ;;  %v11132_v6 = vpop.permute.xlu0 %3422 }
 0x7af   :  { %16434 = vst [vmem:[#allocation335_spill] sm:$0xff] %v11130_v19  ;;  %16435 = vst [vmem:[#allocation336_spill] sm:$0xff] %v11132_v6  ;;  %v11153_v6 = vld [vmem:[%s16010_s2 + $0x22] sm:$0xff] }
 0x7bb   :  { %v11134_v5 = vpop.permute.xlu1 %3548  ;;  %v11136_v41 = vpop.permute.xlu0 %3544 }
 0x7bc   :  { %16436 = vst [vmem:[#allocation337_spill] sm:$0xff] %v11134_v5  ;;  %16437 = vst [vmem:[#allocation338_spill] sm:$0xff] %v11136_v41 }
 0x7bf   :  { %v11138_v3 = vpop.permute.xlu1 %3556  ;;  %v11140_v42 = vpop.permute.xlu0 %3552 }
 0x7c0   :  { %16438 = vst [vmem:[#allocation339_spill] sm:$0xff] %v11138_v3  ;;  %16439 = vst [vmem:[#allocation340_spill] sm:$0xff] %v11140_v42  ;;  %v11158_v3 = vld [vmem:[%s16010_s2 + $0x1a] sm:$0xff] }
 0x7c3   :  { %v11142_v24 = vpop.permute.xlu1 %3564  ;;  %v11144_v4 = vpop.permute.xlu0 %3560 }
 0x7c4   :  { %16440 = vst [vmem:[#allocation341_spill] sm:$0xff] %v11142_v24  ;;  %16441 = vst [vmem:[#allocation342_spill] sm:$0xff] %v11144_v4 }
 0x7c7   :  { %v11146_v23 = vpop.permute.xlu1 %3572  ;;  %v11148_v12 = vpop.permute.xlu0 %3568 }
 0x7c8   :  { %16442 = vst [vmem:[#allocation343_spill] sm:$0xff] %v11146_v23  ;;  %16443 = vst [vmem:[#allocation344_spill] sm:$0xff] %v11148_v12 }
 0x7cb   :  { %v3690_v11 = vpop.permute.xlu0 %3689  ;;  %v3694_v4 = vpop.permute.xlu1 %3693 }
 0x7cc   :  { %v3721_v42 = vmul.f32 %v11153_v6, %v3690_v11  ;;  %v3720_v24 = vmul.f32 %v11158_v3, %v3690_v11  ;;  %v3723_v23 = vmul.f32 %v11153_v6, %v3694_v4  ;;  %v3722_v12 = vmul.f32 %v11158_v3, %v3694_v4 }
 0x7ce   :  { %3786 = vrot.lane.b32.xlu1 %v3721_v42, %s9241_s10  ;;  %3784 = vrot.lane.b32.xlu0 %v3720_v24, %s9241_s10 }
 0x7cf   :  { %v3698_v5 = vpop.permute.xlu0 %3697  ;;  %v3702_v38 = vpop.permute.xlu1 %3701 }
 0x7d0   :  { %v3725_v41 = vmul.f32 %v11153_v6, %v3698_v5  ;;  %v3724_v19 = vmul.f32 %v11158_v3, %v3698_v5  ;;  %v3727_v42 = vmul.f32 %v11153_v6, %v3702_v38  ;;  %v3726_v24 = vmul.f32 %v11158_v3, %v3702_v38 }
 0x7d2   :  { %3790 = vrot.lane.b32.xlu1 %v3723_v23, %s9241_s10  ;;  %3788 = vrot.lane.b32.xlu0 %v3722_v12, %s9241_s10 }
 0x7d3   :  { %v3706_v60 = vpop.permute.xlu0 %3705  ;;  %v3710_v15 = vpop.permute.xlu1 %3709 }
 0x7d4   :  { %v3729_v23 = vmul.f32 %v11153_v6, %v3706_v60  ;;  %v3728_v12 = vmul.f32 %v11158_v3, %v3706_v60 }
 0x7d6   :  { %3794 = vrot.lane.b32.xlu1 %v3725_v41, %s9241_s10  ;;  %3792 = vrot.lane.b32.xlu0 %v3724_v19, %s9241_s10  ;;  %v3731_v19 = vmul.f32 %v11153_v6, %v3710_v15  ;;  %v3730_v41 = vmul.f32 %v11158_v3, %v3710_v15 }
 0x7d7   :  { %v3714_v16 = vpop.permute.xlu0 %3713  ;;  %v3718_v59 = vpop.permute.xlu1 %3717 }
 0x7da   :  { %3798 = vrot.lane.b32.xlu1 %v3727_v42, %s9241_s10  ;;  %3796 = vrot.lane.b32.xlu0 %v3726_v24, %s9241_s10  ;;  %v3733_v42 = vmul.f32 %v11153_v6, %v3714_v16  ;;  %v3732_v24 = vmul.f32 %v11158_v3, %v3714_v16 }
 0x7de   :  { %3802 = vrot.lane.b32.xlu1 %v3729_v23, %s9241_s10  ;;  %3800 = vrot.lane.b32.xlu0 %v3728_v12, %s9241_s10  ;;  %v3735_v23 = vmul.f32 %v11153_v6, %v3718_v59  ;;  %v3734_v12 = vmul.f32 %v11158_v3, %v3718_v59 }
 0x7e2   :  { %3806 = vrot.lane.b32.xlu1 %v3731_v19, %s9241_s10  ;;  %3804 = vrot.lane.b32.xlu0 %v3730_v41, %s9241_s10  ;;  %v11195_v19 = vld [vmem:[%s16010_s2 + $0x82] sm:$0xff]  ;;  %v11200_v41 = vld [vmem:[%s16010_s2 + $0x7a] sm:$0xff] }
 0x7e3   :  { %v3741_v37 = vmul.f32 %v11195_v19, %v3698_v5  ;;  %v3740_v20 = vmul.f32 %v11200_v41, %v3698_v5  ;;  %v3748_v5 = vmul.f32 %v11200_v41, %v3714_v16 }
 0x7e6   :  { %3810 = vrot.lane.b32.xlu1 %v3733_v42, %s9241_s10  ;;  %3808 = vrot.lane.b32.xlu0 %v3732_v24, %s9241_s10  ;;  %v3737_v42 = vmul.f32 %v11195_v19, %v3690_v11  ;;  %v3736_v24 = vmul.f32 %v11200_v41, %v3690_v11  ;;  %v3743_v11 = vmul.f32 %v11195_v19, %v3702_v38 }
 0x7ea   :  { %3814 = vrot.lane.b32.xlu1 %v3735_v23, %s9241_s10  ;;  %3812 = vrot.lane.b32.xlu0 %v3734_v12, %s9241_s10  ;;  %v3739_v23 = vmul.f32 %v11195_v19, %v3694_v4  ;;  %v3738_v12 = vmul.f32 %v11200_v41, %v3694_v4  ;;  %v3745_v4 = vmul.f32 %v11195_v19, %v3706_v60 }
 0x7ee   :  { %3818 = vrot.lane.b32.xlu1 %v3737_v42, %s9241_s10  ;;  %3816 = vrot.lane.b32.xlu0 %v3736_v24, %s9241_s10  ;;  %v3742_v42 = vmul.f32 %v11200_v41, %v3702_v38  ;;  %v3744_v24 = vmul.f32 %v11200_v41, %v3706_v60  ;;  %v3749_v38 = vmul.f32 %v11195_v19, %v3714_v16  ;;  %v8834_v16 = vld [vmem:[%s16008_s0 + $0x88] ss:$0 sm:$0xff] }
 0x7ef   :  { %v3751_v60 = vmul.f32 %v11195_v19, %v3718_v59 }
 0x7f2   :  { %3822 = vrot.lane.b32.xlu1 %v3739_v23, %s9241_s10  ;;  %3820 = vrot.lane.b32.xlu0 %v3738_v12, %s9241_s10  ;;  %v3750_v23 = vmul.f32 %v11200_v41, %v3718_v59  ;;  %v8837_v12 = vld [vmem:[%s16008_s0 + $0x8b] ss:$0 sm:$0xff]  ;;  %v8836_v59 = vld [vmem:[%s16008_s0 + $0x8a] ss:$0 sm:$0xff] }
 0x7f6   :  { %3826 = vrot.lane.b32.xlu1 %v3741_v37, %s9241_s10  ;;  %3824 = vrot.lane.b32.xlu0 %v3740_v20, %s9241_s10  ;;  %v3747_v37 = vmul.f32 %v11195_v19, %v3710_v15  ;;  %v3746_v20 = vmul.f32 %v11200_v41, %v3710_v15  ;;  %v8835_v15 = vld [vmem:[%s16008_s0 + $0x89] ss:$0 sm:$0xff] }
 0x7fa   :  { %3830 = vrot.lane.b32.xlu1 %v3743_v11, %s9241_s10  ;;  %3828 = vrot.lane.b32.xlu0 %v3742_v42, %s9241_s10  ;;  %v8839_v11 = vld [vmem:[%s16008_s0 + $0x8d] ss:$0 sm:$0xff]  ;;  %v8838_v42 = vld [vmem:[%s16008_s0 + $0x8c] ss:$0 sm:$0xff] }
 0x7fe   :  { %3834 = vrot.lane.b32.xlu1 %v3745_v4, %s9241_s10  ;;  %3832 = vrot.lane.b32.xlu0 %v3744_v24, %s9241_s10  ;;  %v8841_v4 = vld [vmem:[%s16008_s0 + $0x8f] ss:$0 sm:$0xff]  ;;  %v8840_v24 = vld [vmem:[%s16008_s0 + $0x8e] ss:$0 sm:$0xff] }
 0x802   :  { %3838 = vrot.lane.b32.xlu1 %v3747_v37, %s9241_s10  ;;  %3836 = vrot.lane.b32.xlu0 %v3746_v20, %s9241_s10 }
 0x806   :  { %3842 = vrot.lane.b32.xlu1 %v3749_v38, %s9241_s10  ;;  %3840 = vrot.lane.b32.xlu0 %v3748_v5, %s9241_s10 }
 0x80a   :  { %3846 = vrot.lane.b32.xlu1 %v3751_v60, %s9241_s10  ;;  %3844 = vrot.lane.b32.xlu0 %v3750_v23, %s9241_s10 }
 0x80e   :  { %3966 = vperm.xlu1 %9169, %v8835_v15   ;;  %3962 = vperm.xlu0 %9168, %v8834_v16  }
 0x812   :  { %3974 = vperm.xlu1 %9169, %v8837_v12   ;;  %3970 = vperm.xlu0 %9168, %v8836_v59  }
 0x816   :  { %3982 = vperm.xlu1 %9169, %v8839_v11   ;;  %3978 = vperm.xlu0 %9168, %v8838_v42  }
 0x81a   :  { %3990 = vperm.xlu1 %9169, %v8841_v4   ;;  %3986 = vperm.xlu0 %9168, %v8840_v24  }
 0x840   :  { %v11258_v37 = vpop.permute.xlu1 %3786  ;;  %v11260_v20 = vpop.permute.xlu0 %3784 }
 0x841   :  { %16444 = vst [vmem:[#allocation345_spill] sm:$0xff] %v11258_v37  ;;  %16445 = vst [vmem:[#allocation346_spill] sm:$0xff] %v11260_v20 }
 0x844   :  { %v11262_v38 = vpop.permute.xlu1 %3790  ;;  %v11264_v5 = vpop.permute.xlu0 %3788 }
 0x845   :  { %16446 = vst [vmem:[#allocation347_spill] sm:$0xff] %v11262_v38  ;;  %16447 = vst [vmem:[#allocation348_spill] sm:$0xff] %v11264_v5 }
 0x848   :  { %v11266_v60 = vpop.permute.xlu1 %3794  ;;  %v11268_v23 = vpop.permute.xlu0 %3792 }
 0x849   :  { %16448 = vst [vmem:[#allocation349_spill] sm:$0xff] %v11266_v60  ;;  %16449 = vst [vmem:[#allocation350_spill] sm:$0xff] %v11268_v23 }
 0x84c   :  { %v11270_v15 = vpop.permute.xlu1 %3798  ;;  %v11272_v16 = vpop.permute.xlu0 %3796 }
 0x84d   :  { %16450 = vst [vmem:[#allocation351_spill] sm:$0xff] %v11270_v15  ;;  %16451 = vst [vmem:[#allocation352_spill] sm:$0xff] %v11272_v16 }
 0x850   :  { %v11274_v12 = vpop.permute.xlu1 %3802  ;;  %v11276_v59 = vpop.permute.xlu0 %3800 }
 0x851   :  { %16452 = vst [vmem:[#allocation353_spill] sm:$0xff] %v11274_v12  ;;  %16453 = vst [vmem:[#allocation354_spill] sm:$0xff] %v11276_v59 }
 0x854   :  { %v11278_v11 = vpop.permute.xlu1 %3806  ;;  %v11280_v42 = vpop.permute.xlu0 %3804 }
 0x855   :  { %16454 = vst [vmem:[#allocation355_spill] sm:$0xff] %v11278_v11  ;;  %16455 = vst [vmem:[#allocation356_spill] sm:$0xff] %v11280_v42 }
 0x858   :  { %v11282_v4 = vpop.permute.xlu1 %3810  ;;  %v11284_v24 = vpop.permute.xlu0 %3808 }
 0x859   :  { %16456 = vst [vmem:[#allocation357_spill] sm:$0xff] %v11282_v4  ;;  %16457 = vst [vmem:[#allocation358_spill] sm:$0xff] %v11284_v24 }
 0x85c   :  { %v11286_v5 = vpop.permute.xlu1 %3814  ;;  %v11288_v60 = vpop.permute.xlu0 %3812 }
 0x85d   :  { %16458 = vst [vmem:[#allocation359_spill] sm:$0xff] %v11286_v5  ;;  %16459 = vst [vmem:[#allocation360_spill] sm:$0xff] %v11288_v60 }
 0x860   :  { %v11290_v23 = vpop.permute.xlu1 %3818  ;;  %v11292_v15 = vpop.permute.xlu0 %3816 }
 0x861   :  { %16460 = vst [vmem:[#allocation361_spill] sm:$0xff] %v11290_v23  ;;  %16461 = vst [vmem:[#allocation362_spill] sm:$0xff] %v11292_v15 }
 0x864   :  { %v11294_v16 = vpop.permute.xlu1 %3822  ;;  %v11296_v12 = vpop.permute.xlu0 %3820 }
 0x865   :  { %16462 = vst [vmem:[#allocation363_spill] sm:$0xff] %v11294_v16  ;;  %16463 = vst [vmem:[#allocation364_spill] sm:$0xff] %v11296_v12 }
 0x868   :  { %v11298_v59 = vpop.permute.xlu0 %3824  ;;  %v11300_v11 = vpop.permute.xlu1 %3826 }
 0x869   :  { %16464 = vst [vmem:[#allocation365_spill] sm:$0xff] %v11298_v59  ;;  %16465 = vst [vmem:[#allocation366_spill] sm:$0xff] %v11300_v11 }
 0x86c   :  { %v11302_v42 = vpop.permute.xlu0 %3828  ;;  %v11304_v4 = vpop.permute.xlu1 %3830 }
 0x86d   :  { %16466 = vst [vmem:[#allocation367_spill] sm:$0xff] %v11302_v42  ;;  %16467 = vst [vmem:[#allocation368_spill] sm:$0xff] %v11304_v4 }
 0x870   :  { %v11306_v24 = vpop.permute.xlu0 %3832  ;;  %v11308_v5 = vpop.permute.xlu1 %3834 }
 0x871   :  { %16468 = vst [vmem:[#allocation369_spill] sm:$0xff] %v11306_v24  ;;  %16469 = vst [vmem:[#allocation370_spill] sm:$0xff] %v11308_v5 }
 0x874   :  { %v11310_v60 = vpop.permute.xlu0 %3836  ;;  %v11312_v23 = vpop.permute.xlu1 %3838 }
 0x875   :  { %16470 = vst [vmem:[#allocation371_spill] sm:$0xff] %v11310_v60  ;;  %16471 = vst [vmem:[#allocation372_spill] sm:$0xff] %v11312_v23 }
 0x878   :  { %v11314_v15 = vpop.permute.xlu0 %3840  ;;  %v11316_v16 = vpop.permute.xlu1 %3842 }
 0x879   :  { %16472 = vst [vmem:[#allocation373_spill] sm:$0xff] %v11314_v15  ;;  %16473 = vst [vmem:[#allocation374_spill] sm:$0xff] %v11316_v16 }
 0x87c   :  { %v11318_v12 = vpop.permute.xlu0 %3844  ;;  %v11320_v59 = vpop.permute.xlu1 %3846 }
 0x87d   :  { %16474 = vst [vmem:[#allocation375_spill] sm:$0xff] %v11318_v12  ;;  %16475 = vst [vmem:[#allocation376_spill] sm:$0xff] %v11320_v59 }
 0x889   :  { %v3963_v11 = vpop.permute.xlu0 %3962  ;;  %v3967_v24 = vpop.permute.xlu1 %3966 }
 0x88a   :  { %v3994_v42 = vmul.f32 %v11153_v6, %v3963_v11  ;;  %v3993_v4 = vmul.f32 %v11158_v3, %v3963_v11  ;;  %v3996_v60 = vmul.f32 %v11153_v6, %v3967_v24  ;;  %v3995_v15 = vmul.f32 %v11158_v3, %v3967_v24 }
 0x88c   :  { %4059 = vrot.lane.b32.xlu1 %v3994_v42, %s9242_s15  ;;  %4057 = vrot.lane.b32.xlu0 %v3993_v4, %s9242_s15 }
 0x88d   :  { %v3971_v23 = vpop.permute.xlu0 %3970  ;;  %v3975_v16 = vpop.permute.xlu1 %3974 }
 0x88e   :  { %v3998_v12 = vmul.f32 %v11153_v6, %v3971_v23  ;;  %v3997_v59 = vmul.f32 %v11158_v3, %v3971_v23  ;;  %v4000_v42 = vmul.f32 %v11153_v6, %v3975_v16  ;;  %v3999_v4 = vmul.f32 %v11158_v3, %v3975_v16 }
 0x890   :  { %4063 = vrot.lane.b32.xlu1 %v3996_v60, %s9242_s15  ;;  %4061 = vrot.lane.b32.xlu0 %v3995_v15, %s9242_s15 }
 0x891   :  { %v3979_v5 = vpop.permute.xlu0 %3978  ;;  %v3983_v38 = vpop.permute.xlu1 %3982 }
 0x892   :  { %v4002_v60 = vmul.f32 %v11153_v6, %v3979_v5  ;;  %v4001_v15 = vmul.f32 %v11158_v3, %v3979_v5 }
 0x894   :  { %4067 = vrot.lane.b32.xlu1 %v3998_v12, %s9242_s15  ;;  %4065 = vrot.lane.b32.xlu0 %v3997_v59, %s9242_s15  ;;  %v4004_v12 = vmul.f32 %v11153_v6, %v3983_v38  ;;  %v4003_v59 = vmul.f32 %v11158_v3, %v3983_v38 }
 0x895   :  { %v3987_v20 = vpop.permute.xlu0 %3986  ;;  %v3991_v37 = vpop.permute.xlu1 %3990 }
 0x898   :  { %4071 = vrot.lane.b32.xlu1 %v4000_v42, %s9242_s15  ;;  %4069 = vrot.lane.b32.xlu0 %v3999_v4, %s9242_s15  ;;  %v4006_v42 = vmul.f32 %v11153_v6, %v3987_v20  ;;  %v4005_v4 = vmul.f32 %v11158_v3, %v3987_v20 }
 0x89c   :  { %4075 = vrot.lane.b32.xlu1 %v4002_v60, %s9242_s15  ;;  %4073 = vrot.lane.b32.xlu0 %v4001_v15, %s9242_s15  ;;  %v4008_v60 = vmul.f32 %v11153_v6, %v3991_v37  ;;  %v4007_v15 = vmul.f32 %v11158_v3, %v3991_v37  ;;  %v4014_v6 = vmul.f32 %v11195_v19, %v3971_v23 }
 0x89d   :  { %v4013_v3 = vmul.f32 %v11200_v41, %v3971_v23  ;;  %v4020_v23 = vmul.f32 %v11195_v19, %v3983_v38 }
 0x8a0   :  { %4079 = vrot.lane.b32.xlu1 %v4004_v12, %s9242_s15  ;;  %4077 = vrot.lane.b32.xlu0 %v4003_v59, %s9242_s15  ;;  %v4010_v12 = vmul.f32 %v11195_v19, %v3963_v11  ;;  %v4009_v59 = vmul.f32 %v11200_v41, %v3963_v11  ;;  %v4016_v11 = vmul.f32 %v11195_v19, %v3975_v16 }
 0x8a4   :  { %4083 = vrot.lane.b32.xlu1 %v4006_v42, %s9242_s15  ;;  %4081 = vrot.lane.b32.xlu0 %v4005_v4, %s9242_s15  ;;  %v4012_v42 = vmul.f32 %v11195_v19, %v3967_v24  ;;  %v4011_v4 = vmul.f32 %v11200_v41, %v3967_v24  ;;  %v4018_v24 = vmul.f32 %v11195_v19, %v3979_v5 }
 0x8a8   :  { %4087 = vrot.lane.b32.xlu1 %v4008_v60, %s9242_s15  ;;  %4085 = vrot.lane.b32.xlu0 %v4007_v15, %s9242_s15  ;;  %v4015_v60 = vmul.f32 %v11200_v41, %v3975_v16  ;;  %v4017_v15 = vmul.f32 %v11200_v41, %v3979_v5  ;;  %v4022_v16 = vmul.f32 %v11195_v19, %v3987_v20 }
 0x8a9   :  { %v4024_v5 = vmul.f32 %v11195_v19, %v3991_v37  ;;  %v8857_v19 = vld [vmem:[%s16008_s0 + $0x93] ss:$0 sm:$0xff] }
 0x8ac   :  { %4091 = vrot.lane.b32.xlu1 %v4010_v12, %s9242_s15  ;;  %4089 = vrot.lane.b32.xlu0 %v4009_v59, %s9242_s15  ;;  %v4019_v12 = vmul.f32 %v11200_v41, %v3983_v38  ;;  %v4021_v59 = vmul.f32 %v11200_v41, %v3987_v20  ;;  %v8855_v38 = vld [vmem:[%s16008_s0 + $0x91] ss:$0 sm:$0xff]  ;;  %v8854_v20 = vld [vmem:[%s16008_s0 + $0x90] ss:$0 sm:$0xff] }
 0x8b0   :  { %4095 = vrot.lane.b32.xlu1 %v4012_v42, %s9242_s15  ;;  %4093 = vrot.lane.b32.xlu0 %v4011_v4, %s9242_s15  ;;  %v4023_v42 = vmul.f32 %v11200_v41, %v3991_v37  ;;  %v8856_v41 = vld [vmem:[%s16008_s0 + $0x92] ss:$0 sm:$0xff]  ;;  %v8859_v37 = vld [vmem:[%s16008_s0 + $0x95] ss:$0 sm:$0xff] }
 0x8b1   :  { %v8858_v4 = vld [vmem:[%s16008_s0 + $0x94] ss:$0 sm:$0xff] }
 0x8b4   :  { %4099 = vrot.lane.b32.xlu1 %v4014_v6, %s9242_s15  ;;  %4097 = vrot.lane.b32.xlu0 %v4013_v3, %s9242_s15  ;;  %v8861_v6 = vld [vmem:[%s16008_s0 + $0x97] ss:$0 sm:$0xff]  ;;  %v8860_v3 = vld [vmem:[%s16008_s0 + $0x96] ss:$0 sm:$0xff] }
 0x8b8   :  { %4103 = vrot.lane.b32.xlu1 %v4016_v11, %s9242_s15  ;;  %4101 = vrot.lane.b32.xlu0 %v4015_v60, %s9242_s15  ;;  %v8871_v11 = vld [vmem:[%s16008_s0 + $0x99] ss:$0 sm:$0xff]  ;;  %v8870_v60 = vld [vmem:[%s16008_s0 + $0x98] ss:$0 sm:$0xff] }
 0x8bc   :  { %4107 = vrot.lane.b32.xlu1 %v4018_v24, %s9242_s15  ;;  %4105 = vrot.lane.b32.xlu0 %v4017_v15, %s9242_s15  ;;  %v8873_v24 = vld [vmem:[%s16008_s0 + $0x9b] ss:$0 sm:$0xff]  ;;  %v8872_v15 = vld [vmem:[%s16008_s0 + $0x9a] ss:$0 sm:$0xff] }
 0x8c0   :  { %4111 = vrot.lane.b32.xlu1 %v4020_v23, %s9242_s15  ;;  %4109 = vrot.lane.b32.xlu0 %v4019_v12, %s9242_s15  ;;  %v8875_v23 = vld [vmem:[%s16008_s0 + $0x9d] ss:$0 sm:$0xff]  ;;  %v8874_v12 = vld [vmem:[%s16008_s0 + $0x9c] ss:$0 sm:$0xff] }
 0x8c4   :  { %4115 = vrot.lane.b32.xlu1 %v4022_v16, %s9242_s15  ;;  %4113 = vrot.lane.b32.xlu0 %v4021_v59, %s9242_s15  ;;  %v8877_v16 = vld [vmem:[%s16008_s0 + $0x9f] ss:$0 sm:$0xff]  ;;  %v8876_v59 = vld [vmem:[%s16008_s0 + $0x9e] ss:$0 sm:$0xff] }
 0x8c8   :  { %4119 = vrot.lane.b32.xlu1 %v4024_v5, %s9242_s15  ;;  %4117 = vrot.lane.b32.xlu0 %v4023_v42, %s9242_s15 }
 0x8cc   :  { %4244 = vperm.xlu1 %9169, %v8855_v38   ;;  %4240 = vperm.xlu0 %9168, %v8854_v20  }
 0x8d0   :  { %4252 = vperm.xlu1 %9169, %v8857_v19   ;;  %4248 = vperm.xlu0 %9168, %v8856_v41  }
 0x8d4   :  { %4260 = vperm.xlu1 %9169, %v8859_v37   ;;  %4256 = vperm.xlu0 %9168, %v8858_v4  }
 0x8d8   :  { %4268 = vperm.xlu1 %9169, %v8861_v6   ;;  %4264 = vperm.xlu0 %9168, %v8860_v3  }
 0x8dc   :  { %4389 = vperm.xlu1 %9169, %v8871_v11   ;;  %4385 = vperm.xlu0 %9168, %v8870_v60  }
 0x8e0   :  { %4397 = vperm.xlu1 %9169, %v8873_v24   ;;  %4393 = vperm.xlu0 %9168, %v8872_v15  }
 0x8e4   :  { %4405 = vperm.xlu1 %9169, %v8875_v23   ;;  %4401 = vperm.xlu0 %9168, %v8874_v12  }
 0x8e8   :  { %4413 = vperm.xlu1 %9169, %v8877_v16   ;;  %4409 = vperm.xlu0 %9168, %v8876_v59  }
 0x8fe   :  { %v11434_v5 = vpop.permute.xlu1 %4059  ;;  %v11436_v42 = vpop.permute.xlu0 %4057 }
 0x8ff   :  { %16476 = vst [vmem:[#allocation377_spill] sm:$0xff] %v11434_v5  ;;  %16477 = vst [vmem:[#allocation378_spill] sm:$0xff] %v11436_v42 }
 0x902   :  { %v11438_v38 = vpop.permute.xlu1 %4063  ;;  %v11440_v20 = vpop.permute.xlu0 %4061 }
 0x903   :  { %16478 = vst [vmem:[#allocation379_spill] sm:$0xff] %v11438_v38  ;;  %16479 = vst [vmem:[#allocation380_spill] sm:$0xff] %v11440_v20 }
 0x906   :  { %v11442_v19 = vpop.permute.xlu1 %4067  ;;  %v11444_v41 = vpop.permute.xlu0 %4065 }
 0x907   :  { %16480 = vst [vmem:[#allocation381_spill] sm:$0xff] %v11442_v19  ;;  %16481 = vst [vmem:[#allocation382_spill] sm:$0xff] %v11444_v41 }
 0x90a   :  { %v11446_v37 = vpop.permute.xlu1 %4071  ;;  %v11448_v4 = vpop.permute.xlu0 %4069 }
 0x90b   :  { %16482 = vst [vmem:[#allocation383_spill] sm:$0xff] %v11446_v37  ;;  %16483 = vst [vmem:[#allocation384_spill] sm:$0xff] %v11448_v4 }
 0x90e   :  { %v11450_v6 = vpop.permute.xlu1 %4075  ;;  %v11452_v3 = vpop.permute.xlu0 %4073 }
 0x90f   :  { %16484 = vst [vmem:[#allocation385_spill] sm:$0xff] %v11450_v6  ;;  %16485 = vst [vmem:[#allocation386_spill] sm:$0xff] %v11452_v3 }
 0x912   :  { %v11454_v11 = vpop.permute.xlu1 %4079  ;;  %v11456_v60 = vpop.permute.xlu0 %4077 }
 0x913   :  { %16486 = vst [vmem:[#allocation387_spill] sm:$0xff] %v11454_v11  ;;  %16487 = vst [vmem:[#allocation388_spill] sm:$0xff] %v11456_v60 }
 0x916   :  { %v11458_v24 = vpop.permute.xlu1 %4083  ;;  %v11460_v15 = vpop.permute.xlu0 %4081 }
 0x917   :  { %16488 = vst [vmem:[#allocation389_spill] sm:$0xff] %v11458_v24  ;;  %16489 = vst [vmem:[#allocation390_spill] sm:$0xff] %v11460_v15 }
 0x91a   :  { %v11462_v23 = vpop.permute.xlu1 %4087  ;;  %v11464_v12 = vpop.permute.xlu0 %4085 }
 0x91b   :  { %16490 = vst [vmem:[#allocation391_spill] sm:$0xff] %v11462_v23  ;;  %16491 = vst [vmem:[#allocation392_spill] sm:$0xff] %v11464_v12 }
 0x91e   :  { %v11466_v16 = vpop.permute.xlu1 %4091  ;;  %v11468_v59 = vpop.permute.xlu0 %4089 }
 0x91f   :  { %16492 = vst [vmem:[#allocation393_spill] sm:$0xff] %v11466_v16  ;;  %16493 = vst [vmem:[#allocation394_spill] sm:$0xff] %v11468_v59 }
 0x922   :  { %v11470_v4 = vpop.permute.xlu1 %4095  ;;  %v11472_v6 = vpop.permute.xlu0 %4093 }
 0x923   :  { %16494 = vst [vmem:[#allocation395_spill] sm:$0xff] %v11470_v4  ;;  %16495 = vst [vmem:[#allocation396_spill] sm:$0xff] %v11472_v6 }
 0x926   :  { %v11474_v3 = vpop.permute.xlu1 %4099  ;;  %v11476_v11 = vpop.permute.xlu0 %4097 }
 0x927   :  { %16496 = vst [vmem:[#allocation397_spill] sm:$0xff] %v11474_v3  ;;  %16497 = vst [vmem:[#allocation398_spill] sm:$0xff] %v11476_v11 }
 0x92a   :  { %v11478_v60 = vpop.permute.xlu1 %4103  ;;  %v11480_v24 = vpop.permute.xlu0 %4101 }
 0x92b   :  { %16498 = vst [vmem:[#allocation399_spill] sm:$0xff] %v11478_v60  ;;  %16499 = vst [vmem:[#allocation400_spill] sm:$0xff] %v11480_v24 }
 0x92e   :  { %v11482_v15 = vpop.permute.xlu1 %4107  ;;  %v11484_v23 = vpop.permute.xlu0 %4105 }
 0x92f   :  { %16500 = vst [vmem:[#allocation401_spill] sm:$0xff] %v11482_v15  ;;  %16501 = vst [vmem:[#allocation402_spill] sm:$0xff] %v11484_v23 }
 0x932   :  { %v11486_v12 = vpop.permute.xlu1 %4111  ;;  %v11488_v16 = vpop.permute.xlu0 %4109 }
 0x933   :  { %16502 = vst [vmem:[#allocation403_spill] sm:$0xff] %v11486_v12  ;;  %16503 = vst [vmem:[#allocation404_spill] sm:$0xff] %v11488_v16 }
 0x936   :  { %v11490_v59 = vpop.permute.xlu1 %4115  ;;  %v11492_v4 = vpop.permute.xlu0 %4113 }
 0x937   :  { %16504 = vst [vmem:[#allocation405_spill] sm:$0xff] %v11490_v59  ;;  %16505 = vst [vmem:[#allocation406_spill] sm:$0xff] %v11492_v4 }
 0x93a   :  { %v11494_v6 = vpop.permute.xlu1 %4119  ;;  %v11496_v3 = vpop.permute.xlu0 %4117 }
 0x93b   :  { %16506 = vst [vmem:[#allocation407_spill] sm:$0xff] %v11494_v6  ;;  %16507 = vst [vmem:[#allocation408_spill] sm:$0xff] %v11496_v3  ;;  %v11517_v3 = vld [vmem:[%s16010_s2 + $0x38] sm:$0xff] }
 0x947   :  { %v11498_v11 = vpop.permute.xlu1 %4244  ;;  %v11500_v60 = vpop.permute.xlu0 %4240 }
 0x948   :  { %16508 = vst [vmem:[#allocation409_spill] sm:$0xff] %v11498_v11  ;;  %16509 = vst [vmem:[#allocation410_spill] sm:$0xff] %v11500_v60 }
 0x94b   :  { %v11502_v24 = vpop.permute.xlu1 %4252  ;;  %v11504_v15 = vpop.permute.xlu0 %4248 }
 0x94c   :  { %16510 = vst [vmem:[#allocation411_spill] sm:$0xff] %v11502_v24  ;;  %16511 = vst [vmem:[#allocation412_spill] sm:$0xff] %v11504_v15  ;;  %v11522_v24 = vld [vmem:[%s16010_s2 + $0x30] sm:$0xff] }
 0x94f   :  { %v11506_v23 = vpop.permute.xlu1 %4260  ;;  %v11508_v12 = vpop.permute.xlu0 %4256 }
 0x950   :  { %16512 = vst [vmem:[#allocation413_spill] sm:$0xff] %v11506_v23  ;;  %16513 = vst [vmem:[#allocation414_spill] sm:$0xff] %v11508_v12 }
 0x953   :  { %v11510_v16 = vpop.permute.xlu1 %4268  ;;  %v11512_v59 = vpop.permute.xlu0 %4264 }
 0x954   :  { %16514 = vst [vmem:[#allocation415_spill] sm:$0xff] %v11510_v16  ;;  %16515 = vst [vmem:[#allocation416_spill] sm:$0xff] %v11512_v59 }
 0x957   :  { %v4386_v4 = vpop.permute.xlu0 %4385  ;;  %v4390_v12 = vpop.permute.xlu1 %4389 }
 0x958   :  { %v4417_v15 = vmul.f32 %v11517_v3, %v4386_v4  ;;  %v4416_v23 = vmul.f32 %v11522_v24, %v4386_v4  ;;  %v4419_v16 = vmul.f32 %v11517_v3, %v4390_v12  ;;  %v4418_v59 = vmul.f32 %v11522_v24, %v4390_v12 }
 0x95a   :  { %4482 = vrot.lane.b32.xlu1 %v4417_v15, %s9241_s10  ;;  %4480 = vrot.lane.b32.xlu0 %v4416_v23, %s9241_s10 }
 0x95b   :  { %v4394_v6 = vpop.permute.xlu0 %4393  ;;  %v4398_v37 = vpop.permute.xlu1 %4397 }
 0x95c   :  { %v4421_v11 = vmul.f32 %v11517_v3, %v4394_v6  ;;  %v4420_v60 = vmul.f32 %v11522_v24, %v4394_v6  ;;  %v4423_v15 = vmul.f32 %v11517_v3, %v4398_v37  ;;  %v4422_v23 = vmul.f32 %v11522_v24, %v4398_v37 }
 0x95e   :  { %4486 = vrot.lane.b32.xlu1 %v4419_v16, %s9241_s10  ;;  %4484 = vrot.lane.b32.xlu0 %v4418_v59, %s9241_s10 }
 0x95f   :  { %v4402_v41 = vpop.permute.xlu0 %4401  ;;  %v4406_v19 = vpop.permute.xlu1 %4405 }
 0x960   :  { %v4425_v16 = vmul.f32 %v11517_v3, %v4402_v41  ;;  %v4424_v59 = vmul.f32 %v11522_v24, %v4402_v41 }
 0x962   :  { %4490 = vrot.lane.b32.xlu1 %v4421_v11, %s9241_s10  ;;  %4488 = vrot.lane.b32.xlu0 %v4420_v60, %s9241_s10  ;;  %v4427_v11 = vmul.f32 %v11517_v3, %v4406_v19  ;;  %v4426_v60 = vmul.f32 %v11522_v24, %v4406_v19 }
 0x963   :  { %v4410_v20 = vpop.permute.xlu0 %4409  ;;  %v4414_v38 = vpop.permute.xlu1 %4413 }
 0x966   :  { %4494 = vrot.lane.b32.xlu1 %v4423_v15, %s9241_s10  ;;  %4492 = vrot.lane.b32.xlu0 %v4422_v23, %s9241_s10  ;;  %v4429_v15 = vmul.f32 %v11517_v3, %v4410_v20  ;;  %v4428_v23 = vmul.f32 %v11522_v24, %v4410_v20 }
 0x96a   :  { %4498 = vrot.lane.b32.xlu1 %v4425_v16, %s9241_s10  ;;  %4496 = vrot.lane.b32.xlu0 %v4424_v59, %s9241_s10  ;;  %v4431_v16 = vmul.f32 %v11517_v3, %v4414_v38  ;;  %v4430_v59 = vmul.f32 %v11522_v24, %v4414_v38 }
 0x96e   :  { %4502 = vrot.lane.b32.xlu1 %v4427_v11, %s9241_s10  ;;  %4500 = vrot.lane.b32.xlu0 %v4426_v60, %s9241_s10  ;;  %v11559_v11 = vld [vmem:[%s16010_s2 + $0x98] sm:$0xff]  ;;  %v11564_v60 = vld [vmem:[%s16010_s2 + $0x90] sm:$0xff] }
 0x96f   :  { %v4437_v42 = vmul.f32 %v11559_v11, %v4394_v6  ;;  %v4436_v5 = vmul.f32 %v11564_v60, %v4394_v6  ;;  %v4444_v6 = vmul.f32 %v11564_v60, %v4410_v20 }
 0x972   :  { %4506 = vrot.lane.b32.xlu1 %v4429_v15, %s9241_s10  ;;  %4504 = vrot.lane.b32.xlu0 %v4428_v23, %s9241_s10  ;;  %v4433_v15 = vmul.f32 %v11559_v11, %v4386_v4  ;;  %v4432_v23 = vmul.f32 %v11564_v60, %v4386_v4  ;;  %v4439_v4 = vmul.f32 %v11559_v11, %v4398_v37 }
 0x976   :  { %4510 = vrot.lane.b32.xlu1 %v4431_v16, %s9241_s10  ;;  %4508 = vrot.lane.b32.xlu0 %v4430_v59, %s9241_s10  ;;  %v4435_v16 = vmul.f32 %v11559_v11, %v4390_v12  ;;  %v4434_v59 = vmul.f32 %v11564_v60, %v4390_v12  ;;  %v4441_v12 = vmul.f32 %v11559_v11, %v4402_v41 }
 0x97a   :  { %4514 = vrot.lane.b32.xlu1 %v4433_v15, %s9241_s10  ;;  %4512 = vrot.lane.b32.xlu0 %v4432_v23, %s9241_s10  ;;  %v4438_v15 = vmul.f32 %v11564_v60, %v4398_v37  ;;  %v4440_v23 = vmul.f32 %v11564_v60, %v4402_v41  ;;  %v4445_v37 = vmul.f32 %v11559_v11, %v4410_v20  ;;  %v8886_v20 = vld [vmem:[%s16008_s0 + $0xa0] ss:$0 sm:$0xff] }
 0x97b   :  { %v4447_v41 = vmul.f32 %v11559_v11, %v4414_v38 }
 0x97e   :  { %4518 = vrot.lane.b32.xlu1 %v4435_v16, %s9241_s10  ;;  %4516 = vrot.lane.b32.xlu0 %v4434_v59, %s9241_s10  ;;  %v4446_v16 = vmul.f32 %v11564_v60, %v4414_v38  ;;  %v8889_v59 = vld [vmem:[%s16008_s0 + $0xa3] ss:$0 sm:$0xff]  ;;  %v8888_v38 = vld [vmem:[%s16008_s0 + $0xa2] ss:$0 sm:$0xff] }
 0x982   :  { %4522 = vrot.lane.b32.xlu1 %v4437_v42, %s9241_s10  ;;  %4520 = vrot.lane.b32.xlu0 %v4436_v5, %s9241_s10  ;;  %v4443_v42 = vmul.f32 %v11559_v11, %v4406_v19  ;;  %v4442_v5 = vmul.f32 %v11564_v60, %v4406_v19  ;;  %v8887_v19 = vld [vmem:[%s16008_s0 + $0xa1] ss:$0 sm:$0xff] }
 0x986   :  { %4526 = vrot.lane.b32.xlu1 %v4439_v4, %s9241_s10  ;;  %4524 = vrot.lane.b32.xlu0 %v4438_v15, %s9241_s10  ;;  %v8891_v4 = vld [vmem:[%s16008_s0 + $0xa5] ss:$0 sm:$0xff]  ;;  %v8890_v15 = vld [vmem:[%s16008_s0 + $0xa4] ss:$0 sm:$0xff] }
 0x98a   :  { %4530 = vrot.lane.b32.xlu1 %v4441_v12, %s9241_s10  ;;  %4528 = vrot.lane.b32.xlu0 %v4440_v23, %s9241_s10  ;;  %v8893_v12 = vld [vmem:[%s16008_s0 + $0xa7] ss:$0 sm:$0xff]  ;;  %v8892_v23 = vld [vmem:[%s16008_s0 + $0xa6] ss:$0 sm:$0xff] }
 0x98e   :  { %4534 = vrot.lane.b32.xlu1 %v4443_v42, %s9241_s10  ;;  %4532 = vrot.lane.b32.xlu0 %v4442_v5, %s9241_s10 }
 0x992   :  { %4538 = vrot.lane.b32.xlu1 %v4445_v37, %s9241_s10  ;;  %4536 = vrot.lane.b32.xlu0 %v4444_v6, %s9241_s10 }
 0x996   :  { %4542 = vrot.lane.b32.xlu1 %v4447_v41, %s9241_s10  ;;  %4540 = vrot.lane.b32.xlu0 %v4446_v16, %s9241_s10 }
 0x99a   :  { %4662 = vperm.xlu1 %9169, %v8887_v19   ;;  %4658 = vperm.xlu0 %9168, %v8886_v20  }
 0x99e   :  { %4670 = vperm.xlu1 %9169, %v8889_v59   ;;  %4666 = vperm.xlu0 %9168, %v8888_v38  }
 0x9a2   :  { %4678 = vperm.xlu1 %9169, %v8891_v4   ;;  %4674 = vperm.xlu0 %9168, %v8890_v15  }
 0x9a6   :  { %4686 = vperm.xlu1 %9169, %v8893_v12   ;;  %4682 = vperm.xlu0 %9168, %v8892_v23  }
 0x9cc   :  { %v11622_v42 = vpop.permute.xlu1 %4482  ;;  %v11624_v5 = vpop.permute.xlu0 %4480 }
 0x9cd   :  { %16516 = vst [vmem:[#allocation417_spill] sm:$0xff] %v11622_v42  ;;  %16517 = vst [vmem:[#allocation418_spill] sm:$0xff] %v11624_v5 }
 0x9d0   :  { %v11626_v37 = vpop.permute.xlu1 %4486  ;;  %v11628_v6 = vpop.permute.xlu0 %4484 }
 0x9d1   :  { %16518 = vst [vmem:[#allocation419_spill] sm:$0xff] %v11626_v37  ;;  %16519 = vst [vmem:[#allocation420_spill] sm:$0xff] %v11628_v6 }
 0x9d4   :  { %v11630_v41 = vpop.permute.xlu1 %4490  ;;  %v11632_v16 = vpop.permute.xlu0 %4488 }
 0x9d5   :  { %16520 = vst [vmem:[#allocation421_spill] sm:$0xff] %v11630_v41  ;;  %16521 = vst [vmem:[#allocation422_spill] sm:$0xff] %v11632_v16 }
 0x9d8   :  { %v11634_v19 = vpop.permute.xlu1 %4494  ;;  %v11636_v20 = vpop.permute.xlu0 %4492 }
 0x9d9   :  { %16522 = vst [vmem:[#allocation423_spill] sm:$0xff] %v11634_v19  ;;  %16523 = vst [vmem:[#allocation424_spill] sm:$0xff] %v11636_v20 }
 0x9dc   :  { %v11638_v59 = vpop.permute.xlu1 %4498  ;;  %v11640_v38 = vpop.permute.xlu0 %4496 }
 0x9dd   :  { %16524 = vst [vmem:[#allocation425_spill] sm:$0xff] %v11638_v59  ;;  %16525 = vst [vmem:[#allocation426_spill] sm:$0xff] %v11640_v38 }
 0x9e0   :  { %v11642_v4 = vpop.permute.xlu1 %4502  ;;  %v11644_v15 = vpop.permute.xlu0 %4500 }
 0x9e1   :  { %16526 = vst [vmem:[#allocation427_spill] sm:$0xff] %v11642_v4  ;;  %16527 = vst [vmem:[#allocation428_spill] sm:$0xff] %v11644_v15 }
 0x9e4   :  { %v11646_v12 = vpop.permute.xlu1 %4506  ;;  %v11648_v23 = vpop.permute.xlu0 %4504 }
 0x9e5   :  { %16528 = vst [vmem:[#allocation429_spill] sm:$0xff] %v11646_v12  ;;  %16529 = vst [vmem:[#allocation430_spill] sm:$0xff] %v11648_v23 }
 0x9e8   :  { %v11650_v6 = vpop.permute.xlu1 %4510  ;;  %v11652_v41 = vpop.permute.xlu0 %4508 }
 0x9e9   :  { %16530 = vst [vmem:[#allocation431_spill] sm:$0xff] %v11650_v6  ;;  %16531 = vst [vmem:[#allocation432_spill] sm:$0xff] %v11652_v41 }
 0x9ec   :  { %v11654_v16 = vpop.permute.xlu1 %4514  ;;  %v11656_v19 = vpop.permute.xlu0 %4512 }
 0x9ed   :  { %16532 = vst [vmem:[#allocation433_spill] sm:$0xff] %v11654_v16  ;;  %16533 = vst [vmem:[#allocation434_spill] sm:$0xff] %v11656_v19 }
 0x9f0   :  { %v11658_v20 = vpop.permute.xlu1 %4518  ;;  %v11660_v59 = vpop.permute.xlu0 %4516 }
 0x9f1   :  { %16534 = vst [vmem:[#allocation435_spill] sm:$0xff] %v11658_v20  ;;  %16535 = vst [vmem:[#allocation436_spill] sm:$0xff] %v11660_v59 }
 0x9f4   :  { %v11662_v38 = vpop.permute.xlu0 %4520  ;;  %v11664_v4 = vpop.permute.xlu1 %4522 }
 0x9f5   :  { %16536 = vst [vmem:[#allocation437_spill] sm:$0xff] %v11662_v38  ;;  %16537 = vst [vmem:[#allocation438_spill] sm:$0xff] %v11664_v4 }
 0x9f8   :  { %v11666_v15 = vpop.permute.xlu0 %4524  ;;  %v11668_v12 = vpop.permute.xlu1 %4526 }
 0x9f9   :  { %16538 = vst [vmem:[#allocation439_spill] sm:$0xff] %v11666_v15  ;;  %16539 = vst [vmem:[#allocation440_spill] sm:$0xff] %v11668_v12 }
 0x9fc   :  { %v11670_v23 = vpop.permute.xlu0 %4528  ;;  %v11672_v6 = vpop.permute.xlu1 %4530 }
 0x9fd   :  { %16540 = vst [vmem:[#allocation441_spill] sm:$0xff] %v11670_v23  ;;  %16541 = vst [vmem:[#allocation442_spill] sm:$0xff] %v11672_v6 }
 0xa00   :  { %v11674_v41 = vpop.permute.xlu0 %4532  ;;  %v11676_v16 = vpop.permute.xlu1 %4534 }
 0xa01   :  { %16542 = vst [vmem:[#allocation443_spill] sm:$0xff] %v11674_v41  ;;  %16543 = vst [vmem:[#allocation444_spill] sm:$0xff] %v11676_v16 }
 0xa04   :  { %v11678_v19 = vpop.permute.xlu0 %4536  ;;  %v11680_v20 = vpop.permute.xlu1 %4538 }
 0xa05   :  { %16544 = vst [vmem:[#allocation445_spill] sm:$0xff] %v11678_v19  ;;  %16545 = vst [vmem:[#allocation446_spill] sm:$0xff] %v11680_v20 }
 0xa08   :  { %v11682_v59 = vpop.permute.xlu0 %4540  ;;  %v11684_v38 = vpop.permute.xlu1 %4542 }
 0xa09   :  { %16546 = vst [vmem:[#allocation447_spill] sm:$0xff] %v11682_v59  ;;  %16547 = vst [vmem:[#allocation448_spill] sm:$0xff] %v11684_v38 }
 0xa15   :  { %v4659_v4 = vpop.permute.xlu0 %4658  ;;  %v4663_v23 = vpop.permute.xlu1 %4662 }
 0xa16   :  { %v4690_v15 = vmul.f32 %v11517_v3, %v4659_v4  ;;  %v4689_v12 = vmul.f32 %v11522_v24, %v4659_v4  ;;  %v4692_v41 = vmul.f32 %v11517_v3, %v4663_v23  ;;  %v4691_v19 = vmul.f32 %v11522_v24, %v4663_v23 }
 0xa18   :  { %4755 = vrot.lane.b32.xlu1 %v4690_v15, %s9242_s15  ;;  %4753 = vrot.lane.b32.xlu0 %v4689_v12, %s9242_s15 }
 0xa19   :  { %v4667_v16 = vpop.permute.xlu0 %4666  ;;  %v4671_v20 = vpop.permute.xlu1 %4670 }
 0xa1a   :  { %v4694_v59 = vmul.f32 %v11517_v3, %v4667_v16  ;;  %v4693_v38 = vmul.f32 %v11522_v24, %v4667_v16  ;;  %v4696_v15 = vmul.f32 %v11517_v3, %v4671_v20  ;;  %v4695_v12 = vmul.f32 %v11522_v24, %v4671_v20 }
 0xa1c   :  { %4759 = vrot.lane.b32.xlu1 %v4692_v41, %s9242_s15  ;;  %4757 = vrot.lane.b32.xlu0 %v4691_v19, %s9242_s15 }
 0xa1d   :  { %v4675_v6 = vpop.permute.xlu0 %4674  ;;  %v4679_v37 = vpop.permute.xlu1 %4678 }
 0xa1e   :  { %v4698_v41 = vmul.f32 %v11517_v3, %v4675_v6  ;;  %v4697_v19 = vmul.f32 %v11522_v24, %v4675_v6 }
 0xa20   :  { %4763 = vrot.lane.b32.xlu1 %v4694_v59, %s9242_s15  ;;  %4761 = vrot.lane.b32.xlu0 %v4693_v38, %s9242_s15  ;;  %v4700_v59 = vmul.f32 %v11517_v3, %v4679_v37  ;;  %v4699_v38 = vmul.f32 %v11522_v24, %v4679_v37 }
 0xa21   :  { %v4683_v5 = vpop.permute.xlu0 %4682  ;;  %v4687_v42 = vpop.permute.xlu1 %4686 }
 0xa24   :  { %4767 = vrot.lane.b32.xlu1 %v4696_v15, %s9242_s15  ;;  %4765 = vrot.lane.b32.xlu0 %v4695_v12, %s9242_s15  ;;  %v4702_v15 = vmul.f32 %v11517_v3, %v4683_v5  ;;  %v4701_v12 = vmul.f32 %v11522_v24, %v4683_v5 }
 0xa28   :  { %4771 = vrot.lane.b32.xlu1 %v4698_v41, %s9242_s15  ;;  %4769 = vrot.lane.b32.xlu0 %v4697_v19, %s9242_s15  ;;  %v4704_v41 = vmul.f32 %v11517_v3, %v4687_v42  ;;  %v4703_v19 = vmul.f32 %v11522_v24, %v4687_v42  ;;  %v4710_v3 = vmul.f32 %v11559_v11, %v4667_v16 }
 0xa29   :  { %v4709_v24 = vmul.f32 %v11564_v60, %v4667_v16  ;;  %v4716_v16 = vmul.f32 %v11559_v11, %v4679_v37 }
 0xa2c   :  { %4775 = vrot.lane.b32.xlu1 %v4700_v59, %s9242_s15  ;;  %4773 = vrot.lane.b32.xlu0 %v4699_v38, %s9242_s15  ;;  %v4706_v59 = vmul.f32 %v11559_v11, %v4659_v4  ;;  %v4705_v38 = vmul.f32 %v11564_v60, %v4659_v4  ;;  %v4712_v4 = vmul.f32 %v11559_v11, %v4671_v20 }
 0xa30   :  { %4779 = vrot.lane.b32.xlu1 %v4702_v15, %s9242_s15  ;;  %4777 = vrot.lane.b32.xlu0 %v4701_v12, %s9242_s15  ;;  %v4708_v15 = vmul.f32 %v11559_v11, %v4663_v23  ;;  %v4707_v12 = vmul.f32 %v11564_v60, %v4663_v23  ;;  %v4714_v23 = vmul.f32 %v11559_v11, %v4675_v6 }
 0xa34   :  { %4783 = vrot.lane.b32.xlu1 %v4704_v41, %s9242_s15  ;;  %4781 = vrot.lane.b32.xlu0 %v4703_v19, %s9242_s15  ;;  %v4711_v41 = vmul.f32 %v11564_v60, %v4671_v20  ;;  %v4713_v19 = vmul.f32 %v11564_v60, %v4675_v6  ;;  %v4718_v20 = vmul.f32 %v11559_v11, %v4683_v5 }
 0xa35   :  { %v4720_v6 = vmul.f32 %v11559_v11, %v4687_v42  ;;  %v8909_v11 = vld [vmem:[%s16008_s0 + $0xab] ss:$0 sm:$0xff] }
 0xa38   :  { %4787 = vrot.lane.b32.xlu1 %v4706_v59, %s9242_s15  ;;  %4785 = vrot.lane.b32.xlu0 %v4705_v38, %s9242_s15  ;;  %v4715_v59 = vmul.f32 %v11564_v60, %v4679_v37  ;;  %v4717_v38 = vmul.f32 %v11564_v60, %v4683_v5  ;;  %v8907_v37 = vld [vmem:[%s16008_s0 + $0xa9] ss:$0 sm:$0xff]  ;;  %v8906_v5 = vld [vmem:[%s16008_s0 + $0xa8] ss:$0 sm:$0xff] }
 0xa3c   :  { %4791 = vrot.lane.b32.xlu1 %v4708_v15, %s9242_s15  ;;  %4789 = vrot.lane.b32.xlu0 %v4707_v12, %s9242_s15  ;;  %v4719_v15 = vmul.f32 %v11564_v60, %v4687_v42  ;;  %v8908_v60 = vld [vmem:[%s16008_s0 + $0xaa] ss:$0 sm:$0xff]  ;;  %v8911_v42 = vld [vmem:[%s16008_s0 + $0xad] ss:$0 sm:$0xff] }
 0xa3d   :  { %v8910_v12 = vld [vmem:[%s16008_s0 + $0xac] ss:$0 sm:$0xff] }
 0xa40   :  { %4795 = vrot.lane.b32.xlu1 %v4710_v3, %s9242_s15  ;;  %4793 = vrot.lane.b32.xlu0 %v4709_v24, %s9242_s15  ;;  %v8913_v3 = vld [vmem:[%s16008_s0 + $0xaf] ss:$0 sm:$0xff]  ;;  %v8912_v24 = vld [vmem:[%s16008_s0 + $0xae] ss:$0 sm:$0xff] }
 0xa44   :  { %4799 = vrot.lane.b32.xlu1 %v4712_v4, %s9242_s15  ;;  %4797 = vrot.lane.b32.xlu0 %v4711_v41, %s9242_s15  ;;  %v8923_v4 = vld [vmem:[%s16008_s0 + $0xb1] ss:$0 sm:$0xff]  ;;  %v8922_v41 = vld [vmem:[%s16008_s0 + $0xb0] ss:$0 sm:$0xff] }
 0xa48   :  { %4803 = vrot.lane.b32.xlu1 %v4714_v23, %s9242_s15  ;;  %4801 = vrot.lane.b32.xlu0 %v4713_v19, %s9242_s15  ;;  %v8925_v23 = vld [vmem:[%s16008_s0 + $0xb3] ss:$0 sm:$0xff]  ;;  %v8924_v19 = vld [vmem:[%s16008_s0 + $0xb2] ss:$0 sm:$0xff] }
 0xa4c   :  { %4807 = vrot.lane.b32.xlu1 %v4716_v16, %s9242_s15  ;;  %4805 = vrot.lane.b32.xlu0 %v4715_v59, %s9242_s15  ;;  %v8927_v16 = vld [vmem:[%s16008_s0 + $0xb5] ss:$0 sm:$0xff]  ;;  %v8926_v59 = vld [vmem:[%s16008_s0 + $0xb4] ss:$0 sm:$0xff] }
 0xa50   :  { %4811 = vrot.lane.b32.xlu1 %v4718_v20, %s9242_s15  ;;  %4809 = vrot.lane.b32.xlu0 %v4717_v38, %s9242_s15  ;;  %v8929_v20 = vld [vmem:[%s16008_s0 + $0xb7] ss:$0 sm:$0xff]  ;;  %v8928_v38 = vld [vmem:[%s16008_s0 + $0xb6] ss:$0 sm:$0xff] }
 0xa54   :  { %4815 = vrot.lane.b32.xlu1 %v4720_v6, %s9242_s15  ;;  %4813 = vrot.lane.b32.xlu0 %v4719_v15, %s9242_s15 }
 0xa58   :  { %4939 = vperm.xlu1 %9169, %v8907_v37   ;;  %4935 = vperm.xlu0 %9168, %v8906_v5  }
 0xa5c   :  { %4947 = vperm.xlu1 %9169, %v8909_v11   ;;  %4943 = vperm.xlu0 %9168, %v8908_v60  }
 0xa60   :  { %4955 = vperm.xlu1 %9169, %v8911_v42   ;;  %4951 = vperm.xlu0 %9168, %v8910_v12  }
 0xa64   :  { %4963 = vperm.xlu1 %9169, %v8913_v3   ;;  %4959 = vperm.xlu0 %9168, %v8912_v24  }
 0xa68   :  { %5084 = vperm.xlu1 %9169, %v8923_v4   ;;  %5080 = vperm.xlu0 %9168, %v8922_v41  }
 0xa6c   :  { %5092 = vperm.xlu1 %9169, %v8925_v23   ;;  %5088 = vperm.xlu0 %9168, %v8924_v19  }
 0xa70   :  { %5100 = vperm.xlu1 %9169, %v8927_v16   ;;  %5096 = vperm.xlu0 %9168, %v8926_v59  }
 0xa74   :  { %5108 = vperm.xlu1 %9169, %v8929_v20   ;;  %5104 = vperm.xlu0 %9168, %v8928_v38  }
 0xa8a   :  { %v11798_v6 = vpop.permute.xlu1 %4755  ;;  %v11800_v15 = vpop.permute.xlu0 %4753 }
 0xa8b   :  { %16548 = vst [vmem:[#allocation449_spill] sm:$0xff] %v11798_v6  ;;  %16549 = vst [vmem:[#allocation450_spill] sm:$0xff] %v11800_v15 }
 0xa8e   :  { %v11802_v37 = vpop.permute.xlu1 %4759  ;;  %v11804_v5 = vpop.permute.xlu0 %4757 }
 0xa8f   :  { %16550 = vst [vmem:[#allocation451_spill] sm:$0xff] %v11802_v37  ;;  %16551 = vst [vmem:[#allocation452_spill] sm:$0xff] %v11804_v5 }
 0xa92   :  { %v11806_v11 = vpop.permute.xlu1 %4763  ;;  %v11808_v60 = vpop.permute.xlu0 %4761 }
 0xa93   :  { %16552 = vst [vmem:[#allocation453_spill] sm:$0xff] %v11806_v11  ;;  %16553 = vst [vmem:[#allocation454_spill] sm:$0xff] %v11808_v60 }
 0xa96   :  { %v11810_v42 = vpop.permute.xlu1 %4767  ;;  %v11812_v12 = vpop.permute.xlu0 %4765 }
 0xa97   :  { %16554 = vst [vmem:[#allocation455_spill] sm:$0xff] %v11810_v42  ;;  %16555 = vst [vmem:[#allocation456_spill] sm:$0xff] %v11812_v12 }
 0xa9a   :  { %v11814_v3 = vpop.permute.xlu1 %4771  ;;  %v11816_v24 = vpop.permute.xlu0 %4769 }
 0xa9b   :  { %16556 = vst [vmem:[#allocation457_spill] sm:$0xff] %v11814_v3  ;;  %16557 = vst [vmem:[#allocation458_spill] sm:$0xff] %v11816_v24 }
 0xa9e   :  { %v11818_v4 = vpop.permute.xlu1 %4775  ;;  %v11820_v41 = vpop.permute.xlu0 %4773 }
 0xa9f   :  { %16558 = vst [vmem:[#allocation459_spill] sm:$0xff] %v11818_v4  ;;  %16559 = vst [vmem:[#allocation460_spill] sm:$0xff] %v11820_v41 }
 0xaa2   :  { %v11822_v23 = vpop.permute.xlu1 %4779  ;;  %v11824_v19 = vpop.permute.xlu0 %4777 }
 0xaa3   :  { %16560 = vst [vmem:[#allocation461_spill] sm:$0xff] %v11822_v23  ;;  %16561 = vst [vmem:[#allocation462_spill] sm:$0xff] %v11824_v19 }
 0xaa6   :  { %v11826_v16 = vpop.permute.xlu1 %4783  ;;  %v11828_v59 = vpop.permute.xlu0 %4781 }
 0xaa7   :  { %16562 = vst [vmem:[#allocation463_spill] sm:$0xff] %v11826_v16  ;;  %16563 = vst [vmem:[#allocation464_spill] sm:$0xff] %v11828_v59 }
 0xaaa   :  { %v11830_v20 = vpop.permute.xlu1 %4787  ;;  %v11832_v38 = vpop.permute.xlu0 %4785 }
 0xaab   :  { %16564 = vst [vmem:[#allocation465_spill] sm:$0xff] %v11830_v20  ;;  %16565 = vst [vmem:[#allocation466_spill] sm:$0xff] %v11832_v38 }
 0xaae   :  { %v11834_v12 = vpop.permute.xlu1 %4791  ;;  %v11836_v3 = vpop.permute.xlu0 %4789 }
 0xaaf   :  { %16566 = vst [vmem:[#allocation467_spill] sm:$0xff] %v11834_v12  ;;  %16567 = vst [vmem:[#allocation468_spill] sm:$0xff] %v11836_v3 }
 0xab2   :  { %v11838_v24 = vpop.permute.xlu1 %4795  ;;  %v11840_v4 = vpop.permute.xlu0 %4793 }
 0xab3   :  { %16568 = vst [vmem:[#allocation469_spill] sm:$0xff] %v11838_v24  ;;  %16569 = vst [vmem:[#allocation470_spill] sm:$0xff] %v11840_v4 }
 0xab6   :  { %v11842_v41 = vpop.permute.xlu1 %4799  ;;  %v11844_v23 = vpop.permute.xlu0 %4797 }
 0xab7   :  { %16570 = vst [vmem:[#allocation471_spill] sm:$0xff] %v11842_v41  ;;  %16571 = vst [vmem:[#allocation472_spill] sm:$0xff] %v11844_v23 }
 0xaba   :  { %v11846_v19 = vpop.permute.xlu1 %4803  ;;  %v11848_v16 = vpop.permute.xlu0 %4801 }
 0xabb   :  { %16572 = vst [vmem:[#allocation473_spill] sm:$0xff] %v11846_v19  ;;  %16573 = vst [vmem:[#allocation474_spill] sm:$0xff] %v11848_v16 }
 0xabe   :  { %v11850_v59 = vpop.permute.xlu1 %4807  ;;  %v11852_v20 = vpop.permute.xlu0 %4805 }
 0xabf   :  { %16574 = vst [vmem:[#allocation475_spill] sm:$0xff] %v11850_v59  ;;  %16575 = vst [vmem:[#allocation476_spill] sm:$0xff] %v11852_v20 }
 0xac2   :  { %v11854_v38 = vpop.permute.xlu1 %4811  ;;  %v11856_v12 = vpop.permute.xlu0 %4809 }
 0xac3   :  { %16576 = vst [vmem:[#allocation477_spill] sm:$0xff] %v11854_v38  ;;  %16577 = vst [vmem:[#allocation478_spill] sm:$0xff] %v11856_v12 }
 0xac6   :  { %v11858_v3 = vpop.permute.xlu1 %4815  ;;  %v11860_v24 = vpop.permute.xlu0 %4813 }
 0xac7   :  { %16578 = vst [vmem:[#allocation479_spill] sm:$0xff] %v11858_v3  ;;  %16579 = vst [vmem:[#allocation480_spill] sm:$0xff] %v11860_v24  ;;  %v11881_v24 = vld [vmem:[%s16010_s2 + $0x39] sm:$0xff] }
 0xad3   :  { %v11862_v4 = vpop.permute.xlu1 %4939  ;;  %v11864_v41 = vpop.permute.xlu0 %4935 }
 0xad4   :  { %16580 = vst [vmem:[#allocation481_spill] sm:$0xff] %v11862_v4  ;;  %16581 = vst [vmem:[#allocation482_spill] sm:$0xff] %v11864_v41 }
 0xad7   :  { %v11866_v23 = vpop.permute.xlu1 %4947  ;;  %v11868_v19 = vpop.permute.xlu0 %4943 }
 0xad8   :  { %16582 = vst [vmem:[#allocation483_spill] sm:$0xff] %v11866_v23  ;;  %16583 = vst [vmem:[#allocation484_spill] sm:$0xff] %v11868_v19  ;;  %v11886_v23 = vld [vmem:[%s16010_s2 + $0x31] sm:$0xff] }
 0xadb   :  { %v11870_v16 = vpop.permute.xlu1 %4955  ;;  %v11872_v59 = vpop.permute.xlu0 %4951 }
 0xadc   :  { %16584 = vst [vmem:[#allocation485_spill] sm:$0xff] %v11870_v16  ;;  %16585 = vst [vmem:[#allocation486_spill] sm:$0xff] %v11872_v59 }
 0xadf   :  { %v11874_v20 = vpop.permute.xlu1 %4963  ;;  %v11876_v38 = vpop.permute.xlu0 %4959 }
 0xae0   :  { %16586 = vst [vmem:[#allocation487_spill] sm:$0xff] %v11874_v20  ;;  %16587 = vst [vmem:[#allocation488_spill] sm:$0xff] %v11876_v38 }
 0xae3   :  { %v5081_v12 = vpop.permute.xlu0 %5080  ;;  %v5085_v59 = vpop.permute.xlu1 %5084 }
 0xae4   :  { %v5112_v19 = vmul.f32 %v11881_v24, %v5081_v12  ;;  %v5111_v16 = vmul.f32 %v11886_v23, %v5081_v12  ;;  %v5114_v20 = vmul.f32 %v11881_v24, %v5085_v59  ;;  %v5113_v38 = vmul.f32 %v11886_v23, %v5085_v59 }
 0xae6   :  { %5177 = vrot.lane.b32.xlu1 %v5112_v19, %s9241_s10  ;;  %5175 = vrot.lane.b32.xlu0 %v5111_v16, %s9241_s10 }
 0xae7   :  { %v5089_v4 = vpop.permute.xlu0 %5088  ;;  %v5093_v42 = vpop.permute.xlu1 %5092 }
 0xae8   :  { %v5116_v3 = vmul.f32 %v11881_v24, %v5089_v4  ;;  %v5115_v41 = vmul.f32 %v11886_v23, %v5089_v4  ;;  %v5118_v19 = vmul.f32 %v11881_v24, %v5093_v42  ;;  %v5117_v16 = vmul.f32 %v11886_v23, %v5093_v42 }
 0xaea   :  { %5181 = vrot.lane.b32.xlu1 %v5114_v20, %s9241_s10  ;;  %5179 = vrot.lane.b32.xlu0 %v5113_v38, %s9241_s10 }
 0xaeb   :  { %v5097_v60 = vpop.permute.xlu0 %5096  ;;  %v5101_v11 = vpop.permute.xlu1 %5100 }
 0xaec   :  { %v5120_v20 = vmul.f32 %v11881_v24, %v5097_v60  ;;  %v5119_v38 = vmul.f32 %v11886_v23, %v5097_v60 }
 0xaee   :  { %5185 = vrot.lane.b32.xlu1 %v5116_v3, %s9241_s10  ;;  %5183 = vrot.lane.b32.xlu0 %v5115_v41, %s9241_s10  ;;  %v5122_v3 = vmul.f32 %v11881_v24, %v5101_v11  ;;  %v5121_v41 = vmul.f32 %v11886_v23, %v5101_v11 }
 0xaef   :  { %v5105_v5 = vpop.permute.xlu0 %5104  ;;  %v5109_v37 = vpop.permute.xlu1 %5108 }
 0xaf2   :  { %5189 = vrot.lane.b32.xlu1 %v5118_v19, %s9241_s10  ;;  %5187 = vrot.lane.b32.xlu0 %v5117_v16, %s9241_s10  ;;  %v5124_v19 = vmul.f32 %v11881_v24, %v5105_v5  ;;  %v5123_v16 = vmul.f32 %v11886_v23, %v5105_v5 }
 0xaf6   :  { %5193 = vrot.lane.b32.xlu1 %v5120_v20, %s9241_s10  ;;  %5191 = vrot.lane.b32.xlu0 %v5119_v38, %s9241_s10  ;;  %v5126_v20 = vmul.f32 %v11881_v24, %v5109_v37  ;;  %v5125_v38 = vmul.f32 %v11886_v23, %v5109_v37 }
 0xafa   :  { %5197 = vrot.lane.b32.xlu1 %v5122_v3, %s9241_s10  ;;  %5195 = vrot.lane.b32.xlu0 %v5121_v41, %s9241_s10  ;;  %v11923_v3 = vld [vmem:[%s16010_s2 + $0x99] sm:$0xff]  ;;  %v11928_v41 = vld [vmem:[%s16010_s2 + $0x91] sm:$0xff] }
 0xafb   :  { %v5132_v15 = vmul.f32 %v11923_v3, %v5089_v4  ;;  %v5131_v6 = vmul.f32 %v11928_v41, %v5089_v4  ;;  %v5139_v4 = vmul.f32 %v11928_v41, %v5105_v5 }
 0xafe   :  { %5201 = vrot.lane.b32.xlu1 %v5124_v19, %s9241_s10  ;;  %5199 = vrot.lane.b32.xlu0 %v5123_v16, %s9241_s10  ;;  %v5128_v19 = vmul.f32 %v11923_v3, %v5081_v12  ;;  %v5127_v16 = vmul.f32 %v11928_v41, %v5081_v12  ;;  %v5134_v12 = vmul.f32 %v11923_v3, %v5093_v42 }
 0xb02   :  { %5205 = vrot.lane.b32.xlu1 %v5126_v20, %s9241_s10  ;;  %5203 = vrot.lane.b32.xlu0 %v5125_v38, %s9241_s10  ;;  %v5130_v20 = vmul.f32 %v11923_v3, %v5085_v59  ;;  %v5129_v38 = vmul.f32 %v11928_v41, %v5085_v59  ;;  %v5136_v59 = vmul.f32 %v11923_v3, %v5097_v60 }
 0xb06   :  { %5209 = vrot.lane.b32.xlu1 %v5128_v19, %s9241_s10  ;;  %5207 = vrot.lane.b32.xlu0 %v5127_v16, %s9241_s10  ;;  %v5133_v19 = vmul.f32 %v11928_v41, %v5093_v42  ;;  %v5135_v16 = vmul.f32 %v11928_v41, %v5097_v60  ;;  %v5140_v42 = vmul.f32 %v11923_v3, %v5105_v5  ;;  %v8938_v5 = vld [vmem:[%s16008_s0 + $0xb8] ss:$0 sm:$0xff] }
 0xb07   :  { %v5142_v60 = vmul.f32 %v11923_v3, %v5109_v37 }
 0xb0a   :  { %5213 = vrot.lane.b32.xlu1 %v5130_v20, %s9241_s10  ;;  %5211 = vrot.lane.b32.xlu0 %v5129_v38, %s9241_s10  ;;  %v5141_v20 = vmul.f32 %v11928_v41, %v5109_v37  ;;  %v8941_v38 = vld [vmem:[%s16008_s0 + $0xbb] ss:$0 sm:$0xff]  ;;  %v8940_v37 = vld [vmem:[%s16008_s0 + $0xba] ss:$0 sm:$0xff] }
 0xb0e   :  { %5217 = vrot.lane.b32.xlu1 %v5132_v15, %s9241_s10  ;;  %5215 = vrot.lane.b32.xlu0 %v5131_v6, %s9241_s10  ;;  %v5138_v15 = vmul.f32 %v11923_v3, %v5101_v11  ;;  %v5137_v6 = vmul.f32 %v11928_v41, %v5101_v11  ;;  %v8939_v11 = vld [vmem:[%s16008_s0 + $0xb9] ss:$0 sm:$0xff] }
 0xb12   :  { %5221 = vrot.lane.b32.xlu1 %v5134_v12, %s9241_s10  ;;  %5219 = vrot.lane.b32.xlu0 %v5133_v19, %s9241_s10  ;;  %v8943_v12 = vld [vmem:[%s16008_s0 + $0xbd] ss:$0 sm:$0xff]  ;;  %v8942_v19 = vld [vmem:[%s16008_s0 + $0xbc] ss:$0 sm:$0xff] }
 0xb16   :  { %5225 = vrot.lane.b32.xlu1 %v5136_v59, %s9241_s10  ;;  %5223 = vrot.lane.b32.xlu0 %v5135_v16, %s9241_s10  ;;  %v8945_v59 = vld [vmem:[%s16008_s0 + $0xbf] ss:$0 sm:$0xff]  ;;  %v8944_v16 = vld [vmem:[%s16008_s0 + $0xbe] ss:$0 sm:$0xff] }
 0xb1a   :  { %5229 = vrot.lane.b32.xlu1 %v5138_v15, %s9241_s10  ;;  %5227 = vrot.lane.b32.xlu0 %v5137_v6, %s9241_s10 }
 0xb1e   :  { %5233 = vrot.lane.b32.xlu1 %v5140_v42, %s9241_s10  ;;  %5231 = vrot.lane.b32.xlu0 %v5139_v4, %s9241_s10 }
 0xb22   :  { %5237 = vrot.lane.b32.xlu1 %v5142_v60, %s9241_s10  ;;  %5235 = vrot.lane.b32.xlu0 %v5141_v20, %s9241_s10 }
 0xb26   :  { %5357 = vperm.xlu1 %9169, %v8939_v11   ;;  %5353 = vperm.xlu0 %9168, %v8938_v5  }
 0xb2a   :  { %5365 = vperm.xlu1 %9169, %v8941_v38   ;;  %5361 = vperm.xlu0 %9168, %v8940_v37  }
 0xb2e   :  { %5373 = vperm.xlu1 %9169, %v8943_v12   ;;  %5369 = vperm.xlu0 %9168, %v8942_v19  }
 0xb32   :  { %5381 = vperm.xlu1 %9169, %v8945_v59   ;;  %5377 = vperm.xlu0 %9168, %v8944_v16  }
 0xb58   :  { %v11986_v15 = vpop.permute.xlu1 %5177  ;;  %v11988_v6 = vpop.permute.xlu0 %5175 }
 0xb59   :  { %16588 = vst [vmem:[#allocation489_spill] sm:$0xff] %v11986_v15  ;;  %16589 = vst [vmem:[#allocation490_spill] sm:$0xff] %v11988_v6 }
 0xb5c   :  { %v11990_v42 = vpop.permute.xlu1 %5181  ;;  %v11992_v4 = vpop.permute.xlu0 %5179 }
 0xb5d   :  { %16590 = vst [vmem:[#allocation491_spill] sm:$0xff] %v11990_v42  ;;  %16591 = vst [vmem:[#allocation492_spill] sm:$0xff] %v11992_v4 }
 0xb60   :  { %v11994_v60 = vpop.permute.xlu1 %5185  ;;  %v11996_v20 = vpop.permute.xlu0 %5183 }
 0xb61   :  { %16592 = vst [vmem:[#allocation493_spill] sm:$0xff] %v11994_v60  ;;  %16593 = vst [vmem:[#allocation494_spill] sm:$0xff] %v11996_v20 }
 0xb64   :  { %v11998_v11 = vpop.permute.xlu1 %5189  ;;  %v12000_v5 = vpop.permute.xlu0 %5187 }
 0xb65   :  { %16594 = vst [vmem:[#allocation495_spill] sm:$0xff] %v11998_v11  ;;  %16595 = vst [vmem:[#allocation496_spill] sm:$0xff] %v12000_v5 }
 0xb68   :  { %v12002_v38 = vpop.permute.xlu1 %5193  ;;  %v12004_v37 = vpop.permute.xlu0 %5191 }
 0xb69   :  { %16596 = vst [vmem:[#allocation497_spill] sm:$0xff] %v12002_v38  ;;  %16597 = vst [vmem:[#allocation498_spill] sm:$0xff] %v12004_v37 }
 0xb6c   :  { %v12006_v12 = vpop.permute.xlu1 %5197  ;;  %v12008_v19 = vpop.permute.xlu0 %5195 }
 0xb6d   :  { %16598 = vst [vmem:[#allocation499_spill] sm:$0xff] %v12006_v12  ;;  %16599 = vst [vmem:[#allocation500_spill] sm:$0xff] %v12008_v19 }
 0xb70   :  { %v12010_v59 = vpop.permute.xlu1 %5201  ;;  %v12012_v16 = vpop.permute.xlu0 %5199 }
 0xb71   :  { %16600 = vst [vmem:[#allocation501_spill] sm:$0xff] %v12010_v59  ;;  %16601 = vst [vmem:[#allocation502_spill] sm:$0xff] %v12012_v16 }
 0xb74   :  { %v12014_v4 = vpop.permute.xlu1 %5205  ;;  %v12016_v60 = vpop.permute.xlu0 %5203 }
 0xb75   :  { %16602 = vst [vmem:[#allocation503_spill] sm:$0xff] %v12014_v4  ;;  %16603 = vst [vmem:[#allocation504_spill] sm:$0xff] %v12016_v60 }
 0xb78   :  { %v12018_v20 = vpop.permute.xlu1 %5209  ;;  %v12020_v11 = vpop.permute.xlu0 %5207 }
 0xb79   :  { %16604 = vst [vmem:[#allocation505_spill] sm:$0xff] %v12018_v20  ;;  %16605 = vst [vmem:[#allocation506_spill] sm:$0xff] %v12020_v11 }
 0xb7c   :  { %v12022_v5 = vpop.permute.xlu1 %5213  ;;  %v12024_v38 = vpop.permute.xlu0 %5211 }
 0xb7d   :  { %16606 = vst [vmem:[#allocation507_spill] sm:$0xff] %v12022_v5  ;;  %16607 = vst [vmem:[#allocation508_spill] sm:$0xff] %v12024_v38 }
 0xb80   :  { %v12026_v37 = vpop.permute.xlu0 %5215  ;;  %v12028_v12 = vpop.permute.xlu1 %5217 }
 0xb81   :  { %16608 = vst [vmem:[#allocation509_spill] sm:$0xff] %v12026_v37  ;;  %16609 = vst [vmem:[#allocation510_spill] sm:$0xff] %v12028_v12 }
 0xb84   :  { %v12030_v19 = vpop.permute.xlu0 %5219  ;;  %v12032_v59 = vpop.permute.xlu1 %5221 }
 0xb85   :  { %16610 = vst [vmem:[#allocation511_spill] sm:$0xff] %v12030_v19  ;;  %16611 = vst [vmem:[#allocation512_spill] sm:$0xff] %v12032_v59 }
 0xb88   :  { %v12034_v16 = vpop.permute.xlu0 %5223  ;;  %v12036_v4 = vpop.permute.xlu1 %5225 }
 0xb89   :  { %16612 = vst [vmem:[#allocation513_spill] sm:$0xff] %v12034_v16  ;;  %16613 = vst [vmem:[#allocation514_spill] sm:$0xff] %v12036_v4 }
 0xb8c   :  { %v12038_v60 = vpop.permute.xlu0 %5227  ;;  %v12040_v20 = vpop.permute.xlu1 %5229 }
 0xb8d   :  { %16614 = vst [vmem:[#allocation515_spill] sm:$0xff] %v12038_v60  ;;  %16615 = vst [vmem:[#allocation516_spill] sm:$0xff] %v12040_v20 }
 0xb90   :  { %v12042_v11 = vpop.permute.xlu0 %5231  ;;  %v12044_v5 = vpop.permute.xlu1 %5233 }
 0xb91   :  { %16616 = vst [vmem:[#allocation517_spill] sm:$0xff] %v12042_v11  ;;  %16617 = vst [vmem:[#allocation518_spill] sm:$0xff] %v12044_v5 }
 0xb94   :  { %v12046_v38 = vpop.permute.xlu0 %5235  ;;  %v12048_v37 = vpop.permute.xlu1 %5237 }
 0xb95   :  { %16618 = vst [vmem:[#allocation519_spill] sm:$0xff] %v12046_v38  ;;  %16619 = vst [vmem:[#allocation520_spill] sm:$0xff] %v12048_v37 }
 0xba1   :  { %v5354_v12 = vpop.permute.xlu0 %5353  ;;  %v5358_v16 = vpop.permute.xlu1 %5357 }
 0xba2   :  { %v5385_v19 = vmul.f32 %v11881_v24, %v5354_v12  ;;  %v5384_v59 = vmul.f32 %v11886_v23, %v5354_v12  ;;  %v5387_v60 = vmul.f32 %v11881_v24, %v5358_v16  ;;  %v5386_v11 = vmul.f32 %v11886_v23, %v5358_v16 }
 0xba4   :  { %5450 = vrot.lane.b32.xlu1 %v5385_v19, %s9242_s15  ;;  %5448 = vrot.lane.b32.xlu0 %v5384_v59, %s9242_s15 }
 0xba5   :  { %v5362_v20 = vpop.permute.xlu0 %5361  ;;  %v5366_v5 = vpop.permute.xlu1 %5365 }
 0xba6   :  { %v5389_v38 = vmul.f32 %v11881_v24, %v5362_v20  ;;  %v5388_v37 = vmul.f32 %v11886_v23, %v5362_v20  ;;  %v5391_v19 = vmul.f32 %v11881_v24, %v5366_v5  ;;  %v5390_v59 = vmul.f32 %v11886_v23, %v5366_v5 }
 0xba8   :  { %5454 = vrot.lane.b32.xlu1 %v5387_v60, %s9242_s15  ;;  %5452 = vrot.lane.b32.xlu0 %v5386_v11, %s9242_s15 }
 0xba9   :  { %v5370_v4 = vpop.permute.xlu0 %5369  ;;  %v5374_v42 = vpop.permute.xlu1 %5373 }
 0xbaa   :  { %v5393_v60 = vmul.f32 %v11881_v24, %v5370_v4  ;;  %v5392_v11 = vmul.f32 %v11886_v23, %v5370_v4 }
 0xbac   :  { %5458 = vrot.lane.b32.xlu1 %v5389_v38, %s9242_s15  ;;  %5456 = vrot.lane.b32.xlu0 %v5388_v37, %s9242_s15  ;;  %v5395_v38 = vmul.f32 %v11881_v24, %v5374_v42  ;;  %v5394_v37 = vmul.f32 %v11886_v23, %v5374_v42 }
 0xbad   :  { %v5378_v6 = vpop.permute.xlu0 %5377  ;;  %v5382_v15 = vpop.permute.xlu1 %5381 }
 0xbb0   :  { %5462 = vrot.lane.b32.xlu1 %v5391_v19, %s9242_s15  ;;  %5460 = vrot.lane.b32.xlu0 %v5390_v59, %s9242_s15  ;;  %v5397_v19 = vmul.f32 %v11881_v24, %v5378_v6  ;;  %v5396_v59 = vmul.f32 %v11886_v23, %v5378_v6 }
 0xbb4   :  { %5466 = vrot.lane.b32.xlu1 %v5393_v60, %s9242_s15  ;;  %5464 = vrot.lane.b32.xlu0 %v5392_v11, %s9242_s15  ;;  %v5399_v60 = vmul.f32 %v11881_v24, %v5382_v15  ;;  %v5398_v11 = vmul.f32 %v11886_v23, %v5382_v15  ;;  %v5405_v24 = vmul.f32 %v11923_v3, %v5362_v20 }
 0xbb5   :  { %v5404_v23 = vmul.f32 %v11928_v41, %v5362_v20  ;;  %v5411_v20 = vmul.f32 %v11923_v3, %v5374_v42 }
 0xbb8   :  { %5470 = vrot.lane.b32.xlu1 %v5395_v38, %s9242_s15  ;;  %5468 = vrot.lane.b32.xlu0 %v5394_v37, %s9242_s15  ;;  %v5401_v38 = vmul.f32 %v11923_v3, %v5354_v12  ;;  %v5400_v37 = vmul.f32 %v11928_v41, %v5354_v12  ;;  %v5407_v12 = vmul.f32 %v11923_v3, %v5366_v5 }
 0xbbc   :  { %5474 = vrot.lane.b32.xlu1 %v5397_v19, %s9242_s15  ;;  %5472 = vrot.lane.b32.xlu0 %v5396_v59, %s9242_s15  ;;  %v5403_v19 = vmul.f32 %v11923_v3, %v5358_v16  ;;  %v5402_v59 = vmul.f32 %v11928_v41, %v5358_v16  ;;  %v5409_v16 = vmul.f32 %v11923_v3, %v5370_v4 }
 0xbc0   :  { %5478 = vrot.lane.b32.xlu1 %v5399_v60, %s9242_s15  ;;  %5476 = vrot.lane.b32.xlu0 %v5398_v11, %s9242_s15  ;;  %v5406_v60 = vmul.f32 %v11928_v41, %v5366_v5  ;;  %v5408_v11 = vmul.f32 %v11928_v41, %v5370_v4  ;;  %v5413_v5 = vmul.f32 %v11923_v3, %v5378_v6 }
 0xbc1   :  { %v5415_v4 = vmul.f32 %v11923_v3, %v5382_v15  ;;  %v8961_v3 = vld [vmem:[%s16008_s0 + $0xc3] ss:$0 sm:$0xff] }
 0xbc4   :  { %5482 = vrot.lane.b32.xlu1 %v5401_v38, %s9242_s15  ;;  %5480 = vrot.lane.b32.xlu0 %v5400_v37, %s9242_s15  ;;  %v5410_v38 = vmul.f32 %v11928_v41, %v5374_v42  ;;  %v5412_v37 = vmul.f32 %v11928_v41, %v5378_v6  ;;  %v8959_v42 = vld [vmem:[%s16008_s0 + $0xc1] ss:$0 sm:$0xff]  ;;  %v8958_v6 = vld [vmem:[%s16008_s0 + $0xc0] ss:$0 sm:$0xff] }
 0xbc8   :  { %5486 = vrot.lane.b32.xlu1 %v5403_v19, %s9242_s15  ;;  %5484 = vrot.lane.b32.xlu0 %v5402_v59, %s9242_s15  ;;  %v5414_v19 = vmul.f32 %v11928_v41, %v5382_v15  ;;  %v8960_v41 = vld [vmem:[%s16008_s0 + $0xc2] ss:$0 sm:$0xff]  ;;  %v8963_v15 = vld [vmem:[%s16008_s0 + $0xc5] ss:$0 sm:$0xff] }
 0xbc9   :  { %v8962_v59 = vld [vmem:[%s16008_s0 + $0xc4] ss:$0 sm:$0xff] }
 0xbcc   :  { %5490 = vrot.lane.b32.xlu1 %v5405_v24, %s9242_s15  ;;  %5488 = vrot.lane.b32.xlu0 %v5404_v23, %s9242_s15  ;;  %v8965_v24 = vld [vmem:[%s16008_s0 + $0xc7] ss:$0 sm:$0xff]  ;;  %v8964_v23 = vld [vmem:[%s16008_s0 + $0xc6] ss:$0 sm:$0xff] }
 0xbd0   :  { %5494 = vrot.lane.b32.xlu1 %v5407_v12, %s9242_s15  ;;  %5492 = vrot.lane.b32.xlu0 %v5406_v60, %s9242_s15  ;;  %v8975_v12 = vld [vmem:[%s16008_s0 + $0xc9] ss:$0 sm:$0xff]  ;;  %v8974_v60 = vld [vmem:[%s16008_s0 + $0xc8] ss:$0 sm:$0xff] }
 0xbd4   :  { %5498 = vrot.lane.b32.xlu1 %v5409_v16, %s9242_s15  ;;  %5496 = vrot.lane.b32.xlu0 %v5408_v11, %s9242_s15  ;;  %v8977_v16 = vld [vmem:[%s16008_s0 + $0xcb] ss:$0 sm:$0xff]  ;;  %v8976_v11 = vld [vmem:[%s16008_s0 + $0xca] ss:$0 sm:$0xff] }
 0xbd8   :  { %5502 = vrot.lane.b32.xlu1 %v5411_v20, %s9242_s15  ;;  %5500 = vrot.lane.b32.xlu0 %v5410_v38, %s9242_s15  ;;  %v8979_v20 = vld [vmem:[%s16008_s0 + $0xcd] ss:$0 sm:$0xff]  ;;  %v8978_v38 = vld [vmem:[%s16008_s0 + $0xcc] ss:$0 sm:$0xff] }
 0xbdc   :  { %5506 = vrot.lane.b32.xlu1 %v5413_v5, %s9242_s15  ;;  %5504 = vrot.lane.b32.xlu0 %v5412_v37, %s9242_s15  ;;  %v8981_v5 = vld [vmem:[%s16008_s0 + $0xcf] ss:$0 sm:$0xff]  ;;  %v8980_v37 = vld [vmem:[%s16008_s0 + $0xce] ss:$0 sm:$0xff] }
 0xbe0   :  { %5510 = vrot.lane.b32.xlu1 %v5415_v4, %s9242_s15  ;;  %5508 = vrot.lane.b32.xlu0 %v5414_v19, %s9242_s15 }
 0xbe4   :  { %5634 = vperm.xlu1 %9169, %v8959_v42   ;;  %5630 = vperm.xlu0 %9168, %v8958_v6  }
 0xbe8   :  { %5642 = vperm.xlu1 %9169, %v8961_v3   ;;  %5638 = vperm.xlu0 %9168, %v8960_v41  }
 0xbec   :  { %5650 = vperm.xlu1 %9169, %v8963_v15   ;;  %5646 = vperm.xlu0 %9168, %v8962_v59  }
 0xbf0   :  { %5658 = vperm.xlu1 %9169, %v8965_v24   ;;  %5654 = vperm.xlu0 %9168, %v8964_v23  }
 0xbf4   :  { %5779 = vperm.xlu1 %9169, %v8975_v12   ;;  %5775 = vperm.xlu0 %9168, %v8974_v60  }
 0xbf8   :  { %5787 = vperm.xlu1 %9169, %v8977_v16   ;;  %5783 = vperm.xlu0 %9168, %v8976_v11  }
 0xbfc   :  { %5795 = vperm.xlu1 %9169, %v8979_v20   ;;  %5791 = vperm.xlu0 %9168, %v8978_v38  }
 0xc00   :  { %5803 = vperm.xlu1 %9169, %v8981_v5   ;;  %5799 = vperm.xlu0 %9168, %v8980_v37  }
 0xc16   :  { %v12162_v4 = vpop.permute.xlu1 %5450  ;;  %v12164_v19 = vpop.permute.xlu0 %5448 }
 0xc17   :  { %16620 = vst [vmem:[#allocation521_spill] sm:$0xff] %v12162_v4  ;;  %16621 = vst [vmem:[#allocation522_spill] sm:$0xff] %v12164_v19 }
 0xc1a   :  { %v12166_v42 = vpop.permute.xlu1 %5454  ;;  %v12168_v6 = vpop.permute.xlu0 %5452 }
 0xc1b   :  { %16622 = vst [vmem:[#allocation523_spill] sm:$0xff] %v12166_v42  ;;  %16623 = vst [vmem:[#allocation524_spill] sm:$0xff] %v12168_v6 }
 0xc1e   :  { %v12170_v3 = vpop.permute.xlu1 %5458  ;;  %v12172_v41 = vpop.permute.xlu0 %5456 }
 0xc1f   :  { %16624 = vst [vmem:[#allocation525_spill] sm:$0xff] %v12170_v3  ;;  %16625 = vst [vmem:[#allocation526_spill] sm:$0xff] %v12172_v41 }
 0xc22   :  { %v12174_v15 = vpop.permute.xlu1 %5462  ;;  %v12176_v59 = vpop.permute.xlu0 %5460 }
 0xc23   :  { %16626 = vst [vmem:[#allocation527_spill] sm:$0xff] %v12174_v15  ;;  %16627 = vst [vmem:[#allocation528_spill] sm:$0xff] %v12176_v59 }
 0xc26   :  { %v12178_v24 = vpop.permute.xlu1 %5466  ;;  %v12180_v23 = vpop.permute.xlu0 %5464 }
 0xc27   :  { %16628 = vst [vmem:[#allocation529_spill] sm:$0xff] %v12178_v24  ;;  %16629 = vst [vmem:[#allocation530_spill] sm:$0xff] %v12180_v23 }
 0xc2a   :  { %v12182_v12 = vpop.permute.xlu1 %5470  ;;  %v12184_v60 = vpop.permute.xlu0 %5468 }
 0xc2b   :  { %16630 = vst [vmem:[#allocation531_spill] sm:$0xff] %v12182_v12  ;;  %16631 = vst [vmem:[#allocation532_spill] sm:$0xff] %v12184_v60 }
 0xc2e   :  { %v12186_v16 = vpop.permute.xlu1 %5474  ;;  %v12188_v11 = vpop.permute.xlu0 %5472 }
 0xc2f   :  { %16632 = vst [vmem:[#allocation533_spill] sm:$0xff] %v12186_v16  ;;  %16633 = vst [vmem:[#allocation534_spill] sm:$0xff] %v12188_v11 }
 0xc32   :  { %v12190_v20 = vpop.permute.xlu1 %5478  ;;  %v12192_v38 = vpop.permute.xlu0 %5476 }
 0xc33   :  { %16634 = vst [vmem:[#allocation535_spill] sm:$0xff] %v12190_v20  ;;  %16635 = vst [vmem:[#allocation536_spill] sm:$0xff] %v12192_v38 }
 0xc36   :  { %v12194_v5 = vpop.permute.xlu1 %5482  ;;  %v12196_v37 = vpop.permute.xlu0 %5480 }
 0xc37   :  { %16636 = vst [vmem:[#allocation537_spill] sm:$0xff] %v12194_v5  ;;  %16637 = vst [vmem:[#allocation538_spill] sm:$0xff] %v12196_v37 }
 0xc3a   :  { %v12198_v59 = vpop.permute.xlu1 %5486  ;;  %v12200_v24 = vpop.permute.xlu0 %5484 }
 0xc3b   :  { %16638 = vst [vmem:[#allocation539_spill] sm:$0xff] %v12198_v59  ;;  %16639 = vst [vmem:[#allocation540_spill] sm:$0xff] %v12200_v24 }
 0xc3e   :  { %v12202_v23 = vpop.permute.xlu1 %5490  ;;  %v12204_v12 = vpop.permute.xlu0 %5488 }
 0xc3f   :  { %16640 = vst [vmem:[#allocation541_spill] sm:$0xff] %v12202_v23  ;;  %16641 = vst [vmem:[#allocation542_spill] sm:$0xff] %v12204_v12 }
 0xc42   :  { %v12206_v60 = vpop.permute.xlu1 %5494  ;;  %v12208_v16 = vpop.permute.xlu0 %5492 }
 0xc43   :  { %16642 = vst [vmem:[#allocation543_spill] sm:$0xff] %v12206_v60  ;;  %16643 = vst [vmem:[#allocation544_spill] sm:$0xff] %v12208_v16 }
 0xc46   :  { %v12210_v11 = vpop.permute.xlu1 %5498  ;;  %v12212_v20 = vpop.permute.xlu0 %5496 }
 0xc47   :  { %16644 = vst [vmem:[#allocation545_spill] sm:$0xff] %v12210_v11  ;;  %16645 = vst [vmem:[#allocation546_spill] sm:$0xff] %v12212_v20 }
 0xc4a   :  { %v12214_v38 = vpop.permute.xlu1 %5502  ;;  %v12216_v5 = vpop.permute.xlu0 %5500 }
 0xc4b   :  { %16646 = vst [vmem:[#allocation547_spill] sm:$0xff] %v12214_v38  ;;  %16647 = vst [vmem:[#allocation548_spill] sm:$0xff] %v12216_v5 }
 0xc4e   :  { %v12218_v37 = vpop.permute.xlu1 %5506  ;;  %v12220_v59 = vpop.permute.xlu0 %5504 }
 0xc4f   :  { %16648 = vst [vmem:[#allocation549_spill] sm:$0xff] %v12218_v37  ;;  %16649 = vst [vmem:[#allocation550_spill] sm:$0xff] %v12220_v59 }
 0xc52   :  { %v12222_v24 = vpop.permute.xlu1 %5510  ;;  %v12224_v23 = vpop.permute.xlu0 %5508 }
 0xc53   :  { %16650 = vst [vmem:[#allocation551_spill] sm:$0xff] %v12222_v24  ;;  %16651 = vst [vmem:[#allocation552_spill] sm:$0xff] %v12224_v23  ;;  %v12245_v23 = vld [vmem:[%s16010_s2 + $0x3a] sm:$0xff] }
 0xc5f   :  { %v12226_v12 = vpop.permute.xlu1 %5634  ;;  %v12228_v60 = vpop.permute.xlu0 %5630 }
 0xc60   :  { %16652 = vst [vmem:[#allocation553_spill] sm:$0xff] %v12226_v12  ;;  %16653 = vst [vmem:[#allocation554_spill] sm:$0xff] %v12228_v60 }
 0xc63   :  { %v12230_v16 = vpop.permute.xlu1 %5642  ;;  %v12232_v11 = vpop.permute.xlu0 %5638 }
 0xc64   :  { %16654 = vst [vmem:[#allocation555_spill] sm:$0xff] %v12230_v16  ;;  %16655 = vst [vmem:[#allocation556_spill] sm:$0xff] %v12232_v11  ;;  %v12250_v16 = vld [vmem:[%s16010_s2 + $0x32] sm:$0xff] }
 0xc67   :  { %v12234_v20 = vpop.permute.xlu1 %5650  ;;  %v12236_v38 = vpop.permute.xlu0 %5646 }
 0xc68   :  { %16656 = vst [vmem:[#allocation557_spill] sm:$0xff] %v12234_v20  ;;  %16657 = vst [vmem:[#allocation558_spill] sm:$0xff] %v12236_v38 }
 0xc6b   :  { %v12238_v5 = vpop.permute.xlu1 %5658  ;;  %v12240_v37 = vpop.permute.xlu0 %5654 }
 0xc6c   :  { %16658 = vst [vmem:[#allocation559_spill] sm:$0xff] %v12238_v5  ;;  %16659 = vst [vmem:[#allocation560_spill] sm:$0xff] %v12240_v37 }
 0xc6f   :  { %v5776_v59 = vpop.permute.xlu0 %5775  ;;  %v5780_v38 = vpop.permute.xlu1 %5779 }
 0xc70   :  { %v5807_v11 = vmul.f32 %v12245_v23, %v5776_v59  ;;  %v5806_v20 = vmul.f32 %v12250_v16, %v5776_v59  ;;  %v5809_v5 = vmul.f32 %v12245_v23, %v5780_v38  ;;  %v5808_v37 = vmul.f32 %v12250_v16, %v5780_v38 }
 0xc72   :  { %5872 = vrot.lane.b32.xlu1 %v5807_v11, %s9241_s10  ;;  %5870 = vrot.lane.b32.xlu0 %v5806_v20, %s9241_s10 }
 0xc73   :  { %v5784_v12 = vpop.permute.xlu0 %5783  ;;  %v5788_v15 = vpop.permute.xlu1 %5787 }
 0xc74   :  { %v5811_v60 = vmul.f32 %v12245_v23, %v5784_v12  ;;  %v5810_v24 = vmul.f32 %v12250_v16, %v5784_v12  ;;  %v5813_v11 = vmul.f32 %v12245_v23, %v5788_v15  ;;  %v5812_v20 = vmul.f32 %v12250_v16, %v5788_v15 }
 0xc76   :  { %5876 = vrot.lane.b32.xlu1 %v5809_v5, %s9241_s10  ;;  %5874 = vrot.lane.b32.xlu0 %v5808_v37, %s9241_s10 }
 0xc77   :  { %v5792_v41 = vpop.permute.xlu0 %5791  ;;  %v5796_v3 = vpop.permute.xlu1 %5795 }
 0xc78   :  { %v5815_v5 = vmul.f32 %v12245_v23, %v5792_v41  ;;  %v5814_v37 = vmul.f32 %v12250_v16, %v5792_v41 }
 0xc7a   :  { %5880 = vrot.lane.b32.xlu1 %v5811_v60, %s9241_s10  ;;  %5878 = vrot.lane.b32.xlu0 %v5810_v24, %s9241_s10  ;;  %v5817_v24 = vmul.f32 %v12245_v23, %v5796_v3  ;;  %v5816_v60 = vmul.f32 %v12250_v16, %v5796_v3 }
 0xc7b   :  { %v5800_v6 = vpop.permute.xlu0 %5799  ;;  %v5804_v42 = vpop.permute.xlu1 %5803 }
 0xc7e   :  { %5884 = vrot.lane.b32.xlu1 %v5813_v11, %s9241_s10  ;;  %5882 = vrot.lane.b32.xlu0 %v5812_v20, %s9241_s10  ;;  %v5819_v11 = vmul.f32 %v12245_v23, %v5800_v6  ;;  %v5818_v20 = vmul.f32 %v12250_v16, %v5800_v6 }
 0xc82   :  { %5888 = vrot.lane.b32.xlu1 %v5815_v5, %s9241_s10  ;;  %5886 = vrot.lane.b32.xlu0 %v5814_v37, %s9241_s10  ;;  %v5821_v5 = vmul.f32 %v12245_v23, %v5804_v42  ;;  %v5820_v37 = vmul.f32 %v12250_v16, %v5804_v42 }
 0xc86   :  { %5892 = vrot.lane.b32.xlu1 %v5817_v24, %s9241_s10  ;;  %5890 = vrot.lane.b32.xlu0 %v5816_v60, %s9241_s10  ;;  %v12287_v24 = vld [vmem:[%s16010_s2 + $0x9a] sm:$0xff]  ;;  %v12292_v60 = vld [vmem:[%s16010_s2 + $0x92] sm:$0xff] }
 0xc87   :  { %v5827_v19 = vmul.f32 %v12287_v24, %v5784_v12  ;;  %v5826_v4 = vmul.f32 %v12292_v60, %v5784_v12  ;;  %v5834_v12 = vmul.f32 %v12292_v60, %v5800_v6 }
 0xc8a   :  { %5896 = vrot.lane.b32.xlu1 %v5819_v11, %s9241_s10  ;;  %5894 = vrot.lane.b32.xlu0 %v5818_v20, %s9241_s10  ;;  %v5823_v11 = vmul.f32 %v12287_v24, %v5776_v59  ;;  %v5822_v20 = vmul.f32 %v12292_v60, %v5776_v59  ;;  %v5829_v59 = vmul.f32 %v12287_v24, %v5788_v15 }
 0xc8e   :  { %5900 = vrot.lane.b32.xlu1 %v5821_v5, %s9241_s10  ;;  %5898 = vrot.lane.b32.xlu0 %v5820_v37, %s9241_s10  ;;  %v5825_v5 = vmul.f32 %v12287_v24, %v5780_v38  ;;  %v5824_v37 = vmul.f32 %v12292_v60, %v5780_v38  ;;  %v5831_v38 = vmul.f32 %v12287_v24, %v5792_v41 }
 0xc92   :  { %5904 = vrot.lane.b32.xlu1 %v5823_v11, %s9241_s10  ;;  %5902 = vrot.lane.b32.xlu0 %v5822_v20, %s9241_s10  ;;  %v5828_v11 = vmul.f32 %v12292_v60, %v5788_v15  ;;  %v5830_v20 = vmul.f32 %v12292_v60, %v5792_v41  ;;  %v5835_v15 = vmul.f32 %v12287_v24, %v5800_v6  ;;  %v8990_v6 = vld [vmem:[%s16008_s0 + $0xd0] ss:$0 sm:$0xff] }
 0xc93   :  { %v5837_v41 = vmul.f32 %v12287_v24, %v5804_v42 }
 0xc96   :  { %5908 = vrot.lane.b32.xlu1 %v5825_v5, %s9241_s10  ;;  %5906 = vrot.lane.b32.xlu0 %v5824_v37, %s9241_s10  ;;  %v5836_v5 = vmul.f32 %v12292_v60, %v5804_v42  ;;  %v8993_v37 = vld [vmem:[%s16008_s0 + $0xd3] ss:$0 sm:$0xff]  ;;  %v8992_v42 = vld [vmem:[%s16008_s0 + $0xd2] ss:$0 sm:$0xff] }
 0xc9a   :  { %5912 = vrot.lane.b32.xlu1 %v5827_v19, %s9241_s10  ;;  %5910 = vrot.lane.b32.xlu0 %v5826_v4, %s9241_s10  ;;  %v5833_v19 = vmul.f32 %v12287_v24, %v5796_v3  ;;  %v5832_v4 = vmul.f32 %v12292_v60, %v5796_v3  ;;  %v8991_v3 = vld [vmem:[%s16008_s0 + $0xd1] ss:$0 sm:$0xff] }
 0xc9e   :  { %5916 = vrot.lane.b32.xlu1 %v5829_v59, %s9241_s10  ;;  %5914 = vrot.lane.b32.xlu0 %v5828_v11, %s9241_s10  ;;  %v8995_v59 = vld [vmem:[%s16008_s0 + $0xd5] ss:$0 sm:$0xff]  ;;  %v8994_v11 = vld [vmem:[%s16008_s0 + $0xd4] ss:$0 sm:$0xff] }
 0xca2   :  { %5920 = vrot.lane.b32.xlu1 %v5831_v38, %s9241_s10  ;;  %5918 = vrot.lane.b32.xlu0 %v5830_v20, %s9241_s10  ;;  %v8997_v38 = vld [vmem:[%s16008_s0 + $0xd7] ss:$0 sm:$0xff]  ;;  %v8996_v20 = vld [vmem:[%s16008_s0 + $0xd6] ss:$0 sm:$0xff] }
 0xca6   :  { %5924 = vrot.lane.b32.xlu1 %v5833_v19, %s9241_s10  ;;  %5922 = vrot.lane.b32.xlu0 %v5832_v4, %s9241_s10 }
 0xcaa   :  { %5928 = vrot.lane.b32.xlu1 %v5835_v15, %s9241_s10  ;;  %5926 = vrot.lane.b32.xlu0 %v5834_v12, %s9241_s10 }
 0xcae   :  { %5932 = vrot.lane.b32.xlu1 %v5837_v41, %s9241_s10  ;;  %5930 = vrot.lane.b32.xlu0 %v5836_v5, %s9241_s10 }
 0xcb2   :  { %6052 = vperm.xlu1 %9169, %v8991_v3   ;;  %6048 = vperm.xlu0 %9168, %v8990_v6  }
 0xcb6   :  { %6060 = vperm.xlu1 %9169, %v8993_v37   ;;  %6056 = vperm.xlu0 %9168, %v8992_v42  }
 0xcba   :  { %6068 = vperm.xlu1 %9169, %v8995_v59   ;;  %6064 = vperm.xlu0 %9168, %v8994_v11  }
 0xcbe   :  { %6076 = vperm.xlu1 %9169, %v8997_v38   ;;  %6072 = vperm.xlu0 %9168, %v8996_v20  }
 0xce4   :  { %v12350_v19 = vpop.permute.xlu1 %5872  ;;  %v12352_v4 = vpop.permute.xlu0 %5870 }
 0xce5   :  { %16660 = vst [vmem:[#allocation561_spill] sm:$0xff] %v12350_v19  ;;  %16661 = vst [vmem:[#allocation562_spill] sm:$0xff] %v12352_v4 }
 0xce8   :  { %v12354_v15 = vpop.permute.xlu1 %5876  ;;  %v12356_v12 = vpop.permute.xlu0 %5874 }
 0xce9   :  { %16662 = vst [vmem:[#allocation563_spill] sm:$0xff] %v12354_v15  ;;  %16663 = vst [vmem:[#allocation564_spill] sm:$0xff] %v12356_v12 }
 0xcec   :  { %v12358_v41 = vpop.permute.xlu1 %5880  ;;  %v12360_v5 = vpop.permute.xlu0 %5878 }
 0xced   :  { %16664 = vst [vmem:[#allocation565_spill] sm:$0xff] %v12358_v41  ;;  %16665 = vst [vmem:[#allocation566_spill] sm:$0xff] %v12360_v5 }
 0xcf0   :  { %v12362_v3 = vpop.permute.xlu1 %5884  ;;  %v12364_v6 = vpop.permute.xlu0 %5882 }
 0xcf1   :  { %16666 = vst [vmem:[#allocation567_spill] sm:$0xff] %v12362_v3  ;;  %16667 = vst [vmem:[#allocation568_spill] sm:$0xff] %v12364_v6 }
 0xcf4   :  { %v12366_v37 = vpop.permute.xlu1 %5888  ;;  %v12368_v42 = vpop.permute.xlu0 %5886 }
 0xcf5   :  { %16668 = vst [vmem:[#allocation569_spill] sm:$0xff] %v12366_v37  ;;  %16669 = vst [vmem:[#allocation570_spill] sm:$0xff] %v12368_v42 }
 0xcf8   :  { %v12370_v59 = vpop.permute.xlu1 %5892  ;;  %v12372_v11 = vpop.permute.xlu0 %5890 }
 0xcf9   :  { %16670 = vst [vmem:[#allocation571_spill] sm:$0xff] %v12370_v59  ;;  %16671 = vst [vmem:[#allocation572_spill] sm:$0xff] %v12372_v11 }
 0xcfc   :  { %v12374_v38 = vpop.permute.xlu1 %5896  ;;  %v12376_v20 = vpop.permute.xlu0 %5894 }
 0xcfd   :  { %16672 = vst [vmem:[#allocation573_spill] sm:$0xff] %v12374_v38  ;;  %16673 = vst [vmem:[#allocation574_spill] sm:$0xff] %v12376_v20 }
 0xd00   :  { %v12378_v12 = vpop.permute.xlu1 %5900  ;;  %v12380_v41 = vpop.permute.xlu0 %5898 }
 0xd01   :  { %16674 = vst [vmem:[#allocation575_spill] sm:$0xff] %v12378_v12  ;;  %16675 = vst [vmem:[#allocation576_spill] sm:$0xff] %v12380_v41 }
 0xd04   :  { %v12382_v5 = vpop.permute.xlu1 %5904  ;;  %v12384_v3 = vpop.permute.xlu0 %5902 }
 0xd05   :  { %16676 = vst [vmem:[#allocation577_spill] sm:$0xff] %v12382_v5  ;;  %16677 = vst [vmem:[#allocation578_spill] sm:$0xff] %v12384_v3 }
 0xd08   :  { %v12386_v6 = vpop.permute.xlu1 %5908  ;;  %v12388_v37 = vpop.permute.xlu0 %5906 }
 0xd09   :  { %16678 = vst [vmem:[#allocation579_spill] sm:$0xff] %v12386_v6  ;;  %16679 = vst [vmem:[#allocation580_spill] sm:$0xff] %v12388_v37 }
 0xd0c   :  { %v12390_v42 = vpop.permute.xlu0 %5910  ;;  %v12392_v59 = vpop.permute.xlu1 %5912 }
 0xd0d   :  { %16680 = vst [vmem:[#allocation581_spill] sm:$0xff] %v12390_v42  ;;  %16681 = vst [vmem:[#allocation582_spill] sm:$0xff] %v12392_v59 }
 0xd10   :  { %v12394_v11 = vpop.permute.xlu0 %5914  ;;  %v12396_v38 = vpop.permute.xlu1 %5916 }
 0xd11   :  { %16682 = vst [vmem:[#allocation583_spill] sm:$0xff] %v12394_v11  ;;  %16683 = vst [vmem:[#allocation584_spill] sm:$0xff] %v12396_v38 }
 0xd14   :  { %v12398_v20 = vpop.permute.xlu0 %5918  ;;  %v12400_v12 = vpop.permute.xlu1 %5920 }
 0xd15   :  { %16684 = vst [vmem:[#allocation585_spill] sm:$0xff] %v12398_v20  ;;  %16685 = vst [vmem:[#allocation586_spill] sm:$0xff] %v12400_v12 }
 0xd18   :  { %v12402_v41 = vpop.permute.xlu0 %5922  ;;  %v12404_v5 = vpop.permute.xlu1 %5924 }
 0xd19   :  { %16686 = vst [vmem:[#allocation587_spill] sm:$0xff] %v12402_v41  ;;  %16687 = vst [vmem:[#allocation588_spill] sm:$0xff] %v12404_v5 }
 0xd1c   :  { %v12406_v3 = vpop.permute.xlu0 %5926  ;;  %v12408_v6 = vpop.permute.xlu1 %5928 }
 0xd1d   :  { %16688 = vst [vmem:[#allocation589_spill] sm:$0xff] %v12406_v3  ;;  %16689 = vst [vmem:[#allocation590_spill] sm:$0xff] %v12408_v6 }
 0xd20   :  { %v12410_v37 = vpop.permute.xlu0 %5930  ;;  %v12412_v42 = vpop.permute.xlu1 %5932 }
 0xd21   :  { %16690 = vst [vmem:[#allocation591_spill] sm:$0xff] %v12410_v37  ;;  %16691 = vst [vmem:[#allocation592_spill] sm:$0xff] %v12412_v42 }
 0xd2d   :  { %v6049_v59 = vpop.permute.xlu0 %6048  ;;  %v6053_v20 = vpop.permute.xlu1 %6052 }
 0xd2e   :  { %v6080_v11 = vmul.f32 %v12245_v23, %v6049_v59  ;;  %v6079_v38 = vmul.f32 %v12250_v16, %v6049_v59  ;;  %v6082_v41 = vmul.f32 %v12245_v23, %v6053_v20  ;;  %v6081_v3 = vmul.f32 %v12250_v16, %v6053_v20 }
 0xd30   :  { %6145 = vrot.lane.b32.xlu1 %v6080_v11, %s9242_s15  ;;  %6143 = vrot.lane.b32.xlu0 %v6079_v38, %s9242_s15 }
 0xd31   :  { %v6057_v5 = vpop.permute.xlu0 %6056  ;;  %v6061_v6 = vpop.permute.xlu1 %6060 }
 0xd32   :  { %v6084_v37 = vmul.f32 %v12245_v23, %v6057_v5  ;;  %v6083_v42 = vmul.f32 %v12250_v16, %v6057_v5  ;;  %v6086_v11 = vmul.f32 %v12245_v23, %v6061_v6  ;;  %v6085_v38 = vmul.f32 %v12250_v16, %v6061_v6 }
 0xd34   :  { %6149 = vrot.lane.b32.xlu1 %v6082_v41, %s9242_s15  ;;  %6147 = vrot.lane.b32.xlu0 %v6081_v3, %s9242_s15 }
 0xd35   :  { %v6065_v12 = vpop.permute.xlu0 %6064  ;;  %v6069_v15 = vpop.permute.xlu1 %6068 }
 0xd36   :  { %v6088_v41 = vmul.f32 %v12245_v23, %v6065_v12  ;;  %v6087_v3 = vmul.f32 %v12250_v16, %v6065_v12 }
 0xd38   :  { %6153 = vrot.lane.b32.xlu1 %v6084_v37, %s9242_s15  ;;  %6151 = vrot.lane.b32.xlu0 %v6083_v42, %s9242_s15  ;;  %v6090_v37 = vmul.f32 %v12245_v23, %v6069_v15  ;;  %v6089_v42 = vmul.f32 %v12250_v16, %v6069_v15 }
 0xd39   :  { %v6073_v4 = vpop.permute.xlu0 %6072  ;;  %v6077_v19 = vpop.permute.xlu1 %6076 }
 0xd3c   :  { %6157 = vrot.lane.b32.xlu1 %v6086_v11, %s9242_s15  ;;  %6155 = vrot.lane.b32.xlu0 %v6085_v38, %s9242_s15  ;;  %v6092_v11 = vmul.f32 %v12245_v23, %v6073_v4  ;;  %v6091_v38 = vmul.f32 %v12250_v16, %v6073_v4 }
 0xd40   :  { %6161 = vrot.lane.b32.xlu1 %v6088_v41, %s9242_s15  ;;  %6159 = vrot.lane.b32.xlu0 %v6087_v3, %s9242_s15  ;;  %v6094_v41 = vmul.f32 %v12245_v23, %v6077_v19  ;;  %v6093_v3 = vmul.f32 %v12250_v16, %v6077_v19  ;;  %v6100_v23 = vmul.f32 %v12287_v24, %v6057_v5 }
 0xd41   :  { %v6099_v16 = vmul.f32 %v12292_v60, %v6057_v5  ;;  %v6106_v5 = vmul.f32 %v12287_v24, %v6069_v15 }
 0xd44   :  { %6165 = vrot.lane.b32.xlu1 %v6090_v37, %s9242_s15  ;;  %6163 = vrot.lane.b32.xlu0 %v6089_v42, %s9242_s15  ;;  %v6096_v37 = vmul.f32 %v12287_v24, %v6049_v59  ;;  %v6095_v42 = vmul.f32 %v12292_v60, %v6049_v59  ;;  %v6102_v59 = vmul.f32 %v12287_v24, %v6061_v6 }
 0xd48   :  { %6169 = vrot.lane.b32.xlu1 %v6092_v11, %s9242_s15  ;;  %6167 = vrot.lane.b32.xlu0 %v6091_v38, %s9242_s15  ;;  %v6098_v11 = vmul.f32 %v12287_v24, %v6053_v20  ;;  %v6097_v38 = vmul.f32 %v12292_v60, %v6053_v20  ;;  %v6104_v20 = vmul.f32 %v12287_v24, %v6065_v12 }
 0xd4c   :  { %6173 = vrot.lane.b32.xlu1 %v6094_v41, %s9242_s15  ;;  %6171 = vrot.lane.b32.xlu0 %v6093_v3, %s9242_s15  ;;  %v6101_v41 = vmul.f32 %v12292_v60, %v6061_v6  ;;  %v6103_v3 = vmul.f32 %v12292_v60, %v6065_v12  ;;  %v6108_v6 = vmul.f32 %v12287_v24, %v6073_v4 }
 0xd4d   :  { %v6110_v12 = vmul.f32 %v12287_v24, %v6077_v19  ;;  %v9013_v24 = vld [vmem:[%s16008_s0 + $0xdb] ss:$0 sm:$0xff] }
 0xd50   :  { %6177 = vrot.lane.b32.xlu1 %v6096_v37, %s9242_s15  ;;  %6175 = vrot.lane.b32.xlu0 %v6095_v42, %s9242_s15  ;;  %v6105_v37 = vmul.f32 %v12292_v60, %v6069_v15  ;;  %v6107_v42 = vmul.f32 %v12292_v60, %v6073_v4  ;;  %v9011_v15 = vld [vmem:[%s16008_s0 + $0xd9] ss:$0 sm:$0xff]  ;;  %v9010_v4 = vld [vmem:[%s16008_s0 + $0xd8] ss:$0 sm:$0xff] }
 0xd54   :  { %6181 = vrot.lane.b32.xlu1 %v6098_v11, %s9242_s15  ;;  %6179 = vrot.lane.b32.xlu0 %v6097_v38, %s9242_s15  ;;  %v6109_v11 = vmul.f32 %v12292_v60, %v6077_v19  ;;  %v9012_v60 = vld [vmem:[%s16008_s0 + $0xda] ss:$0 sm:$0xff]  ;;  %v9015_v19 = vld [vmem:[%s16008_s0 + $0xdd] ss:$0 sm:$0xff] }
 0xd55   :  { %v9014_v38 = vld [vmem:[%s16008_s0 + $0xdc] ss:$0 sm:$0xff] }
 0xd58   :  { %6185 = vrot.lane.b32.xlu1 %v6100_v23, %s9242_s15  ;;  %6183 = vrot.lane.b32.xlu0 %v6099_v16, %s9242_s15  ;;  %v9017_v23 = vld [vmem:[%s16008_s0 + $0xdf] ss:$0 sm:$0xff]  ;;  %v9016_v16 = vld [vmem:[%s16008_s0 + $0xde] ss:$0 sm:$0xff] }
 0xd5c   :  { %6189 = vrot.lane.b32.xlu1 %v6102_v59, %s9242_s15  ;;  %6187 = vrot.lane.b32.xlu0 %v6101_v41, %s9242_s15  ;;  %v9027_v59 = vld [vmem:[%s16008_s0 + $0xe1] ss:$0 sm:$0xff]  ;;  %v9026_v41 = vld [vmem:[%s16008_s0 + $0xe0] ss:$0 sm:$0xff] }
 0xd60   :  { %6193 = vrot.lane.b32.xlu1 %v6104_v20, %s9242_s15  ;;  %6191 = vrot.lane.b32.xlu0 %v6103_v3, %s9242_s15  ;;  %v9029_v20 = vld [vmem:[%s16008_s0 + $0xe3] ss:$0 sm:$0xff]  ;;  %v9028_v3 = vld [vmem:[%s16008_s0 + $0xe2] ss:$0 sm:$0xff] }
 0xd64   :  { %6197 = vrot.lane.b32.xlu1 %v6106_v5, %s9242_s15  ;;  %6195 = vrot.lane.b32.xlu0 %v6105_v37, %s9242_s15  ;;  %v9031_v5 = vld [vmem:[%s16008_s0 + $0xe5] ss:$0 sm:$0xff]  ;;  %v9030_v37 = vld [vmem:[%s16008_s0 + $0xe4] ss:$0 sm:$0xff] }
 0xd68   :  { %6201 = vrot.lane.b32.xlu1 %v6108_v6, %s9242_s15  ;;  %6199 = vrot.lane.b32.xlu0 %v6107_v42, %s9242_s15  ;;  %v9033_v6 = vld [vmem:[%s16008_s0 + $0xe7] ss:$0 sm:$0xff]  ;;  %v9032_v42 = vld [vmem:[%s16008_s0 + $0xe6] ss:$0 sm:$0xff] }
 0xd6c   :  { %6205 = vrot.lane.b32.xlu1 %v6110_v12, %s9242_s15  ;;  %6203 = vrot.lane.b32.xlu0 %v6109_v11, %s9242_s15 }
 0xd70   :  { %6330 = vperm.xlu1 %9169, %v9011_v15   ;;  %6326 = vperm.xlu0 %9168, %v9010_v4  }
 0xd74   :  { %6338 = vperm.xlu1 %9169, %v9013_v24   ;;  %6334 = vperm.xlu0 %9168, %v9012_v60  }
 0xd78   :  { %6346 = vperm.xlu1 %9169, %v9015_v19   ;;  %6342 = vperm.xlu0 %9168, %v9014_v38  }
 0xd7c   :  { %6354 = vperm.xlu1 %9169, %v9017_v23   ;;  %6350 = vperm.xlu0 %9168, %v9016_v16  }
 0xd80   :  { %6475 = vperm.xlu1 %9169, %v9027_v59   ;;  %6471 = vperm.xlu0 %9168, %v9026_v41  }
 0xd84   :  { %6483 = vperm.xlu1 %9169, %v9029_v20   ;;  %6479 = vperm.xlu0 %9168, %v9028_v3  }
 0xd88   :  { %6491 = vperm.xlu1 %9169, %v9031_v5   ;;  %6487 = vperm.xlu0 %9168, %v9030_v37  }
 0xd8c   :  { %6499 = vperm.xlu1 %9169, %v9033_v6   ;;  %6495 = vperm.xlu0 %9168, %v9032_v42  }
 0xda2   :  { %v12526_v12 = vpop.permute.xlu1 %6145  ;;  %v12528_v11 = vpop.permute.xlu0 %6143 }
 0xda3   :  { %16692 = vst [vmem:[#allocation593_spill] sm:$0xff] %v12526_v12  ;;  %16693 = vst [vmem:[#allocation594_spill] sm:$0xff] %v12528_v11 }
 0xda6   :  { %v12530_v15 = vpop.permute.xlu1 %6149  ;;  %v12532_v4 = vpop.permute.xlu0 %6147 }
 0xda7   :  { %16694 = vst [vmem:[#allocation595_spill] sm:$0xff] %v12530_v15  ;;  %16695 = vst [vmem:[#allocation596_spill] sm:$0xff] %v12532_v4 }
 0xdaa   :  { %v12534_v24 = vpop.permute.xlu1 %6153  ;;  %v12536_v60 = vpop.permute.xlu0 %6151 }
 0xdab   :  { %16696 = vst [vmem:[#allocation597_spill] sm:$0xff] %v12534_v24  ;;  %16697 = vst [vmem:[#allocation598_spill] sm:$0xff] %v12536_v60 }
 0xdae   :  { %v12538_v19 = vpop.permute.xlu1 %6157  ;;  %v12540_v38 = vpop.permute.xlu0 %6155 }
 0xdaf   :  { %16698 = vst [vmem:[#allocation599_spill] sm:$0xff] %v12538_v19  ;;  %16699 = vst [vmem:[#allocation600_spill] sm:$0xff] %v12540_v38 }
 0xdb2   :  { %v12542_v23 = vpop.permute.xlu1 %6161  ;;  %v12544_v16 = vpop.permute.xlu0 %6159 }
 0xdb3   :  { %16700 = vst [vmem:[#allocation601_spill] sm:$0xff] %v12542_v23  ;;  %16701 = vst [vmem:[#allocation602_spill] sm:$0xff] %v12544_v16 }
 0xdb6   :  { %v12546_v59 = vpop.permute.xlu1 %6165  ;;  %v12548_v41 = vpop.permute.xlu0 %6163 }
 0xdb7   :  { %16702 = vst [vmem:[#allocation603_spill] sm:$0xff] %v12546_v59  ;;  %16703 = vst [vmem:[#allocation604_spill] sm:$0xff] %v12548_v41 }
 0xdba   :  { %v12550_v20 = vpop.permute.xlu1 %6169  ;;  %v12552_v3 = vpop.permute.xlu0 %6167 }
 0xdbb   :  { %16704 = vst [vmem:[#allocation605_spill] sm:$0xff] %v12550_v20  ;;  %16705 = vst [vmem:[#allocation606_spill] sm:$0xff] %v12552_v3 }
 0xdbe   :  { %v12554_v5 = vpop.permute.xlu1 %6173  ;;  %v12556_v37 = vpop.permute.xlu0 %6171 }
 0xdbf   :  { %16706 = vst [vmem:[#allocation607_spill] sm:$0xff] %v12554_v5  ;;  %16707 = vst [vmem:[#allocation608_spill] sm:$0xff] %v12556_v37 }
 0xdc2   :  { %v12558_v6 = vpop.permute.xlu1 %6177  ;;  %v12560_v42 = vpop.permute.xlu0 %6175 }
 0xdc3   :  { %16708 = vst [vmem:[#allocation609_spill] sm:$0xff] %v12558_v6  ;;  %16709 = vst [vmem:[#allocation610_spill] sm:$0xff] %v12560_v42 }
 0xdc6   :  { %v12562_v38 = vpop.permute.xlu1 %6181  ;;  %v12564_v23 = vpop.permute.xlu0 %6179 }
 0xdc7   :  { %16710 = vst [vmem:[#allocation611_spill] sm:$0xff] %v12562_v38  ;;  %16711 = vst [vmem:[#allocation612_spill] sm:$0xff] %v12564_v23 }
 0xdca   :  { %v12566_v16 = vpop.permute.xlu1 %6185  ;;  %v12568_v59 = vpop.permute.xlu0 %6183 }
 0xdcb   :  { %16712 = vst [vmem:[#allocation613_spill] sm:$0xff] %v12566_v16  ;;  %16713 = vst [vmem:[#allocation614_spill] sm:$0xff] %v12568_v59 }
 0xdce   :  { %v12570_v41 = vpop.permute.xlu1 %6189  ;;  %v12572_v20 = vpop.permute.xlu0 %6187 }
 0xdcf   :  { %16714 = vst [vmem:[#allocation615_spill] sm:$0xff] %v12570_v41  ;;  %16715 = vst [vmem:[#allocation616_spill] sm:$0xff] %v12572_v20 }
 0xdd2   :  { %v12574_v3 = vpop.permute.xlu1 %6193  ;;  %v12576_v5 = vpop.permute.xlu0 %6191 }
 0xdd3   :  { %16716 = vst [vmem:[#allocation617_spill] sm:$0xff] %v12574_v3  ;;  %16717 = vst [vmem:[#allocation618_spill] sm:$0xff] %v12576_v5 }
 0xdd6   :  { %v12578_v37 = vpop.permute.xlu1 %6197  ;;  %v12580_v6 = vpop.permute.xlu0 %6195 }
 0xdd7   :  { %16718 = vst [vmem:[#allocation619_spill] sm:$0xff] %v12578_v37  ;;  %16719 = vst [vmem:[#allocation620_spill] sm:$0xff] %v12580_v6 }
 0xdda   :  { %v12582_v42 = vpop.permute.xlu1 %6201  ;;  %v12584_v38 = vpop.permute.xlu0 %6199 }
 0xddb   :  { %16720 = vst [vmem:[#allocation621_spill] sm:$0xff] %v12582_v42  ;;  %16721 = vst [vmem:[#allocation622_spill] sm:$0xff] %v12584_v38 }
 0xdde   :  { %v12586_v23 = vpop.permute.xlu1 %6205  ;;  %v12588_v16 = vpop.permute.xlu0 %6203 }
 0xddf   :  { %16722 = vst [vmem:[#allocation623_spill] sm:$0xff] %v12586_v23  ;;  %16723 = vst [vmem:[#allocation624_spill] sm:$0xff] %v12588_v16  ;;  %v12609_v16 = vld [vmem:[%s16010_s2 + $0x50] sm:$0xff] }
 0xdeb   :  { %v12590_v59 = vpop.permute.xlu1 %6330  ;;  %v12592_v41 = vpop.permute.xlu0 %6326 }
 0xdec   :  { %16724 = vst [vmem:[#allocation625_spill] sm:$0xff] %v12590_v59  ;;  %16725 = vst [vmem:[#allocation626_spill] sm:$0xff] %v12592_v41 }
 0xdef   :  { %v12594_v20 = vpop.permute.xlu1 %6338  ;;  %v12596_v3 = vpop.permute.xlu0 %6334 }
 0xdf0   :  { %16726 = vst [vmem:[#allocation627_spill] sm:$0xff] %v12594_v20  ;;  %16727 = vst [vmem:[#allocation628_spill] sm:$0xff] %v12596_v3  ;;  %v12614_v20 = vld [vmem:[%s16010_s2 + $0x48] sm:$0xff] }
 0xdf3   :  { %v12598_v5 = vpop.permute.xlu1 %6346  ;;  %v12600_v37 = vpop.permute.xlu0 %6342 }
 0xdf4   :  { %16728 = vst [vmem:[#allocation629_spill] sm:$0xff] %v12598_v5  ;;  %16729 = vst [vmem:[#allocation630_spill] sm:$0xff] %v12600_v37 }
 0xdf7   :  { %v12602_v6 = vpop.permute.xlu1 %6354  ;;  %v12604_v42 = vpop.permute.xlu0 %6350 }
 0xdf8   :  { %16730 = vst [vmem:[#allocation631_spill] sm:$0xff] %v12602_v6  ;;  %16731 = vst [vmem:[#allocation632_spill] sm:$0xff] %v12604_v42 }
 0xdfb   :  { %v6472_v38 = vpop.permute.xlu0 %6471  ;;  %v6476_v37 = vpop.permute.xlu1 %6475 }
 0xdfc   :  { %v6503_v3 = vmul.f32 %v12609_v16, %v6472_v38  ;;  %v6502_v5 = vmul.f32 %v12614_v20, %v6472_v38  ;;  %v6505_v6 = vmul.f32 %v12609_v16, %v6476_v37  ;;  %v6504_v42 = vmul.f32 %v12614_v20, %v6476_v37 }
 0xdfe   :  { %6568 = vrot.lane.b32.xlu1 %v6503_v3, %s9241_s10  ;;  %6566 = vrot.lane.b32.xlu0 %v6502_v5, %s9241_s10 }
 0xdff   :  { %v6480_v59 = vpop.permute.xlu0 %6479  ;;  %v6484_v19 = vpop.permute.xlu1 %6483 }
 0xe00   :  { %v6507_v41 = vmul.f32 %v12609_v16, %v6480_v59  ;;  %v6506_v23 = vmul.f32 %v12614_v20, %v6480_v59  ;;  %v6509_v3 = vmul.f32 %v12609_v16, %v6484_v19  ;;  %v6508_v5 = vmul.f32 %v12614_v20, %v6484_v19 }
 0xe02   :  { %6572 = vrot.lane.b32.xlu1 %v6505_v6, %s9241_s10  ;;  %6570 = vrot.lane.b32.xlu0 %v6504_v42, %s9241_s10 }
 0xe03   :  { %v6488_v60 = vpop.permute.xlu0 %6487  ;;  %v6492_v24 = vpop.permute.xlu1 %6491 }
 0xe04   :  { %v6511_v6 = vmul.f32 %v12609_v16, %v6488_v60  ;;  %v6510_v42 = vmul.f32 %v12614_v20, %v6488_v60 }
 0xe06   :  { %6576 = vrot.lane.b32.xlu1 %v6507_v41, %s9241_s10  ;;  %6574 = vrot.lane.b32.xlu0 %v6506_v23, %s9241_s10  ;;  %v6513_v23 = vmul.f32 %v12609_v16, %v6492_v24  ;;  %v6512_v41 = vmul.f32 %v12614_v20, %v6492_v24 }
 0xe07   :  { %v6496_v4 = vpop.permute.xlu0 %6495  ;;  %v6500_v15 = vpop.permute.xlu1 %6499 }
 0xe0a   :  { %6580 = vrot.lane.b32.xlu1 %v6509_v3, %s9241_s10  ;;  %6578 = vrot.lane.b32.xlu0 %v6508_v5, %s9241_s10  ;;  %v6515_v3 = vmul.f32 %v12609_v16, %v6496_v4  ;;  %v6514_v5 = vmul.f32 %v12614_v20, %v6496_v4 }
 0xe0e   :  { %6584 = vrot.lane.b32.xlu1 %v6511_v6, %s9241_s10  ;;  %6582 = vrot.lane.b32.xlu0 %v6510_v42, %s9241_s10  ;;  %v6517_v6 = vmul.f32 %v12609_v16, %v6500_v15  ;;  %v6516_v42 = vmul.f32 %v12614_v20, %v6500_v15 }
 0xe12   :  { %6588 = vrot.lane.b32.xlu1 %v6513_v23, %s9241_s10  ;;  %6586 = vrot.lane.b32.xlu0 %v6512_v41, %s9241_s10  ;;  %v12651_v23 = vld [vmem:[%s16010_s2 + $0xb0] sm:$0xff]  ;;  %v12656_v41 = vld [vmem:[%s16010_s2 + $0xa8] sm:$0xff] }
 0xe13   :  { %v6523_v11 = vmul.f32 %v12651_v23, %v6480_v59  ;;  %v6522_v12 = vmul.f32 %v12656_v41, %v6480_v59  ;;  %v6530_v59 = vmul.f32 %v12656_v41, %v6496_v4 }
 0xe16   :  { %6592 = vrot.lane.b32.xlu1 %v6515_v3, %s9241_s10  ;;  %6590 = vrot.lane.b32.xlu0 %v6514_v5, %s9241_s10  ;;  %v6519_v3 = vmul.f32 %v12651_v23, %v6472_v38  ;;  %v6518_v5 = vmul.f32 %v12656_v41, %v6472_v38  ;;  %v6525_v38 = vmul.f32 %v12651_v23, %v6484_v19 }
 0xe1a   :  { %6596 = vrot.lane.b32.xlu1 %v6517_v6, %s9241_s10  ;;  %6594 = vrot.lane.b32.xlu0 %v6516_v42, %s9241_s10  ;;  %v6521_v6 = vmul.f32 %v12651_v23, %v6476_v37  ;;  %v6520_v42 = vmul.f32 %v12656_v41, %v6476_v37  ;;  %v6527_v37 = vmul.f32 %v12651_v23, %v6488_v60 }
 0xe1e   :  { %6600 = vrot.lane.b32.xlu1 %v6519_v3, %s9241_s10  ;;  %6598 = vrot.lane.b32.xlu0 %v6518_v5, %s9241_s10  ;;  %v6524_v3 = vmul.f32 %v12656_v41, %v6484_v19  ;;  %v6526_v5 = vmul.f32 %v12656_v41, %v6488_v60  ;;  %v6531_v19 = vmul.f32 %v12651_v23, %v6496_v4  ;;  %v9042_v4 = vld [vmem:[%s16008_s0 + $0xe8] ss:$0 sm:$0xff] }
 0xe1f   :  { %v6533_v60 = vmul.f32 %v12651_v23, %v6500_v15 }
 0xe22   :  { %6604 = vrot.lane.b32.xlu1 %v6521_v6, %s9241_s10  ;;  %6602 = vrot.lane.b32.xlu0 %v6520_v42, %s9241_s10  ;;  %v6532_v6 = vmul.f32 %v12656_v41, %v6500_v15  ;;  %v9045_v42 = vld [vmem:[%s16008_s0 + $0xeb] ss:$0 sm:$0xff]  ;;  %v9044_v15 = vld [vmem:[%s16008_s0 + $0xea] ss:$0 sm:$0xff] }
 0xe26   :  { %6608 = vrot.lane.b32.xlu1 %v6523_v11, %s9241_s10  ;;  %6606 = vrot.lane.b32.xlu0 %v6522_v12, %s9241_s10  ;;  %v6529_v11 = vmul.f32 %v12651_v23, %v6492_v24  ;;  %v6528_v12 = vmul.f32 %v12656_v41, %v6492_v24  ;;  %v9043_v24 = vld [vmem:[%s16008_s0 + $0xe9] ss:$0 sm:$0xff] }
 0xe2a   :  { %6612 = vrot.lane.b32.xlu1 %v6525_v38, %s9241_s10  ;;  %6610 = vrot.lane.b32.xlu0 %v6524_v3, %s9241_s10  ;;  %v9047_v38 = vld [vmem:[%s16008_s0 + $0xed] ss:$0 sm:$0xff]  ;;  %v9046_v3 = vld [vmem:[%s16008_s0 + $0xec] ss:$0 sm:$0xff] }
 0xe2e   :  { %6616 = vrot.lane.b32.xlu1 %v6527_v37, %s9241_s10  ;;  %6614 = vrot.lane.b32.xlu0 %v6526_v5, %s9241_s10  ;;  %v9049_v37 = vld [vmem:[%s16008_s0 + $0xef] ss:$0 sm:$0xff]  ;;  %v9048_v5 = vld [vmem:[%s16008_s0 + $0xee] ss:$0 sm:$0xff] }
 0xe32   :  { %6620 = vrot.lane.b32.xlu1 %v6529_v11, %s9241_s10  ;;  %6618 = vrot.lane.b32.xlu0 %v6528_v12, %s9241_s10 }
 0xe36   :  { %6624 = vrot.lane.b32.xlu1 %v6531_v19, %s9241_s10  ;;  %6622 = vrot.lane.b32.xlu0 %v6530_v59, %s9241_s10 }
 0xe3a   :  { %6628 = vrot.lane.b32.xlu1 %v6533_v60, %s9241_s10  ;;  %6626 = vrot.lane.b32.xlu0 %v6532_v6, %s9241_s10 }
 0xe3e   :  { %6748 = vperm.xlu1 %9169, %v9043_v24   ;;  %6744 = vperm.xlu0 %9168, %v9042_v4  }
 0xe42   :  { %6756 = vperm.xlu1 %9169, %v9045_v42   ;;  %6752 = vperm.xlu0 %9168, %v9044_v15  }
 0xe46   :  { %6764 = vperm.xlu1 %9169, %v9047_v38   ;;  %6760 = vperm.xlu0 %9168, %v9046_v3  }
 0xe4a   :  { %6772 = vperm.xlu1 %9169, %v9049_v37   ;;  %6768 = vperm.xlu0 %9168, %v9048_v5  }
 0xe70   :  { %v12714_v11 = vpop.permute.xlu1 %6568  ;;  %v12716_v12 = vpop.permute.xlu0 %6566 }
 0xe71   :  { %16732 = vst [vmem:[#allocation633_spill] sm:$0xff] %v12714_v11  ;;  %16733 = vst [vmem:[#allocation634_spill] sm:$0xff] %v12716_v12 }
 0xe74   :  { %v12718_v19 = vpop.permute.xlu1 %6572  ;;  %v12720_v59 = vpop.permute.xlu0 %6570 }
 0xe75   :  { %16734 = vst [vmem:[#allocation635_spill] sm:$0xff] %v12718_v19  ;;  %16735 = vst [vmem:[#allocation636_spill] sm:$0xff] %v12720_v59 }
 0xe78   :  { %v12722_v60 = vpop.permute.xlu1 %6576  ;;  %v12724_v6 = vpop.permute.xlu0 %6574 }
 0xe79   :  { %16736 = vst [vmem:[#allocation637_spill] sm:$0xff] %v12722_v60  ;;  %16737 = vst [vmem:[#allocation638_spill] sm:$0xff] %v12724_v6 }
 0xe7c   :  { %v12726_v24 = vpop.permute.xlu1 %6580  ;;  %v12728_v4 = vpop.permute.xlu0 %6578 }
 0xe7d   :  { %16738 = vst [vmem:[#allocation639_spill] sm:$0xff] %v12726_v24  ;;  %16739 = vst [vmem:[#allocation640_spill] sm:$0xff] %v12728_v4 }
 0xe80   :  { %v12730_v42 = vpop.permute.xlu1 %6584  ;;  %v12732_v15 = vpop.permute.xlu0 %6582 }
 0xe81   :  { %16740 = vst [vmem:[#allocation641_spill] sm:$0xff] %v12730_v42  ;;  %16741 = vst [vmem:[#allocation642_spill] sm:$0xff] %v12732_v15 }
 0xe84   :  { %v12734_v38 = vpop.permute.xlu1 %6588  ;;  %v12736_v3 = vpop.permute.xlu0 %6586 }
 0xe85   :  { %16742 = vst [vmem:[#allocation643_spill] sm:$0xff] %v12734_v38  ;;  %16743 = vst [vmem:[#allocation644_spill] sm:$0xff] %v12736_v3 }
 0xe88   :  { %v12738_v37 = vpop.permute.xlu1 %6592  ;;  %v12740_v5 = vpop.permute.xlu0 %6590 }
 0xe89   :  { %16744 = vst [vmem:[#allocation645_spill] sm:$0xff] %v12738_v37  ;;  %16745 = vst [vmem:[#allocation646_spill] sm:$0xff] %v12740_v5 }
 0xe8c   :  { %v12742_v59 = vpop.permute.xlu1 %6596  ;;  %v12744_v60 = vpop.permute.xlu0 %6594 }
 0xe8d   :  { %16746 = vst [vmem:[#allocation647_spill] sm:$0xff] %v12742_v59  ;;  %16747 = vst [vmem:[#allocation648_spill] sm:$0xff] %v12744_v60 }
 0xe90   :  { %v12746_v6 = vpop.permute.xlu1 %6600  ;;  %v12748_v24 = vpop.permute.xlu0 %6598 }
 0xe91   :  { %16748 = vst [vmem:[#allocation649_spill] sm:$0xff] %v12746_v6  ;;  %16749 = vst [vmem:[#allocation650_spill] sm:$0xff] %v12748_v24 }
 0xe94   :  { %v12750_v4 = vpop.permute.xlu1 %6604  ;;  %v12752_v42 = vpop.permute.xlu0 %6602 }
 0xe95   :  { %16750 = vst [vmem:[#allocation651_spill] sm:$0xff] %v12750_v4  ;;  %16751 = vst [vmem:[#allocation652_spill] sm:$0xff] %v12752_v42 }
 0xe98   :  { %v12754_v15 = vpop.permute.xlu0 %6606  ;;  %v12756_v38 = vpop.permute.xlu1 %6608 }
 0xe99   :  { %16752 = vst [vmem:[#allocation653_spill] sm:$0xff] %v12754_v15  ;;  %16753 = vst [vmem:[#allocation654_spill] sm:$0xff] %v12756_v38 }
 0xe9c   :  { %v12758_v3 = vpop.permute.xlu0 %6610  ;;  %v12760_v37 = vpop.permute.xlu1 %6612 }
 0xe9d   :  { %16754 = vst [vmem:[#allocation655_spill] sm:$0xff] %v12758_v3  ;;  %16755 = vst [vmem:[#allocation656_spill] sm:$0xff] %v12760_v37 }
 0xea0   :  { %v12762_v5 = vpop.permute.xlu0 %6614  ;;  %v12764_v59 = vpop.permute.xlu1 %6616 }
 0xea1   :  { %16756 = vst [vmem:[#allocation657_spill] sm:$0xff] %v12762_v5  ;;  %16757 = vst [vmem:[#allocation658_spill] sm:$0xff] %v12764_v59 }
 0xea4   :  { %v12766_v60 = vpop.permute.xlu0 %6618  ;;  %v12768_v6 = vpop.permute.xlu1 %6620 }
 0xea5   :  { %16758 = vst [vmem:[#allocation659_spill] sm:$0xff] %v12766_v60  ;;  %16759 = vst [vmem:[#allocation660_spill] sm:$0xff] %v12768_v6 }
 0xea8   :  { %v12770_v24 = vpop.permute.xlu0 %6622  ;;  %v12772_v4 = vpop.permute.xlu1 %6624 }
 0xea9   :  { %16760 = vst [vmem:[#allocation661_spill] sm:$0xff] %v12770_v24  ;;  %16761 = vst [vmem:[#allocation662_spill] sm:$0xff] %v12772_v4 }
 0xeac   :  { %v12774_v42 = vpop.permute.xlu0 %6626  ;;  %v12776_v15 = vpop.permute.xlu1 %6628 }
 0xead   :  { %16762 = vst [vmem:[#allocation663_spill] sm:$0xff] %v12774_v42  ;;  %16763 = vst [vmem:[#allocation664_spill] sm:$0xff] %v12776_v15 }
 0xeb9   :  { %v6745_v38 = vpop.permute.xlu0 %6744  ;;  %v6749_v5 = vpop.permute.xlu1 %6748 }
 0xeba   :  { %v6776_v3 = vmul.f32 %v12609_v16, %v6745_v38  ;;  %v6775_v37 = vmul.f32 %v12614_v20, %v6745_v38  ;;  %v6778_v60 = vmul.f32 %v12609_v16, %v6749_v5  ;;  %v6777_v24 = vmul.f32 %v12614_v20, %v6749_v5 }
 0xebc   :  { %6841 = vrot.lane.b32.xlu1 %v6776_v3, %s9242_s15  ;;  %6839 = vrot.lane.b32.xlu0 %v6775_v37, %s9242_s15 }
 0xebd   :  { %v6753_v6 = vpop.permute.xlu0 %6752  ;;  %v6757_v4 = vpop.permute.xlu1 %6756 }
 0xebe   :  { %v6780_v42 = vmul.f32 %v12609_v16, %v6753_v6  ;;  %v6779_v15 = vmul.f32 %v12614_v20, %v6753_v6  ;;  %v6782_v3 = vmul.f32 %v12609_v16, %v6757_v4  ;;  %v6781_v37 = vmul.f32 %v12614_v20, %v6757_v4 }
 0xec0   :  { %6845 = vrot.lane.b32.xlu1 %v6778_v60, %s9242_s15  ;;  %6843 = vrot.lane.b32.xlu0 %v6777_v24, %s9242_s15 }
 0xec1   :  { %v6761_v59 = vpop.permute.xlu0 %6760  ;;  %v6765_v19 = vpop.permute.xlu1 %6764 }
 0xec2   :  { %v6784_v60 = vmul.f32 %v12609_v16, %v6761_v59  ;;  %v6783_v24 = vmul.f32 %v12614_v20, %v6761_v59 }
 0xec4   :  { %6849 = vrot.lane.b32.xlu1 %v6780_v42, %s9242_s15  ;;  %6847 = vrot.lane.b32.xlu0 %v6779_v15, %s9242_s15  ;;  %v6786_v42 = vmul.f32 %v12609_v16, %v6765_v19  ;;  %v6785_v15 = vmul.f32 %v12614_v20, %v6765_v19 }
 0xec5   :  { %v6769_v12 = vpop.permute.xlu0 %6768  ;;  %v6773_v11 = vpop.permute.xlu1 %6772 }
 0xec8   :  { %6853 = vrot.lane.b32.xlu1 %v6782_v3, %s9242_s15  ;;  %6851 = vrot.lane.b32.xlu0 %v6781_v37, %s9242_s15  ;;  %v6788_v3 = vmul.f32 %v12609_v16, %v6769_v12  ;;  %v6787_v37 = vmul.f32 %v12614_v20, %v6769_v12 }
 0xecc   :  { %6857 = vrot.lane.b32.xlu1 %v6784_v60, %s9242_s15  ;;  %6855 = vrot.lane.b32.xlu0 %v6783_v24, %s9242_s15  ;;  %v6790_v60 = vmul.f32 %v12609_v16, %v6773_v11  ;;  %v6789_v24 = vmul.f32 %v12614_v20, %v6773_v11  ;;  %v6796_v16 = vmul.f32 %v12651_v23, %v6753_v6 }
 0xecd   :  { %v6795_v20 = vmul.f32 %v12656_v41, %v6753_v6  ;;  %v6802_v6 = vmul.f32 %v12651_v23, %v6765_v19 }
 0xed0   :  { %6861 = vrot.lane.b32.xlu1 %v6786_v42, %s9242_s15  ;;  %6859 = vrot.lane.b32.xlu0 %v6785_v15, %s9242_s15  ;;  %v6792_v42 = vmul.f32 %v12651_v23, %v6745_v38  ;;  %v6791_v15 = vmul.f32 %v12656_v41, %v6745_v38  ;;  %v6798_v38 = vmul.f32 %v12651_v23, %v6757_v4 }
 0xed4   :  { %6865 = vrot.lane.b32.xlu1 %v6788_v3, %s9242_s15  ;;  %6863 = vrot.lane.b32.xlu0 %v6787_v37, %s9242_s15  ;;  %v6794_v3 = vmul.f32 %v12651_v23, %v6749_v5  ;;  %v6793_v37 = vmul.f32 %v12656_v41, %v6749_v5  ;;  %v6800_v5 = vmul.f32 %v12651_v23, %v6761_v59 }
 0xed8   :  { %6869 = vrot.lane.b32.xlu1 %v6790_v60, %s9242_s15  ;;  %6867 = vrot.lane.b32.xlu0 %v6789_v24, %s9242_s15  ;;  %v6797_v60 = vmul.f32 %v12656_v41, %v6757_v4  ;;  %v6799_v24 = vmul.f32 %v12656_v41, %v6761_v59  ;;  %v6804_v4 = vmul.f32 %v12651_v23, %v6769_v12 }
 0xed9   :  { %v6806_v59 = vmul.f32 %v12651_v23, %v6773_v11  ;;  %v9065_v23 = vld [vmem:[%s16008_s0 + $0xf3] ss:$0 sm:$0xff] }
 0xedc   :  { %6873 = vrot.lane.b32.xlu1 %v6792_v42, %s9242_s15  ;;  %6871 = vrot.lane.b32.xlu0 %v6791_v15, %s9242_s15  ;;  %v6801_v42 = vmul.f32 %v12656_v41, %v6765_v19  ;;  %v6803_v15 = vmul.f32 %v12656_v41, %v6769_v12  ;;  %v9063_v19 = vld [vmem:[%s16008_s0 + $0xf1] ss:$0 sm:$0xff]  ;;  %v9062_v12 = vld [vmem:[%s16008_s0 + $0xf0] ss:$0 sm:$0xff] }
 0xee0   :  { %6877 = vrot.lane.b32.xlu1 %v6794_v3, %s9242_s15  ;;  %6875 = vrot.lane.b32.xlu0 %v6793_v37, %s9242_s15  ;;  %v6805_v3 = vmul.f32 %v12656_v41, %v6773_v11  ;;  %v9064_v41 = vld [vmem:[%s16008_s0 + $0xf2] ss:$0 sm:$0xff]  ;;  %v9067_v11 = vld [vmem:[%s16008_s0 + $0xf5] ss:$0 sm:$0xff] }
 0xee1   :  { %v9066_v37 = vld [vmem:[%s16008_s0 + $0xf4] ss:$0 sm:$0xff] }
 0xee4   :  { %6881 = vrot.lane.b32.xlu1 %v6796_v16, %s9242_s15  ;;  %6879 = vrot.lane.b32.xlu0 %v6795_v20, %s9242_s15  ;;  %v9069_v16 = vld [vmem:[%s16008_s0 + $0xf7] ss:$0 sm:$0xff]  ;;  %v9068_v20 = vld [vmem:[%s16008_s0 + $0xf6] ss:$0 sm:$0xff] }
 0xee8   :  { %6885 = vrot.lane.b32.xlu1 %v6798_v38, %s9242_s15  ;;  %6883 = vrot.lane.b32.xlu0 %v6797_v60, %s9242_s15  ;;  %v9079_v38 = vld [vmem:[%s16008_s0 + $0xf9] ss:$0 sm:$0xff]  ;;  %v9078_v60 = vld [vmem:[%s16008_s0 + $0xf8] ss:$0 sm:$0xff] }
 0xeec   :  { %6889 = vrot.lane.b32.xlu1 %v6800_v5, %s9242_s15  ;;  %6887 = vrot.lane.b32.xlu0 %v6799_v24, %s9242_s15  ;;  %v9081_v5 = vld [vmem:[%s16008_s0 + $0xfb] ss:$0 sm:$0xff]  ;;  %v9080_v24 = vld [vmem:[%s16008_s0 + $0xfa] ss:$0 sm:$0xff] }
 0xef0   :  { %6893 = vrot.lane.b32.xlu1 %v6802_v6, %s9242_s15  ;;  %6891 = vrot.lane.b32.xlu0 %v6801_v42, %s9242_s15  ;;  %v9083_v6 = vld [vmem:[%s16008_s0 + $0xfd] ss:$0 sm:$0xff]  ;;  %v9082_v42 = vld [vmem:[%s16008_s0 + $0xfc] ss:$0 sm:$0xff] }
 0xef4   :  { %6897 = vrot.lane.b32.xlu1 %v6804_v4, %s9242_s15  ;;  %6895 = vrot.lane.b32.xlu0 %v6803_v15, %s9242_s15  ;;  %v9085_v4 = vld [vmem:[%s16008_s0 + $0xff] ss:$0 sm:$0xff]  ;;  %v9084_v15 = vld [vmem:[%s16008_s0 + $0xfe] ss:$0 sm:$0xff] }
 0xef8   :  { %6901 = vrot.lane.b32.xlu1 %v6806_v59, %s9242_s15  ;;  %6899 = vrot.lane.b32.xlu0 %v6805_v3, %s9242_s15 }
 0xefc   :  { %7025 = vperm.xlu1 %9169, %v9063_v19   ;;  %7021 = vperm.xlu0 %9168, %v9062_v12  }
 0xf00   :  { %7033 = vperm.xlu1 %9169, %v9065_v23   ;;  %7029 = vperm.xlu0 %9168, %v9064_v41  }
 0xf04   :  { %7041 = vperm.xlu1 %9169, %v9067_v11   ;;  %7037 = vperm.xlu0 %9168, %v9066_v37  }
 0xf08   :  { %7049 = vperm.xlu1 %9169, %v9069_v16   ;;  %7045 = vperm.xlu0 %9168, %v9068_v20  }
 0xf0c   :  { %7170 = vperm.xlu1 %9169, %v9079_v38   ;;  %7166 = vperm.xlu0 %9168, %v9078_v60  }
 0xf10   :  { %7178 = vperm.xlu1 %9169, %v9081_v5   ;;  %7174 = vperm.xlu0 %9168, %v9080_v24  }
 0xf14   :  { %7186 = vperm.xlu1 %9169, %v9083_v6   ;;  %7182 = vperm.xlu0 %9168, %v9082_v42  }
 0xf18   :  { %7194 = vperm.xlu1 %9169, %v9085_v4   ;;  %7190 = vperm.xlu0 %9168, %v9084_v15  }
 0xf2e   :  { %v12890_v59 = vpop.permute.xlu1 %6841  ;;  %v12892_v3 = vpop.permute.xlu0 %6839 }
 0xf2f   :  { %16764 = vst [vmem:[#allocation665_spill] sm:$0xff] %v12890_v59  ;;  %16765 = vst [vmem:[#allocation666_spill] sm:$0xff] %v12892_v3  ;;  %v9173_v59 = vld [vmem:[%s16010_s2 + $0x60] sm:$0xff] }
 0xf30   :  { %v117_v57 = vmul.f32 %v9173_v59, %v9344_v28  ;;  %v123_v34 = vmul.f32 %v9173_v59, %v9348_v30  ;;  %v125_v48 = vmul.f32 %v9173_v59, %v9346_v29  ;;  %v127_v45 = vmul.f32 %v9173_v59, %v9352_v32 }
 0xf32   :  { %v12894_v19 = vpop.permute.xlu1 %6845  ;;  %v12896_v12 = vpop.permute.xlu0 %6843 }
 0xf33   :  { %16766 = vst [vmem:[#allocation667_spill] sm:$0xff] %v12894_v19  ;;  %16767 = vst [vmem:[#allocation668_spill] sm:$0xff] %v12896_v12 }
 0xf36   :  { %v12898_v23 = vpop.permute.xlu1 %6849  ;;  %v12900_v41 = vpop.permute.xlu0 %6847 }
 0xf37   :  { %16768 = vst [vmem:[#allocation669_spill] sm:$0xff] %v12898_v23  ;;  %16769 = vst [vmem:[#allocation670_spill] sm:$0xff] %v12900_v41 }
 0xf3a   :  { %v12902_v11 = vpop.permute.xlu1 %6853  ;;  %v12904_v37 = vpop.permute.xlu0 %6851 }
 0xf3b   :  { %16770 = vst [vmem:[#allocation671_spill] sm:$0xff] %v12902_v11  ;;  %16771 = vst [vmem:[#allocation672_spill] sm:$0xff] %v12904_v37 }
 0xf3e   :  { %v12906_v16 = vpop.permute.xlu1 %6857  ;;  %v12908_v20 = vpop.permute.xlu0 %6855 }
 0xf3f   :  { %16772 = vst [vmem:[#allocation673_spill] sm:$0xff] %v12906_v16  ;;  %16773 = vst [vmem:[#allocation674_spill] sm:$0xff] %v12908_v20 }
 0xf42   :  { %v12910_v38 = vpop.permute.xlu1 %6861  ;;  %v12912_v60 = vpop.permute.xlu0 %6859 }
 0xf43   :  { %16774 = vst [vmem:[#allocation675_spill] sm:$0xff] %v12910_v38  ;;  %16775 = vst [vmem:[#allocation676_spill] sm:$0xff] %v12912_v60 }
 0xf46   :  { %v12914_v5 = vpop.permute.xlu1 %6865  ;;  %v12916_v24 = vpop.permute.xlu0 %6863 }
 0xf47   :  { %16776 = vst [vmem:[#allocation677_spill] sm:$0xff] %v12914_v5  ;;  %16777 = vst [vmem:[#allocation678_spill] sm:$0xff] %v12916_v24 }
 0xf4a   :  { %v12918_v6 = vpop.permute.xlu1 %6869  ;;  %v12920_v42 = vpop.permute.xlu0 %6867 }
 0xf4b   :  { %16778 = vst [vmem:[#allocation679_spill] sm:$0xff] %v12918_v6  ;;  %16779 = vst [vmem:[#allocation680_spill] sm:$0xff] %v12920_v42 }
 0xf4e   :  { %v12922_v4 = vpop.permute.xlu1 %6873  ;;  %v12924_v15 = vpop.permute.xlu0 %6871 }
 0xf4f   :  { %16780 = vst [vmem:[#allocation681_spill] sm:$0xff] %v12922_v4  ;;  %16781 = vst [vmem:[#allocation682_spill] sm:$0xff] %v12924_v15 }
 0xf52   :  { %v12926_v37 = vpop.permute.xlu1 %6877  ;;  %v12928_v16 = vpop.permute.xlu0 %6875 }
 0xf53   :  { %16782 = vst [vmem:[#allocation683_spill] sm:$0xff] %v12926_v37  ;;  %16783 = vst [vmem:[#allocation684_spill] sm:$0xff] %v12928_v16 }
 0xf56   :  { %v12930_v20 = vpop.permute.xlu1 %6881  ;;  %v12932_v38 = vpop.permute.xlu0 %6879 }
 0xf57   :  { %16784 = vst [vmem:[#allocation685_spill] sm:$0xff] %v12930_v20  ;;  %16785 = vst [vmem:[#allocation686_spill] sm:$0xff] %v12932_v38 }
 0xf5a   :  { %v12934_v60 = vpop.permute.xlu1 %6885  ;;  %v12936_v5 = vpop.permute.xlu0 %6883 }
 0xf5b   :  { %16786 = vst [vmem:[#allocation687_spill] sm:$0xff] %v12934_v60  ;;  %16787 = vst [vmem:[#allocation688_spill] sm:$0xff] %v12936_v5 }
 0xf5e   :  { %v12938_v24 = vpop.permute.xlu1 %6889  ;;  %v12940_v6 = vpop.permute.xlu0 %6887 }
 0xf5f   :  { %16788 = vst [vmem:[#allocation689_spill] sm:$0xff] %v12938_v24  ;;  %16789 = vst [vmem:[#allocation690_spill] sm:$0xff] %v12940_v6 }
 0xf62   :  { %v12942_v42 = vpop.permute.xlu1 %6893  ;;  %v12944_v4 = vpop.permute.xlu0 %6891 }
 0xf63   :  { %16790 = vst [vmem:[#allocation691_spill] sm:$0xff] %v12942_v42  ;;  %16791 = vst [vmem:[#allocation692_spill] sm:$0xff] %v12944_v4 }
 0xf66   :  { %v12946_v15 = vpop.permute.xlu1 %6897  ;;  %v12948_v37 = vpop.permute.xlu0 %6895 }
 0xf67   :  { %16792 = vst [vmem:[#allocation693_spill] sm:$0xff] %v12946_v15  ;;  %16793 = vst [vmem:[#allocation694_spill] sm:$0xff] %v12948_v37 }
 0xf6a   :  { %v12950_v16 = vpop.permute.xlu1 %6901  ;;  %v12952_v20 = vpop.permute.xlu0 %6899 }
 0xf6b   :  { %16794 = vst [vmem:[#allocation695_spill] sm:$0xff] %v12950_v16  ;;  %16795 = vst [vmem:[#allocation696_spill] sm:$0xff] %v12952_v20 }
 0xf77   :  { %v12954_v38 = vpop.permute.xlu1 %7025  ;;  %v12956_v60 = vpop.permute.xlu0 %7021 }
 0xf78   :  { %16796 = vst [vmem:[#allocation697_spill] sm:$0xff] %v12954_v38  ;;  %16797 = vst [vmem:[#allocation698_spill] sm:$0xff] %v12956_v60  ;;  %v12975_v38 = vld [vmem:[%s16010_s2 + $0x51] sm:$0xff] }
 0xf7b   :  { %v12958_v5 = vpop.permute.xlu1 %7033  ;;  %v12960_v24 = vpop.permute.xlu0 %7029 }
 0xf7c   :  { %16798 = vst [vmem:[#allocation699_spill] sm:$0xff] %v12958_v5  ;;  %16799 = vst [vmem:[#allocation700_spill] sm:$0xff] %v12960_v24  ;;  %v12980_v5 = vld [vmem:[%s16010_s2 + $0x49] sm:$0xff] }
 0xf7f   :  { %v12962_v6 = vpop.permute.xlu1 %7041  ;;  %v12964_v42 = vpop.permute.xlu0 %7037 }
 0xf80   :  { %16800 = vst [vmem:[#allocation701_spill] sm:$0xff] %v12962_v6  ;;  %16801 = vst [vmem:[#allocation702_spill] sm:$0xff] %v12964_v42 }
 0xf83   :  { %v12966_v4 = vpop.permute.xlu1 %7049  ;;  %v12968_v15 = vpop.permute.xlu0 %7045 }
 0xf84   :  { %16802 = vst [vmem:[#allocation703_spill] sm:$0xff] %v12966_v4  ;;  %16803 = vst [vmem:[#allocation704_spill] sm:$0xff] %v12968_v15 }
 0xf87   :  { %v12970_v37 = vpop.permute.xlu0 %7166  ;;  %v12986_v42 = vpop.permute.xlu1 %7170 }
 0xf88   :  { %16804 = vst [vmem:[#allocation705_spill] sm:$0xff] %v12970_v37  ;;  %v7198_v6 = vmul.f32 %v12975_v38, %v12970_v37  ;;  %v7197_v4 = vmul.f32 %v12980_v5, %v12970_v37  ;;  %16805 = vst [vmem:[#allocation706_spill] sm:$0xff] %v12986_v42  ;;  %v7200_v15 = vmul.f32 %v12975_v38, %v12986_v42 }
 0xf89   :  { %v7199_v24 = vmul.f32 %v12980_v5, %v12986_v42  ;;  %v13035_v37 = vmul.f32 %v9173_v59, %v9338_v25 }
 0xf8a   :  { %7263 = vrot.lane.b32.xlu1 %v7198_v6, %s9241_s10  ;;  %7261 = vrot.lane.b32.xlu0 %v7197_v4, %s9241_s10  ;;  %v9170_v4 = vld [vmem:[%s16010_s2 + $0x8] sm:$0xff] }
 0xf8b   :  { %v12994_v60 = vpop.permute.xlu0 %7174  ;;  %v13002_v16 = vpop.permute.xlu1 %7178  ;;  %v104_v41 = vmul.f32 %v9170_v4, %v9338_v25  ;;  %v102_v3 = vmul.f32 %v9170_v4, %v9344_v28  ;;  %16809 = vst [vmem:[#allocation710_spill] sm:$0xff] %v13035_v37  ;;  %v108_v53 = vmul.f32 %v9170_v4, %v9348_v30  ;;  %v114_v47 = vmul.f32 %v9170_v4, %v9350_v31 }
 0xf8c   :  { %16806 = vst [vmem:[#allocation707_spill] sm:$0xff] %v12994_v60  ;;  %v7202_v20 = vmul.f32 %v12975_v38, %v12994_v60  ;;  %v7201_v6 = vmul.f32 %v12980_v5, %v12994_v60  ;;  %16807 = vst [vmem:[#allocation708_spill] sm:$0xff] %v13002_v16  ;;  %v7204_v12 = vmul.f32 %v12975_v38, %v13002_v16 }
 0xf8d   :  { %v7203_v19 = vmul.f32 %v12980_v5, %v13002_v16  ;;  %v115_v60 = vmul.f32 %v9173_v59, %v9340_v26  ;;  %v106_v16 = vmul.f32 %v9170_v4, %v9342_v27 }
 0xf8e   :  { %7267 = vrot.lane.b32.xlu1 %v7200_v15, %s9241_s10  ;;  %7265 = vrot.lane.b32.xlu0 %v7199_v24, %s9241_s10  ;;  %v100_v15 = vmul.f32 %v9170_v4, %v9340_v26  ;;  %v9171_v24 = vld [vmem:[%s16010_s2] sm:$0xff] }
 0xf8f   :  { %v99_v11 = vmul.f32 %v9171_v24, %v9340_v26  ;;  %v103_v23 = vmul.f32 %v9171_v24, %v9338_v25  ;;  %v13037_v0 = vpop.permute.xlu0 %7182  ;;  %v101_v63 = vmul.f32 %v9171_v24, %v9344_v28  ;;  %v105_v58 = vmul.f32 %v9171_v24, %v9342_v27  ;;  %v13058_v50 = vpop.permute.xlu1 %7186 }
 0xf90   :  { %16810 = vst [vmem:[#allocation711_spill] sm:$0xff] %v13037_v0  ;;  %v107_v52 = vmul.f32 %v9171_v24, %v9348_v30  ;;  %v7206_v51 = vmul.f32 %v12975_v38, %v13037_v0  ;;  %v109_v35 = vmul.f32 %v9171_v24, %v9346_v29  ;;  %v113_v46 = vmul.f32 %v9171_v24, %v9350_v31 }
 0xf91   :  { %v7208_v37 = vmul.f32 %v12975_v38, %v13058_v50 }
 0xf92   :  { %7271 = vrot.lane.b32.xlu1 %v7202_v20, %s9241_s10  ;;  %7269 = vrot.lane.b32.xlu0 %v7201_v6, %s9241_s10  ;;  %v9172_v20 = vld [vmem:[%s16010_s2 + $0x68] sm:$0xff] }
 0xf93   :  { %v13020_v6 = vmul.f32 %v9172_v20, %v9340_v26  ;;  %v13032_v42 = vmul.f32 %v9172_v20, %v9338_v25  ;;  %v118_v26 = vmul.f32 %v9172_v20, %v9344_v28  ;;  %v122_v54 = vmul.f32 %v9172_v20, %v9342_v27  ;;  %v13079_v43 = vpop.permute.xlu0 %7190 }
 0xf94   :  { %v121_v25 = vmul.f32 %v9173_v59, %v9342_v27  ;;  %v124_v28 = vmul.f32 %v9172_v20, %v9348_v30  ;;  %v112_v27 = vmul.f32 %v9170_v4, %v9352_v32  ;;  %v126_v49 = vmul.f32 %v9172_v20, %v9346_v29 }
 0xf95   :  { %16808 = vst [vmem:[#allocation709_spill] sm:$0xff] %v13032_v42  ;;  %v128_v30 = vmul.f32 %v9172_v20, %v9352_v32  ;;  %v130_v44 = vmul.f32 %v9172_v20, %v9350_v31  ;;  %v409_v20 = vadd.f32 %v9506_v1, %v104_v41  ;;  %v408_v42 = vadd.f32 %v9508_v2, %v103_v23  ;;  %v16818_v41 = vld [vmem:[#allocation10_spill] sm:$0xff] }
 0xf96   :  { %7275 = vrot.lane.b32.xlu1 %v7204_v12, %s9241_s10  ;;  %7273 = vrot.lane.b32.xlu0 %v7203_v19, %s9241_s10  ;;  %v7205_v12 = vmul.f32 %v12980_v5, %v13037_v0  ;;  %v110_v19 = vmul.f32 %v9170_v4, %v9346_v29  ;;  %v111_v0 = vmul.f32 %v9171_v24, %v9352_v32 }
 0xf97   :  { %v7207_v29 = vmul.f32 %v12980_v5, %v13058_v50  ;;  %v407_v4 = vadd.f32 %v9498_v61, %v102_v3  ;;  %v129_v24 = vmul.f32 %v9173_v59, %v9350_v31  ;;  %v406_v32 = vadd.f32 %v9500_v62, %v101_v63  ;;  %v16817_v3 = vld [vmem:[#allocation9_spill] sm:$0xff] }
 0xf98   :  { %v413_v61 = vadd.f32 %v9530_v9, %v108_v53  ;;  %v412_v31 = vadd.f32 %v9532_v10, %v107_v52  ;;  %v415_v59 = vadd.f32 %v9540_v13, %v110_v19  ;;  %v414_v62 = vadd.f32 %v9542_v14, %v109_v35  ;;  %v13100_v53 = vpop.permute.xlu1 %7194  ;;  %v16812_v35 = vld [vmem:[#allocation5_spill] sm:$0xff]  ;;  %v16815_v52 = vld [vmem:[#allocation7_spill] sm:$0xff]  ;;  %v16824_v19 = vld [vmem:[#allocation16_spill] sm:$0xff] }
 0xf99   :  { %v7210_v1 = vmul.f32 %v12975_v38, %v13079_v43  ;;  %v7209_v2 = vmul.f32 %v12980_v5, %v13079_v43  ;;  %v417_v63 = vadd.f32 %v9550_v17, %v112_v27  ;;  %v418_v9 = vadd.f32 %v9562_v22, %v113_v46  ;;  %v16814_v22 = vld [vmem:[#allocation6_spill] sm:$0xff] }
 0xf9a   :  { %7279 = vrot.lane.b32.xlu1 %v7206_v51, %s9241_s10  ;;  %7277 = vrot.lane.b32.xlu0 %v7205_v12, %s9241_s10  ;;  %v405_v51 = vadd.f32 %v9490_v55, %v100_v15  ;;  %v404_v12 = vadd.f32 %v9492_v56, %v99_v11  ;;  %v411_v55 = vadd.f32 %v9520_v7, %v106_v16  ;;  %v16826_v27 = vld [vmem:[#allocation18_spill] sm:$0xff] }
 0xf9b   :  { %v410_v56 = vadd.f32 %v9522_v8, %v105_v58  ;;  %v416_v7 = vadd.f32 %v9552_v18, %v111_v0  ;;  %v419_v8 = vadd.f32 %v9560_v21, %v114_v47  ;;  %v421_v10 = vadd.f32 %v9570_v33, %v13020_v6  ;;  %v16813_v47 = vld [vmem:[#allocation710_spill] sm:$0xff]  ;;  %v16816_v0 = vld [vmem:[#allocation8_spill] sm:$0xff] }
 0xf9c   :  { %v420_v13 = vadd.f32 %v9572_v36, %v115_v60  ;;  %v423_v14 = vadd.f32 %v9580_v39, %v118_v26  ;;  %v422_v17 = vadd.f32 %v9582_v40, %v117_v57  ;;  %v16811_v18 = vld [vmem:[#allocation709_spill] sm:$0xff]  ;;  %v424_v46 = vadd.f32 %v16814_v22, %v16813_v47  ;;  %v16819_v57 = vld [vmem:[#allocation11_spill] sm:$0xff]  ;;  %v16822_v6 = vld [vmem:[#allocation14_spill] sm:$0xff] }
 0xf9d   :  { %v425_v21 = vadd.f32 %v16812_v35, %v16811_v18  ;;  %v427_v58 = vadd.f32 %v16815_v52, %v122_v54  ;;  %v426_v33 = vadd.f32 %v16816_v0, %v121_v25  ;;  %v429_v36 = vadd.f32 %v16817_v3, %v124_v28  ;;  %v16821_v60 = vld [vmem:[#allocation13_spill] sm:$0xff]  ;;  %v16823_v26 = vld [vmem:[#allocation15_spill] sm:$0xff]  ;;  %v16833_v47 = vld [vmem:[#allocation24_spill] sm:$0xff] }
 0xf9e   :  { %7283 = vrot.lane.b32.xlu1 %v7208_v37, %s9241_s10  ;;  %7281 = vrot.lane.b32.xlu0 %v7207_v29, %s9241_s10  ;;  %v7212_v39 = vmul.f32 %v12975_v38, %v13100_v53  ;;  %v7211_v23 = vmul.f32 %v12980_v5, %v13100_v53  ;;  %v428_v40 = vadd.f32 %v16818_v41, %v123_v34  ;;  %v16820_v37 = vld [vmem:[#allocation12_spill] sm:$0xff]  ;;  %v16825_v38 = vld [vmem:[#allocation17_spill] sm:$0xff]  ;;  %v16827_v29 = vld [vmem:[#allocation19_spill] sm:$0xff] }
 0xf9f   :  { %v431_v11 = vadd.f32 %v16819_v57, %v126_v49  ;;  %v430_v16 = vadd.f32 %v16820_v37, %v125_v48  ;;  %v433_v15 = vadd.f32 %v16821_v60, %v128_v30  ;;  %v432_v54 = vadd.f32 %v16822_v6, %v127_v45  ;;  %v13136_v45 = vld [vmem:[%s16010_s2 + $0xb1] sm:$0xff]  ;;  %v16829_v30 = vld [vmem:[#allocation21_spill] sm:$0xff] }
 0xfa0   :  { %v435_v25 = vadd.f32 %v16823_v26, %v130_v44  ;;  %v434_v28 = vadd.f32 %v16824_v19, %v129_v24  ;;  %v678_v5 = vadd.f32 %v16825_v38, %v405_v51  ;;  %v677_v34 = vadd.f32 %v16826_v27, %v404_v12  ;;  %v13141_v44 = vld [vmem:[%s16010_s2 + $0xa9] sm:$0xff]  ;;  %v16831_v12 = vld [vmem:[#allocation705_spill] sm:$0xff] }
 0xfa1   :  { %v680_v49 = vadd.f32 %v16827_v29, %v407_v4  ;;  %v13144_v24 = vadd.f32 %v16829_v30, %v409_v20  ;;  %v16830_v51 = vld [vmem:[#allocation22_spill] sm:$0xff]  ;;  %v7214_v4 = vmul.f32 %v13136_v45, %v16831_v12  ;;  %v16832_v18 = vld [vmem:[#allocation23_spill] sm:$0xff]  ;;  %v13157_v22 = vadd.f32 %v16833_v47, %v410_v56  ;;  %v16834_v52 = vld [vmem:[#allocation25_spill] sm:$0xff] }
 0xfa2   :  { %7287 = vrot.lane.b32.xlu1 %v7210_v1, %s9241_s10  ;;  %7285 = vrot.lane.b32.xlu0 %v7209_v2, %s9241_s10  ;;  %v16828_v1 = vld [vmem:[#allocation20_spill] sm:$0xff]  ;;  %v13147_v2 = vadd.f32 %v16830_v51, %v408_v42  ;;  %v13154_v35 = vadd.f32 %v16832_v18, %v411_v55  ;;  %v13160_v0 = vadd.f32 %v16834_v52, %v413_v61  ;;  %v16835_v20 = vld [vmem:[#allocation26_spill] sm:$0xff]  ;;  %v16836_v42 = vld [vmem:[#allocation27_spill] sm:$0xff] }
 0xfa3   :  { %v679_v48 = vadd.f32 %v16828_v1, %v406_v32  ;;  %v7213_v32 = vmul.f32 %v13141_v44, %v16831_v12  ;;  %v13163_v3 = vadd.f32 %v16835_v20, %v412_v31  ;;  %v16838_v57 = vld [vmem:[#allocation29_spill] sm:$0xff]  ;;  %v16839_v55 = vld [vmem:[#allocation30_spill] sm:$0xff]  ;;  %v16840_v61 = vld [vmem:[#allocation31_spill] sm:$0xff] }
 0xfa4   :  { %v13172_v37 = vadd.f32 %v16838_v57, %v417_v63  ;;  %v13177_v56 = vadd.f32 %v16839_v55, %v416_v7  ;;  %v13180_v60 = vadd.f32 %v16840_v61, %v419_v8  ;;  %v16841_v31 = vld [vmem:[#allocation32_spill] sm:$0xff]  ;;  %v16844_v38 = vld [vmem:[#allocation35_spill] sm:$0xff]  ;;  %v16845_v27 = vld [vmem:[#allocation706_spill] sm:$0xff] }
 0xfa5   :  { %v13183_v6 = vadd.f32 %v16841_v31, %v418_v9  ;;  %v696_v63 = vadd.f32 %v16844_v38, %v423_v14  ;;  %v7216_v29 = vmul.f32 %v13136_v45, %v16845_v27  ;;  %v7215_v1 = vmul.f32 %v13141_v44, %v16845_v27  ;;  %v16846_v7 = vld [vmem:[#allocation36_spill] sm:$0xff]  ;;  %v16847_v51 = vld [vmem:[#allocation37_spill] sm:$0xff]  ;;  %v16848_v12 = vld [vmem:[#allocation38_spill] sm:$0xff] }
 0xfa6   :  { %7291 = vrot.lane.b32.xlu1 %v7212_v39, %s9241_s10  ;;  %7289 = vrot.lane.b32.xlu0 %v7211_v23, %s9241_s10  ;;  %v13166_v39 = vadd.f32 %v16836_v42, %v415_v59  ;;  %v16837_v23 = vld [vmem:[#allocation28_spill] sm:$0xff]  ;;  %v16842_v59 = vld [vmem:[#allocation33_spill] sm:$0xff]  ;;  %v695_v30 = vadd.f32 %v16846_v7, %v422_v17  ;;  %v698_v8 = vadd.f32 %v16847_v51, %v425_v21  ;;  %v16849_v9 = vld [vmem:[#allocation39_spill] sm:$0xff] }
 0xfa7   :  { %v13169_v41 = vadd.f32 %v16837_v23, %v414_v62  ;;  %v694_v26 = vadd.f32 %v16842_v59, %v421_v10  ;;  %v16843_v62 = vld [vmem:[#allocation34_spill] sm:$0xff]  ;;  %v16850_v18 = vld [vmem:[#allocation40_spill] sm:$0xff]  ;;  %v16851_v47 = vld [vmem:[#allocation41_spill] sm:$0xff] }
 0xfa8   :  { %v693_v19 = vadd.f32 %v16843_v62, %v420_v13  ;;  %v699_v10 = vadd.f32 %v16850_v18, %v426_v33  ;;  %v13198_v13 = vadd.f32 %v16851_v47, %v429_v36  ;;  %v16852_v14 = vld [vmem:[#allocation42_spill] sm:$0xff]  ;;  %v16853_v20 = vld [vmem:[#allocation43_spill] sm:$0xff]  ;;  %v16856_v42 = vld [vmem:[#allocation44_spill] sm:$0xff] }
 0xfa9   :  { %v13201_v52 = vadd.f32 %v16852_v14, %v428_v40  ;;  %v13206_v17 = vadd.f32 %v16853_v20, %v431_v11  ;;  %v13211_v21 = vld [vmem:[%s16010_s2 + $0x9] sm:$0xff]  ;;  %v13218_v33 = vld [vmem:[%s16010_s2 + $0x1] sm:$0xff]  ;;  %v13225_v23 = vadd.f32 %v16856_v42, %v430_v16  ;;  %v16861_v51 = vld [vmem:[#allocation48_spill] sm:$0xff] }
 0xfaa   :  { %7295 = vrot.lane.b32.xlu1 %v7214_v4, %s9241_s10  ;;  %7293 = vrot.lane.b32.xlu0 %v7213_v32, %s9241_s10  ;;  %v697_v4 = vadd.f32 %v16848_v12, %v424_v46  ;;  %v700_v32 = vadd.f32 %v16849_v9, %v427_v58  ;;  %v16854_v46 = vld [vmem:[#allocation50_spill] sm:$0xff]  ;;  %v16855_v40 = vld [vmem:[#allocation49_spill] sm:$0xff]  ;;  %v16858_v61 = vld [vmem:[#allocation707_spill] sm:$0xff]  ;;  %v13257_v12 = vadd.f32 %v16861_v51, %v434_v28 }
 0xfab   :  { %v795_v58 = vmul.f32 %v13211_v21, %v16854_v46  ;;  %v794_v36 = vmul.f32 %v13218_v33, %v16854_v46  ;;  %v797_v11 = vmul.f32 %v13211_v21, %v16855_v40  ;;  %v16857_v57 = vld [vmem:[#allocation45_spill] sm:$0xff]  ;;  %v7218_v31 = vmul.f32 %v13136_v45, %v16858_v61  ;;  %v16859_v62 = vld [vmem:[#allocation46_spill] sm:$0xff]  ;;  %v16862_v20 = vld [vmem:[#allocation52_spill] sm:$0xff] }
 0xfac   :  { %v13228_v55 = vadd.f32 %v16857_v57, %v433_v15  ;;  %v7217_v59 = vmul.f32 %v13141_v44, %v16858_v61  ;;  %v13235_v38 = vadd.f32 %v16859_v62, %v432_v54  ;;  %v796_v27 = vmul.f32 %v13218_v33, %v16855_v40  ;;  %v13242_v16 = vld [vmem:[%s16010_s2 + $0x69] sm:$0xff]  ;;  %v16863_v42 = vld [vmem:[#allocation708_spill] sm:$0xff] }
 0xfad   :  { %v811_v15 = vmul.f32 %v13242_v16, %v16854_v46  ;;  %v813_v9 = vmul.f32 %v13242_v16, %v16855_v40  ;;  %v13263_v18 = vadd.f32 %v795_v58, %v678_v5  ;;  %v13265_v47 = vadd.f32 %v794_v36, %v677_v34  ;;  %v16864_v34 = vld [vmem:[#allocation51_spill] sm:$0xff] }
 0xfae   :  { %7299 = vrot.lane.b32.xlu1 %v7216_v29, %s9241_s10  ;;  %7297 = vrot.lane.b32.xlu0 %v7215_v1, %s9241_s10  ;;  %v13249_v29 = vld [vmem:[%s16010_s2 + $0x61] sm:$0xff]  ;;  %v16860_v1 = vld [vmem:[#allocation47_spill] sm:$0xff]  ;;  %v13267_v14 = vadd.f32 %v797_v11, %v680_v49  ;;  %v799_v28 = vmul.f32 %v13211_v21, %v16862_v20  ;;  %v7220_v57 = vmul.f32 %v13136_v45, %v16863_v42 }
 0xfaf   :  { %v810_v54 = vmul.f32 %v13249_v29, %v16854_v46  ;;  %v13254_v7 = vadd.f32 %v16860_v1, %v435_v25  ;;  %v812_v25 = vmul.f32 %v13249_v29, %v16855_v40  ;;  %v798_v46 = vmul.f32 %v13218_v33, %v16862_v20 }
 0xfb0   :  { %v7219_v5 = vmul.f32 %v13141_v44, %v16863_v42  ;;  %v13279_v58 = vadd.f32 %v796_v27, %v679_v48  ;;  %v801_v49 = vmul.f32 %v13211_v21, %v16864_v34  ;;  %v13283_v36 = vadd.f32 %v811_v15, %v694_v26  ;;  %v16865_v15 = vld [vmem:[#allocation711_spill] sm:$0xff] }
 0xfb1   :  { %v13285_v40 = vadd.f32 %v810_v54, %v693_v19  ;;  %v800_v11 = vmul.f32 %v13218_v33, %v16864_v34  ;;  %v815_v61 = vmul.f32 %v13242_v16, %v16862_v20  ;;  %v13295_v48 = vadd.f32 %v813_v9, %v696_v63 }
 0xfb2   :  { %7303 = vrot.lane.b32.xlu1 %v7218_v31, %s9241_s10  ;;  %7301 = vrot.lane.b32.xlu0 %v7217_v59, %s9241_s10  ;;  %v814_v31 = vmul.f32 %v13249_v29, %v16862_v20  ;;  %v13297_v59 = vadd.f32 %v812_v25, %v695_v30  ;;  %v817_v26 = vmul.f32 %v13242_v16, %v16864_v34  ;;  %v16866_v30 = vld [vmem:[#allocation54_spill] sm:$0xff]  ;;  %v16867_v25 = vld [vmem:[#allocation53_spill] sm:$0xff] }
 0xfb3   :  { %v816_v19 = vmul.f32 %v13249_v29, %v16864_v34  ;;  %v831_v62 = vadd.f32 %v799_v28, %v13144_v24  ;;  %v830_v27 = vadd.f32 %v798_v46, %v13147_v2  ;;  %v7222_v54 = vmul.f32 %v13136_v45, %v16865_v15 }
 0xfb4   :  { %v7221_v1 = vmul.f32 %v13141_v44, %v16865_v15  ;;  %v833_v63 = vadd.f32 %v801_v49, %v13154_v35  ;;  %v803_v51 = vmul.f32 %v13211_v21, %v16866_v30  ;;  %v802_v9 = vmul.f32 %v13218_v33, %v16866_v30 }
 0xfb5   :  { %v805_v20 = vmul.f32 %v13211_v21, %v16867_v25  ;;  %v832_v24 = vadd.f32 %v800_v11, %v13157_v22  ;;  %v13317_v2 = vadd.f32 %v815_v61, %v698_v8  ;;  %v13319_v28 = vadd.f32 %v814_v31, %v697_v4  ;;  %v16868_v11 = vld [vmem:[#allocation56_spill] sm:$0xff] }
 0xfb6   :  { %7307 = vrot.lane.b32.xlu1 %v7220_v57, %s9241_s10  ;;  %7305 = vrot.lane.b32.xlu0 %v7219_v5, %s9241_s10  ;;  %v804_v35 = vmul.f32 %v13218_v33, %v16867_v25  ;;  %v13325_v46 = vadd.f32 %v817_v26, %v700_v32  ;;  %v13327_v42 = vadd.f32 %v816_v19, %v699_v10  ;;  %v16869_v26 = vld [vmem:[#allocation55_spill] sm:$0xff] }
 0xfb7   :  { %v819_v57 = vmul.f32 %v13242_v16, %v16866_v30  ;;  %v818_v22 = vmul.f32 %v13249_v29, %v16866_v30  ;;  %v821_v8 = vmul.f32 %v13242_v16, %v16867_v25  ;;  %v7224_v4 = vmul.f32 %v13136_v45, %v13058_v50 }
 0xfb8   :  { %v7223_v5 = vmul.f32 %v13141_v44, %v13058_v50  ;;  %v835_v32 = vadd.f32 %v803_v51, %v13160_v0  ;;  %v834_v10 = vadd.f32 %v802_v9, %v13163_v3  ;;  %v837_v34 = vadd.f32 %v805_v20, %v13166_v39  ;;  %v16871_v20 = vld [vmem:[#allocation58_spill] sm:$0xff] }
 0xfb9   :  { %v820_v49 = vmul.f32 %v13249_v29, %v16867_v25  ;;  %v807_v61 = vmul.f32 %v13211_v21, %v16868_v11  ;;  %v806_v31 = vmul.f32 %v13218_v33, %v16868_v11  ;;  %v809_v19 = vmul.f32 %v13211_v21, %v16869_v26 }
 0xfba   :  { %7311 = vrot.lane.b32.xlu1 %v7222_v54, %s9241_s10  ;;  %7309 = vrot.lane.b32.xlu0 %v7221_v1, %s9241_s10  ;;  %v808_v50 = vmul.f32 %v13218_v33, %v16869_v26  ;;  %v823_v0 = vmul.f32 %v13242_v16, %v16868_v11  ;;  %v822_v3 = vmul.f32 %v13249_v29, %v16868_v11 }
 0xfbb   :  { %v825_v39 = vmul.f32 %v13242_v16, %v16869_v26  ;;  %v836_v15 = vadd.f32 %v804_v35, %v13169_v41  ;;  %v824_v21 = vmul.f32 %v13249_v29, %v16869_v26  ;;  %v7226_v54 = vmul.f32 %v13136_v45, %v13079_v43 }
 0xfbc   :  { %v7225_v33 = vmul.f32 %v13141_v44, %v13079_v43  ;;  %v851_v1 = vadd.f32 %v819_v57, %v13198_v13  ;;  %v850_v30 = vadd.f32 %v818_v22, %v13201_v52  ;;  %v853_v51 = vadd.f32 %v821_v8, %v13206_v17  ;;  %v16874_v57 = vld [vmem:[#allocation61_spill] sm:$0xff] }
 0xfbd   :  { %v852_v9 = vadd.f32 %v820_v49, %v13225_v23  ;;  %v839_v16 = vadd.f32 %v807_v61, %v13172_v37  ;;  %v838_v41 = vadd.f32 %v806_v31, %v13177_v56  ;;  %v841_v29 = vadd.f32 %v809_v19, %v13180_v60  ;;  %v16870_v23 = vld [vmem:[#allocation57_spill] sm:$0xff]  ;;  %v16881_v61 = vld [vmem:[#allocation68_spill] sm:$0xff]  ;;  %v16883_v31 = vld [vmem:[#allocation70_spill] sm:$0xff] }
 0xfbe   :  { %7315 = vrot.lane.b32.xlu1 %v7224_v4, %s9241_s10  ;;  %7313 = vrot.lane.b32.xlu0 %v7223_v5, %s9241_s10  ;;  %v840_v43 = vadd.f32 %v808_v50, %v13183_v6  ;;  %v855_v13 = vadd.f32 %v823_v0, %v13228_v55  ;;  %v854_v52 = vadd.f32 %v822_v3, %v13235_v38  ;;  %v16872_v55 = vld [vmem:[#allocation59_spill] sm:$0xff]  ;;  %v16873_v38 = vld [vmem:[#allocation60_spill] sm:$0xff]  ;;  %v16887_v3 = vld [vmem:[#allocation74_spill] sm:$0xff] }
 0xfbf   :  { %v857_v17 = vadd.f32 %v825_v39, %v13254_v7  ;;  %v1100_v25 = vadd.f32 %v16870_v23, %v13263_v18  ;;  %v856_v37 = vadd.f32 %v824_v21, %v13257_v12  ;;  %v7228_v56 = vmul.f32 %v13136_v45, %v13100_v53  ;;  %v16875_v18 = vld [vmem:[#allocation62_spill] sm:$0xff]  ;;  %v16876_v12 = vld [vmem:[#allocation63_spill] sm:$0xff]  ;;  %v16877_v5 = vld [vmem:[#allocation64_spill] sm:$0xff] }
 0xfc0   :  { %v7227_v60 = vmul.f32 %v13141_v44, %v13100_v53  ;;  %v1099_v6 = vadd.f32 %v16871_v20, %v13265_v47  ;;  %v1102_v35 = vadd.f32 %v16872_v55, %v13267_v14  ;;  %v1101_v7 = vadd.f32 %v16873_v38, %v13279_v58  ;;  %v16878_v53 = vld [vmem:[#allocation65_spill] sm:$0xff]  ;;  %v16879_v47 = vld [vmem:[#allocation66_spill] sm:$0xff]  ;;  %v16880_v14 = vld [vmem:[#allocation67_spill] sm:$0xff] }
 0xfc1   :  { %v1104_v22 = vadd.f32 %v16874_v57, %v831_v62  ;;  %v1103_v8 = vadd.f32 %v16875_v18, %v830_v27  ;;  %v1106_v4 = vadd.f32 %v16876_v12, %v833_v63  ;;  %v1105_v45 = vadd.f32 %v16877_v5, %v832_v24  ;;  %v9095_v62 = vld [vmem:[%s16008_s0 + $0x101] ss:$0 sm:$0xff]  ;;  %v9094_v27 = vld [vmem:[%s16008_s0 + $0x100] ss:$0 sm:$0xff]  ;;  %v16884_v19 = vld [vmem:[#allocation71_spill] sm:$0xff] }
 0xfc2   :  { %7319 = vrot.lane.b32.xlu1 %v7226_v54, %s9241_s10  ;;  %7317 = vrot.lane.b32.xlu0 %v7225_v33, %s9241_s10  ;;  %v1108_v44 = vadd.f32 %v16878_v53, %v835_v32  ;;  %v1107_v49 = vadd.f32 %v16879_v47, %v834_v10  ;;  %v1110_v11 = vadd.f32 %v16880_v14, %v837_v34  ;;  %v16882_v63 = vld [vmem:[#allocation69_spill] sm:$0xff]  ;;  %v16885_v50 = vld [vmem:[#allocation72_spill] sm:$0xff]  ;;  %v16898_v18 = vld [vmem:[#allocation86_spill] sm:$0xff] }
 0xfc3   :  { %v1109_v58 = vadd.f32 %v16881_v61, %v836_v15  ;;  %v1112_v24 = vadd.f32 %v16882_v63, %v839_v16  ;;  %v1111_v26 = vadd.f32 %v16883_v31, %v838_v41  ;;  %v1114_v32 = vadd.f32 %v16884_v19, %v841_v29  ;;  %v16886_v34 = vld [vmem:[#allocation73_spill] sm:$0xff]  ;;  %v16888_v15 = vld [vmem:[#allocation75_spill] sm:$0xff]  ;;  %v16889_v54 = vld [vmem:[#allocation76_spill] sm:$0xff] }
 0xfc4   :  { %v1113_v10 = vadd.f32 %v16885_v50, %v840_v43  ;;  %v1116_v0 = vadd.f32 %v16886_v34, %v13283_v36  ;;  %v1115_v39 = vadd.f32 %v16887_v3, %v13285_v40  ;;  %v1118_v21 = vadd.f32 %v16888_v15, %v13295_v48  ;;  %v16890_v16 = vld [vmem:[#allocation78_spill] sm:$0xff]  ;;  %v16891_v41 = vld [vmem:[#allocation77_spill] sm:$0xff]  ;;  %v16892_v43 = vld [vmem:[#allocation80_spill] sm:$0xff] }
 0xfc5   :  { %v1117_v33 = vadd.f32 %v16889_v54, %v13297_v59  ;;  %v1120_v23 = vadd.f32 %v16890_v16, %v13317_v2  ;;  %v1119_v29 = vadd.f32 %v16891_v41, %v13319_v28  ;;  %v16893_v36 = vld [vmem:[#allocation79_spill] sm:$0xff]  ;;  %v16895_v48 = vld [vmem:[#allocation81_spill] sm:$0xff]  ;;  %v16896_v38 = vld [vmem:[#allocation84_spill] sm:$0xff]  ;;  %v1128_v12 = vadd.f32 %v16898_v18, %v855_v13 }
 0xfc6   :  { %7323 = vrot.lane.b32.xlu1 %v7228_v56, %s9241_s10  ;;  %7321 = vrot.lane.b32.xlu0 %v7227_v60, %s9241_s10  ;;  %v1122_v56 = vadd.f32 %v16892_v43, %v13325_v46  ;;  %v1121_v40 = vadd.f32 %v16893_v36, %v13327_v42  ;;  %v16894_v60 = vld [vmem:[#allocation82_spill] sm:$0xff]  ;;  %v1123_v55 = vadd.f32 %v16895_v48, %v850_v30  ;;  %v9097_v2 = vld [vmem:[%s16008_s0 + $0x103] ss:$0 sm:$0xff]  ;;  %v9096_v28 = vld [vmem:[%s16008_s0 + $0x102] ss:$0 sm:$0xff] }
 0xfc7   :  { %v1124_v20 = vadd.f32 %v16894_v60, %v851_v1  ;;  %v1126_v59 = vadd.f32 %v16896_v38, %v853_v51  ;;  %v16897_v46 = vld [vmem:[#allocation83_spill] sm:$0xff]  ;;  %v16899_v5 = vld [vmem:[#allocation85_spill] sm:$0xff]  ;;  %v16900_v53 = vld [vmem:[#allocation88_spill] sm:$0xff] }
 0xfc8   :  { %v1125_v57 = vadd.f32 %v16897_v46, %v852_v9  ;;  %v1127_v42 = vadd.f32 %v16899_v5, %v854_v52  ;;  %v1130_v1 = vadd.f32 %v16900_v53, %v857_v17  ;;  %v16901_v47 = vld [vmem:[#allocation87_spill] sm:$0xff]  ;;  %v16902_v14 = vld [vmem:[#allocation89_spill] sm:$0xff]  ;;  %v16903_v61 = vld [vmem:[#allocation90_spill] sm:$0xff] }
 0xfc9   :  { %v1129_v30 = vadd.f32 %v16901_v47, %v856_v37  ;;  %v1373_v51 = vadd.f32 %v16902_v14, %v1100_v25  ;;  %v16905_v31 = vld [vmem:[#allocation92_spill] sm:$0xff]  ;;  %v16906_v50 = vld [vmem:[#allocation93_spill] sm:$0xff]  ;;  %v16907_v9 = vld [vmem:[#allocation94_spill] sm:$0xff] }
 0xfca   :  { %7443 = vperm.xlu1 %9169, %v9095_v62   ;;  %7439 = vperm.xlu0 %9168, %v9094_v27   ;;  %v1372_v62 = vadd.f32 %v16903_v61, %v1099_v6  ;;  %v16904_v27 = vld [vmem:[#allocation91_spill] sm:$0xff]  ;;  %v1374_v19 = vadd.f32 %v16905_v31, %v1101_v7  ;;  %v13448_v34 = vadd.f32 %v16906_v50, %v1104_v22  ;;  %v16909_v17 = vld [vmem:[#allocation96_spill] sm:$0xff]  ;;  %v16910_v25 = vld [vmem:[#allocation97_spill] sm:$0xff] }
 0xfcb   :  { %v1375_v63 = vadd.f32 %v16904_v27, %v1102_v35  ;;  %v13451_v3 = vadd.f32 %v16907_v9, %v1103_v8  ;;  %v16908_v13 = vld [vmem:[#allocation95_spill] sm:$0xff]  ;;  %v13457_v37 = vadd.f32 %v16909_v17, %v1105_v45  ;;  %v13460_v6 = vadd.f32 %v16910_v25, %v1108_v44  ;;  %v16911_v35 = vld [vmem:[#allocation98_spill] sm:$0xff]  ;;  %v9099_v7 = vld [vmem:[%s16008_s0 + $0x105] ss:$0 sm:$0xff] }
 0xfcc   :  { %v13454_v52 = vadd.f32 %v16908_v13, %v1106_v4  ;;  %v13463_v15 = vadd.f32 %v16911_v35, %v1107_v49  ;;  %v9098_v22 = vld [vmem:[%s16008_s0 + $0x104] ss:$0 sm:$0xff]  ;;  %v16912_v8 = vld [vmem:[#allocation99_spill] sm:$0xff]  ;;  %v16913_v54 = vld [vmem:[#allocation100_spill] sm:$0xff] }
 0xfcd   :  { %v13472_v4 = vadd.f32 %v16912_v8, %v1110_v11  ;;  %v13475_v45 = vadd.f32 %v16913_v54, %v1109_v58  ;;  %v16914_v16 = vld [vmem:[#allocation101_spill] sm:$0xff]  ;;  %v16915_v41 = vld [vmem:[#allocation102_spill] sm:$0xff]  ;;  %v16916_v43 = vld [vmem:[#allocation103_spill] sm:$0xff] }
 0xfce   :  { %7451 = vperm.xlu1 %9169, %v9097_v2   ;;  %7447 = vperm.xlu0 %9168, %v9096_v28   ;;  %v13478_v44 = vadd.f32 %v16914_v16, %v1112_v24  ;;  %v13481_v49 = vadd.f32 %v16915_v41, %v1111_v26  ;;  %v13484_v36 = vadd.f32 %v16916_v43, %v1114_v32  ;;  %v16917_v60 = vld [vmem:[#allocation104_spill] sm:$0xff]  ;;  %v16918_v38 = vld [vmem:[#allocation105_spill] sm:$0xff]  ;;  %v16919_v28 = vld [vmem:[#allocation106_spill] sm:$0xff] }
 0xfcf   :  { %v13487_v48 = vadd.f32 %v16917_v60, %v1113_v10  ;;  %v1389_v2 = vadd.f32 %v16918_v38, %v1116_v0  ;;  %v1388_v11 = vadd.f32 %v16919_v28, %v1115_v39  ;;  %v16920_v46 = vld [vmem:[#allocation107_spill] sm:$0xff]  ;;  %v16921_v58 = vld [vmem:[#allocation108_spill] sm:$0xff]  ;;  %v16922_v53 = vld [vmem:[#allocation109_spill] sm:$0xff] }
 0xfd0   :  { %v1391_v18 = vadd.f32 %v16920_v46, %v1118_v21  ;;  %v1390_v5 = vadd.f32 %v16921_v58, %v1117_v33  ;;  %v1393_v24 = vadd.f32 %v16922_v53, %v1120_v23  ;;  %v16923_v26 = vld [vmem:[#allocation110_spill] sm:$0xff]  ;;  %v16924_v14 = vld [vmem:[#allocation111_spill] sm:$0xff]  ;;  %v16925_v61 = vld [vmem:[#allocation112_spill] sm:$0xff] }
 0xfd1   :  { %v1392_v47 = vadd.f32 %v16923_v26, %v1119_v29  ;;  %v1395_v32 = vadd.f32 %v16924_v14, %v1122_v56  ;;  %v1394_v27 = vadd.f32 %v16925_v61, %v1121_v40  ;;  %v16926_v10 = vld [vmem:[#allocation113_spill] sm:$0xff]  ;;  %v16927_v21 = vld [vmem:[#allocation114_spill] sm:$0xff]  ;;  %v16928_v23 = vld [vmem:[#allocation115_spill] sm:$0xff] }
 0xfd2   :  { %7459 = vperm.xlu1 %9169, %v9099_v7   ;;  %7455 = vperm.xlu0 %9168, %v9098_v22   ;;  %v13498_v31 = vadd.f32 %v16926_v10, %v1124_v20  ;;  %v9101_v0 = vld [vmem:[%s16008_s0 + $0x107] ss:$0 sm:$0xff]  ;;  %v9100_v39 = vld [vmem:[%s16008_s0 + $0x106] ss:$0 sm:$0xff]  ;;  %v13507_v33 = vadd.f32 %v16927_v21, %v1123_v55  ;;  %v13510_v29 = vadd.f32 %v16928_v23, %v1126_v59  ;;  %v16929_v56 = vld [vmem:[#allocation116_spill] sm:$0xff] }
 0xfd3   :  { %v13513_v50 = vadd.f32 %v16929_v56, %v1125_v57  ;;  %v16930_v40 = vld [vmem:[#allocation117_spill] sm:$0xff]  ;;  %v16932_v9 = vld [vmem:[#allocation118_spill] sm:$0xff]  ;;  %v16934_v17 = vld [vmem:[#allocation119_spill] sm:$0xff] }
 0xfd4   :  { %v13516_v20 = vadd.f32 %v16930_v40, %v1128_v12  ;;  %v13519_v13 = vadd.f32 %v16932_v9, %v1127_v42  ;;  %v13522_v25 = vadd.f32 %v16934_v17, %v1130_v1  ;;  %v16936_v35 = vld [vmem:[#allocation120_spill] sm:$0xff]  ;;  %v9178_v55 = vld [vmem:[%s16010_s2 + $0xa] sm:$0xff]  ;;  %v9179_v57 = vld [vmem:[%s16010_s2 + $0x2] sm:$0xff] }
 0xfd5   :  { %v13525_v7 = vadd.f32 %v16936_v35, %v1129_v30  ;;  %v16938_v59 = vld [vmem:[#allocation122_spill] sm:$0xff]  ;;  %v16939_v42 = vld [vmem:[#allocation121_spill] sm:$0xff]  ;;  %v16940_v38 = vld [vmem:[#allocation124_spill] sm:$0xff] }
 0xfd6   :  { %16931 = vst [vmem:[#allocation709_spill] sm:$0xff] %v13516_v20  ;;  %16933 = vst [vmem:[#allocation5_spill] sm:$0xff] %v13519_v13  ;;  %v1490_v22 = vmul.f32 %v9178_v55, %v16938_v59  ;;  %v1489_v12 = vmul.f32 %v9179_v57, %v16938_v59  ;;  %v1492_v8 = vmul.f32 %v9178_v55, %v16939_v42  ;;  %7467 = vperm.xlu1 %9169, %v9101_v0   ;;  %v9180_v30 = vld [vmem:[%s16010_s2 + $0x6a] sm:$0xff]  ;;  %v9181_v16 = vld [vmem:[%s16010_s2 + $0x62] sm:$0xff] }
 0xfd7   :  { %16935 = vst [vmem:[#allocation710_spill] sm:$0xff] %v13522_v25  ;;  %16937 = vst [vmem:[#allocation6_spill] sm:$0xff] %v13525_v7  ;;  %v1491_v1 = vmul.f32 %v9179_v57, %v16939_v42  ;;  %7463 = vperm.xlu0 %9168, %v9100_v39   ;;  %v1506_v54 = vmul.f32 %v9180_v30, %v16938_v59  ;;  %v1505_v41 = vmul.f32 %v9181_v16, %v16938_v59  ;;  %v16941_v58 = vld [vmem:[#allocation123_spill] sm:$0xff] }
 0xfd8   :  { %v1508_v43 = vmul.f32 %v9180_v30, %v16939_v42  ;;  %v1507_v60 = vmul.f32 %v9181_v16, %v16939_v42  ;;  %v1494_v28 = vmul.f32 %v9178_v55, %v16940_v38  ;;  %v1493_v46 = vmul.f32 %v9179_v57, %v16940_v38 }
 0xfd9   :  { %v1496_v53 = vmul.f32 %v9178_v55, %v16941_v58  ;;  %v1495_v26 = vmul.f32 %v9179_v57, %v16941_v58  ;;  %v1510_v14 = vmul.f32 %v9180_v30, %v16940_v38  ;;  %v1509_v61 = vmul.f32 %v9181_v16, %v16940_v38 }
 0xfda   :  { %v1512_v10 = vmul.f32 %v9180_v30, %v16941_v58  ;;  %v1511_v0 = vmul.f32 %v9181_v16, %v16941_v58  ;;  %v1522_v39 = vadd.f32 %v1490_v22, %v1373_v51  ;;  %v1521_v21 = vadd.f32 %v1489_v12, %v1372_v62  ;;  %v16942_v51 = vld [vmem:[#allocation126_spill] sm:$0xff] }
 0xfdb   :  { %v1524_v23 = vadd.f32 %v1492_v8, %v1375_v63  ;;  %v1523_v56 = vadd.f32 %v1491_v1, %v1374_v19  ;;  %v1538_v40 = vadd.f32 %v1506_v54, %v1389_v2  ;;  %v1537_v9 = vadd.f32 %v1505_v41, %v1388_v11  ;;  %v16943_v19 = vld [vmem:[#allocation125_spill] sm:$0xff] }
 0xfdc   :  { %v1540_v17 = vadd.f32 %v1508_v43, %v1391_v18  ;;  %v1539_v35 = vadd.f32 %v1507_v60, %v1390_v5  ;;  %v1526_v59 = vadd.f32 %v1494_v28, %v13448_v34  ;;  %v1525_v42 = vadd.f32 %v1493_v46, %v13451_v3  ;;  %v16944_v18 = vld [vmem:[#allocation128_spill] sm:$0xff] }
 0xfdd   :  { %v1528_v7 = vadd.f32 %v1496_v53, %v13454_v52  ;;  %v1527_v38 = vadd.f32 %v1495_v26, %v13457_v37  ;;  %v1542_v25 = vadd.f32 %v1510_v14, %v1393_v24  ;;  %v1541_v13 = vadd.f32 %v1509_v61, %v1392_v47  ;;  %v16945_v47 = vld [vmem:[#allocation127_spill] sm:$0xff]  ;;  %v16946_v53 = vld [vmem:[#allocation709_spill] sm:$0xff] }
 0xfde   :  { %v1544_v20 = vadd.f32 %v1512_v10, %v1395_v32  ;;  %v1543_v58 = vadd.f32 %v1511_v0, %v1394_v27  ;;  %v1498_v62 = vmul.f32 %v9178_v55, %v16942_v51  ;;  %v1497_v63 = vmul.f32 %v9179_v57, %v16942_v51  ;;  %v16947_v26 = vld [vmem:[#allocation5_spill] sm:$0xff]  ;;  %v16948_v14 = vld [vmem:[#allocation710_spill] sm:$0xff] }
 0xfdf   :  { %v1500_v2 = vmul.f32 %v9178_v55, %v16943_v19  ;;  %v1499_v11 = vmul.f32 %v9179_v57, %v16943_v19  ;;  %v1514_v34 = vmul.f32 %v9180_v30, %v16942_v51  ;;  %v1513_v3 = vmul.f32 %v9181_v16, %v16942_v51  ;;  %v16949_v61 = vld [vmem:[#allocation6_spill] sm:$0xff]  ;;  %v16950_v10 = vld [vmem:[#allocation129_spill] sm:$0xff]  ;;  %v16952_v51 = vld [vmem:[#allocation131_spill] sm:$0xff] }
 0xfe0   :  { %v1516_v52 = vmul.f32 %v9180_v30, %v16943_v19  ;;  %v1515_v37 = vmul.f32 %v9181_v16, %v16943_v19  ;;  %v1502_v5 = vmul.f32 %v9178_v55, %v16944_v18  ;;  %v1501_v24 = vmul.f32 %v9179_v57, %v16944_v18  ;;  %v16951_v0 = vld [vmem:[#allocation130_spill] sm:$0xff] }
 0xfe1   :  { %v1504_v32 = vmul.f32 %v9178_v55, %v16945_v47  ;;  %v1503_v27 = vmul.f32 %v9179_v57, %v16945_v47  ;;  %v1518_v22 = vmul.f32 %v9180_v30, %v16944_v18  ;;  %v1517_v12 = vmul.f32 %v9181_v16, %v16944_v18  ;;  %v16955_v19 = vld [vmem:[#allocation134_spill] sm:$0xff] }
 0xfe2   :  { %v1520_v8 = vmul.f32 %v9180_v30, %v16945_v47  ;;  %v1519_v1 = vmul.f32 %v9181_v16, %v16945_v47  ;;  %v1530_v54 = vadd.f32 %v1498_v62, %v13460_v6  ;;  %v1529_v41 = vadd.f32 %v1497_v63, %v13463_v15  ;;  %v16953_v62 = vld [vmem:[#allocation132_spill] sm:$0xff]  ;;  %v16954_v63 = vld [vmem:[#allocation133_spill] sm:$0xff]  ;;  %v16959_v18 = vld [vmem:[#allocation138_spill] sm:$0xff] }
 0xfe3   :  { %v1532_v43 = vadd.f32 %v1500_v2, %v13472_v4  ;;  %v1531_v60 = vadd.f32 %v1499_v11, %v13475_v45  ;;  %v1546_v55 = vadd.f32 %v1514_v34, %v13498_v31  ;;  %v1545_v57 = vadd.f32 %v1513_v3, %v13507_v33  ;;  %v16956_v2 = vld [vmem:[#allocation135_spill] sm:$0xff]  ;;  %v16957_v34 = vld [vmem:[#allocation136_spill] sm:$0xff] }
 0xfe4   :  { %v1548_v28 = vadd.f32 %v1516_v52, %v13510_v29  ;;  %v1547_v46 = vadd.f32 %v1515_v37, %v13513_v50  ;;  %v1534_v30 = vadd.f32 %v1502_v5, %v13478_v44  ;;  %v1533_v16 = vadd.f32 %v1501_v24, %v13481_v49  ;;  %v16958_v52 = vld [vmem:[#allocation137_spill] sm:$0xff]  ;;  %v16960_v24 = vld [vmem:[#allocation139_spill] sm:$0xff]  ;;  %v16961_v47 = vld [vmem:[#allocation140_spill] sm:$0xff] }
 0xfe5   :  { %v1536_v6 = vadd.f32 %v1504_v32, %v13484_v36  ;;  %v1535_v15 = vadd.f32 %v1503_v27, %v13487_v48  ;;  %v1550_v4 = vadd.f32 %v1518_v22, %v16946_v53  ;;  %v1549_v45 = vadd.f32 %v1517_v12, %v16947_v26  ;;  %v16962_v32 = vld [vmem:[#allocation141_spill] sm:$0xff]  ;;  %v16963_v27 = vld [vmem:[#allocation142_spill] sm:$0xff]  ;;  %v16964_v22 = vld [vmem:[#allocation143_spill] sm:$0xff] }
 0xfe6   :  { %v1552_v31 = vadd.f32 %v1520_v8, %v16948_v14  ;;  %v1551_v33 = vadd.f32 %v1519_v1, %v16949_v61  ;;  %v1795_v29 = vadd.f32 %v16950_v10, %v1522_v39  ;;  %v1794_v50 = vadd.f32 %v16951_v0, %v1521_v21  ;;  %v16965_v12 = vld [vmem:[#allocation144_spill] sm:$0xff]  ;;  %v16966_v8 = vld [vmem:[#allocation145_spill] sm:$0xff]  ;;  %v16967_v1 = vld [vmem:[#allocation146_spill] sm:$0xff] }
 0xfe7   :  { %v1797_v44 = vadd.f32 %v16952_v51, %v1524_v23  ;;  %v1796_v49 = vadd.f32 %v16953_v62, %v1523_v56  ;;  %v1799_v36 = vadd.f32 %v16954_v63, %v1526_v59  ;;  %v1798_v48 = vadd.f32 %v16955_v19, %v1525_v42  ;;  %v16968_v53 = vld [vmem:[#allocation147_spill] sm:$0xff]  ;;  %v16969_v26 = vld [vmem:[#allocation148_spill] sm:$0xff]  ;;  %v16970_v14 = vld [vmem:[#allocation150_spill] sm:$0xff] }
 0xfe8   :  { %v1801_v11 = vadd.f32 %v16956_v2, %v1528_v7  ;;  %v1800_v3 = vadd.f32 %v16957_v34, %v1527_v38  ;;  %v1803_v37 = vadd.f32 %v16958_v52, %v1530_v54  ;;  %v1802_v5 = vadd.f32 %v16959_v18, %v1529_v41  ;;  %v16971_v61 = vld [vmem:[#allocation149_spill] sm:$0xff]  ;;  %v16972_v10 = vld [vmem:[#allocation152_spill] sm:$0xff]  ;;  %v16973_v0 = vld [vmem:[#allocation151_spill] sm:$0xff] }
 0xfe9   :  { %v1805_v39 = vadd.f32 %v16960_v24, %v1532_v43  ;;  %v1804_v21 = vadd.f32 %v16961_v47, %v1531_v60  ;;  %v1807_v23 = vadd.f32 %v16962_v32, %v1534_v30  ;;  %v1806_v56 = vadd.f32 %v16963_v27, %v1533_v16  ;;  %v16974_v51 = vld [vmem:[#allocation154_spill] sm:$0xff]  ;;  %v16975_v62 = vld [vmem:[#allocation153_spill] sm:$0xff]  ;;  %v16976_v63 = vld [vmem:[#allocation156_spill] sm:$0xff] }
 0xfea   :  { %v1809_v59 = vadd.f32 %v16964_v22, %v1536_v6  ;;  %v1808_v42 = vadd.f32 %v16965_v12, %v1535_v15  ;;  %v1811_v7 = vadd.f32 %v16966_v8, %v1538_v40  ;;  %v1810_v38 = vadd.f32 %v16967_v1, %v1537_v9  ;;  %v16977_v19 = vld [vmem:[#allocation155_spill] sm:$0xff]  ;;  %v16978_v2 = vld [vmem:[#allocation158_spill] sm:$0xff]  ;;  %v16979_v34 = vld [vmem:[#allocation157_spill] sm:$0xff] }
 0xfeb   :  { %v1813_v54 = vadd.f32 %v16968_v53, %v1540_v17  ;;  %v1812_v41 = vadd.f32 %v16969_v26, %v1539_v35  ;;  %v1815_v43 = vadd.f32 %v16970_v14, %v1542_v25  ;;  %v1814_v60 = vadd.f32 %v16971_v61, %v1541_v13  ;;  %v16980_v52 = vld [vmem:[#allocation160_spill] sm:$0xff]  ;;  %v16981_v18 = vld [vmem:[#allocation159_spill] sm:$0xff]  ;;  %v16982_v24 = vld [vmem:[#allocation161_spill] sm:$0xff] }
 0xfec   :  { %v1817_v30 = vadd.f32 %v16972_v10, %v1544_v20  ;;  %v1816_v16 = vadd.f32 %v16973_v0, %v1543_v58  ;;  %v1819_v6 = vadd.f32 %v16974_v51, %v1546_v55  ;;  %v1818_v15 = vadd.f32 %v16975_v62, %v1545_v57  ;;  %v16983_v47 = vld [vmem:[#allocation162_spill] sm:$0xff]  ;;  %v16984_v32 = vld [vmem:[#allocation163_spill] sm:$0xff]  ;;  %v16985_v27 = vld [vmem:[#allocation164_spill] sm:$0xff] }
 0xfed   :  { %v1821_v40 = vadd.f32 %v16976_v63, %v1548_v28  ;;  %v1820_v9 = vadd.f32 %v16977_v19, %v1547_v46  ;;  %v1823_v17 = vadd.f32 %v16978_v2, %v1550_v4  ;;  %v1822_v35 = vadd.f32 %v16979_v34, %v1549_v45  ;;  %v16986_v22 = vld [vmem:[#allocation165_spill] sm:$0xff]  ;;  %v16987_v12 = vld [vmem:[#allocation166_spill] sm:$0xff]  ;;  %v16988_v8 = vld [vmem:[#allocation167_spill] sm:$0xff] }
 0xfee   :  { %v1825_v25 = vadd.f32 %v16980_v52, %v1552_v31  ;;  %v1824_v13 = vadd.f32 %v16981_v18, %v1551_v33  ;;  %v2068_v20 = vadd.f32 %v16982_v24, %v1795_v29  ;;  %v2067_v58 = vadd.f32 %v16983_v47, %v1794_v50  ;;  %v16989_v1 = vld [vmem:[#allocation168_spill] sm:$0xff]  ;;  %v16990_v53 = vld [vmem:[#allocation169_spill] sm:$0xff]  ;;  %v16991_v33 = vld [vmem:[#allocation170_spill] sm:$0xff] }
 0xfef   :  { %v2070_v55 = vadd.f32 %v16984_v32, %v1797_v44  ;;  %v2069_v57 = vadd.f32 %v16985_v27, %v1796_v49  ;;  %v2072_v28 = vadd.f32 %v16986_v22, %v1799_v36  ;;  %v2071_v46 = vadd.f32 %v16987_v12, %v1798_v48  ;;  %v16992_v29 = vld [vmem:[#allocation171_spill] sm:$0xff]  ;;  %v16993_v44 = vld [vmem:[#allocation172_spill] sm:$0xff]  ;;  %v16994_v49 = vld [vmem:[#allocation173_spill] sm:$0xff] }
 0xff0   :  { %v2074_v4 = vadd.f32 %v16988_v8, %v1801_v11  ;;  %v2073_v45 = vadd.f32 %v16989_v1, %v1800_v3  ;;  %v13632_v31 = vadd.f32 %v16990_v53, %v1803_v37  ;;  %v13635_v26 = vadd.f32 %v16991_v33, %v1802_v5  ;;  %v16995_v48 = vld [vmem:[#allocation174_spill] sm:$0xff]  ;;  %v16996_v11 = vld [vmem:[#allocation175_spill] sm:$0xff]  ;;  %v16997_v37 = vld [vmem:[#allocation176_spill] sm:$0xff] }
 0xff1   :  { %v13638_v50 = vadd.f32 %v16992_v29, %v1805_v39  ;;  %v13641_v14 = vadd.f32 %v16993_v44, %v1804_v21  ;;  %v13644_v36 = vadd.f32 %v16994_v49, %v1807_v23  ;;  %v13647_v61 = vadd.f32 %v16995_v48, %v1806_v56  ;;  %v16998_v5 = vld [vmem:[#allocation177_spill] sm:$0xff]  ;;  %v16999_v51 = vld [vmem:[#allocation178_spill] sm:$0xff]  ;;  %v17000_v62 = vld [vmem:[#allocation179_spill] sm:$0xff] }
 0xff2   :  { %v13650_v3 = vadd.f32 %v16996_v11, %v1809_v59  ;;  %v13653_v10 = vadd.f32 %v16997_v37, %v1808_v42  ;;  %v2084_v0 = vadd.f32 %v16998_v5, %v1811_v7  ;;  %v2083_v39 = vadd.f32 %v16999_v51, %v1810_v38  ;;  %v17001_v21 = vld [vmem:[#allocation180_spill] sm:$0xff]  ;;  %v17002_v2 = vld [vmem:[#allocation181_spill] sm:$0xff]  ;;  %v17003_v34 = vld [vmem:[#allocation182_spill] sm:$0xff] }
 0xff3   :  { %v2086_v63 = vadd.f32 %v17000_v62, %v1813_v54  ;;  %v2085_v19 = vadd.f32 %v17001_v21, %v1812_v41  ;;  %v2088_v23 = vadd.f32 %v17002_v2, %v1815_v43  ;;  %v2087_v52 = vadd.f32 %v17003_v34, %v1814_v60  ;;  %v17004_v56 = vld [vmem:[#allocation183_spill] sm:$0xff]  ;;  %v17005_v24 = vld [vmem:[#allocation184_spill] sm:$0xff]  ;;  %v17006_v47 = vld [vmem:[#allocation185_spill] sm:$0xff] }
 0xff4   :  { %v2090_v18 = vadd.f32 %v17004_v56, %v1817_v30  ;;  %v2089_v59 = vadd.f32 %v17005_v24, %v1816_v16  ;;  %v13664_v32 = vadd.f32 %v17006_v47, %v1819_v6  ;;  %v17007_v42 = vld [vmem:[#allocation186_spill] sm:$0xff]  ;;  %v17008_v7 = vld [vmem:[#allocation187_spill] sm:$0xff]  ;;  %v17009_v54 = vld [vmem:[#allocation188_spill] sm:$0xff] }
 0xff5   :  { %v13667_v27 = vadd.f32 %v17007_v42, %v1818_v15  ;;  %v13670_v38 = vadd.f32 %v17008_v7, %v1821_v40  ;;  %v13673_v22 = vadd.f32 %v17009_v54, %v1820_v9  ;;  %v17010_v41 = vld [vmem:[#allocation189_spill] sm:$0xff]  ;;  %v17011_v60 = vld [vmem:[#allocation190_spill] sm:$0xff]  ;;  %v17013_v30 = vld [vmem:[#allocation191_spill] sm:$0xff] }
 0xff6   :  { %v13676_v43 = vadd.f32 %v17010_v41, %v1823_v17  ;;  %v13679_v12 = vadd.f32 %v17011_v60, %v1822_v35  ;;  %v13682_v16 = vadd.f32 %v17013_v30, %v1825_v25  ;;  %v17015_v6 = vld [vmem:[#allocation192_spill] sm:$0xff]  ;;  %v9182_v15 = vld [vmem:[%s16010_s2 + $0x20] sm:$0xff]  ;;  %v17017_v40 = vld [vmem:[#allocation194_spill] sm:$0xff] }
 0xff7   :  { %v13685_v8 = vadd.f32 %v17015_v6, %v1824_v13  ;;  %v2186_v1 = vmul.f32 %v9182_v15, %v17017_v40  ;;  %v9183_v9 = vld [vmem:[%s16010_s2 + $0x18] sm:$0xff]  ;;  %v17018_v35 = vld [vmem:[#allocation193_spill] sm:$0xff]  ;;  %v17020_v51 = vld [vmem:[#allocation195_spill] sm:$0xff] }
 0xff8   :  { %17012 = vst [vmem:[#allocation7_spill] sm:$0xff] %v13679_v12  ;;  %17014 = vst [vmem:[#allocation8_spill] sm:$0xff] %v13682_v16  ;;  %v2185_v17 = vmul.f32 %v9183_v9, %v17017_v40  ;;  %v2188_v53 = vmul.f32 %v9182_v15, %v17018_v35  ;;  %v2187_v25 = vmul.f32 %v9183_v9, %v17018_v35  ;;  %v9184_v13 = vld [vmem:[%s16010_s2 + $0x80] sm:$0xff]  ;;  %v9185_v29 = vld [vmem:[%s16010_s2 + $0x78] sm:$0xff] }
 0xff9   :  { %17016 = vst [vmem:[#allocation9_spill] sm:$0xff] %v13685_v8  ;;  %v2202_v33 = vmul.f32 %v9184_v13, %v17017_v40  ;;  %v2201_v44 = vmul.f32 %v9185_v29, %v17017_v40  ;;  %v2204_v49 = vmul.f32 %v9184_v13, %v17018_v35  ;;  %v2203_v48 = vmul.f32 %v9185_v29, %v17018_v35  ;;  %v17019_v11 = vld [vmem:[#allocation196_spill] sm:$0xff] }
 0xffa   :  { %v2190_v37 = vmul.f32 %v9182_v15, %v17019_v11  ;;  %v2189_v5 = vmul.f32 %v9183_v9, %v17019_v11  ;;  %v2192_v62 = vmul.f32 %v9182_v15, %v17020_v51  ;;  %v2191_v21 = vmul.f32 %v9183_v9, %v17020_v51 }
 0xffb   :  { %v2206_v2 = vmul.f32 %v9184_v13, %v17019_v11  ;;  %v2205_v34 = vmul.f32 %v9185_v29, %v17019_v11  ;;  %v2208_v56 = vmul.f32 %v9184_v13, %v17020_v51  ;;  %v2207_v24 = vmul.f32 %v9185_v29, %v17020_v51 }
 0xffc   :  { %v2218_v47 = vadd.f32 %v2186_v1, %v2068_v20  ;;  %v2217_v42 = vadd.f32 %v2185_v17, %v2067_v58  ;;  %v2220_v7 = vadd.f32 %v2188_v53, %v2070_v55  ;;  %v2219_v54 = vadd.f32 %v2187_v25, %v2069_v57  ;;  %v13723_v16 = vpop.permute.xlu1 %7263  ;;  %v13725_v12 = vpop.permute.xlu0 %7261 }
 0xffd   :  { %v13715_v41 = vadd.f32 %v2202_v33, %v2084_v0  ;;  %v13717_v60 = vadd.f32 %v2201_v44, %v2083_v39  ;;  %v13719_v30 = vadd.f32 %v2204_v49, %v2086_v63  ;;  %v13721_v6 = vadd.f32 %v2203_v48, %v2085_v19  ;;  %17021 = vst [vmem:[#allocation10_spill] sm:$0xff] %v13723_v16  ;;  %v17023_v0 = vld [vmem:[#allocation198_spill] sm:$0xff]  ;;  %v17024_v63 = vld [vmem:[#allocation197_spill] sm:$0xff] }
 0xffe   :  { %v2222_v40 = vadd.f32 %v2190_v37, %v2072_v28  ;;  %v2221_v35 = vadd.f32 %v2189_v5, %v2071_v46  ;;  %v2224_v8 = vadd.f32 %v2192_v62, %v2074_v4  ;;  %v2223_v11 = vadd.f32 %v2191_v21, %v2073_v45  ;;  %17022 = vst [vmem:[#allocation11_spill] sm:$0xff] %v13725_v12 }
 0xfff   :  { %v2238_v20 = vadd.f32 %v2206_v2, %v2088_v23  ;;  %v2237_v58 = vadd.f32 %v2205_v34, %v2087_v52  ;;  %v2240_v55 = vadd.f32 %v2208_v56, %v2090_v18  ;;  %v2239_v57 = vadd.f32 %v2207_v24, %v2089_v59  ;;  %v17025_v23 = vld [vmem:[#allocation200_spill] sm:$0xff]  ;;  %v17026_v59 = vld [vmem:[#allocation199_spill] sm:$0xff] }
0x1000   :  { %v2194_v1 = vmul.f32 %v9182_v15, %v17023_v0  ;;  %v2193_v39 = vmul.f32 %v9183_v9, %v17023_v0  ;;  %v2196_v17 = vmul.f32 %v9182_v15, %v17024_v63  ;;  %v2195_v19 = vmul.f32 %v9183_v9, %v17024_v63  ;;  %v13739_v33 = vpop.permute.xlu1 %7267  ;;  %v13741_v44 = vpop.permute.xlu0 %7265 }
0x1001   :  { %v2210_v28 = vmul.f32 %v9184_v13, %v17023_v0  ;;  %v2209_v46 = vmul.f32 %v9185_v29, %v17023_v0  ;;  %v2212_v4 = vmul.f32 %v9184_v13, %v17024_v63  ;;  %v2211_v45 = vmul.f32 %v9185_v29, %v17024_v63  ;;  %17027 = vst [vmem:[#allocation12_spill] sm:$0xff] %v13739_v33  ;;  %v17032_v0 = vld [vmem:[#allocation8_spill] sm:$0xff]  ;;  %v17035_v63 = vld [vmem:[#allocation202_spill] sm:$0xff] }
0x1002   :  { %v2198_v52 = vmul.f32 %v9182_v15, %v17025_v23  ;;  %v2197_v18 = vmul.f32 %v9183_v9, %v17025_v23  ;;  %v2200_v53 = vmul.f32 %v9182_v15, %v17026_v59  ;;  %v2199_v25 = vmul.f32 %v9183_v9, %v17026_v59  ;;  %17028 = vst [vmem:[#allocation13_spill] sm:$0xff] %v13741_v44 }
0x1003   :  { %v2214_v49 = vmul.f32 %v9184_v13, %v17025_v23  ;;  %v2213_v48 = vmul.f32 %v9185_v29, %v17025_v23  ;;  %v2216_v37 = vmul.f32 %v9184_v13, %v17026_v59  ;;  %v2215_v5 = vmul.f32 %v9185_v29, %v17026_v59  ;;  %v17040_v23 = vld [vmem:[#allocation207_spill] sm:$0xff]  ;;  %v17042_v59 = vld [vmem:[#allocation209_spill] sm:$0xff] }
0x1004   :  { %v2226_v51 = vadd.f32 %v2194_v1, %v13632_v31  ;;  %v2225_v62 = vadd.f32 %v2193_v39, %v13635_v26  ;;  %v2228_v15 = vadd.f32 %v2196_v17, %v13638_v50  ;;  %v2227_v9 = vadd.f32 %v2195_v19, %v13641_v14  ;;  %v13759_v24 = vpop.permute.xlu1 %7271  ;;  %v13761_v50 = vpop.permute.xlu0 %7269  ;;  %v17033_v1 = vld [vmem:[#allocation9_spill] sm:$0xff]  ;;  %v17036_v17 = vld [vmem:[#allocation203_spill] sm:$0xff]  ;;  %v17037_v19 = vld [vmem:[#allocation204_spill] sm:$0xff] }
0x1005   :  { %v2242_v21 = vadd.f32 %v2210_v28, %v13664_v32  ;;  %v2241_v2 = vadd.f32 %v2209_v46, %v13667_v27  ;;  %v2244_v34 = vadd.f32 %v2212_v4, %v13670_v38  ;;  %v2243_v56 = vadd.f32 %v2211_v45, %v13673_v22  ;;  %17029 = vst [vmem:[#allocation14_spill] sm:$0xff] %v13759_v24  ;;  %v17031_v32 = vld [vmem:[#allocation7_spill] sm:$0xff]  ;;  %v17034_v39 = vld [vmem:[#allocation201_spill] sm:$0xff]  ;;  %v17039_v4 = vld [vmem:[#allocation206_spill] sm:$0xff] }
0x1006   :  { %v2230_v13 = vadd.f32 %v2198_v52, %v13644_v36  ;;  %v2229_v29 = vadd.f32 %v2197_v18, %v13647_v61  ;;  %v2232_v31 = vadd.f32 %v2200_v53, %v13650_v3  ;;  %v2231_v26 = vadd.f32 %v2199_v25, %v13653_v10  ;;  %17030 = vst [vmem:[#allocation15_spill] sm:$0xff] %v13761_v50  ;;  %v17038_v28 = vld [vmem:[#allocation205_spill] sm:$0xff]  ;;  %v17041_v52 = vld [vmem:[#allocation208_spill] sm:$0xff]  ;;  %v17043_v25 = vld [vmem:[#allocation210_spill] sm:$0xff] }
0x1007   :  { %v2246_v14 = vadd.f32 %v2214_v49, %v13676_v43  ;;  %v2245_v27 = vadd.f32 %v2213_v48, %v17031_v32  ;;  %v2248_v38 = vadd.f32 %v2216_v37, %v17032_v0  ;;  %v2247_v22 = vadd.f32 %v2215_v5, %v17033_v1  ;;  %v17044_v48 = vld [vmem:[#allocation211_spill] sm:$0xff]  ;;  %v17045_v37 = vld [vmem:[#allocation212_spill] sm:$0xff]  ;;  %v17049_v32 = vld [vmem:[#allocation214_spill] sm:$0xff] }
0x1008   :  { %v2491_v36 = vadd.f32 %v17034_v39, %v2218_v47  ;;  %v2490_v61 = vadd.f32 %v17035_v63, %v2217_v42  ;;  %v2493_v3 = vadd.f32 %v17036_v17, %v2220_v7  ;;  %v2492_v10 = vadd.f32 %v17037_v19, %v2219_v54  ;;  %v13779_v5 = vpop.permute.xlu1 %7275  ;;  %v13781_v7 = vpop.permute.xlu0 %7273  ;;  %v17048_v54 = vld [vmem:[#allocation213_spill] sm:$0xff]  ;;  %v17050_v0 = vld [vmem:[#allocation215_spill] sm:$0xff]  ;;  %v17051_v1 = vld [vmem:[#allocation216_spill] sm:$0xff] }
0x1009   :  { %v2495_v46 = vadd.f32 %v17038_v28, %v2222_v40  ;;  %v2494_v45 = vadd.f32 %v17039_v4, %v2221_v35  ;;  %v2497_v43 = vadd.f32 %v17040_v23, %v2224_v8  ;;  %v2496_v18 = vadd.f32 %v17041_v52, %v2223_v11  ;;  %17046 = vst [vmem:[#allocation16_spill] sm:$0xff] %v13779_v5  ;;  %v17055_v17 = vld [vmem:[#allocation220_spill] sm:$0xff]  ;;  %v17056_v28 = vld [vmem:[#allocation222_spill] sm:$0xff]  ;;  %v17057_v4 = vld [vmem:[#allocation221_spill] sm:$0xff] }
0x100a   :  { %v2499_v53 = vadd.f32 %v17042_v59, %v2226_v51  ;;  %v2498_v49 = vadd.f32 %v17043_v25, %v2225_v62  ;;  %v2501_v47 = vadd.f32 %v17044_v48, %v2228_v15  ;;  %v2500_v42 = vadd.f32 %v17045_v37, %v2227_v9  ;;  %17047 = vst [vmem:[#allocation17_spill] sm:$0xff] %v13781_v7  ;;  %v17052_v51 = vld [vmem:[#allocation217_spill] sm:$0xff]  ;;  %v17053_v62 = vld [vmem:[#allocation218_spill] sm:$0xff]  ;;  %v17054_v9 = vld [vmem:[#allocation219_spill] sm:$0xff] }
0x100b   :  { %v2503_v40 = vadd.f32 %v17048_v54, %v2230_v13  ;;  %v2502_v35 = vadd.f32 %v17049_v32, %v2229_v29  ;;  %v2505_v8 = vadd.f32 %v17050_v0, %v2232_v31  ;;  %v2504_v11 = vadd.f32 %v17051_v1, %v2231_v26  ;;  %v17058_v23 = vld [vmem:[#allocation224_spill] sm:$0xff]  ;;  %v17059_v52 = vld [vmem:[#allocation223_spill] sm:$0xff]  ;;  %v17060_v59 = vld [vmem:[#allocation226_spill] sm:$0xff] }
0x100c   :  { %v2507_v39 = vadd.f32 %v17052_v51, %v13715_v41  ;;  %v2506_v15 = vadd.f32 %v17053_v62, %v13717_v60  ;;  %v2509_v63 = vadd.f32 %v17054_v9, %v13719_v30  ;;  %v2508_v19 = vadd.f32 %v17055_v17, %v13721_v6  ;;  %v17061_v41 = vld [vmem:[#allocation225_spill] sm:$0xff]  ;;  %v17062_v37 = vld [vmem:[#allocation228_spill] sm:$0xff]  ;;  %v17063_v54 = vld [vmem:[#allocation227_spill] sm:$0xff]  ;;  %v13803_v30 = vpop.permute.xlu1 %7279  ;;  %v13805_v0 = vpop.permute.xlu0 %7277 }
0x100d   :  { %v2511_v13 = vadd.f32 %v17056_v28, %v2238_v20  ;;  %v2510_v29 = vadd.f32 %v17057_v4, %v2237_v58  ;;  %v2513_v31 = vadd.f32 %v17058_v23, %v2240_v55  ;;  %v2512_v26 = vadd.f32 %v17059_v52, %v2239_v57  ;;  %17064 = vst [vmem:[#allocation18_spill] sm:$0xff] %v13803_v30  ;;  %v17066_v6 = vld [vmem:[#allocation230_spill] sm:$0xff]  ;;  %v17067_v1 = vld [vmem:[#allocation229_spill] sm:$0xff]  ;;  %v17068_v51 = vld [vmem:[#allocation232_spill] sm:$0xff] }
0x100e   :  { %v2515_v25 = vadd.f32 %v17060_v59, %v2242_v21  ;;  %v2514_v48 = vadd.f32 %v17061_v41, %v2241_v2  ;;  %v2517_v60 = vadd.f32 %v17062_v37, %v2244_v34  ;;  %v2516_v32 = vadd.f32 %v17063_v54, %v2243_v56  ;;  %17065 = vst [vmem:[#allocation19_spill] sm:$0xff] %v13805_v0  ;;  %v17069_v62 = vld [vmem:[#allocation231_spill] sm:$0xff]  ;;  %v17070_v9 = vld [vmem:[#allocation233_spill] sm:$0xff]  ;;  %v17071_v17 = vld [vmem:[#allocation234_spill] sm:$0xff] }
0x100f   :  { %v2519_v20 = vadd.f32 %v17066_v6, %v2246_v14  ;;  %v2518_v58 = vadd.f32 %v17067_v1, %v2245_v27  ;;  %v2521_v55 = vadd.f32 %v17068_v51, %v2248_v38  ;;  %v2520_v57 = vadd.f32 %v17069_v62, %v2247_v22  ;;  %v17072_v28 = vld [vmem:[#allocation235_spill] sm:$0xff]  ;;  %v17073_v4 = vld [vmem:[#allocation236_spill] sm:$0xff]  ;;  %v17074_v23 = vld [vmem:[#allocation237_spill] sm:$0xff] }
0x1010   :  { %v2764_v21 = vadd.f32 %v17070_v9, %v2491_v36  ;;  %v2763_v2 = vadd.f32 %v17071_v17, %v2490_v61  ;;  %v2766_v34 = vadd.f32 %v17072_v28, %v2493_v3  ;;  %v2765_v56 = vadd.f32 %v17073_v4, %v2492_v10  ;;  %v17075_v59 = vld [vmem:[#allocation238_spill] sm:$0xff]  ;;  %v17076_v37 = vld [vmem:[#allocation239_spill] sm:$0xff]  ;;  %v17077_v54 = vld [vmem:[#allocation240_spill] sm:$0xff]  ;;  %v13831_v10 = vpop.permute.xlu1 %7283 }
0x1011   :  { %v2768_v52 = vadd.f32 %v17074_v23, %v2495_v46  ;;  %v2767_v41 = vadd.f32 %v17075_v59, %v2494_v45  ;;  %v2770_v14 = vadd.f32 %v17076_v37, %v2497_v43  ;;  %v2769_v27 = vadd.f32 %v17077_v54, %v2496_v18  ;;  %v17078_v6 = vld [vmem:[#allocation241_spill] sm:$0xff]  ;;  %v17079_v22 = vld [vmem:[#allocation242_spill] sm:$0xff]  ;;  %v17080_v36 = vld [vmem:[#allocation243_spill] sm:$0xff]  ;;  %17082 = vst [vmem:[#allocation20_spill] sm:$0xff] %v13831_v10  ;;  %v13833_v46 = vpop.permute.xlu0 %7281 }
0x1012   :  { %v13820_v38 = vadd.f32 %v17078_v6, %v2499_v53  ;;  %v13823_v1 = vadd.f32 %v17079_v22, %v2498_v49  ;;  %v13826_v61 = vadd.f32 %v17080_v36, %v2501_v47  ;;  %v17081_v3 = vld [vmem:[#allocation244_spill] sm:$0xff]  ;;  %17083 = vst [vmem:[#allocation21_spill] sm:$0xff] %v13833_v46  ;;  %v17084_v45 = vld [vmem:[#allocation245_spill] sm:$0xff]  ;;  %v17085_v18 = vld [vmem:[#allocation246_spill] sm:$0xff] }
0x1013   :  { %v13829_v51 = vadd.f32 %v17081_v3, %v2500_v42  ;;  %v13836_v43 = vadd.f32 %v17084_v45, %v2503_v40  ;;  %v13839_v62 = vadd.f32 %v17085_v18, %v2502_v35  ;;  %v17086_v53 = vld [vmem:[#allocation247_spill] sm:$0xff]  ;;  %v17087_v49 = vld [vmem:[#allocation248_spill] sm:$0xff]  ;;  %v17088_v47 = vld [vmem:[#allocation249_spill] sm:$0xff] }
0x1014   :  { %v13842_v9 = vadd.f32 %v17086_v53, %v2505_v8  ;;  %v13845_v17 = vadd.f32 %v17087_v49, %v2504_v11  ;;  %v2780_v28 = vadd.f32 %v17088_v47, %v2507_v39  ;;  %v17089_v42 = vld [vmem:[#allocation250_spill] sm:$0xff]  ;;  %v17090_v23 = vld [vmem:[#allocation251_spill] sm:$0xff]  ;;  %v17091_v37 = vld [vmem:[#allocation252_spill] sm:$0xff] }
0x1015   :  { %v2779_v4 = vadd.f32 %v17089_v42, %v2506_v15  ;;  %v2782_v59 = vadd.f32 %v17090_v23, %v2509_v63  ;;  %v2781_v54 = vadd.f32 %v17091_v37, %v2508_v19  ;;  %v17092_v6 = vld [vmem:[#allocation253_spill] sm:$0xff]  ;;  %v17093_v22 = vld [vmem:[#allocation254_spill] sm:$0xff]  ;;  %v17094_v35 = vld [vmem:[#allocation255_spill] sm:$0xff]  ;;  %v13867_v19 = vpop.permute.xlu1 %7287 }
0x1016   :  { %v2784_v40 = vadd.f32 %v17092_v6, %v2511_v13  ;;  %v2783_v36 = vadd.f32 %v17093_v22, %v2510_v29  ;;  %v2786_v3 = vadd.f32 %v17094_v35, %v2513_v31  ;;  %v17095_v45 = vld [vmem:[#allocation256_spill] sm:$0xff]  ;;  %v17096_v18 = vld [vmem:[#allocation257_spill] sm:$0xff]  ;;  %v17097_v11 = vld [vmem:[#allocation258_spill] sm:$0xff]  ;;  %17100 = vst [vmem:[#allocation22_spill] sm:$0xff] %v13867_v19  ;;  %v13869_v13 = vpop.permute.xlu0 %7285 }
0x1017   :  { %v2785_v8 = vadd.f32 %v17095_v45, %v2512_v26  ;;  %v13856_v53 = vadd.f32 %v17096_v18, %v2515_v25  ;;  %v13859_v49 = vadd.f32 %v17097_v11, %v2514_v48  ;;  %v17098_v39 = vld [vmem:[#allocation259_spill] sm:$0xff]  ;;  %v17099_v63 = vld [vmem:[#allocation260_spill] sm:$0xff]  ;;  %17101 = vst [vmem:[#allocation705_spill] sm:$0xff] %v13869_v13  ;;  %v17102_v29 = vld [vmem:[#allocation261_spill] sm:$0xff] }
0x1018   :  { %v13862_v15 = vadd.f32 %v17098_v39, %v2517_v60  ;;  %v13865_v47 = vadd.f32 %v17099_v63, %v2516_v32  ;;  %v13872_v31 = vadd.f32 %v17102_v29, %v2519_v20  ;;  %v17103_v26 = vld [vmem:[#allocation262_spill] sm:$0xff]  ;;  %v17105_v25 = vld [vmem:[#allocation263_spill] sm:$0xff]  ;;  %v17107_v48 = vld [vmem:[#allocation264_spill] sm:$0xff] }
0x1019   :  { %v13875_v42 = vadd.f32 %v17103_v26, %v2518_v58  ;;  %v13878_v23 = vadd.f32 %v17105_v25, %v2521_v55  ;;  %v13881_v37 = vadd.f32 %v17107_v48, %v2520_v57  ;;  %v9186_v60 = vld [vmem:[%s16010_s2 + $0x21] sm:$0xff]  ;;  %v9187_v20 = vld [vmem:[%s16010_s2 + $0x19] sm:$0xff]  ;;  %v17112_v48 = vld [vmem:[#allocation267_spill] sm:$0xff]  ;;  %v13907_v46 = vpop.permute.xlu1 %7291 }
0x101a   :  { %v17109_v32 = vld [vmem:[#allocation266_spill] sm:$0xff]  ;;  %v17110_v58 = vld [vmem:[#allocation265_spill] sm:$0xff]  ;;  %v17111_v29 = vld [vmem:[#allocation268_spill] sm:$0xff]  ;;  %v2887_v13 = vmul.f32 %v9186_v60, %v17112_v48  ;;  %v2886_v19 = vmul.f32 %v9187_v20, %v17112_v48  ;;  %17113 = vst [vmem:[#allocation26_spill] sm:$0xff] %v13907_v46  ;;  %v13909_v10 = vpop.permute.xlu0 %7289 }
0x101b   :  { %17104 = vst [vmem:[#allocation23_spill] sm:$0xff] %v13875_v42  ;;  %17106 = vst [vmem:[#allocation24_spill] sm:$0xff] %v13878_v23  ;;  %v2881_v6 = vmul.f32 %v9186_v60, %v17109_v32  ;;  %v2880_v22 = vmul.f32 %v9187_v20, %v17109_v32  ;;  %v2883_v35 = vmul.f32 %v9186_v60, %v17110_v58  ;;  %v9188_v57 = vld [vmem:[%s16010_s2 + $0x81] sm:$0xff]  ;;  %v9189_v18 = vld [vmem:[%s16010_s2 + $0x79] sm:$0xff] }
0x101c   :  { %17108 = vst [vmem:[#allocation25_spill] sm:$0xff] %v13881_v37  ;;  %v2882_v55 = vmul.f32 %v9187_v20, %v17110_v58  ;;  %v2897_v45 = vmul.f32 %v9188_v57, %v17109_v32  ;;  %v2896_v11 = vmul.f32 %v9189_v18, %v17109_v32  ;;  %v2899_v39 = vmul.f32 %v9188_v57, %v17110_v58 }
0x101d   :  { %v2898_v63 = vmul.f32 %v9189_v18, %v17110_v58  ;;  %v2885_v26 = vmul.f32 %v9186_v60, %v17111_v29  ;;  %v2884_v25 = vmul.f32 %v9187_v20, %v17111_v29  ;;  %17114 = vst [vmem:[#allocation27_spill] sm:$0xff] %v13909_v10  ;;  %v2901_v0 = vmul.f32 %v9188_v57, %v17111_v29  ;;  %v13923_v23 = vpop.permute.xlu1 %7295 }
0x101e   :  { %v2900_v32 = vmul.f32 %v9189_v18, %v17111_v29  ;;  %v2903_v30 = vmul.f32 %v9188_v57, %v17112_v48  ;;  %v2902_v58 = vmul.f32 %v9189_v18, %v17112_v48  ;;  %v2913_v7 = vadd.f32 %v2881_v6, %v2764_v21  ;;  %17115 = vst [vmem:[#allocation28_spill] sm:$0xff] %v13923_v23  ;;  %v13925_v42 = vpop.permute.xlu0 %7293 }
0x101f   :  { %v2912_v5 = vadd.f32 %v2880_v22, %v2763_v2  ;;  %v2915_v50 = vadd.f32 %v2883_v35, %v2766_v34  ;;  %v2914_v24 = vadd.f32 %v2882_v55, %v2765_v56  ;;  %v13915_v44 = vadd.f32 %v2897_v45, %v2780_v28  ;;  %17116 = vst [vmem:[#allocation29_spill] sm:$0xff] %v13925_v42  ;;  %v17117_v28 = vld [vmem:[#allocation270_spill] sm:$0xff] }
0x1020   :  { %v13917_v33 = vadd.f32 %v2896_v11, %v2779_v4  ;;  %v13919_v12 = vadd.f32 %v2899_v39, %v2782_v59  ;;  %v13921_v46 = vadd.f32 %v2898_v63, %v2781_v54  ;;  %v2917_v10 = vadd.f32 %v2885_v26, %v2768_v52  ;;  %v17118_v59 = vld [vmem:[#allocation269_spill] sm:$0xff] }
0x1021   :  { %v2916_v16 = vadd.f32 %v2884_v25, %v2767_v41  ;;  %v2919_v37 = vadd.f32 %v2887_v13, %v2770_v14  ;;  %v2918_v29 = vadd.f32 %v2886_v19, %v2769_v27  ;;  %v2933_v21 = vadd.f32 %v2901_v0, %v2784_v40  ;;  %v17119_v0 = vld [vmem:[#allocation272_spill] sm:$0xff]  ;;  %v13939_v19 = vpop.permute.xlu1 %7299 }
0x1022   :  { %v2932_v2 = vadd.f32 %v2900_v32, %v2783_v36  ;;  %v2935_v34 = vadd.f32 %v2903_v30, %v2786_v3  ;;  %v2934_v56 = vadd.f32 %v2902_v58, %v2785_v8  ;;  %v2889_v6 = vmul.f32 %v9186_v60, %v17117_v28  ;;  %v17120_v36 = vld [vmem:[#allocation271_spill] sm:$0xff]  ;;  %17121 = vst [vmem:[#allocation30_spill] sm:$0xff] %v13939_v19  ;;  %v13941_v13 = vpop.permute.xlu0 %7297 }
0x1023   :  { %v2888_v4 = vmul.f32 %v9187_v20, %v17117_v28  ;;  %v2891_v22 = vmul.f32 %v9186_v60, %v17118_v59  ;;  %v2890_v54 = vmul.f32 %v9187_v20, %v17118_v59  ;;  %v2905_v52 = vmul.f32 %v9188_v57, %v17117_v28  ;;  %17122 = vst [vmem:[#allocation31_spill] sm:$0xff] %v13941_v13 }
0x1024   :  { %v2904_v41 = vmul.f32 %v9189_v18, %v17117_v28  ;;  %v2907_v14 = vmul.f32 %v9188_v57, %v17118_v59  ;;  %v2906_v27 = vmul.f32 %v9189_v18, %v17118_v59  ;;  %v2893_v40 = vmul.f32 %v9186_v60, %v17119_v0  ;;  %v17125_v28 = vld [vmem:[#allocation24_spill] sm:$0xff]  ;;  %v17129_v59 = vld [vmem:[#allocation274_spill] sm:$0xff] }
0x1025   :  { %v2892_v30 = vmul.f32 %v9187_v20, %v17119_v0  ;;  %v2895_v3 = vmul.f32 %v9186_v60, %v17120_v36  ;;  %v2894_v8 = vmul.f32 %v9187_v20, %v17120_v36  ;;  %v2909_v35 = vmul.f32 %v9188_v57, %v17119_v0 }
0x1026   :  { %v2908_v55 = vmul.f32 %v9189_v18, %v17119_v0  ;;  %v2911_v45 = vmul.f32 %v9188_v57, %v17120_v36  ;;  %v2910_v11 = vmul.f32 %v9189_v18, %v17120_v36  ;;  %v2921_v39 = vadd.f32 %v2889_v6, %v13820_v38  ;;  %v13959_v58 = vpop.permute.xlu0 %7301  ;;  %v17126_v6 = vld [vmem:[#allocation25_spill] sm:$0xff] }
0x1027   :  { %v2920_v63 = vadd.f32 %v2888_v4, %v13823_v1  ;;  %v2923_v60 = vadd.f32 %v2891_v22, %v13826_v61  ;;  %v2922_v20 = vadd.f32 %v2890_v54, %v13829_v51  ;;  %v2937_v26 = vadd.f32 %v2905_v52, %v13856_v53  ;;  %17123 = vst [vmem:[#allocation32_spill] sm:$0xff] %v13959_v58  ;;  %v17124_v51 = vld [vmem:[#allocation23_spill] sm:$0xff]  ;;  %v13965_v4 = vpop.permute.xlu1 %7303  ;;  %v17131_v54 = vld [vmem:[#allocation276_spill] sm:$0xff]  ;;  %v17132_v52 = vld [vmem:[#allocation277_spill] sm:$0xff] }
0x1028   :  { %v2936_v25 = vadd.f32 %v2904_v41, %v13859_v49  ;;  %v2939_v48 = vadd.f32 %v2907_v14, %v13862_v15  ;;  %v2938_v32 = vadd.f32 %v2906_v27, %v13865_v47  ;;  %v2925_v57 = vadd.f32 %v2893_v40, %v13836_v43  ;;  %17127 = vst [vmem:[#allocation33_spill] sm:$0xff] %v13965_v4  ;;  %v17128_v47 = vld [vmem:[#allocation273_spill] sm:$0xff]  ;;  %v17130_v22 = vld [vmem:[#allocation275_spill] sm:$0xff]  ;;  %v17133_v14 = vld [vmem:[#allocation278_spill] sm:$0xff] }
0x1029   :  { %v2924_v18 = vadd.f32 %v2892_v30, %v13839_v62  ;;  %v2927_v38 = vadd.f32 %v2895_v3, %v13842_v9  ;;  %v2926_v1 = vadd.f32 %v2894_v8, %v13845_v17  ;;  %v2941_v61 = vadd.f32 %v2909_v35, %v13872_v31  ;;  %v17134_v27 = vld [vmem:[#allocation279_spill] sm:$0xff]  ;;  %v17135_v40 = vld [vmem:[#allocation280_spill] sm:$0xff]  ;;  %v17136_v36 = vld [vmem:[#allocation281_spill] sm:$0xff] }
0x102a   :  { %v2940_v53 = vadd.f32 %v2908_v55, %v17124_v51  ;;  %v2943_v49 = vadd.f32 %v2911_v45, %v17125_v28  ;;  %v2942_v15 = vadd.f32 %v2910_v11, %v17126_v6  ;;  %v3186_v43 = vadd.f32 %v17128_v47, %v2913_v7  ;;  %v17137_v8 = vld [vmem:[#allocation282_spill] sm:$0xff]  ;;  %v17138_v55 = vld [vmem:[#allocation283_spill] sm:$0xff]  ;;  %v17139_v45 = vld [vmem:[#allocation284_spill] sm:$0xff]  ;;  %v13983_v47 = vpop.permute.xlu0 %7305 }
0x102b   :  { %v3185_v62 = vadd.f32 %v17129_v59, %v2912_v5  ;;  %v3188_v9 = vadd.f32 %v17130_v22, %v2915_v50  ;;  %v3187_v17 = vadd.f32 %v17131_v54, %v2914_v24  ;;  %v3190_v41 = vadd.f32 %v17132_v52, %v2917_v10  ;;  %v17140_v11 = vld [vmem:[#allocation285_spill] sm:$0xff]  ;;  %v17141_v51 = vld [vmem:[#allocation286_spill] sm:$0xff]  ;;  %v17142_v28 = vld [vmem:[#allocation287_spill] sm:$0xff]  ;;  %17144 = vst [vmem:[#allocation34_spill] sm:$0xff] %v13983_v47 }
0x102c   :  { %v3189_v31 = vadd.f32 %v17133_v14, %v2916_v16  ;;  %v3192_v0 = vadd.f32 %v17134_v27, %v2919_v37  ;;  %v3191_v30 = vadd.f32 %v17135_v40, %v2918_v29  ;;  %v3194_v3 = vadd.f32 %v17136_v36, %v2921_v39  ;;  %v17143_v6 = vld [vmem:[#allocation288_spill] sm:$0xff]  ;;  %v17145_v37 = vld [vmem:[#allocation289_spill] sm:$0xff]  ;;  %v17146_v39 = vld [vmem:[#allocation290_spill] sm:$0xff]  ;;  %v13997_v40 = vpop.permute.xlu1 %7307 }
0x102d   :  { %v3193_v35 = vadd.f32 %v17137_v8, %v2920_v63  ;;  %v3196_v7 = vadd.f32 %v17138_v55, %v2923_v60  ;;  %v3195_v5 = vadd.f32 %v17139_v45, %v2922_v20  ;;  %v3198_v50 = vadd.f32 %v17140_v11, %v2925_v57  ;;  %v17147_v60 = vld [vmem:[#allocation291_spill] sm:$0xff]  ;;  %v17148_v20 = vld [vmem:[#allocation292_spill] sm:$0xff]  ;;  %v17149_v22 = vld [vmem:[#allocation294_spill] sm:$0xff]  ;;  %17153 = vst [vmem:[#allocation35_spill] sm:$0xff] %v13997_v40 }
0x102e   :  { %v3197_v24 = vadd.f32 %v17141_v51, %v2924_v18  ;;  %v3200_v10 = vadd.f32 %v17142_v28, %v2927_v38  ;;  %v3199_v16 = vadd.f32 %v17143_v6, %v2926_v1  ;;  %v3202_v29 = vadd.f32 %v17145_v37, %v13915_v44  ;;  %v17150_v54 = vld [vmem:[#allocation293_spill] sm:$0xff]  ;;  %v17151_v52 = vld [vmem:[#allocation296_spill] sm:$0xff]  ;;  %v17152_v14 = vld [vmem:[#allocation295_spill] sm:$0xff] }
0x102f   :  { %v3201_v63 = vadd.f32 %v17146_v39, %v13917_v33  ;;  %v3204_v59 = vadd.f32 %v17147_v60, %v13919_v12  ;;  %v3203_v57 = vadd.f32 %v17148_v20, %v13921_v46  ;;  %v3206_v18 = vadd.f32 %v17149_v22, %v2933_v21  ;;  %v17154_v44 = vld [vmem:[#allocation298_spill] sm:$0xff]  ;;  %v17155_v8 = vld [vmem:[#allocation297_spill] sm:$0xff]  ;;  %v17156_v55 = vld [vmem:[#allocation300_spill] sm:$0xff] }
0x1030   :  { %v3205_v38 = vadd.f32 %v17150_v54, %v2932_v2  ;;  %v3208_v1 = vadd.f32 %v17151_v52, %v2935_v34  ;;  %v3207_v27 = vadd.f32 %v17152_v14, %v2934_v56  ;;  %v3210_v36 = vadd.f32 %v17154_v44, %v2937_v26  ;;  %v17157_v12 = vld [vmem:[#allocation299_spill] sm:$0xff]  ;;  %v17158_v51 = vld [vmem:[#allocation302_spill] sm:$0xff]  ;;  %v17159_v28 = vld [vmem:[#allocation301_spill] sm:$0xff] }
0x1031   :  { %v3209_v33 = vadd.f32 %v17155_v8, %v2936_v25  ;;  %v3212_v45 = vadd.f32 %v17156_v55, %v2939_v48  ;;  %v3211_v11 = vadd.f32 %v17157_v12, %v2938_v32  ;;  %v3214_v46 = vadd.f32 %v17158_v51, %v2941_v61  ;;  %v17160_v6 = vld [vmem:[#allocation304_spill] sm:$0xff]  ;;  %v17161_v37 = vld [vmem:[#allocation303_spill] sm:$0xff]  ;;  %v17162_v39 = vld [vmem:[#allocation305_spill] sm:$0xff]  ;;  %v14015_v55 = vpop.permute.xlu0 %7309 }
0x1032   :  { %v3213_v21 = vadd.f32 %v17159_v28, %v2940_v53  ;;  %v3216_v2 = vadd.f32 %v17160_v6, %v2943_v49  ;;  %v3215_v34 = vadd.f32 %v17161_v37, %v2942_v15  ;;  %v3459_v56 = vadd.f32 %v17162_v39, %v3186_v43  ;;  %v17163_v60 = vld [vmem:[#allocation306_spill] sm:$0xff]  ;;  %v17164_v22 = vld [vmem:[#allocation307_spill] sm:$0xff]  ;;  %v17165_v54 = vld [vmem:[#allocation308_spill] sm:$0xff]  ;;  %17170 = vst [vmem:[#allocation706_spill] sm:$0xff] %v14015_v55 }
0x1033   :  { %v3458_v20 = vadd.f32 %v17163_v60, %v3185_v62  ;;  %v3461_v26 = vadd.f32 %v17164_v22, %v3188_v9  ;;  %v3460_v25 = vadd.f32 %v17165_v54, %v3187_v17  ;;  %v17166_v52 = vld [vmem:[#allocation309_spill] sm:$0xff]  ;;  %v17167_v14 = vld [vmem:[#allocation310_spill] sm:$0xff]  ;;  %v17168_v44 = vld [vmem:[#allocation311_spill] sm:$0xff] }
0x1034   :  { %v3463_v48 = vadd.f32 %v17166_v52, %v3190_v41  ;;  %v3462_v32 = vadd.f32 %v17167_v14, %v3189_v31  ;;  %v3465_v61 = vadd.f32 %v17168_v44, %v3192_v0  ;;  %v17169_v8 = vld [vmem:[#allocation312_spill] sm:$0xff]  ;;  %v17171_v49 = vld [vmem:[#allocation313_spill] sm:$0xff]  ;;  %v17172_v43 = vld [vmem:[#allocation314_spill] sm:$0xff] }
0x1035   :  { %v3464_v53 = vadd.f32 %v17169_v8, %v3191_v30  ;;  %v14018_v15 = vadd.f32 %v17171_v49, %v3194_v3  ;;  %v14021_v12 = vadd.f32 %v17172_v43, %v3193_v35  ;;  %v17173_v62 = vld [vmem:[#allocation315_spill] sm:$0xff]  ;;  %v17174_v17 = vld [vmem:[#allocation316_spill] sm:$0xff]  ;;  %v17175_v41 = vld [vmem:[#allocation317_spill] sm:$0xff]  ;;  %v14041_v35 = vpop.permute.xlu1 %7311 }
0x1036   :  { %v14024_v9 = vadd.f32 %v17173_v62, %v3196_v7  ;;  %v14027_v51 = vadd.f32 %v17174_v17, %v3195_v5  ;;  %v14030_v31 = vadd.f32 %v17175_v41, %v3198_v50  ;;  %v17176_v0 = vld [vmem:[#allocation318_spill] sm:$0xff]  ;;  %v17177_v30 = vld [vmem:[#allocation319_spill] sm:$0xff]  ;;  %v17178_v3 = vld [vmem:[#allocation320_spill] sm:$0xff]  ;;  %17179 = vst [vmem:[#allocation36_spill] sm:$0xff] %v14041_v35 }
0x1037   :  { %v14033_v28 = vadd.f32 %v17176_v0, %v3197_v24  ;;  %v14036_v6 = vadd.f32 %v17177_v30, %v3200_v10  ;;  %v14039_v37 = vadd.f32 %v17178_v3, %v3199_v16  ;;  %v17180_v39 = vld [vmem:[#allocation321_spill] sm:$0xff]  ;;  %v17181_v60 = vld [vmem:[#allocation322_spill] sm:$0xff]  ;;  %v17182_v5 = vld [vmem:[#allocation323_spill] sm:$0xff] }
0x1038   :  { %v3475_v7 = vadd.f32 %v17180_v39, %v3202_v29  ;;  %v3474_v22 = vadd.f32 %v17181_v60, %v3201_v63  ;;  %v3477_v54 = vadd.f32 %v17182_v5, %v3204_v59  ;;  %v17183_v52 = vld [vmem:[#allocation324_spill] sm:$0xff]  ;;  %v17184_v14 = vld [vmem:[#allocation325_spill] sm:$0xff]  ;;  %v17185_v24 = vld [vmem:[#allocation326_spill] sm:$0xff] }
0x1039   :  { %v3476_v50 = vadd.f32 %v17183_v52, %v3203_v57  ;;  %v3479_v44 = vadd.f32 %v17184_v14, %v3206_v18  ;;  %v3478_v8 = vadd.f32 %v17185_v24, %v3205_v38  ;;  %v17186_v49 = vld [vmem:[#allocation327_spill] sm:$0xff]  ;;  %v17187_v43 = vld [vmem:[#allocation328_spill] sm:$0xff]  ;;  %v17188_v16 = vld [vmem:[#allocation329_spill] sm:$0xff] }
0x103a   :  { %v3481_v10 = vadd.f32 %v17186_v49, %v3208_v1  ;;  %v3480_v62 = vadd.f32 %v17187_v43, %v3207_v27  ;;  %v14052_v17 = vadd.f32 %v17188_v16, %v3210_v36  ;;  %v17189_v41 = vld [vmem:[#allocation330_spill] sm:$0xff]  ;;  %v17190_v29 = vld [vmem:[#allocation331_spill] sm:$0xff]  ;;  %v17191_v59 = vld [vmem:[#allocation332_spill] sm:$0xff] }
0x103b   :  { %v14055_v0 = vadd.f32 %v17189_v41, %v3209_v33  ;;  %v14058_v63 = vadd.f32 %v17190_v29, %v3212_v45  ;;  %v14061_v30 = vadd.f32 %v17191_v59, %v3211_v11  ;;  %v17192_v57 = vld [vmem:[#allocation333_spill] sm:$0xff]  ;;  %v17193_v38 = vld [vmem:[#allocation334_spill] sm:$0xff]  ;;  %v17195_v1 = vld [vmem:[#allocation335_spill] sm:$0xff]  ;;  %v14075_v33 = vpop.permute.xlu0 %7313  ;;  %v14097_v41 = vpop.permute.xlu1 %7315 }
0x103c   :  { %v14064_v18 = vadd.f32 %v17192_v57, %v3214_v46  ;;  %v14067_v3 = vadd.f32 %v17193_v38, %v3213_v21  ;;  %v14070_v27 = vadd.f32 %v17195_v1, %v3216_v2  ;;  %v17197_v36 = vld [vmem:[#allocation336_spill] sm:$0xff]  ;;  %17199 = vst [vmem:[#allocation40_spill] sm:$0xff] %v14075_v33  ;;  %v9190_v45 = vld [vmem:[%s16010_s2 + $0x22] sm:$0xff]  ;;  %17202 = vst [vmem:[#allocation41_spill] sm:$0xff] %v14097_v41 }
0x103d   :  { %v14073_v39 = vadd.f32 %v17197_v36, %v3215_v34  ;;  %v17200_v11 = vld [vmem:[#allocation338_spill] sm:$0xff]  ;;  %v9191_v46 = vld [vmem:[%s16010_s2 + $0x1a] sm:$0xff]  ;;  %v17204_v38 = vld [vmem:[#allocation339_spill] sm:$0xff] }
0x103e   :  { %17194 = vst [vmem:[#allocation37_spill] sm:$0xff] %v14067_v3  ;;  %17196 = vst [vmem:[#allocation38_spill] sm:$0xff] %v14070_v27  ;;  %v3576_v60 = vmul.f32 %v9190_v45, %v17200_v11  ;;  %v3575_v21 = vmul.f32 %v9191_v46, %v17200_v11  ;;  %v17201_v5 = vld [vmem:[#allocation337_spill] sm:$0xff]  ;;  %v17203_v29 = vld [vmem:[#allocation340_spill] sm:$0xff]  ;;  %v3582_v1 = vmul.f32 %v9190_v45, %v17204_v38 }
0x103f   :  { %17198 = vst [vmem:[#allocation39_spill] sm:$0xff] %v14073_v39  ;;  %v3578_v2 = vmul.f32 %v9190_v45, %v17201_v5  ;;  %v3577_v52 = vmul.f32 %v9191_v46, %v17201_v5  ;;  %v9192_v34 = vld [vmem:[%s16010_s2 + $0x82] sm:$0xff]  ;;  %v9193_v24 = vld [vmem:[%s16010_s2 + $0x7a] sm:$0xff]  ;;  %v3580_v59 = vmul.f32 %v9190_v45, %v17203_v29  ;;  %v3579_v57 = vmul.f32 %v9191_v46, %v17203_v29  ;;  %v14115_v42 = vpop.permute.xlu0 %7317 }
0x1040   :  { %v3592_v14 = vmul.f32 %v9192_v34, %v17200_v11  ;;  %v3591_v49 = vmul.f32 %v9193_v24, %v17200_v11  ;;  %v3594_v43 = vmul.f32 %v9192_v34, %v17201_v5  ;;  %v3593_v16 = vmul.f32 %v9193_v24, %v17201_v5  ;;  %17205 = vst [vmem:[#allocation42_spill] sm:$0xff] %v14115_v42 }
0x1041   :  { %v3581_v36 = vmul.f32 %v9191_v46, %v17204_v38  ;;  %v3596_v33 = vmul.f32 %v9192_v34, %v17203_v29  ;;  %v3595_v55 = vmul.f32 %v9193_v24, %v17203_v29  ;;  %v3598_v11 = vmul.f32 %v9192_v34, %v17204_v38 }
0x1042   :  { %v3597_v35 = vmul.f32 %v9193_v24, %v17204_v38  ;;  %v3608_v47 = vadd.f32 %v3576_v60, %v3459_v56  ;;  %v3607_v5 = vadd.f32 %v3575_v21, %v3458_v20  ;;  %v3610_v40 = vadd.f32 %v3578_v2, %v3461_v26 }
0x1043   :  { %v3609_v41 = vadd.f32 %v3577_v52, %v3460_v25  ;;  %v14107_v58 = vadd.f32 %v3592_v14, %v3475_v7  ;;  %v14109_v4 = vadd.f32 %v3591_v49, %v3474_v22  ;;  %v14111_v13 = vadd.f32 %v3594_v43, %v3477_v54  ;;  %v14125_v25 = vpop.permute.xlu1 %7319  ;;  %v17207_v7 = vld [vmem:[#allocation342_spill] sm:$0xff]  ;;  %v14143_v49 = vpop.permute.xlu0 %7321 }
0x1044   :  { %v14113_v19 = vadd.f32 %v3593_v16, %v3476_v50  ;;  %v3612_v23 = vadd.f32 %v3580_v59, %v3463_v48  ;;  %v3611_v29 = vadd.f32 %v3579_v57, %v3462_v32  ;;  %v3614_v39 = vadd.f32 %v3582_v1, %v3465_v61  ;;  %17206 = vst [vmem:[#allocation43_spill] sm:$0xff] %v14125_v25  ;;  %v17208_v50 = vld [vmem:[#allocation341_spill] sm:$0xff] }
0x1045   :  { %v3613_v27 = vadd.f32 %v3581_v36, %v3464_v53  ;;  %v14117_v3 = vadd.f32 %v3596_v33, %v3479_v44  ;;  %v14119_v56 = vadd.f32 %v3595_v55, %v3478_v8  ;;  %v14121_v20 = vadd.f32 %v3598_v11, %v3481_v10  ;;  %v17210_v10 = vld [vmem:[#allocation343_spill] sm:$0xff]  ;;  %17211 = vst [vmem:[#allocation50_spill] sm:$0xff] %v14143_v49  ;;  %v17213_v36 = vld [vmem:[#allocation37_spill] sm:$0xff]  ;;  %v17214_v11 = vld [vmem:[#allocation38_spill] sm:$0xff] }
0x1046   :  { %v14123_v26 = vadd.f32 %v3597_v35, %v3480_v62  ;;  %v3584_v22 = vmul.f32 %v9190_v45, %v17207_v7  ;;  %v3583_v54 = vmul.f32 %v9191_v46, %v17207_v7  ;;  %v3586_v60 = vmul.f32 %v9190_v45, %v17208_v50  ;;  %v17209_v35 = vld [vmem:[#allocation344_spill] sm:$0xff]  ;;  %v17284_v49 = vld [vmem:[#allocation411_spill] sm:$0xff] }
0x1047   :  { %v3585_v48 = vmul.f32 %v9191_v46, %v17208_v50  ;;  %v3600_v32 = vmul.f32 %v9192_v34, %v17207_v7  ;;  %v3599_v61 = vmul.f32 %v9193_v24, %v17207_v7  ;;  %v3602_v53 = vmul.f32 %v9192_v34, %v17208_v50  ;;  %v14153_v1 = vpop.permute.xlu1 %7323  ;;  %v17215_v7 = vld [vmem:[#allocation39_spill] sm:$0xff] }
0x1048   :  { %v3601_v55 = vmul.f32 %v9193_v24, %v17208_v50  ;;  %v3588_v44 = vmul.f32 %v9190_v45, %v17209_v35  ;;  %v3587_v8 = vmul.f32 %v9191_v46, %v17209_v35  ;;  %v3590_v62 = vmul.f32 %v9190_v45, %v17210_v10  ;;  %17212 = vst [vmem:[#allocation49_spill] sm:$0xff] %v14153_v1  ;;  %v17217_v50 = vld [vmem:[#allocation346_spill] sm:$0xff] }
0x1049   :  { %v3589_v33 = vmul.f32 %v9191_v46, %v17210_v10  ;;  %v3604_v21 = vmul.f32 %v9192_v34, %v17209_v35  ;;  %v3603_v2 = vmul.f32 %v9193_v24, %v17209_v35  ;;  %v3606_v52 = vmul.f32 %v9192_v34, %v17210_v10 }
0x104a   :  { %v3605_v14 = vmul.f32 %v9193_v24, %v17210_v10  ;;  %v3616_v43 = vadd.f32 %v3584_v22, %v14018_v15  ;;  %v3615_v16 = vadd.f32 %v3583_v54, %v14021_v12  ;;  %v3618_v59 = vadd.f32 %v3586_v60, %v14024_v9  ;;  %v14163_v22 = vpop.permute.xlu0 %7439  ;;  %v17218_v60 = vld [vmem:[#allocation347_spill] sm:$0xff]  ;;  %v17223_v10 = vld [vmem:[#allocation352_spill] sm:$0xff] }
0x104b   :  { %v3617_v45 = vadd.f32 %v3585_v48, %v14027_v51  ;;  %v3632_v46 = vadd.f32 %v3600_v32, %v14052_v17  ;;  %v3631_v57 = vadd.f32 %v3599_v61, %v14055_v0  ;;  %v3634_v38 = vadd.f32 %v3602_v53, %v14058_v63  ;;  %v17219_v48 = vld [vmem:[#allocation348_spill] sm:$0xff]  ;;  %v17220_v32 = vld [vmem:[#allocation349_spill] sm:$0xff]  ;;  %v17221_v53 = vld [vmem:[#allocation350_spill] sm:$0xff]  ;;  %v14185_v35 = vpop.permute.xlu1 %7443 }
0x104c   :  { %v3633_v34 = vadd.f32 %v3601_v55, %v14061_v30  ;;  %v3620_v24 = vadd.f32 %v3588_v44, %v14030_v31  ;;  %v3619_v15 = vadd.f32 %v3587_v8, %v14033_v28  ;;  %v3622_v12 = vadd.f32 %v3590_v62, %v14036_v6  ;;  %v17216_v30 = vld [vmem:[#allocation345_spill] sm:$0xff]  ;;  %v14170_v28 = vld [vmem:[%s16010_s2 + $0x51] sm:$0xff] }
0x104d   :  { %v3621_v9 = vadd.f32 %v3589_v33, %v14039_v37  ;;  %v3636_v51 = vadd.f32 %v3604_v21, %v14064_v18  ;;  %v3635_v17 = vadd.f32 %v3603_v2, %v17213_v36  ;;  %v3638_v0 = vadd.f32 %v3606_v52, %v17214_v11  ;;  %v14177_v37 = vld [vmem:[%s16010_s2 + $0x49] sm:$0xff]  ;;  %v17224_v33 = vld [vmem:[#allocation353_spill] sm:$0xff] }
0x104e   :  { %v3637_v63 = vadd.f32 %v3605_v14, %v17215_v7  ;;  %v3881_v54 = vadd.f32 %v17216_v30, %v3608_v47  ;;  %v3880_v31 = vadd.f32 %v17217_v50, %v3607_v5  ;;  %v7471_v6 = vmul.f32 %v14170_v28, %v14163_v22  ;;  %v17222_v44 = vld [vmem:[#allocation351_spill] sm:$0xff]  ;;  %v17225_v2 = vld [vmem:[#allocation354_spill] sm:$0xff]  ;;  %v17227_v14 = vld [vmem:[#allocation356_spill] sm:$0xff] }
0x104f   :  { %v7470_v18 = vmul.f32 %v14177_v37, %v14163_v22  ;;  %v3883_v47 = vadd.f32 %v17218_v60, %v3610_v40  ;;  %v3882_v5 = vadd.f32 %v17219_v48, %v3609_v41  ;;  %v3885_v61 = vadd.f32 %v17220_v32, %v3612_v23  ;;  %v17226_v52 = vld [vmem:[#allocation355_spill] sm:$0xff]  ;;  %v17228_v36 = vld [vmem:[#allocation357_spill] sm:$0xff]  ;;  %v17229_v11 = vld [vmem:[#allocation358_spill] sm:$0xff] }
0x1050   :  { %v3884_v55 = vadd.f32 %v17221_v53, %v3611_v29  ;;  %v3887_v8 = vadd.f32 %v17222_v44, %v3614_v39  ;;  %v3886_v62 = vadd.f32 %v17223_v10, %v3613_v27  ;;  %v3889_v21 = vadd.f32 %v17224_v33, %v3616_v43  ;;  %7536 = vrot.lane.b32.xlu1 %v7471_v6, %s9242_s15  ;;  %v17230_v30 = vld [vmem:[#allocation359_spill] sm:$0xff]  ;;  %v17231_v50 = vld [vmem:[#allocation360_spill] sm:$0xff]  ;;  %v17236_v32 = vld [vmem:[#allocation366_spill] sm:$0xff] }
0x1051   :  { %7534 = vrot.lane.b32.xlu0 %v7470_v18, %s9242_s15  ;;  %v3888_v40 = vadd.f32 %v17225_v2, %v3615_v16  ;;  %v3891_v41 = vadd.f32 %v17226_v52, %v3618_v59  ;;  %v3890_v23 = vadd.f32 %v17227_v14, %v3617_v45  ;;  %v3893_v29 = vadd.f32 %v17228_v36, %v3620_v24  ;;  %v17232_v16 = vld [vmem:[#allocation361_spill] sm:$0xff]  ;;  %v17233_v59 = vld [vmem:[#allocation362_spill] sm:$0xff]  ;;  %v17234_v24 = vld [vmem:[#allocation363_spill] sm:$0xff] }
0x1052   :  { %v3892_v7 = vadd.f32 %v17229_v11, %v3619_v15  ;;  %v3895_v39 = vadd.f32 %v17230_v30, %v3622_v12  ;;  %v7473_v27 = vmul.f32 %v14170_v28, %v14185_v35  ;;  %v7472_v43 = vmul.f32 %v14177_v37, %v14185_v35  ;;  %v14209_v15 = vpop.permute.xlu0 %7447  ;;  %v17235_v12 = vld [vmem:[#allocation364_spill] sm:$0xff]  ;;  %v17237_v44 = vld [vmem:[#allocation365_spill] sm:$0xff]  ;;  %v17240_v33 = vld [vmem:[#allocation370_spill] sm:$0xff] }
0x1053   :  { %v3894_v6 = vadd.f32 %v17231_v50, %v3621_v9  ;;  %v3897_v18 = vadd.f32 %v17232_v16, %v14107_v58  ;;  %v3896_v45 = vadd.f32 %v17233_v59, %v14109_v4  ;;  %v3899_v60 = vadd.f32 %v17234_v24, %v14111_v13  ;;  %v17238_v58 = vld [vmem:[#allocation368_spill] sm:$0xff]  ;;  %v17239_v13 = vld [vmem:[#allocation367_spill] sm:$0xff]  ;;  %v17241_v52 = vld [vmem:[#allocation369_spill] sm:$0xff]  ;;  %v14235_v24 = vpop.permute.xlu1 %7451 }
0x1054   :  { %v3898_v48 = vadd.f32 %v17235_v12, %v14113_v19  ;;  %v3901_v53 = vadd.f32 %v17236_v32, %v14117_v3  ;;  %v3900_v9 = vadd.f32 %v17237_v44, %v14119_v56  ;;  %7540 = vrot.lane.b32.xlu1 %v7473_v27, %s9242_s15  ;;  %v3903_v4 = vadd.f32 %v17238_v58, %v14121_v20  ;;  %v17242_v14 = vld [vmem:[#allocation372_spill] sm:$0xff]  ;;  %v17243_v3 = vld [vmem:[#allocation371_spill] sm:$0xff]  ;;  %v17244_v27 = vld [vmem:[#allocation374_spill] sm:$0xff] }
0x1055   :  { %7538 = vrot.lane.b32.xlu0 %v7472_v43, %s9242_s15  ;;  %v3902_v10 = vadd.f32 %v17239_v13, %v14123_v26  ;;  %v3905_v2 = vadd.f32 %v17240_v33, %v3632_v46  ;;  %v3904_v19 = vadd.f32 %v17241_v52, %v3631_v57  ;;  %v3907_v36 = vadd.f32 %v17242_v14, %v3634_v38  ;;  %v17245_v20 = vld [vmem:[#allocation373_spill] sm:$0xff]  ;;  %v17246_v16 = vld [vmem:[#allocation376_spill] sm:$0xff]  ;;  %v17247_v59 = vld [vmem:[#allocation375_spill] sm:$0xff] }
0x1056   :  { %v3906_v11 = vadd.f32 %v17243_v3, %v3633_v34  ;;  %v7475_v56 = vmul.f32 %v14170_v28, %v14209_v15  ;;  %v7474_v30 = vmul.f32 %v14177_v37, %v14209_v15  ;;  %v3909_v43 = vadd.f32 %v17244_v27, %v3636_v51  ;;  %v17248_v57 = vld [vmem:[#allocation377_spill] sm:$0xff]  ;;  %v17249_v12 = vld [vmem:[#allocation378_spill] sm:$0xff]  ;;  %v17250_v32 = vld [vmem:[#allocation379_spill] sm:$0xff] }
0x1057   :  { %v3908_v50 = vadd.f32 %v17245_v20, %v3635_v17  ;;  %v3911_v26 = vadd.f32 %v17246_v16, %v3638_v0  ;;  %v3910_v46 = vadd.f32 %v17247_v59, %v3637_v63  ;;  %v4154_v38 = vadd.f32 %v17248_v57, %v3881_v54  ;;  %v17251_v58 = vld [vmem:[#allocation380_spill] sm:$0xff]  ;;  %v17252_v13 = vld [vmem:[#allocation381_spill] sm:$0xff]  ;;  %v17253_v0 = vld [vmem:[#allocation382_spill] sm:$0xff] }
0x1058   :  { %v4153_v34 = vadd.f32 %v17249_v12, %v3880_v31  ;;  %v4156_v44 = vadd.f32 %v17250_v32, %v3883_v47  ;;  %7544 = vrot.lane.b32.xlu1 %v7475_v56, %s9242_s15  ;;  %v4155_v51 = vadd.f32 %v17251_v58, %v3882_v5  ;;  %v14244_v17 = vadd.f32 %v17252_v13, %v3885_v61  ;;  %v17254_v63 = vld [vmem:[#allocation383_spill] sm:$0xff]  ;;  %v17255_v54 = vld [vmem:[#allocation384_spill] sm:$0xff]  ;;  %v17256_v31 = vld [vmem:[#allocation385_spill] sm:$0xff] }
0x1059   :  { %7542 = vrot.lane.b32.xlu0 %v7474_v30, %s9242_s15  ;;  %v14247_v33 = vadd.f32 %v17253_v0, %v3884_v55  ;;  %v14250_v52 = vadd.f32 %v17254_v63, %v3887_v8  ;;  %v14253_v14 = vadd.f32 %v17255_v54, %v3886_v62  ;;  %v14256_v47 = vadd.f32 %v17256_v31, %v3889_v21  ;;  %v17257_v61 = vld [vmem:[#allocation386_spill] sm:$0xff]  ;;  %v17258_v55 = vld [vmem:[#allocation387_spill] sm:$0xff]  ;;  %v17259_v8 = vld [vmem:[#allocation388_spill] sm:$0xff]  ;;  %v14274_v21 = vpop.permute.xlu0 %7455 }
0x105a   :  { %v7477_v3 = vmul.f32 %v14170_v28, %v14235_v24  ;;  %v7476_v5 = vmul.f32 %v14177_v37, %v14235_v24  ;;  %v14263_v56 = vadd.f32 %v17257_v61, %v3888_v40  ;;  %v14266_v30 = vadd.f32 %v17258_v55, %v3891_v41  ;;  %v17260_v62 = vld [vmem:[#allocation389_spill] sm:$0xff]  ;;  %v17261_v16 = vld [vmem:[#allocation390_spill] sm:$0xff]  ;;  %v17262_v57 = vld [vmem:[#allocation391_spill] sm:$0xff] }
0x105b   :  { %v14269_v27 = vadd.f32 %v17259_v8, %v3890_v23  ;;  %v14272_v20 = vadd.f32 %v17260_v62, %v3893_v29  ;;  %v14277_v59 = vadd.f32 %v17261_v16, %v3892_v7  ;;  %v14280_v12 = vadd.f32 %v17262_v57, %v3895_v39  ;;  %v17263_v32 = vld [vmem:[#allocation392_spill] sm:$0xff]  ;;  %v17264_v41 = vld [vmem:[#allocation393_spill] sm:$0xff]  ;;  %v17265_v58 = vld [vmem:[#allocation394_spill] sm:$0xff] }
0x105c   :  { %v14283_v40 = vadd.f32 %v17263_v32, %v3894_v6  ;;  %7548 = vrot.lane.b32.xlu1 %v7477_v3, %s9242_s15  ;;  %v4170_v23 = vadd.f32 %v17264_v41, %v3897_v18  ;;  %v4169_v29 = vadd.f32 %v17265_v58, %v3896_v45  ;;  %v17266_v13 = vld [vmem:[#allocation395_spill] sm:$0xff]  ;;  %v17267_v63 = vld [vmem:[#allocation396_spill] sm:$0xff]  ;;  %v17268_v7 = vld [vmem:[#allocation397_spill] sm:$0xff]  ;;  %v7479_v6 = vmul.f32 %v14170_v28, %v14274_v21 }
0x105d   :  { %7546 = vrot.lane.b32.xlu0 %v7476_v5, %s9242_s15  ;;  %v4172_v0 = vadd.f32 %v17266_v13, %v3899_v60  ;;  %v4171_v54 = vadd.f32 %v17267_v63, %v3898_v48  ;;  %v14292_v31 = vadd.f32 %v17268_v7, %v3901_v53  ;;  %v17269_v39 = vld [vmem:[#allocation398_spill] sm:$0xff]  ;;  %v7478_v3 = vmul.f32 %v14177_v37, %v14274_v21  ;;  %v17270_v5 = vld [vmem:[#allocation399_spill] sm:$0xff]  ;;  %v17271_v45 = vld [vmem:[#allocation400_spill] sm:$0xff] }
0x105e   :  { %v14295_v61 = vadd.f32 %v17269_v39, %v3900_v9  ;;  %v14302_v18 = vadd.f32 %v17270_v5, %v3903_v4  ;;  %v14305_v55 = vadd.f32 %v17271_v45, %v3902_v10  ;;  %v17272_v60 = vld [vmem:[#allocation401_spill] sm:$0xff]  ;;  %v17273_v53 = vld [vmem:[#allocation402_spill] sm:$0xff]  ;;  %v14313_v9 = vpop.permute.xlu1 %7459  ;;  %v17274_v62 = vld [vmem:[#allocation403_spill] sm:$0xff] }
0x105f   :  { %v14308_v48 = vadd.f32 %v17272_v60, %v3905_v2  ;;  %v14311_v8 = vadd.f32 %v17273_v53, %v3904_v19  ;;  %v14316_v16 = vadd.f32 %v17274_v62, %v3907_v36  ;;  %v14321_v57 = vld [vmem:[%s16010_s2 + $0x38] sm:$0xff]  ;;  %v17275_v4 = vld [vmem:[#allocation410_spill] sm:$0xff]  ;;  %v14328_v2 = vld [vmem:[%s16010_s2 + $0x30] sm:$0xff] }
0x1060   :  { %v4272_v10 = vmul.f32 %v14321_v57, %v17275_v4  ;;  %v4271_v19 = vmul.f32 %v14328_v2, %v17275_v4  ;;  %7552 = vrot.lane.b32.xlu1 %v7479_v6, %s9242_s15  ;;  %v17276_v36 = vld [vmem:[#allocation404_spill] sm:$0xff]  ;;  %v17277_v41 = vld [vmem:[#allocation405_spill] sm:$0xff]  ;;  %v17278_v13 = vld [vmem:[#allocation406_spill] sm:$0xff] }
0x1061   :  { %7550 = vrot.lane.b32.xlu0 %v7478_v3, %s9242_s15  ;;  %v14335_v32 = vadd.f32 %v17276_v36, %v3906_v11  ;;  %v14338_v58 = vadd.f32 %v17277_v41, %v3909_v43  ;;  %v14341_v63 = vadd.f32 %v17278_v13, %v3908_v50  ;;  %v17279_v7 = vld [vmem:[#allocation409_spill] sm:$0xff]  ;;  %v14350_v6 = vld [vmem:[%s16010_s2 + $0x98] sm:$0xff]  ;;  %v7481_v43 = vmul.f32 %v14170_v28, %v14313_v9  ;;  %v17280_v3 = vld [vmem:[#allocation407_spill] sm:$0xff]  ;;  %v14373_v13 = vpop.permute.xlu0 %7463 }
0x1062   :  { %v4274_v39 = vmul.f32 %v14321_v57, %v17279_v7  ;;  %v4273_v5 = vmul.f32 %v14328_v2, %v17279_v7  ;;  %v4288_v11 = vmul.f32 %v14350_v6, %v17275_v4  ;;  %v7480_v50 = vmul.f32 %v14177_v37, %v14313_v9  ;;  %v17281_v60 = vld [vmem:[#allocation408_spill] sm:$0xff]  ;;  %v14367_v62 = vld [vmem:[%s16010_s2 + $0x90] sm:$0xff]  ;;  %17282 = vst [vmem:[#allocation44_spill] sm:$0xff] %v14373_v13 }
0x1063   :  { %v14359_v45 = vadd.f32 %v17280_v3, %v3911_v26  ;;  %v14362_v53 = vadd.f32 %v17281_v60, %v3910_v46  ;;  %v4287_v36 = vmul.f32 %v14367_v62, %v17275_v4  ;;  %v4290_v41 = vmul.f32 %v14350_v6, %v17279_v7  ;;  %v17283_v60 = vld [vmem:[#allocation412_spill] sm:$0xff] }
0x1064   :  { %v14375_v42 = vadd.f32 %v4272_v10, %v4154_v38  ;;  %v14377_v26 = vadd.f32 %v4271_v19, %v4153_v34  ;;  %v4289_v46 = vmul.f32 %v14367_v62, %v17279_v7  ;;  %7556 = vrot.lane.b32.xlu1 %v7481_v43, %s9242_s15  ;;  %v14383_v3 = vadd.f32 %v4274_v39, %v4156_v44 }
0x1065   :  { %7554 = vrot.lane.b32.xlu0 %v7480_v50, %s9242_s15  ;;  %v4276_v4 = vmul.f32 %v14321_v57, %v17283_v60  ;;  %v4275_v25 = vmul.f32 %v14328_v2, %v17283_v60  ;;  %v4278_v38 = vmul.f32 %v14321_v57, %v17284_v49  ;;  %v14391_v34 = vadd.f32 %v4273_v5, %v4155_v51  ;;  %v14407_v5 = vpop.permute.xlu1 %7467 }
0x1066   :  { %v14393_v10 = vadd.f32 %v4288_v11, %v4170_v23  ;;  %v7483_v19 = vmul.f32 %v14170_v28, %v14373_v13  ;;  %v7482_v44 = vmul.f32 %v14177_v37, %v14373_v13  ;;  %v4277_v7 = vmul.f32 %v14328_v2, %v17284_v49 }
0x1067   :  { %v14401_v39 = vadd.f32 %v4287_v36, %v4169_v29  ;;  %v4292_v43 = vmul.f32 %v14350_v6, %v17283_v60  ;;  %v4291_v51 = vmul.f32 %v14367_v62, %v17283_v60  ;;  %v14409_v23 = vadd.f32 %v4290_v41, %v4172_v0  ;;  %v17285_v0 = vld [vmem:[#allocation414_spill] sm:$0xff] }
0x1068   :  { %v4294_v11 = vmul.f32 %v14350_v6, %v17284_v49  ;;  %v4293_v50 = vmul.f32 %v14367_v62, %v17284_v49  ;;  %7560 = vrot.lane.b32.xlu1 %v7483_v19, %s9242_s15  ;;  %v4308_v29 = vadd.f32 %v4276_v4, %v14244_v17  ;;  %v4307_v36 = vadd.f32 %v4275_v25, %v14247_v33  ;;  %v17286_v4 = vld [vmem:[#allocation413_spill] sm:$0xff] }
0x1069   :  { %7558 = vrot.lane.b32.xlu0 %v7482_v44, %s9242_s15  ;;  %v4310_v60 = vadd.f32 %v4278_v38, %v14250_v52  ;;  %v14420_v1 = vadd.f32 %v4289_v46, %v4171_v54  ;;  %v4280_v41 = vmul.f32 %v14321_v57, %v17285_v0  ;;  %v4279_v13 = vmul.f32 %v14328_v2, %v17285_v0  ;;  %v14462_v38 = vld [vmem:[%s16010_s2 + $0xb1] sm:$0xff] }
0x106a   :  { %v7485_v49 = vmul.f32 %v14170_v28, %v14407_v5  ;;  %v7484_v19 = vmul.f32 %v14177_v37, %v14407_v5  ;;  %v4309_v17 = vadd.f32 %v4277_v7, %v14253_v14  ;;  %v4282_v25 = vmul.f32 %v14321_v57, %v17286_v4  ;;  %v14469_v7 = vld [vmem:[%s16010_s2 + $0xa9] sm:$0xff] }
0x106b   :  { %v14434_v33 = vadd.f32 %v4292_v43, %v14292_v31  ;;  %v14437_v52 = vadd.f32 %v4291_v51, %v14295_v61  ;;  %v4281_v54 = vmul.f32 %v14328_v2, %v17286_v4  ;;  %v14442_v46 = vadd.f32 %v4294_v11, %v14302_v18  ;;  %v17287_v51 = vld [vmem:[#allocation416_spill] sm:$0xff]  ;;  %v17288_v11 = vld [vmem:[#allocation415_spill] sm:$0xff] }
0x106c   :  { %v14445_v28 = vadd.f32 %v4293_v50, %v14305_v55  ;;  %7564 = vrot.lane.b32.xlu1 %v7485_v49, %s9242_s15  ;;  %v4296_v37 = vmul.f32 %v14350_v6, %v17285_v0  ;;  %v4295_v14 = vmul.f32 %v14367_v62, %v17285_v0  ;;  %v4298_v31 = vmul.f32 %v14350_v6, %v17286_v4 }
0x106d   :  { %7562 = vrot.lane.b32.xlu0 %v7484_v19, %s9242_s15  ;;  %v4297_v61 = vmul.f32 %v14367_v62, %v17286_v4  ;;  %v4312_v18 = vadd.f32 %v4280_v41, %v14256_v47  ;;  %v4311_v55 = vadd.f32 %v4279_v13, %v14263_v56  ;;  %v7487_v44 = vmul.f32 %v14462_v38, %v14163_v22 }
0x106e   :  { %v7486_v43 = vmul.f32 %v14469_v7, %v14163_v22  ;;  %v4314_v47 = vadd.f32 %v4282_v25, %v14266_v30  ;;  %v4284_v56 = vmul.f32 %v14321_v57, %v17287_v51  ;;  %v4283_v13 = vmul.f32 %v14328_v2, %v17287_v51 }
0x106f   :  { %v4286_v50 = vmul.f32 %v14321_v57, %v17288_v11  ;;  %v4285_v0 = vmul.f32 %v14328_v2, %v17288_v11  ;;  %v4300_v41 = vmul.f32 %v14350_v6, %v17287_v51  ;;  %v4299_v22 = vmul.f32 %v14367_v62, %v17287_v51  ;;  %v17294_v51 = vld [vmem:[#allocation422_spill] sm:$0xff] }
0x1070   :  { %7568 = vrot.lane.b32.xlu1 %v7487_v44, %s9242_s15  ;;  %v4313_v30 = vadd.f32 %v4281_v54, %v14269_v27  ;;  %v4328_v49 = vadd.f32 %v4296_v37, %v14308_v48  ;;  %v4302_v57 = vmul.f32 %v14350_v6, %v17288_v11  ;;  %v4301_v2 = vmul.f32 %v14367_v62, %v17288_v11  ;;  %v17297_v11 = vld [vmem:[#allocation425_spill] sm:$0xff] }
0x1071   :  { %7566 = vrot.lane.b32.xlu0 %v7486_v43, %s9242_s15  ;;  %v4327_v19 = vadd.f32 %v4295_v14, %v14311_v8  ;;  %v4330_v4 = vadd.f32 %v4298_v31, %v14316_v16  ;;  %v7489_v25 = vmul.f32 %v14462_v38, %v14185_v35  ;;  %v7488_v44 = vmul.f32 %v14469_v7, %v14185_v35  ;;  %v17289_v35 = vld [vmem:[#allocation417_spill] sm:$0xff] }
0x1072   :  { %v4316_v27 = vadd.f32 %v4284_v56, %v14272_v20  ;;  %v4315_v48 = vadd.f32 %v4283_v13, %v14277_v59  ;;  %v4318_v54 = vadd.f32 %v4286_v50, %v14280_v12  ;;  %v4329_v6 = vadd.f32 %v4297_v61, %v14335_v32  ;;  %v17290_v20 = vld [vmem:[#allocation418_spill] sm:$0xff]  ;;  %v17295_v56 = vld [vmem:[#allocation423_spill] sm:$0xff]  ;;  %v17296_v13 = vld [vmem:[#allocation424_spill] sm:$0xff] }
0x1073   :  { %v4317_v62 = vadd.f32 %v4285_v0, %v14283_v40  ;;  %v4332_v8 = vadd.f32 %v4300_v41, %v14338_v58  ;;  %v4331_v16 = vadd.f32 %v4299_v22, %v14341_v63  ;;  %v4577_v37 = vadd.f32 %v17289_v35, %v14375_v42  ;;  %v17291_v40 = vld [vmem:[#allocation419_spill] sm:$0xff]  ;;  %v17292_v58 = vld [vmem:[#allocation420_spill] sm:$0xff]  ;;  %v17293_v42 = vld [vmem:[#allocation421_spill] sm:$0xff] }
0x1074   :  { %7572 = vrot.lane.b32.xlu1 %v7489_v25, %s9242_s15  ;;  %v4576_v59 = vadd.f32 %v17290_v20, %v14377_v26  ;;  %v4334_v12 = vadd.f32 %v4302_v57, %v14359_v45  ;;  %v4333_v32 = vadd.f32 %v4301_v2, %v14362_v53  ;;  %v4579_v14 = vadd.f32 %v17291_v40, %v14383_v3  ;;  %v17298_v3 = vld [vmem:[#allocation426_spill] sm:$0xff]  ;;  %v17299_v41 = vld [vmem:[#allocation427_spill] sm:$0xff]  ;;  %v17300_v22 = vld [vmem:[#allocation428_spill] sm:$0xff] }
0x1075   :  { %7570 = vrot.lane.b32.xlu0 %v7488_v44, %s9242_s15  ;;  %v4578_v63 = vadd.f32 %v17292_v58, %v14391_v34  ;;  %v7491_v31 = vmul.f32 %v14462_v38, %v14209_v15  ;;  %v7490_v61 = vmul.f32 %v14469_v7, %v14209_v15  ;;  %v4581_v43 = vadd.f32 %v17293_v42, %v4308_v29  ;;  %v17301_v57 = vld [vmem:[#allocation429_spill] sm:$0xff]  ;;  %v17302_v2 = vld [vmem:[#allocation430_spill] sm:$0xff]  ;;  %v17303_v25 = vld [vmem:[#allocation431_spill] sm:$0xff] }
0x1076   :  { %v4580_v26 = vadd.f32 %v17294_v51, %v4307_v36  ;;  %v4583_v45 = vadd.f32 %v17295_v56, %v4310_v60  ;;  %v4582_v53 = vadd.f32 %v17296_v13, %v4309_v17  ;;  %v4585_v50 = vadd.f32 %v17297_v11, %v4312_v18  ;;  %v17304_v44 = vld [vmem:[#allocation432_spill] sm:$0xff]  ;;  %v17305_v18 = vld [vmem:[#allocation433_spill] sm:$0xff]  ;;  %v17306_v20 = vld [vmem:[#allocation434_spill] sm:$0xff] }
0x1077   :  { %v4584_v0 = vadd.f32 %v17298_v3, %v4311_v55  ;;  %v4587_v34 = vadd.f32 %v17299_v41, %v4314_v47  ;;  %v4586_v15 = vadd.f32 %v17300_v22, %v4313_v30  ;;  %v4589_v29 = vadd.f32 %v17301_v57, %v4316_v27  ;;  %v17307_v27 = vld [vmem:[#allocation435_spill] sm:$0xff]  ;;  %v17314_v56 = vld [vmem:[#allocation441_spill] sm:$0xff]  ;;  %v17315_v13 = vld [vmem:[#allocation444_spill] sm:$0xff] }
0x1078   :  { %7576 = vrot.lane.b32.xlu1 %v7491_v31, %s9242_s15  ;;  %v4588_v36 = vadd.f32 %v17302_v2, %v4315_v48  ;;  %v4591_v60 = vadd.f32 %v17303_v25, %v4318_v54  ;;  %v4590_v17 = vadd.f32 %v17304_v44, %v4317_v62  ;;  %v4593_v35 = vadd.f32 %v17305_v18, %v14393_v10  ;;  %v17308_v48 = vld [vmem:[#allocation436_spill] sm:$0xff]  ;;  %v17309_v62 = vld [vmem:[#allocation438_spill] sm:$0xff]  ;;  %v17310_v10 = vld [vmem:[#allocation437_spill] sm:$0xff] }
0x1079   :  { %7574 = vrot.lane.b32.xlu0 %v7490_v61, %s9242_s15  ;;  %v7493_v55 = vmul.f32 %v14462_v38, %v14235_v24  ;;  %v7492_v47 = vmul.f32 %v14469_v7, %v14235_v24  ;;  %v4592_v30 = vadd.f32 %v17306_v20, %v14401_v39  ;;  %v4595_v40 = vadd.f32 %v17307_v27, %v14409_v23  ;;  %v17311_v61 = vld [vmem:[#allocation440_spill] sm:$0xff]  ;;  %v17312_v24 = vld [vmem:[#allocation439_spill] sm:$0xff]  ;;  %v17313_v39 = vld [vmem:[#allocation442_spill] sm:$0xff] }
0x107a   :  { %v4594_v54 = vadd.f32 %v17308_v48, %v14420_v1  ;;  %v4597_v58 = vadd.f32 %v17309_v62, %v14434_v33  ;;  %v4596_v31 = vadd.f32 %v17310_v10, %v14437_v52  ;;  %v4599_v42 = vadd.f32 %v17311_v61, %v14442_v46  ;;  %v17316_v33 = vld [vmem:[#allocation443_spill] sm:$0xff]  ;;  %v17317_v41 = vld [vmem:[#allocation446_spill] sm:$0xff]  ;;  %v17318_v22 = vld [vmem:[#allocation445_spill] sm:$0xff] }
0x107b   :  { %v4598_v51 = vadd.f32 %v17312_v24, %v14445_v28  ;;  %v4601_v23 = vadd.f32 %v17313_v39, %v4328_v49  ;;  %v4600_v1 = vadd.f32 %v17314_v56, %v4327_v19  ;;  %v4603_v11 = vadd.f32 %v17315_v13, %v4330_v4  ;;  %v17319_v2 = vld [vmem:[#allocation448_spill] sm:$0xff]  ;;  %v17320_v44 = vld [vmem:[#allocation447_spill] sm:$0xff]  ;;  %v17321_v18 = vld [vmem:[#allocation449_spill] sm:$0xff] }
0x107c   :  { %7580 = vrot.lane.b32.xlu1 %v7493_v55, %s9242_s15  ;;  %v4602_v3 = vadd.f32 %v17316_v33, %v4329_v6  ;;  %v4605_v52 = vadd.f32 %v17317_v41, %v4332_v8  ;;  %v4604_v57 = vadd.f32 %v17318_v22, %v4331_v16  ;;  %v7495_v46 = vmul.f32 %v14462_v38, %v14274_v21  ;;  %v17322_v55 = vld [vmem:[#allocation450_spill] sm:$0xff]  ;;  %v17324_v8 = vld [vmem:[#allocation452_spill] sm:$0xff]  ;;  %v17325_v16 = vld [vmem:[#allocation453_spill] sm:$0xff] }
0x107d   :  { %7578 = vrot.lane.b32.xlu0 %v7492_v47, %s9242_s15  ;;  %v7494_v28 = vmul.f32 %v14469_v7, %v14274_v21  ;;  %v4607_v25 = vadd.f32 %v17319_v2, %v4334_v12  ;;  %v4606_v49 = vadd.f32 %v17320_v44, %v4333_v32  ;;  %v4850_v19 = vadd.f32 %v17321_v18, %v4577_v37  ;;  %v17323_v47 = vld [vmem:[#allocation451_spill] sm:$0xff]  ;;  %v17326_v21 = vld [vmem:[#allocation454_spill] sm:$0xff]  ;;  %v17337_v22 = vld [vmem:[#allocation465_spill] sm:$0xff] }
0x107e   :  { %v4849_v4 = vadd.f32 %v17322_v55, %v4576_v59  ;;  %v14574_v6 = vadd.f32 %v17323_v47, %v4579_v14  ;;  %v14577_v20 = vadd.f32 %v17324_v8, %v4578_v63  ;;  %v14580_v27 = vadd.f32 %v17325_v16, %v4581_v43  ;;  %v17327_v32 = vld [vmem:[#allocation455_spill] sm:$0xff]  ;;  %v17328_v59 = vld [vmem:[#allocation456_spill] sm:$0xff]  ;;  %v17329_v14 = vld [vmem:[#allocation457_spill] sm:$0xff] }
0x107f   :  { %v14585_v12 = vadd.f32 %v17326_v21, %v4580_v26  ;;  %v14588_v37 = vadd.f32 %v17327_v32, %v4583_v45  ;;  %v14591_v48 = vadd.f32 %v17328_v59, %v4582_v53  ;;  %v14594_v62 = vadd.f32 %v17329_v14, %v4585_v50  ;;  %v17330_v63 = vld [vmem:[#allocation458_spill] sm:$0xff]  ;;  %v17331_v43 = vld [vmem:[#allocation459_spill] sm:$0xff]  ;;  %v17332_v45 = vld [vmem:[#allocation460_spill] sm:$0xff] }
0x1080   :  { %7584 = vrot.lane.b32.xlu1 %v7495_v46, %s9242_s15  ;;  %v14597_v10 = vadd.f32 %v17330_v63, %v4584_v0  ;;  %v14600_v61 = vadd.f32 %v17331_v43, %v4587_v34  ;;  %v7497_v24 = vmul.f32 %v14462_v38, %v14313_v9  ;;  %v7496_v26 = vmul.f32 %v14469_v7, %v14313_v9  ;;  %v17333_v53 = vld [vmem:[#allocation461_spill] sm:$0xff]  ;;  %v17334_v50 = vld [vmem:[#allocation462_spill] sm:$0xff]  ;;  %v17335_v0 = vld [vmem:[#allocation463_spill] sm:$0xff] }
0x1081   :  { %7582 = vrot.lane.b32.xlu0 %v7494_v28, %s9242_s15  ;;  %v14607_v39 = vadd.f32 %v17332_v45, %v4586_v15  ;;  %v14610_v56 = vadd.f32 %v17333_v53, %v4589_v29  ;;  %v14613_v13 = vadd.f32 %v17334_v50, %v4588_v36  ;;  %v14616_v33 = vadd.f32 %v17335_v0, %v4591_v60  ;;  %v17336_v34 = vld [vmem:[#allocation464_spill] sm:$0xff]  ;;  %v17338_v28 = vld [vmem:[#allocation466_spill] sm:$0xff]  ;;  %v17339_v9 = vld [vmem:[#allocation467_spill] sm:$0xff] }
0x1082   :  { %v14619_v41 = vadd.f32 %v17336_v34, %v4590_v17  ;;  %v4866_v46 = vadd.f32 %v17337_v22, %v4593_v35  ;;  %v4865_v2 = vadd.f32 %v17338_v28, %v4592_v30  ;;  %v4868_v15 = vadd.f32 %v17339_v9, %v4595_v40  ;;  %v17340_v29 = vld [vmem:[#allocation468_spill] sm:$0xff]  ;;  %v17341_v36 = vld [vmem:[#allocation469_spill] sm:$0xff]  ;;  %v17342_v55 = vld [vmem:[#allocation470_spill] sm:$0xff] }
0x1083   :  { %v4867_v44 = vadd.f32 %v17340_v29, %v4594_v54  ;;  %v4870_v18 = vadd.f32 %v17341_v36, %v4597_v58  ;;  %v4869_v60 = vadd.f32 %v17342_v55, %v4596_v31  ;;  %v17343_v47 = vld [vmem:[#allocation471_spill] sm:$0xff]  ;;  %v17344_v17 = vld [vmem:[#allocation472_spill] sm:$0xff]  ;;  %v17346_v32 = vld [vmem:[#allocation473_spill] sm:$0xff] }
0x1084   :  { %7588 = vrot.lane.b32.xlu1 %v7497_v24, %s9242_s15  ;;  %v4872_v8 = vadd.f32 %v17343_v47, %v4599_v42  ;;  %v4871_v16 = vadd.f32 %v17344_v17, %v4598_v51  ;;  %v17345_v21 = vld [vmem:[#allocation44_spill] sm:$0xff]  ;;  %v14636_v59 = vadd.f32 %v17346_v32, %v4601_v23  ;;  %v17347_v40 = vld [vmem:[#allocation474_spill] sm:$0xff]  ;;  %v17348_v54 = vld [vmem:[#allocation475_spill] sm:$0xff] }
0x1085   :  { %7586 = vrot.lane.b32.xlu0 %v7496_v26, %s9242_s15  ;;  %v7499_v35 = vmul.f32 %v14462_v38, %v17345_v21  ;;  %v7498_v30 = vmul.f32 %v14469_v7, %v17345_v21  ;;  %v14639_v14 = vadd.f32 %v17347_v40, %v4600_v1  ;;  %v14642_v58 = vadd.f32 %v17348_v54, %v4603_v11  ;;  %v14647_v31 = vld [vmem:[%s16010_s2 + $0x39] sm:$0xff]  ;;  %v17349_v42 = vld [vmem:[#allocation482_spill] sm:$0xff]  ;;  %v14660_v1 = vld [vmem:[%s16010_s2 + $0x31] sm:$0xff] }
0x1086   :  { %v4967_v51 = vmul.f32 %v14647_v31, %v17349_v42  ;;  %v17350_v63 = vld [vmem:[#allocation476_spill] sm:$0xff]  ;;  %v17351_v24 = vld [vmem:[#allocation477_spill] sm:$0xff]  ;;  %v4966_v11 = vmul.f32 %v14660_v1, %v17349_v42  ;;  %v17352_v26 = vld [vmem:[#allocation478_spill] sm:$0xff] }
0x1087   :  { %v14652_v43 = vadd.f32 %v17350_v63, %v4602_v3  ;;  %v14655_v23 = vadd.f32 %v17351_v24, %v4605_v52  ;;  %v14667_v45 = vadd.f32 %v17352_v26, %v4604_v57  ;;  %v17353_v3 = vld [vmem:[#allocation479_spill] sm:$0xff]  ;;  %v17354_v52 = vld [vmem:[#allocation480_spill] sm:$0xff]  ;;  %v17355_v0 = vld [vmem:[#allocation481_spill] sm:$0xff]  ;;  %v7501_v57 = vmul.f32 %v14462_v38, %v14407_v5 }
0x1088   :  { %7592 = vrot.lane.b32.xlu1 %v7499_v35, %s9242_s15  ;;  %v14670_v53 = vadd.f32 %v17353_v3, %v4607_v25  ;;  %v14673_v50 = vadd.f32 %v17354_v52, %v4606_v49  ;;  %v4969_v34 = vmul.f32 %v14647_v31, %v17355_v0  ;;  %v4968_v22 = vmul.f32 %v14660_v1, %v17355_v0  ;;  %v9204_v28 = vld [vmem:[%s16010_s2 + $0x99] sm:$0xff]  ;;  %v9205_v29 = vld [vmem:[%s16010_s2 + $0x91] sm:$0xff]  ;;  %v9115_v32 = vld [vmem:[%s16008_s0 + $0x109] ss:$0 sm:$0xff] }
0x1089   :  { %7590 = vrot.lane.b32.xlu0 %v7498_v30, %s9242_s15  ;;  %v4983_v9 = vmul.f32 %v9204_v28, %v17349_v42  ;;  %v7500_v25 = vmul.f32 %v14469_v7, %v14407_v5  ;;  %v14687_v49 = vadd.f32 %v4967_v51, %v4850_v19  ;;  %v4982_v36 = vmul.f32 %v9205_v29, %v17349_v42  ;;  %v17356_v21 = vld [vmem:[#allocation484_spill] sm:$0xff]  ;;  %v17357_v7 = vld [vmem:[#allocation483_spill] sm:$0xff]  ;;  %v9114_v40 = vld [vmem:[%s16008_s0 + $0x108] ss:$0 sm:$0xff] }
0x108a   :  { %v4985_v55 = vmul.f32 %v9204_v28, %v17355_v0  ;;  %v4984_v47 = vmul.f32 %v9205_v29, %v17355_v0  ;;  %v14695_v17 = vadd.f32 %v4966_v11, %v4849_v4  ;;  %v4971_v38 = vmul.f32 %v14647_v31, %v17356_v21 }
0x108b   :  { %v4970_v5 = vmul.f32 %v14660_v1, %v17356_v21  ;;  %v4973_v19 = vmul.f32 %v14647_v31, %v17357_v7  ;;  %v4972_v35 = vmul.f32 %v14660_v1, %v17357_v7  ;;  %v4987_v30 = vmul.f32 %v9204_v28, %v17356_v21 }
0x108c   :  { %7596 = vrot.lane.b32.xlu1 %v7501_v57, %s9242_s15  ;;  %v4986_v4 = vmul.f32 %v9205_v29, %v17356_v21  ;;  %v5001_v54 = vadd.f32 %v4969_v34, %v14574_v6  ;;  %v5000_v42 = vadd.f32 %v4968_v22, %v14577_v20  ;;  %v4989_v51 = vmul.f32 %v9204_v28, %v17357_v7  ;;  %v17358_v57 = vld [vmem:[#allocation486_spill] sm:$0xff] }
0x108d   :  { %7594 = vrot.lane.b32.xlu0 %v7500_v25, %s9242_s15  ;;  %v4988_v63 = vmul.f32 %v9205_v29, %v17357_v7  ;;  %v14719_v24 = vadd.f32 %v4983_v9, %v4866_v46  ;;  %v14721_v11 = vadd.f32 %v4982_v36, %v4865_v2  ;;  %v14723_v26 = vadd.f32 %v4985_v55, %v4868_v15  ;;  %v9117_v15 = vld [vmem:[%s16008_s0 + $0x10b] ss:$0 sm:$0xff]  ;;  %v17360_v55 = vld [vmem:[#allocation488_spill] sm:$0xff] }
0x108e   :  { %v14725_v3 = vadd.f32 %v4984_v47, %v4867_v44  ;;  %v5003_v52 = vadd.f32 %v4971_v38, %v14580_v27  ;;  %v5002_v0 = vadd.f32 %v4970_v5, %v14585_v12  ;;  %v4975_v6 = vmul.f32 %v14647_v31, %v17358_v57  ;;  %v9116_v27 = vld [vmem:[%s16008_s0 + $0x10a] ss:$0 sm:$0xff]  ;;  %v17359_v44 = vld [vmem:[#allocation485_spill] sm:$0xff] }
0x108f   :  { %v5005_v20 = vadd.f32 %v4973_v19, %v14588_v37  ;;  %v5004_v46 = vadd.f32 %v4972_v35, %v14591_v48  ;;  %v14733_v34 = vadd.f32 %v4987_v30, %v4870_v18  ;;  %v14735_v2 = vadd.f32 %v4986_v4, %v4869_v60  ;;  %v9118_v19 = vld [vmem:[%s16008_s0 + $0x10c] ss:$0 sm:$0xff] }
0x1090   :  { %7720 = vperm.xlu1 %9169, %v9115_v32   ;;  %v4974_v12 = vmul.f32 %v14660_v1, %v17358_v57  ;;  %v4977_v37 = vmul.f32 %v14647_v31, %v17359_v44  ;;  %v14747_v22 = vadd.f32 %v4989_v51, %v4872_v8  ;;  %v14749_v48 = vadd.f32 %v4988_v63, %v4871_v16  ;;  %v17361_v16 = vld [vmem:[#allocation487_spill] sm:$0xff] }
0x1091   :  { %7716 = vperm.xlu0 %9168, %v9114_v40   ;;  %v4976_v18 = vmul.f32 %v14660_v1, %v17359_v44  ;;  %v4991_v60 = vmul.f32 %v9204_v28, %v17358_v57  ;;  %v4990_v9 = vmul.f32 %v9205_v29, %v17358_v57  ;;  %v4993_v25 = vmul.f32 %v9204_v28, %v17359_v44 }
0x1092   :  { %v5007_v36 = vadd.f32 %v4975_v6, %v14594_v62  ;;  %v4979_v47 = vmul.f32 %v14647_v31, %v17360_v55  ;;  %v4992_v21 = vmul.f32 %v9205_v29, %v17359_v44  ;;  %v4978_v8 = vmul.f32 %v14660_v1, %v17360_v55  ;;  %v9119_v62 = vld [vmem:[%s16008_s0 + $0x10d] ss:$0 sm:$0xff]  ;;  %v17364_v6 = vld [vmem:[#allocation491_spill] sm:$0xff]  ;;  %v17366_v44 = vld [vmem:[#allocation493_spill] sm:$0xff] }
0x1093   :  { %v4981_v38 = vmul.f32 %v14647_v31, %v17361_v16  ;;  %v4980_v5 = vmul.f32 %v14660_v1, %v17361_v16  ;;  %v4995_v7 = vmul.f32 %v9204_v28, %v17360_v55  ;;  %v5006_v35 = vadd.f32 %v4974_v12, %v14597_v10 }
0x1094   :  { %7728 = vperm.xlu1 %9169, %v9117_v15   ;;  %v4994_v30 = vmul.f32 %v9205_v29, %v17360_v55  ;;  %v4997_v4 = vmul.f32 %v9204_v28, %v17361_v16  ;;  %v4996_v31 = vmul.f32 %v9205_v29, %v17361_v16  ;;  %v5009_v1 = vadd.f32 %v4977_v37, %v14600_v61 }
0x1095   :  { %7724 = vperm.xlu0 %9168, %v9116_v27   ;;  %v5008_v32 = vadd.f32 %v4976_v18, %v14607_v39  ;;  %v5023_v40 = vadd.f32 %v4991_v60, %v14636_v59  ;;  %v5022_v51 = vadd.f32 %v4990_v9, %v14639_v14  ;;  %v5011_v63 = vadd.f32 %v4979_v47, %v14610_v56  ;;  %v9121_v59 = vld [vmem:[%s16008_s0 + $0x10f] ss:$0 sm:$0xff]  ;;  %v9120_v56 = vld [vmem:[%s16008_s0 + $0x10e] ss:$0 sm:$0xff]  ;;  %v17362_v14 = vld [vmem:[#allocation489_spill] sm:$0xff] }
0x1096   :  { %v5025_v57 = vadd.f32 %v4993_v25, %v14642_v58  ;;  %v5024_v10 = vadd.f32 %v4992_v21, %v14652_v43  ;;  %v5010_v28 = vadd.f32 %v4978_v8, %v14613_v13  ;;  %v5013_v29 = vadd.f32 %v4981_v38, %v14616_v33  ;;  %v17365_v27 = vld [vmem:[#allocation492_spill] sm:$0xff]  ;;  %v17367_v18 = vld [vmem:[#allocation494_spill] sm:$0xff]  ;;  %v17368_v9 = vld [vmem:[#allocation495_spill] sm:$0xff] }
0x1097   :  { %v5012_v61 = vadd.f32 %v4980_v5, %v14619_v41  ;;  %v5027_v39 = vadd.f32 %v4995_v7, %v14655_v23  ;;  %v5272_v58 = vadd.f32 %v17362_v14, %v14687_v49  ;;  %v5026_v43 = vadd.f32 %v4994_v30, %v14667_v45  ;;  %v17363_v41 = vld [vmem:[#allocation490_spill] sm:$0xff]  ;;  %v17369_v49 = vld [vmem:[#allocation496_spill] sm:$0xff]  ;;  %v17370_v45 = vld [vmem:[#allocation497_spill] sm:$0xff] }
0x1098   :  { %7736 = vperm.xlu1 %9169, %v9119_v62   ;;  %v5029_v13 = vadd.f32 %v4997_v4, %v14670_v53  ;;  %v5028_v33 = vadd.f32 %v4996_v31, %v14673_v50  ;;  %v5271_v23 = vadd.f32 %v17363_v41, %v14695_v17  ;;  %v5274_v15 = vadd.f32 %v17364_v6, %v5001_v54  ;;  %v17371_v50 = vld [vmem:[#allocation498_spill] sm:$0xff]  ;;  %v17372_v21 = vld [vmem:[#allocation499_spill] sm:$0xff]  ;;  %v17373_v8 = vld [vmem:[#allocation500_spill] sm:$0xff] }
0x1099   :  { %7732 = vperm.xlu0 %9168, %v9118_v19   ;;  %v5273_v12 = vadd.f32 %v17365_v27, %v5000_v42  ;;  %v5276_v37 = vadd.f32 %v17366_v44, %v5003_v52  ;;  %v5275_v60 = vadd.f32 %v17367_v18, %v5002_v0  ;;  %v5278_v25 = vadd.f32 %v17368_v9, %v5005_v20  ;;  %v9131_v42 = vld [vmem:[%s16008_s0 + $0x111] ss:$0 sm:$0xff]  ;;  %v9130_v52 = vld [vmem:[%s16008_s0 + $0x110] ss:$0 sm:$0xff]  ;;  %v17374_v0 = vld [vmem:[#allocation501_spill] sm:$0xff] }
0x109a   :  { %v5277_v55 = vadd.f32 %v17369_v49, %v5004_v46  ;;  %v5280_v53 = vadd.f32 %v17370_v45, %v5007_v36  ;;  %v5279_v47 = vadd.f32 %v17371_v50, %v5006_v35  ;;  %v5282_v17 = vadd.f32 %v17372_v21, %v5009_v1  ;;  %v17375_v46 = vld [vmem:[#allocation502_spill] sm:$0xff]  ;;  %v17376_v38 = vld [vmem:[#allocation503_spill] sm:$0xff]  ;;  %v17377_v5 = vld [vmem:[#allocation504_spill] sm:$0xff] }
0x109b   :  { %v5281_v54 = vadd.f32 %v17373_v8, %v5008_v32  ;;  %v5284_v20 = vadd.f32 %v17374_v0, %v5011_v63  ;;  %v5283_v16 = vadd.f32 %v17375_v46, %v5010_v28  ;;  %v5286_v36 = vadd.f32 %v17376_v38, %v5013_v29  ;;  %v17378_v62 = vld [vmem:[#allocation505_spill] sm:$0xff]  ;;  %v17379_v35 = vld [vmem:[#allocation506_spill] sm:$0xff]  ;;  %v17380_v4 = vld [vmem:[#allocation507_spill] sm:$0xff] }
0x109c   :  { %7744 = vperm.xlu1 %9169, %v9121_v59   ;;  %v5285_v7 = vadd.f32 %v17377_v5, %v5012_v61  ;;  %v5288_v19 = vadd.f32 %v17378_v62, %v14719_v24  ;;  %v5287_v30 = vadd.f32 %v17379_v35, %v14721_v11  ;;  %v5290_v31 = vadd.f32 %v17380_v4, %v14723_v26  ;;  %v17381_v1 = vld [vmem:[#allocation508_spill] sm:$0xff]  ;;  %v17382_v63 = vld [vmem:[#allocation510_spill] sm:$0xff]  ;;  %v17383_v28 = vld [vmem:[#allocation509_spill] sm:$0xff] }
0x109d   :  { %7740 = vperm.xlu0 %9168, %v9120_v56   ;;  %v5289_v32 = vadd.f32 %v17381_v1, %v14725_v3  ;;  %v5292_v59 = vadd.f32 %v17382_v63, %v14733_v34  ;;  %v5291_v29 = vadd.f32 %v17383_v28, %v14735_v2  ;;  %v17384_v61 = vld [vmem:[#allocation512_spill] sm:$0xff]  ;;  %v17385_v24 = vld [vmem:[#allocation511_spill] sm:$0xff]  ;;  %v17386_v14 = vld [vmem:[#allocation514_spill] sm:$0xff] }
0x109e   :  { %v5294_v56 = vadd.f32 %v17384_v61, %v14747_v22  ;;  %v5293_v11 = vadd.f32 %v17385_v24, %v14749_v48  ;;  %v5296_v41 = vadd.f32 %v17386_v14, %v5023_v40  ;;  %v17387_v26 = vld [vmem:[#allocation513_spill] sm:$0xff]  ;;  %v17388_v27 = vld [vmem:[#allocation516_spill] sm:$0xff]  ;;  %v9133_v34 = vld [vmem:[%s16008_s0 + $0x113] ss:$0 sm:$0xff] }
0x109f   :  { %v5295_v6 = vadd.f32 %v17387_v26, %v5022_v51  ;;  %v5298_v3 = vadd.f32 %v17388_v27, %v5025_v57  ;;  %v9132_v2 = vld [vmem:[%s16008_s0 + $0x112] ss:$0 sm:$0xff]  ;;  %v17390_v18 = vld [vmem:[#allocation518_spill] sm:$0xff]  ;;  %v17391_v49 = vld [vmem:[#allocation517_spill] sm:$0xff] }
0x10a0   :  { %7865 = vperm.xlu1 %9169, %v9131_v42   ;;  %v17389_v22 = vld [vmem:[#allocation515_spill] sm:$0xff]  ;;  %v5300_v9 = vadd.f32 %v17390_v18, %v5027_v39  ;;  %v5299_v48 = vadd.f32 %v17391_v49, %v5026_v43  ;;  %v17392_v45 = vld [vmem:[#allocation520_spill] sm:$0xff]  ;;  %v17394_v21 = vld [vmem:[#allocation521_spill] sm:$0xff] }
0x10a1   :  { %7861 = vperm.xlu0 %9168, %v9130_v52   ;;  %v5297_v44 = vadd.f32 %v17389_v22, %v5024_v10  ;;  %v5302_v40 = vadd.f32 %v17392_v45, %v5029_v13  ;;  %v17393_v50 = vld [vmem:[#allocation519_spill] sm:$0xff]  ;;  %v5545_v57 = vadd.f32 %v17394_v21, %v5272_v58  ;;  %v17395_v8 = vld [vmem:[#allocation522_spill] sm:$0xff]  ;;  %v17397_v46 = vld [vmem:[#allocation524_spill] sm:$0xff] }
0x10a2   :  { %v5301_v51 = vadd.f32 %v17393_v50, %v5028_v33  ;;  %v5544_v42 = vadd.f32 %v17395_v8, %v5271_v23  ;;  %v17396_v52 = vld [vmem:[#allocation523_spill] sm:$0xff]  ;;  %v5546_v38 = vadd.f32 %v17397_v46, %v5273_v12  ;;  %v17398_v5 = vld [vmem:[#allocation525_spill] sm:$0xff]  ;;  %v17399_v10 = vld [vmem:[#allocation526_spill] sm:$0xff] }
0x10a3   :  { %v5547_v0 = vadd.f32 %v17396_v52, %v5274_v15  ;;  %v14856_v62 = vadd.f32 %v17398_v5, %v5276_v37  ;;  %v14859_v35 = vadd.f32 %v17399_v10, %v5275_v60  ;;  %v17400_v39 = vld [vmem:[#allocation527_spill] sm:$0xff]  ;;  %v17401_v13 = vld [vmem:[#allocation528_spill] sm:$0xff]  ;;  %v17402_v58 = vld [vmem:[#allocation529_spill] sm:$0xff] }
0x10a4   :  { %7873 = vperm.xlu1 %9169, %v9133_v34   ;;  %v14862_v43 = vadd.f32 %v17400_v39, %v5278_v25  ;;  %v14865_v33 = vadd.f32 %v17401_v13, %v5277_v55  ;;  %v14868_v23 = vadd.f32 %v17402_v58, %v5280_v53  ;;  %v17403_v15 = vld [vmem:[#allocation530_spill] sm:$0xff]  ;;  %v9135_v12 = vld [vmem:[%s16008_s0 + $0x115] ss:$0 sm:$0xff]  ;;  %v9134_v37 = vld [vmem:[%s16008_s0 + $0x114] ss:$0 sm:$0xff] }
0x10a5   :  { %7869 = vperm.xlu0 %9168, %v9132_v2   ;;  %v14871_v4 = vadd.f32 %v17403_v15, %v5279_v47  ;;  %v17404_v60 = vld [vmem:[#allocation531_spill] sm:$0xff]  ;;  %v17405_v1 = vld [vmem:[#allocation532_spill] sm:$0xff]  ;;  %v17406_v63 = vld [vmem:[#allocation533_spill] sm:$0xff] }
0x10a6   :  { %v14880_v25 = vadd.f32 %v17404_v60, %v5282_v17  ;;  %v14883_v55 = vadd.f32 %v17405_v1, %v5281_v54  ;;  %v14886_v53 = vadd.f32 %v17406_v63, %v5284_v20  ;;  %v17407_v28 = vld [vmem:[#allocation534_spill] sm:$0xff]  ;;  %v17408_v61 = vld [vmem:[#allocation535_spill] sm:$0xff]  ;;  %v17409_v14 = vld [vmem:[#allocation536_spill] sm:$0xff] }
0x10a7   :  { %v14889_v47 = vadd.f32 %v17407_v28, %v5283_v16  ;;  %v14892_v24 = vadd.f32 %v17408_v61, %v5286_v36  ;;  %v14895_v26 = vadd.f32 %v17409_v14, %v5285_v7  ;;  %v17410_v27 = vld [vmem:[#allocation537_spill] sm:$0xff]  ;;  %v17411_v2 = vld [vmem:[#allocation538_spill] sm:$0xff]  ;;  %v17412_v22 = vld [vmem:[#allocation539_spill] sm:$0xff] }
0x10a8   :  { %v5561_v34 = vadd.f32 %v17410_v27, %v5288_v19  ;;  %v5560_v17 = vadd.f32 %v17411_v2, %v5287_v30  ;;  %v5563_v18 = vadd.f32 %v17412_v22, %v5290_v31  ;;  %v17413_v54 = vld [vmem:[#allocation540_spill] sm:$0xff]  ;;  %v17414_v45 = vld [vmem:[#allocation541_spill] sm:$0xff]  ;;  %7881 = vperm.xlu1 %9169, %v9135_v12   ;;  %v17415_v16 = vld [vmem:[#allocation542_spill] sm:$0xff] }
0x10a9   :  { %v5562_v49 = vadd.f32 %v17413_v54, %v5289_v32  ;;  %v5565_v20 = vadd.f32 %v17414_v45, %v5292_v59  ;;  %7877 = vperm.xlu0 %9168, %v9134_v37   ;;  %v5564_v50 = vadd.f32 %v17415_v16, %v5291_v29  ;;  %v17416_v21 = vld [vmem:[#allocation543_spill] sm:$0xff]  ;;  %v17417_v8 = vld [vmem:[#allocation544_spill] sm:$0xff]  ;;  %v17418_v7 = vld [vmem:[#allocation545_spill] sm:$0xff] }
0x10aa   :  { %v5567_v36 = vadd.f32 %v17416_v21, %v5294_v56  ;;  %v5566_v52 = vadd.f32 %v17417_v8, %v5293_v11  ;;  %v14906_v46 = vadd.f32 %v17418_v7, %v5296_v41  ;;  %v9137_v19 = vld [vmem:[%s16008_s0 + $0x117] ss:$0 sm:$0xff]  ;;  %v9136_v30 = vld [vmem:[%s16008_s0 + $0x116] ss:$0 sm:$0xff]  ;;  %v17419_v31 = vld [vmem:[#allocation546_spill] sm:$0xff] }
0x10ab   :  { %v14915_v32 = vadd.f32 %v17419_v31, %v5295_v6  ;;  %v17420_v59 = vld [vmem:[#allocation547_spill] sm:$0xff]  ;;  %v17421_v56 = vld [vmem:[#allocation548_spill] sm:$0xff]  ;;  %v17422_v11 = vld [vmem:[#allocation549_spill] sm:$0xff] }
0x10ac   :  { %v14918_v29 = vadd.f32 %v17420_v59, %v5298_v3  ;;  %v14921_v5 = vadd.f32 %v17421_v56, %v5297_v44  ;;  %v14924_v41 = vadd.f32 %v17422_v11, %v5300_v9  ;;  %v17424_v10 = vld [vmem:[#allocation550_spill] sm:$0xff]  ;;  %v17426_v13 = vld [vmem:[#allocation551_spill] sm:$0xff]  ;;  %v17428_v15 = vld [vmem:[#allocation552_spill] sm:$0xff]  ;;  %7889 = vperm.xlu1 %9169, %v9137_v19  }
0x10ad   :  { %v14927_v39 = vadd.f32 %v17424_v10, %v5299_v48  ;;  %v14930_v58 = vadd.f32 %v17426_v13, %v5302_v40  ;;  %v14933_v12 = vadd.f32 %v17428_v15, %v5301_v51  ;;  %v9206_v6 = vld [vmem:[%s16010_s2 + $0x3a] sm:$0xff]  ;;  %v17430_v3 = vld [vmem:[#allocation554_spill] sm:$0xff]  ;;  %v9207_v44 = vld [vmem:[%s16010_s2 + $0x32] sm:$0xff]  ;;  %7885 = vperm.xlu0 %9168, %v9136_v30  }
0x10ae   :  { %17423 = vst [vmem:[#allocation45_spill] sm:$0xff] %v14924_v41  ;;  %v5662_v37 = vmul.f32 %v9206_v6, %v17430_v3  ;;  %v5661_v9 = vmul.f32 %v9207_v44, %v17430_v3  ;;  %v17431_v48 = vld [vmem:[#allocation553_spill] sm:$0xff]  ;;  %v9209_v63 = vld [vmem:[%s16010_s2 + $0x92] sm:$0xff] }
0x10af   :  { %17425 = vst [vmem:[#allocation707_spill] sm:$0xff] %v14927_v39  ;;  %17427 = vst [vmem:[#allocation46_spill] sm:$0xff] %v14930_v58  ;;  %v5664_v60 = vmul.f32 %v9206_v6, %v17431_v48  ;;  %v5663_v40 = vmul.f32 %v9207_v44, %v17431_v48  ;;  %v9208_v51 = vld [vmem:[%s16010_s2 + $0x9a] sm:$0xff]  ;;  %v5677_v28 = vmul.f32 %v9209_v63, %v17430_v3  ;;  %v17433_v54 = vld [vmem:[#allocation555_spill] sm:$0xff] }
0x10b0   :  { %17429 = vst [vmem:[#allocation47_spill] sm:$0xff] %v14933_v12  ;;  %v5678_v1 = vmul.f32 %v9208_v51, %v17430_v3  ;;  %v5680_v61 = vmul.f32 %v9208_v51, %v17431_v48  ;;  %v5679_v14 = vmul.f32 %v9209_v63, %v17431_v48  ;;  %v17432_v27 = vld [vmem:[#allocation556_spill] sm:$0xff]  ;;  %v5668_v45 = vmul.f32 %v9206_v6, %v17433_v54 }
0x10b1   :  { %v5666_v2 = vmul.f32 %v9206_v6, %v17432_v27  ;;  %v5665_v22 = vmul.f32 %v9207_v44, %v17432_v27  ;;  %v5667_v16 = vmul.f32 %v9207_v44, %v17433_v54  ;;  %v5682_v21 = vmul.f32 %v9208_v51, %v17432_v27 }
0x10b2   :  { %v5681_v8 = vmul.f32 %v9209_v63, %v17432_v27  ;;  %v5684_v7 = vmul.f32 %v9208_v51, %v17433_v54  ;;  %v5683_v19 = vmul.f32 %v9209_v63, %v17433_v54  ;;  %v5694_v30 = vadd.f32 %v5662_v37, %v5545_v57  ;;  %v17434_v57 = vld [vmem:[#allocation558_spill] sm:$0xff] }
0x10b3   :  { %v5693_v31 = vadd.f32 %v5661_v9, %v5544_v42  ;;  %v5696_v59 = vadd.f32 %v5664_v60, %v5547_v0  ;;  %v5695_v56 = vadd.f32 %v5663_v40, %v5546_v38  ;;  %v5710_v11 = vadd.f32 %v5678_v1, %v5561_v34  ;;  %v17435_v38 = vld [vmem:[#allocation557_spill] sm:$0xff] }
0x10b4   :  { %v5709_v10 = vadd.f32 %v5677_v28, %v5560_v17  ;;  %v5712_v13 = vadd.f32 %v5680_v61, %v5563_v18  ;;  %v5711_v15 = vadd.f32 %v5679_v14, %v5562_v49  ;;  %v5698_v3 = vadd.f32 %v5666_v2, %v14856_v62  ;;  %v17436_v18 = vld [vmem:[#allocation560_spill] sm:$0xff] }
0x10b5   :  { %v5697_v48 = vadd.f32 %v5665_v22, %v14859_v35  ;;  %v5700_v12 = vadd.f32 %v5668_v45, %v14862_v43  ;;  %v5699_v27 = vadd.f32 %v5667_v16, %v14865_v33  ;;  %v5714_v58 = vadd.f32 %v5682_v21, %v5565_v20  ;;  %v17438_v45 = vld [vmem:[#allocation45_spill] sm:$0xff] }
0x10b6   :  { %v5713_v39 = vadd.f32 %v5681_v8, %v5564_v50  ;;  %v5716_v41 = vadd.f32 %v5684_v7, %v5567_v36  ;;  %v5715_v54 = vadd.f32 %v5683_v19, %v5566_v52  ;;  %v5670_v42 = vmul.f32 %v9206_v6, %v17434_v57  ;;  %v17437_v50 = vld [vmem:[#allocation559_spill] sm:$0xff]  ;;  %v17440_v21 = vld [vmem:[#allocation46_spill] sm:$0xff]  ;;  %v17442_v7 = vld [vmem:[#allocation561_spill] sm:$0xff] }
0x10b7   :  { %v5669_v0 = vmul.f32 %v9207_v44, %v17434_v57  ;;  %v5672_v34 = vmul.f32 %v9206_v6, %v17435_v38  ;;  %v5671_v17 = vmul.f32 %v9207_v44, %v17435_v38  ;;  %v5686_v62 = vmul.f32 %v9208_v51, %v17434_v57  ;;  %v17439_v16 = vld [vmem:[#allocation707_spill] sm:$0xff]  ;;  %v17443_v19 = vld [vmem:[#allocation562_spill] sm:$0xff] }
0x10b8   :  { %v5685_v35 = vmul.f32 %v9209_v63, %v17434_v57  ;;  %v5688_v43 = vmul.f32 %v9208_v51, %v17435_v38  ;;  %v5687_v33 = vmul.f32 %v9209_v63, %v17435_v38  ;;  %v5674_v49 = vmul.f32 %v9206_v6, %v17436_v18  ;;  %v17441_v8 = vld [vmem:[#allocation47_spill] sm:$0xff]  ;;  %v17447_v38 = vld [vmem:[#allocation566_spill] sm:$0xff] }
0x10b9   :  { %v5673_v20 = vmul.f32 %v9207_v44, %v17436_v18  ;;  %v5676_v36 = vmul.f32 %v9206_v6, %v17437_v50  ;;  %v5675_v52 = vmul.f32 %v9207_v44, %v17437_v50  ;;  %v5690_v37 = vmul.f32 %v9208_v51, %v17436_v18  ;;  %v17444_v57 = vld [vmem:[#allocation563_spill] sm:$0xff] }
0x10ba   :  { %v5689_v9 = vmul.f32 %v9209_v63, %v17436_v18  ;;  %v5692_v60 = vmul.f32 %v9208_v51, %v17437_v50  ;;  %v5691_v40 = vmul.f32 %v9209_v63, %v17437_v50  ;;  %v5702_v1 = vadd.f32 %v5670_v42, %v14868_v23  ;;  %v17445_v42 = vld [vmem:[#allocation564_spill] sm:$0xff]  ;;  %v17451_v18 = vld [vmem:[#allocation570_spill] sm:$0xff] }
0x10bb   :  { %v5701_v28 = vadd.f32 %v5669_v0, %v14871_v4  ;;  %v5704_v61 = vadd.f32 %v5672_v34, %v14880_v25  ;;  %v5703_v14 = vadd.f32 %v5671_v17, %v14883_v55  ;;  %v5718_v6 = vadd.f32 %v5686_v62, %v14906_v46  ;;  %v17446_v0 = vld [vmem:[#allocation565_spill] sm:$0xff]  ;;  %v17448_v34 = vld [vmem:[#allocation567_spill] sm:$0xff]  ;;  %v17449_v62 = vld [vmem:[#allocation568_spill] sm:$0xff] }
0x10bc   :  { %v5717_v44 = vadd.f32 %v5685_v35, %v14915_v32  ;;  %v5720_v2 = vadd.f32 %v5688_v43, %v14918_v29  ;;  %v5719_v22 = vadd.f32 %v5687_v33, %v14921_v5  ;;  %v5706_v51 = vadd.f32 %v5674_v49, %v14886_v53  ;;  %v17450_v43 = vld [vmem:[#allocation569_spill] sm:$0xff]  ;;  %v17453_v50 = vld [vmem:[#allocation572_spill] sm:$0xff] }
0x10bd   :  { %v5705_v63 = vadd.f32 %v5673_v20, %v14889_v47  ;;  %v5708_v23 = vadd.f32 %v5676_v36, %v14892_v24  ;;  %v5707_v4 = vadd.f32 %v5675_v52, %v14895_v26  ;;  %v5722_v25 = vadd.f32 %v5690_v37, %v17438_v45  ;;  %v17452_v20 = vld [vmem:[#allocation571_spill] sm:$0xff]  ;;  %v17454_v36 = vld [vmem:[#allocation573_spill] sm:$0xff]  ;;  %v17455_v52 = vld [vmem:[#allocation574_spill] sm:$0xff] }
0x10be   :  { %v5721_v55 = vadd.f32 %v5689_v9, %v17439_v16  ;;  %v5724_v46 = vadd.f32 %v5692_v60, %v17440_v21  ;;  %v5723_v32 = vadd.f32 %v5691_v40, %v17441_v8  ;;  %v5967_v29 = vadd.f32 %v17442_v7, %v5694_v30  ;;  %v17456_v37 = vld [vmem:[#allocation575_spill] sm:$0xff]  ;;  %v17457_v9 = vld [vmem:[#allocation576_spill] sm:$0xff]  ;;  %v17458_v60 = vld [vmem:[#allocation577_spill] sm:$0xff] }
0x10bf   :  { %v5966_v5 = vadd.f32 %v17443_v19, %v5693_v31  ;;  %v5969_v53 = vadd.f32 %v17444_v57, %v5696_v59  ;;  %v5968_v47 = vadd.f32 %v17445_v42, %v5695_v56  ;;  %v5971_v24 = vadd.f32 %v17446_v0, %v5698_v3  ;;  %v17459_v40 = vld [vmem:[#allocation578_spill] sm:$0xff]  ;;  %v17460_v45 = vld [vmem:[#allocation579_spill] sm:$0xff]  ;;  %v17461_v16 = vld [vmem:[#allocation580_spill] sm:$0xff] }
0x10c0   :  { %v5970_v26 = vadd.f32 %v17447_v38, %v5697_v48  ;;  %v5973_v17 = vadd.f32 %v17448_v34, %v5700_v12  ;;  %v5972_v35 = vadd.f32 %v17449_v62, %v5699_v27  ;;  %v5975_v33 = vadd.f32 %v17450_v43, %v5702_v1  ;;  %v17462_v21 = vld [vmem:[#allocation582_spill] sm:$0xff]  ;;  %v17463_v8 = vld [vmem:[#allocation581_spill] sm:$0xff]  ;;  %v17464_v7 = vld [vmem:[#allocation584_spill] sm:$0xff] }
0x10c1   :  { %v5974_v49 = vadd.f32 %v17451_v18, %v5701_v28  ;;  %v5977_v30 = vadd.f32 %v17452_v20, %v5704_v61  ;;  %v5976_v31 = vadd.f32 %v17453_v50, %v5703_v14  ;;  %v5979_v59 = vadd.f32 %v17454_v36, %v5706_v51  ;;  %v17465_v19 = vld [vmem:[#allocation583_spill] sm:$0xff]  ;;  %v17466_v57 = vld [vmem:[#allocation586_spill] sm:$0xff]  ;;  %v17467_v42 = vld [vmem:[#allocation585_spill] sm:$0xff] }
0x10c2   :  { %v5978_v56 = vadd.f32 %v17455_v52, %v5705_v63  ;;  %v5981_v3 = vadd.f32 %v17456_v37, %v5708_v23  ;;  %v5980_v48 = vadd.f32 %v17457_v9, %v5707_v4  ;;  %v5983_v12 = vadd.f32 %v17458_v60, %v5710_v11  ;;  %v17468_v0 = vld [vmem:[#allocation588_spill] sm:$0xff]  ;;  %v17469_v38 = vld [vmem:[#allocation587_spill] sm:$0xff]  ;;  %v15027_v34 = vpop.permute.xlu1 %7536  ;;  %v17473_v62 = vld [vmem:[#allocation589_spill] sm:$0xff] }
0x10c3   :  { %v5982_v27 = vadd.f32 %v17459_v40, %v5709_v10  ;;  %v5985_v1 = vadd.f32 %v17460_v45, %v5712_v13  ;;  %v5984_v28 = vadd.f32 %v17461_v16, %v5711_v15  ;;  %v5987_v61 = vadd.f32 %v17462_v21, %v5714_v58  ;;  %17470 = vst [vmem:[#allocation48_spill] sm:$0xff] %v15027_v34  ;;  %v15029_v13 = vpop.permute.xlu0 %7534  ;;  %v17472_v15 = vld [vmem:[#allocation590_spill] sm:$0xff]  ;;  %v17474_v43 = vld [vmem:[#allocation592_spill] sm:$0xff]  ;;  %v17475_v18 = vld [vmem:[#allocation591_spill] sm:$0xff] }
0x10c4   :  { %v5986_v14 = vadd.f32 %v17463_v8, %v5713_v39  ;;  %v5989_v51 = vadd.f32 %v17464_v7, %v5716_v41  ;;  %v5988_v63 = vadd.f32 %v17465_v19, %v5715_v54  ;;  %v5991_v23 = vadd.f32 %v17466_v57, %v5718_v6  ;;  %17471 = vst [vmem:[#allocation52_spill] sm:$0xff] %v15029_v13  ;;  %v17476_v20 = vld [vmem:[#allocation593_spill] sm:$0xff]  ;;  %v17477_v50 = vld [vmem:[#allocation594_spill] sm:$0xff]  ;;  %v17478_v36 = vld [vmem:[#allocation595_spill] sm:$0xff] }
0x10c5   :  { %v5990_v4 = vadd.f32 %v17467_v42, %v5717_v44  ;;  %v5993_v11 = vadd.f32 %v17468_v0, %v5720_v2  ;;  %v5992_v10 = vadd.f32 %v17469_v38, %v5719_v22  ;;  %v5995_v58 = vadd.f32 %v17472_v15, %v5722_v25  ;;  %v17479_v52 = vld [vmem:[#allocation596_spill] sm:$0xff]  ;;  %v17480_v37 = vld [vmem:[#allocation597_spill] sm:$0xff]  ;;  %v17481_v60 = vld [vmem:[#allocation598_spill] sm:$0xff] }
0x10c6   :  { %v5994_v39 = vadd.f32 %v17473_v62, %v5721_v55  ;;  %v5997_v41 = vadd.f32 %v17474_v43, %v5724_v46  ;;  %v5996_v54 = vadd.f32 %v17475_v18, %v5723_v32  ;;  %v6240_v6 = vadd.f32 %v17476_v20, %v5967_v29  ;;  %v17482_v45 = vld [vmem:[#allocation599_spill] sm:$0xff]  ;;  %v17483_v16 = vld [vmem:[#allocation600_spill] sm:$0xff]  ;;  %v17484_v21 = vld [vmem:[#allocation601_spill] sm:$0xff] }
0x10c7   :  { %v6239_v44 = vadd.f32 %v17477_v50, %v5966_v5  ;;  %v6242_v2 = vadd.f32 %v17478_v36, %v5969_v53  ;;  %v6241_v22 = vadd.f32 %v17479_v52, %v5968_v47  ;;  %v6244_v9 = vadd.f32 %v17480_v37, %v5971_v24  ;;  %v17485_v32 = vld [vmem:[#allocation602_spill] sm:$0xff]  ;;  %v17486_v29 = vld [vmem:[#allocation603_spill] sm:$0xff]  ;;  %v17487_v53 = vld [vmem:[#allocation604_spill] sm:$0xff]  ;;  %v15055_v47 = vpop.permute.xlu1 %7540  ;;  %v15057_v24 = vpop.permute.xlu0 %7538 }
0x10c8   :  { %v6243_v40 = vadd.f32 %v17481_v60, %v5970_v26  ;;  %v6246_v25 = vadd.f32 %v17482_v45, %v5973_v17  ;;  %v6245_v55 = vadd.f32 %v17483_v16, %v5972_v35  ;;  %v15044_v46 = vadd.f32 %v17484_v21, %v5975_v33  ;;  %17488 = vst [vmem:[#allocation708_spill] sm:$0xff] %v15055_v47  ;;  %v17490_v26 = vld [vmem:[#allocation605_spill] sm:$0xff]  ;;  %v17491_v35 = vld [vmem:[#allocation606_spill] sm:$0xff]  ;;  %v17492_v33 = vld [vmem:[#allocation607_spill] sm:$0xff] }
0x10c9   :  { %v15047_v8 = vadd.f32 %v17485_v32, %v5974_v49  ;;  %v15050_v5 = vadd.f32 %v17486_v29, %v5977_v30  ;;  %v15053_v7 = vadd.f32 %v17487_v53, %v5976_v31  ;;  %17489 = vst [vmem:[#allocation51_spill] sm:$0xff] %v15057_v24  ;;  %v15060_v17 = vadd.f32 %v17490_v26, %v5979_v59  ;;  %v17493_v49 = vld [vmem:[#allocation608_spill] sm:$0xff]  ;;  %v17494_v30 = vld [vmem:[#allocation609_spill] sm:$0xff]  ;;  %v17495_v31 = vld [vmem:[#allocation610_spill] sm:$0xff] }
0x10ca   :  { %v15063_v19 = vadd.f32 %v17491_v35, %v5978_v56  ;;  %v15066_v57 = vadd.f32 %v17492_v33, %v5981_v3  ;;  %v15069_v42 = vadd.f32 %v17493_v49, %v5980_v48  ;;  %v6256_v0 = vadd.f32 %v17494_v30, %v5983_v12  ;;  %v17496_v15 = vld [vmem:[#allocation611_spill] sm:$0xff]  ;;  %v17497_v43 = vld [vmem:[#allocation612_spill] sm:$0xff]  ;;  %v17498_v20 = vld [vmem:[#allocation613_spill] sm:$0xff] }
0x10cb   :  { %v6255_v38 = vadd.f32 %v17495_v31, %v5982_v27  ;;  %v6258_v62 = vadd.f32 %v17496_v15, %v5985_v1  ;;  %v6257_v18 = vadd.f32 %v17497_v43, %v5984_v28  ;;  %v6260_v59 = vadd.f32 %v17498_v20, %v5987_v61  ;;  %v17499_v50 = vld [vmem:[#allocation614_spill] sm:$0xff]  ;;  %v17500_v56 = vld [vmem:[#allocation615_spill] sm:$0xff]  ;;  %v17501_v37 = vld [vmem:[#allocation616_spill] sm:$0xff]  ;;  %v15091_v28 = vpop.permute.xlu1 %7544  ;;  %v15093_v61 = vpop.permute.xlu0 %7542 }
0x10cc   :  { %v6259_v36 = vadd.f32 %v17499_v50, %v5986_v14  ;;  %v6262_v52 = vadd.f32 %v17500_v56, %v5989_v51  ;;  %v6261_v3 = vadd.f32 %v17501_v37, %v5988_v63  ;;  %v17502_v60 = vld [vmem:[#allocation617_spill] sm:$0xff]  ;;  %v17503_v48 = vld [vmem:[#allocation618_spill] sm:$0xff]  ;;  %v17504_v12 = vld [vmem:[#allocation619_spill] sm:$0xff]  ;;  %17506 = vst [vmem:[#allocation711_spill] sm:$0xff] %v15091_v28 }
0x10cd   :  { %v15080_v45 = vadd.f32 %v17502_v60, %v5991_v23  ;;  %v15083_v16 = vadd.f32 %v17503_v48, %v5990_v4  ;;  %v15086_v27 = vadd.f32 %v17504_v12, %v5993_v11  ;;  %v17505_v1 = vld [vmem:[#allocation620_spill] sm:$0xff]  ;;  %17507 = vst [vmem:[#allocation54_spill] sm:$0xff] %v15093_v61  ;;  %v17508_v14 = vld [vmem:[#allocation621_spill] sm:$0xff]  ;;  %v17509_v63 = vld [vmem:[#allocation622_spill] sm:$0xff] }
0x10ce   :  { %v15089_v21 = vadd.f32 %v17505_v1, %v5992_v10  ;;  %v15096_v51 = vadd.f32 %v17508_v14, %v5995_v58  ;;  %v15099_v32 = vadd.f32 %v17509_v63, %v5994_v39  ;;  %v17511_v23 = vld [vmem:[#allocation623_spill] sm:$0xff]  ;;  %v17513_v4 = vld [vmem:[#allocation624_spill] sm:$0xff]  ;;  %v17515_v10 = vld [vmem:[#allocation626_spill] sm:$0xff] }
0x10cf   :  { %v15102_v29 = vadd.f32 %v17511_v23, %v5997_v41  ;;  %v15105_v53 = vadd.f32 %v17513_v4, %v5996_v54  ;;  %v9210_v11 = vld [vmem:[%s16010_s2 + $0x50] sm:$0xff]  ;;  %v9211_v58 = vld [vmem:[%s16010_s2 + $0x48] sm:$0xff]  ;;  %v17516_v39 = vld [vmem:[#allocation625_spill] sm:$0xff]  ;;  %v15131_v12 = vpop.permute.xlu1 %7548  ;;  %v15133_v1 = vpop.permute.xlu0 %7546 }
0x10d0   :  { %17510 = vst [vmem:[#allocation53_spill] sm:$0xff] %v15099_v32  ;;  %v6358_v26 = vmul.f32 %v9210_v11, %v17515_v10  ;;  %v6357_v35 = vmul.f32 %v9211_v58, %v17515_v10  ;;  %v6360_v33 = vmul.f32 %v9210_v11, %v17516_v39  ;;  %v6359_v41 = vmul.f32 %v9211_v58, %v17516_v39  ;;  %v9212_v54 = vld [vmem:[%s16010_s2 + $0xb0] sm:$0xff]  ;;  %v9213_v30 = vld [vmem:[%s16010_s2 + $0xa8] sm:$0xff]  ;;  %v17517_v20 = vld [vmem:[#allocation628_spill] sm:$0xff] }
0x10d1   :  { %17512 = vst [vmem:[#allocation56_spill] sm:$0xff] %v15102_v29  ;;  %17514 = vst [vmem:[#allocation55_spill] sm:$0xff] %v15105_v53  ;;  %v6374_v49 = vmul.f32 %v9212_v54, %v17515_v10  ;;  %v6373_v31 = vmul.f32 %v9213_v30, %v17515_v10  ;;  %v6376_v15 = vmul.f32 %v9212_v54, %v17516_v39  ;;  %v17518_v37 = vld [vmem:[#allocation627_spill] sm:$0xff] }
0x10d2   :  { %v6375_v43 = vmul.f32 %v9213_v30, %v17516_v39  ;;  %v6362_v50 = vmul.f32 %v9210_v11, %v17517_v20  ;;  %v6361_v56 = vmul.f32 %v9211_v58, %v17517_v20  ;;  %v6364_v60 = vmul.f32 %v9210_v11, %v17518_v37  ;;  %17519 = vst [vmem:[#allocation57_spill] sm:$0xff] %v15131_v12 }
0x10d3   :  { %v6363_v48 = vmul.f32 %v9211_v58, %v17518_v37  ;;  %17520 = vst [vmem:[#allocation58_spill] sm:$0xff] %v15133_v1  ;;  %v6378_v14 = vmul.f32 %v9212_v54, %v17517_v20  ;;  %v6377_v63 = vmul.f32 %v9213_v30, %v17517_v20  ;;  %v6380_v23 = vmul.f32 %v9212_v54, %v17518_v37  ;;  %v15147_v29 = vpop.permute.xlu1 %7552  ;;  %v15149_v32 = vpop.permute.xlu0 %7550 }
0x10d4   :  { %v6379_v4 = vmul.f32 %v9213_v30, %v17518_v37  ;;  %v6390_v10 = vadd.f32 %v6358_v26, %v6240_v6  ;;  %v6389_v39 = vadd.f32 %v6357_v35, %v6239_v44  ;;  %v6392_v61 = vadd.f32 %v6360_v33, %v6242_v2  ;;  %17521 = vst [vmem:[#allocation59_spill] sm:$0xff] %v15147_v29 }
0x10d5   :  { %v6391_v28 = vadd.f32 %v6359_v41, %v6241_v22  ;;  %v15139_v24 = vadd.f32 %v6374_v49, %v6256_v0  ;;  %v15141_v47 = vadd.f32 %v6373_v31, %v6255_v38  ;;  %v15143_v13 = vadd.f32 %v6376_v15, %v6258_v62  ;;  %17522 = vst [vmem:[#allocation60_spill] sm:$0xff] %v15149_v32  ;;  %v17523_v0 = vld [vmem:[#allocation630_spill] sm:$0xff]  ;;  %v17524_v62 = vld [vmem:[#allocation629_spill] sm:$0xff] }
0x10d6   :  { %v15145_v12 = vadd.f32 %v6375_v43, %v6257_v18  ;;  %v6394_v1 = vadd.f32 %v6362_v50, %v6244_v9  ;;  %v6393_v34 = vadd.f32 %v6361_v56, %v6243_v40  ;;  %v6396_v53 = vadd.f32 %v6364_v60, %v6246_v25 }
0x10d7   :  { %v6395_v20 = vadd.f32 %v6363_v48, %v6245_v55  ;;  %v6410_v6 = vadd.f32 %v6378_v14, %v6260_v59  ;;  %v6409_v44 = vadd.f32 %v6377_v63, %v6259_v36  ;;  %v6412_v2 = vadd.f32 %v6380_v23, %v6262_v52  ;;  %v17525_v59 = vld [vmem:[#allocation632_spill] sm:$0xff]  ;;  %v15163_v49 = vpop.permute.xlu1 %7556  ;;  %v15165_v31 = vpop.permute.xlu0 %7554 }
0x10d8   :  { %v6411_v22 = vadd.f32 %v6379_v4, %v6261_v3  ;;  %v6366_v26 = vmul.f32 %v9210_v11, %v17523_v0  ;;  %v6365_v38 = vmul.f32 %v9211_v58, %v17523_v0  ;;  %v6368_v35 = vmul.f32 %v9210_v11, %v17524_v62  ;;  %v17526_v3 = vld [vmem:[#allocation631_spill] sm:$0xff]  ;;  %17527 = vst [vmem:[#allocation61_spill] sm:$0xff] %v15163_v49 }
0x10d9   :  { %v6367_v18 = vmul.f32 %v9211_v58, %v17524_v62  ;;  %v6382_v9 = vmul.f32 %v9212_v54, %v17523_v0  ;;  %v6381_v40 = vmul.f32 %v9213_v30, %v17523_v0  ;;  %v6384_v25 = vmul.f32 %v9212_v54, %v17524_v62  ;;  %17528 = vst [vmem:[#allocation62_spill] sm:$0xff] %v15165_v31  ;;  %v17532_v0 = vld [vmem:[#allocation56_spill] sm:$0xff] }
0x10da   :  { %v6383_v55 = vmul.f32 %v9213_v30, %v17524_v62  ;;  %v6370_v36 = vmul.f32 %v9210_v11, %v17525_v59  ;;  %v6369_v52 = vmul.f32 %v9211_v58, %v17525_v59  ;;  %v6372_v33 = vmul.f32 %v9210_v11, %v17526_v3  ;;  %v17535_v62 = vld [vmem:[#allocation634_spill] sm:$0xff] }
0x10db   :  { %v6371_v41 = vmul.f32 %v9211_v58, %v17526_v3  ;;  %v6386_v15 = vmul.f32 %v9212_v54, %v17525_v59  ;;  %v6385_v43 = vmul.f32 %v9213_v30, %v17525_v59  ;;  %v6388_v50 = vmul.f32 %v9212_v54, %v17526_v3  ;;  %v15183_v4 = vpop.permute.xlu1 %7560  ;;  %v17540_v59 = vld [vmem:[#allocation639_spill] sm:$0xff] }
0x10dc   :  { %v6387_v56 = vmul.f32 %v9213_v30, %v17526_v3  ;;  %v6398_v37 = vadd.f32 %v6366_v26, %v15044_v46  ;;  %v6397_v60 = vadd.f32 %v6365_v38, %v15047_v8  ;;  %v6400_v11 = vadd.f32 %v6368_v35, %v15050_v5  ;;  %17529 = vst [vmem:[#allocation63_spill] sm:$0xff] %v15183_v4  ;;  %v15185_v5 = vpop.permute.xlu0 %7558  ;;  %v17533_v26 = vld [vmem:[#allocation55_spill] sm:$0xff]  ;;  %v17534_v38 = vld [vmem:[#allocation633_spill] sm:$0xff] }
0x10dd   :  { %v6399_v58 = vadd.f32 %v6367_v18, %v15053_v7  ;;  %v6414_v48 = vadd.f32 %v6382_v9, %v15080_v45  ;;  %v6413_v14 = vadd.f32 %v6381_v40, %v15083_v16  ;;  %v6416_v63 = vadd.f32 %v6384_v25, %v15086_v27  ;;  %17530 = vst [vmem:[#allocation64_spill] sm:$0xff] %v15185_v5  ;;  %v17531_v45 = vld [vmem:[#allocation53_spill] sm:$0xff]  ;;  %v17536_v35 = vld [vmem:[#allocation635_spill] sm:$0xff]  ;;  %v17537_v18 = vld [vmem:[#allocation636_spill] sm:$0xff] }
0x10de   :  { %v6415_v23 = vadd.f32 %v6383_v55, %v15089_v21  ;;  %v6402_v54 = vadd.f32 %v6370_v36, %v15060_v17  ;;  %v6401_v30 = vadd.f32 %v6369_v52, %v15063_v19  ;;  %v6404_v46 = vadd.f32 %v6372_v33, %v15066_v57  ;;  %v17538_v9 = vld [vmem:[#allocation637_spill] sm:$0xff]  ;;  %v17539_v25 = vld [vmem:[#allocation638_spill] sm:$0xff]  ;;  %v17541_v36 = vld [vmem:[#allocation640_spill] sm:$0xff] }
0x10df   :  { %v6403_v8 = vadd.f32 %v6371_v41, %v15069_v42  ;;  %v6418_v7 = vadd.f32 %v6386_v15, %v15096_v51  ;;  %v6417_v16 = vadd.f32 %v6385_v43, %v17531_v45  ;;  %v6420_v27 = vadd.f32 %v6388_v50, %v17532_v0  ;;  %v17542_v3 = vld [vmem:[#allocation641_spill] sm:$0xff]  ;;  %v17543_v41 = vld [vmem:[#allocation642_spill] sm:$0xff]  ;;  %v17544_v43 = vld [vmem:[#allocation643_spill] sm:$0xff] }
0x10e0   :  { %v6419_v21 = vadd.f32 %v6387_v56, %v17533_v26  ;;  %v6663_v17 = vadd.f32 %v17534_v38, %v6390_v10  ;;  %v6662_v19 = vadd.f32 %v17535_v62, %v6389_v39  ;;  %v6665_v57 = vadd.f32 %v17536_v35, %v6392_v61  ;;  %v17545_v50 = vld [vmem:[#allocation644_spill] sm:$0xff]  ;;  %v15203_v56 = vpop.permute.xlu1 %7564  ;;  %v15205_v61 = vpop.permute.xlu0 %7562  ;;  %v17549_v45 = vld [vmem:[#allocation646_spill] sm:$0xff]  ;;  %v17550_v0 = vld [vmem:[#allocation647_spill] sm:$0xff] }
0x10e1   :  { %v6664_v42 = vadd.f32 %v17537_v18, %v6391_v28  ;;  %v6667_v40 = vadd.f32 %v17538_v9, %v6394_v1  ;;  %v6666_v55 = vadd.f32 %v17539_v25, %v6393_v34  ;;  %v6669_v51 = vadd.f32 %v17540_v59, %v6396_v53  ;;  %17546 = vst [vmem:[#allocation65_spill] sm:$0xff] %v15203_v56  ;;  %v17548_v28 = vld [vmem:[#allocation645_spill] sm:$0xff]  ;;  %v17551_v26 = vld [vmem:[#allocation648_spill] sm:$0xff]  ;;  %v17556_v9 = vld [vmem:[#allocation654_spill] sm:$0xff] }
0x10e2   :  { %v6668_v52 = vadd.f32 %v17541_v36, %v6395_v20  ;;  %v6671_v33 = vadd.f32 %v17542_v3, %v6398_v37  ;;  %v6670_v15 = vadd.f32 %v17543_v41, %v6397_v60  ;;  %v6673_v10 = vadd.f32 %v17544_v43, %v6400_v11  ;;  %17547 = vst [vmem:[#allocation66_spill] sm:$0xff] %v15205_v61  ;;  %v17552_v37 = vld [vmem:[#allocation649_spill] sm:$0xff]  ;;  %v17553_v60 = vld [vmem:[#allocation650_spill] sm:$0xff]  ;;  %v17555_v35 = vld [vmem:[#allocation652_spill] sm:$0xff] }
0x10e3   :  { %v6672_v39 = vadd.f32 %v17545_v50, %v6399_v58  ;;  %v6675_v1 = vadd.f32 %v17548_v28, %v6402_v54  ;;  %v6674_v34 = vadd.f32 %v17549_v45, %v6401_v30  ;;  %v6677_v53 = vadd.f32 %v17550_v0, %v6404_v46  ;;  %v17554_v58 = vld [vmem:[#allocation651_spill] sm:$0xff]  ;;  %v17557_v25 = vld [vmem:[#allocation653_spill] sm:$0xff]  ;;  %v17558_v59 = vld [vmem:[#allocation656_spill] sm:$0xff] }
0x10e4   :  { %v6676_v20 = vadd.f32 %v17551_v26, %v6403_v8  ;;  %v6679_v38 = vadd.f32 %v17552_v37, %v15139_v24  ;;  %v6678_v11 = vadd.f32 %v17553_v60, %v15141_v47  ;;  %v6681_v62 = vadd.f32 %v17554_v58, %v15143_v13  ;;  %v17559_v36 = vld [vmem:[#allocation655_spill] sm:$0xff]  ;;  %v17560_v3 = vld [vmem:[#allocation658_spill] sm:$0xff]  ;;  %v17561_v24 = vld [vmem:[#allocation657_spill] sm:$0xff]  ;;  %v15227_v13 = vpop.permute.xlu1 %7568  ;;  %v15229_v0 = vpop.permute.xlu0 %7566 }
0x10e5   :  { %v6680_v18 = vadd.f32 %v17555_v35, %v15145_v12  ;;  %v6683_v54 = vadd.f32 %v17556_v9, %v6410_v6  ;;  %v6682_v30 = vadd.f32 %v17557_v25, %v6409_v44  ;;  %v6685_v46 = vadd.f32 %v17558_v59, %v6412_v2  ;;  %v17562_v50 = vld [vmem:[#allocation660_spill] sm:$0xff]  ;;  %v17563_v28 = vld [vmem:[#allocation659_spill] sm:$0xff]  ;;  %17564 = vst [vmem:[#allocation67_spill] sm:$0xff] %v15227_v13  ;;  %v17566_v12 = vld [vmem:[#allocation662_spill] sm:$0xff] }
0x10e6   :  { %v6684_v8 = vadd.f32 %v17559_v36, %v6411_v22  ;;  %v6687_v41 = vadd.f32 %v17560_v3, %v6414_v48  ;;  %v6686_v43 = vadd.f32 %v17561_v24, %v6413_v14  ;;  %v6689_v47 = vadd.f32 %v17562_v50, %v6416_v63  ;;  %17565 = vst [vmem:[#allocation68_spill] sm:$0xff] %v15229_v0  ;;  %v17567_v26 = vld [vmem:[#allocation661_spill] sm:$0xff]  ;;  %v17568_v37 = vld [vmem:[#allocation664_spill] sm:$0xff]  ;;  %v17569_v60 = vld [vmem:[#allocation663_spill] sm:$0xff] }
0x10e7   :  { %v6688_v45 = vadd.f32 %v17563_v28, %v6415_v23  ;;  %v6691_v6 = vadd.f32 %v17566_v12, %v6418_v7  ;;  %v6690_v44 = vadd.f32 %v17567_v26, %v6417_v16  ;;  %v6693_v2 = vadd.f32 %v17568_v37, %v6420_v27  ;;  %v17570_v58 = vld [vmem:[#allocation665_spill] sm:$0xff]  ;;  %v17571_v35 = vld [vmem:[#allocation666_spill] sm:$0xff]  ;;  %v17572_v9 = vld [vmem:[#allocation667_spill] sm:$0xff] }
0x10e8   :  { %v6692_v22 = vadd.f32 %v17569_v60, %v6419_v21  ;;  %v6936_v48 = vadd.f32 %v17570_v58, %v6663_v17  ;;  %v6935_v14 = vadd.f32 %v17571_v35, %v6662_v19  ;;  %v6938_v63 = vadd.f32 %v17572_v9, %v6665_v57  ;;  %v17573_v25 = vld [vmem:[#allocation668_spill] sm:$0xff]  ;;  %v17574_v59 = vld [vmem:[#allocation669_spill] sm:$0xff]  ;;  %v17575_v3 = vld [vmem:[#allocation670_spill] sm:$0xff] }
0x10e9   :  { %v6937_v23 = vadd.f32 %v17573_v25, %v6664_v42  ;;  %v6940_v36 = vadd.f32 %v17574_v59, %v6667_v40  ;;  %v6939_v24 = vadd.f32 %v17575_v3, %v6666_v55  ;;  %v17576_v50 = vld [vmem:[#allocation671_spill] sm:$0xff]  ;;  %v17577_v28 = vld [vmem:[#allocation672_spill] sm:$0xff]  ;;  %v17578_v12 = vld [vmem:[#allocation673_spill] sm:$0xff]  ;;  %v15255_v42 = vpop.permute.xlu1 %7572  ;;  %v15257_v40 = vpop.permute.xlu0 %7570 }
0x10ea   :  { %v6942_v7 = vadd.f32 %v17576_v50, %v6669_v51  ;;  %v6941_v16 = vadd.f32 %v17577_v28, %v6668_v52  ;;  %v15244_v27 = vadd.f32 %v17578_v12, %v6671_v33  ;;  %v17579_v21 = vld [vmem:[#allocation674_spill] sm:$0xff]  ;;  %v17580_v17 = vld [vmem:[#allocation675_spill] sm:$0xff]  ;;  %v17581_v57 = vld [vmem:[#allocation676_spill] sm:$0xff]  ;;  %17582 = vst [vmem:[#allocation69_spill] sm:$0xff] %v15255_v42 }
0x10eb   :  { %v15247_v26 = vadd.f32 %v17579_v21, %v6670_v15  ;;  %v15250_v19 = vadd.f32 %v17580_v17, %v6673_v10  ;;  %v15253_v37 = vadd.f32 %v17581_v57, %v6672_v39  ;;  %17583 = vst [vmem:[#allocation70_spill] sm:$0xff] %v15257_v40  ;;  %v17584_v55 = vld [vmem:[#allocation677_spill] sm:$0xff]  ;;  %v17585_v52 = vld [vmem:[#allocation678_spill] sm:$0xff]  ;;  %v17586_v33 = vld [vmem:[#allocation679_spill] sm:$0xff] }
0x10ec   :  { %v15260_v51 = vadd.f32 %v17584_v55, %v6675_v1  ;;  %v15263_v60 = vadd.f32 %v17585_v52, %v6674_v34  ;;  %v15266_v58 = vadd.f32 %v17586_v33, %v6677_v53  ;;  %v17587_v15 = vld [vmem:[#allocation680_spill] sm:$0xff]  ;;  %v17588_v10 = vld [vmem:[#allocation681_spill] sm:$0xff]  ;;  %v17589_v39 = vld [vmem:[#allocation682_spill] sm:$0xff] }
0x10ed   :  { %v15269_v35 = vadd.f32 %v17587_v15, %v6676_v20  ;;  %v6952_v9 = vadd.f32 %v17588_v10, %v6679_v38  ;;  %v6951_v25 = vadd.f32 %v17589_v39, %v6678_v11  ;;  %v17590_v59 = vld [vmem:[#allocation683_spill] sm:$0xff]  ;;  %v17591_v50 = vld [vmem:[#allocation684_spill] sm:$0xff]  ;;  %v17592_v12 = vld [vmem:[#allocation685_spill] sm:$0xff] }
0x10ee   :  { %v6954_v3 = vadd.f32 %v17590_v59, %v6681_v62  ;;  %v6953_v28 = vadd.f32 %v17591_v50, %v6680_v18  ;;  %v6956_v1 = vadd.f32 %v17592_v12, %v6683_v54  ;;  %v17593_v21 = vld [vmem:[#allocation686_spill] sm:$0xff]  ;;  %v17594_v34 = vld [vmem:[#allocation687_spill] sm:$0xff]  ;;  %v17595_v55 = vld [vmem:[#allocation688_spill] sm:$0xff]  ;;  %v15291_v18 = vpop.permute.xlu1 %7576  ;;  %v15293_v54 = vpop.permute.xlu0 %7574 }
0x10ef   :  { %v6955_v17 = vadd.f32 %v17593_v21, %v6682_v30  ;;  %v6958_v57 = vadd.f32 %v17594_v34, %v6685_v46  ;;  %v6957_v53 = vadd.f32 %v17595_v55, %v6684_v8  ;;  %v17596_v52 = vld [vmem:[#allocation689_spill] sm:$0xff]  ;;  %v17597_v20 = vld [vmem:[#allocation690_spill] sm:$0xff]  ;;  %v17598_v38 = vld [vmem:[#allocation691_spill] sm:$0xff]  ;;  %17600 = vst [vmem:[#allocation71_spill] sm:$0xff] %v15291_v18 }
0x10f0   :  { %v15280_v33 = vadd.f32 %v17596_v52, %v6687_v41  ;;  %v15283_v15 = vadd.f32 %v17597_v20, %v6686_v43  ;;  %v15286_v11 = vadd.f32 %v17598_v38, %v6689_v47  ;;  %v17599_v62 = vld [vmem:[#allocation692_spill] sm:$0xff]  ;;  %17601 = vst [vmem:[#allocation72_spill] sm:$0xff] %v15293_v54  ;;  %v17602_v30 = vld [vmem:[#allocation693_spill] sm:$0xff]  ;;  %v17603_v8 = vld [vmem:[#allocation694_spill] sm:$0xff] }
0x10f1   :  { %v15289_v10 = vadd.f32 %v17599_v62, %v6688_v45  ;;  %v15296_v46 = vadd.f32 %v17602_v30, %v6691_v6  ;;  %v15299_v39 = vadd.f32 %v17603_v8, %v6690_v44  ;;  %v17605_v41 = vld [vmem:[#allocation695_spill] sm:$0xff]  ;;  %v17607_v43 = vld [vmem:[#allocation696_spill] sm:$0xff]  ;;  %v17609_v45 = vld [vmem:[#allocation698_spill] sm:$0xff] }
0x10f2   :  { %v15302_v59 = vadd.f32 %v17605_v41, %v6693_v2  ;;  %v15305_v50 = vadd.f32 %v17607_v43, %v6692_v22  ;;  %v9214_v47 = vld [vmem:[%s16010_s2 + $0x51] sm:$0xff]  ;;  %v9215_v6 = vld [vmem:[%s16010_s2 + $0x49] sm:$0xff]  ;;  %v17610_v44 = vld [vmem:[#allocation697_spill] sm:$0xff]  ;;  %v15331_v40 = vpop.permute.xlu1 %7580  ;;  %v15333_v42 = vpop.permute.xlu0 %7578 }
0x10f3   :  { %17604 = vst [vmem:[#allocation73_spill] sm:$0xff] %v15299_v39  ;;  %v7053_v12 = vmul.f32 %v9214_v47, %v17609_v45  ;;  %v7052_v21 = vmul.f32 %v9215_v6, %v17609_v45  ;;  %v7055_v34 = vmul.f32 %v9214_v47, %v17610_v44  ;;  %v7054_v2 = vmul.f32 %v9215_v6, %v17610_v44  ;;  %v9216_v22 = vld [vmem:[%s16010_s2 + $0xb1] sm:$0xff]  ;;  %v9217_v52 = vld [vmem:[%s16010_s2 + $0xa9] sm:$0xff] }
0x10f4   :  { %17606 = vst [vmem:[#allocation74_spill] sm:$0xff] %v15302_v59  ;;  %17608 = vst [vmem:[#allocation75_spill] sm:$0xff] %v15305_v50  ;;  %v7069_v55 = vmul.f32 %v9216_v22, %v17609_v45  ;;  %v7068_v20 = vmul.f32 %v9217_v52, %v17609_v45  ;;  %v7071_v38 = vmul.f32 %v9216_v22, %v17610_v44  ;;  %v17611_v30 = vld [vmem:[#allocation700_spill] sm:$0xff]  ;;  %v17612_v43 = vld [vmem:[#allocation699_spill] sm:$0xff] }
0x10f5   :  { %v7070_v62 = vmul.f32 %v9217_v52, %v17610_v44  ;;  %v7057_v8 = vmul.f32 %v9214_v47, %v17611_v30  ;;  %v7056_v41 = vmul.f32 %v9215_v6, %v17611_v30  ;;  %v7059_v54 = vmul.f32 %v9214_v47, %v17612_v43  ;;  %17613 = vst [vmem:[#allocation76_spill] sm:$0xff] %v15331_v40 }
0x10f6   :  { %v7058_v18 = vmul.f32 %v9215_v6, %v17612_v43  ;;  %17614 = vst [vmem:[#allocation78_spill] sm:$0xff] %v15333_v42  ;;  %v7073_v0 = vmul.f32 %v9216_v22, %v17611_v30  ;;  %v7072_v45 = vmul.f32 %v9217_v52, %v17611_v30  ;;  %v7075_v13 = vmul.f32 %v9216_v22, %v17612_v43  ;;  %v15347_v59 = vpop.permute.xlu1 %7584  ;;  %v15349_v39 = vpop.permute.xlu0 %7582 }
0x10f7   :  { %v7074_v44 = vmul.f32 %v9217_v52, %v17612_v43  ;;  %v7085_v61 = vadd.f32 %v7053_v12, %v6936_v48  ;;  %v7084_v56 = vadd.f32 %v7052_v21, %v6935_v14  ;;  %v7087_v5 = vadd.f32 %v7055_v34, %v6938_v63 }
0x10f8   :  { %v7086_v4 = vadd.f32 %v7054_v2, %v6937_v23  ;;  %v15339_v31 = vadd.f32 %v7069_v55, %v6952_v9  ;;  %v15341_v49 = vadd.f32 %v7068_v20, %v6951_v25  ;;  %v15343_v32 = vadd.f32 %v7071_v38, %v6954_v3  ;;  %v17615_v9 = vld [vmem:[#allocation702_spill] sm:$0xff] }
0x10f9   :  { %v15345_v40 = vadd.f32 %v7070_v62, %v6953_v28  ;;  %v7089_v42 = vadd.f32 %v7057_v8, %v6940_v36  ;;  %v7088_v29 = vadd.f32 %v7056_v41, %v6939_v24  ;;  %v7091_v50 = vadd.f32 %v7059_v54, %v6942_v7  ;;  %v17616_v36 = vld [vmem:[#allocation701_spill] sm:$0xff] }
0x10fa   :  { %v7090_v30 = vadd.f32 %v7058_v18, %v6941_v16  ;;  %v15351_v48 = vadd.f32 %v7073_v0, %v6956_v1  ;;  %v15353_v14 = vadd.f32 %v7072_v45, %v6955_v17  ;;  %v15355_v63 = vadd.f32 %v7075_v13, %v6958_v57  ;;  %v17617_v13 = vld [vmem:[#allocation704_spill] sm:$0xff]  ;;  %v15371_v12 = vpop.permute.xlu1 %7588  ;;  %v15373_v21 = vpop.permute.xlu0 %7586 }
0x10fb   :  { %v15357_v23 = vadd.f32 %v7074_v44, %v6957_v53  ;;  %v7061_v25 = vmul.f32 %v9214_v47, %v17615_v9  ;;  %v7060_v3 = vmul.f32 %v9215_v6, %v17615_v9  ;;  %v7063_v24 = vmul.f32 %v9214_v47, %v17616_v36  ;;  %v17618_v53 = vld [vmem:[#allocation703_spill] sm:$0xff] }
0x10fc   :  { %v7062_v7 = vmul.f32 %v9215_v6, %v17616_v36  ;;  %v7077_v16 = vmul.f32 %v9216_v22, %v17615_v9  ;;  %v7076_v28 = vmul.f32 %v9217_v52, %v17615_v9  ;;  %v7079_v0 = vmul.f32 %v9216_v22, %v17616_v36  ;;  %v17620_v9 = vld [vmem:[#allocation74_spill] sm:$0xff] }
0x10fd   :  { %v7078_v1 = vmul.f32 %v9217_v52, %v17616_v36  ;;  %v7065_v17 = vmul.f32 %v9214_v47, %v17617_v13  ;;  %v7064_v57 = vmul.f32 %v9215_v6, %v17617_v13  ;;  %v7067_v18 = vmul.f32 %v9214_v47, %v17618_v53  ;;  %v17623_v36 = vld [vmem:[#allocation11_spill] sm:$0xff] }
0x10fe   :  { %v7066_v54 = vmul.f32 %v9215_v6, %v17618_v53  ;;  %v7081_v34 = vmul.f32 %v9216_v22, %v17617_v13  ;;  %v7080_v2 = vmul.f32 %v9217_v52, %v17617_v13  ;;  %v7083_v55 = vmul.f32 %v9216_v22, %v17618_v53  ;;  %v15391_v44 = vpop.permute.xlu1 %7592  ;;  %v17628_v13 = vld [vmem:[#allocation49_spill] sm:$0xff] }
0x10ff   :  { %v7082_v20 = vmul.f32 %v9217_v52, %v17618_v53  ;;  %v7093_v38 = vadd.f32 %v7061_v25, %v15244_v27  ;;  %v7092_v62 = vadd.f32 %v7060_v3, %v15247_v26  ;;  %v7095_v47 = vadd.f32 %v7063_v24, %v15250_v19  ;;  %v15393_v19 = vpop.permute.xlu0 %7590  ;;  %v17621_v25 = vld [vmem:[#allocation75_spill] sm:$0xff]  ;;  %v17622_v3 = vld [vmem:[#allocation10_spill] sm:$0xff]  ;;  %v17624_v24 = vld [vmem:[#allocation12_spill] sm:$0xff] }
0x1100   :  { %v7094_v6 = vadd.f32 %v7062_v7, %v15253_v37  ;;  %v7109_v8 = vadd.f32 %v7077_v16, %v15280_v33  ;;  %v7108_v41 = vadd.f32 %v7076_v28, %v15283_v15  ;;  %v7111_v43 = vadd.f32 %v7079_v0, %v15286_v11  ;;  %v17619_v33 = vld [vmem:[#allocation73_spill] sm:$0xff]  ;;  %v17626_v16 = vld [vmem:[#allocation14_spill] sm:$0xff]  ;;  %v17627_v0 = vld [vmem:[#allocation15_spill] sm:$0xff] }
0x1101   :  { %v7110_v45 = vadd.f32 %v7078_v1, %v15289_v10  ;;  %v7097_v22 = vadd.f32 %v7065_v17, %v15260_v51  ;;  %v7096_v52 = vadd.f32 %v7064_v57, %v15263_v60  ;;  %v7099_v27 = vadd.f32 %v7067_v18, %v15266_v58  ;;  %v17625_v7 = vld [vmem:[#allocation13_spill] sm:$0xff]  ;;  %v17629_v17 = vld [vmem:[#allocation50_spill] sm:$0xff]  ;;  %v17630_v53 = vld [vmem:[#allocation16_spill] sm:$0xff] }
0x1102   :  { %v7098_v26 = vadd.f32 %v7066_v54, %v15269_v35  ;;  %v7113_v37 = vadd.f32 %v7081_v34, %v15296_v46  ;;  %v7112_v15 = vadd.f32 %v7080_v2, %v17619_v33  ;;  %v7115_v11 = vadd.f32 %v7083_v55, %v17620_v9  ;;  %v17631_v54 = vld [vmem:[#allocation17_spill] sm:$0xff]  ;;  %v17632_v2 = vld [vmem:[#allocation18_spill] sm:$0xff]  ;;  %v17633_v55 = vld [vmem:[#allocation19_spill] sm:$0xff] }
0x1103   :  { %v7114_v10 = vadd.f32 %v7082_v20, %v17621_v25  ;;  %v7358_v51 = vadd.f32 %v17622_v3, %v7085_v61  ;;  %v7357_v60 = vadd.f32 %v17623_v36, %v7084_v56  ;;  %v7360_v58 = vadd.f32 %v17624_v24, %v7087_v5  ;;  %v7597_v20 = vpop.permute.xlu1 %7596  ;;  %v7595_v5 = vpop.permute.xlu0 %7594  ;;  %v17634_v33 = vld [vmem:[#allocation20_spill] sm:$0xff]  ;;  %v17635_v9 = vld [vmem:[#allocation21_spill] sm:$0xff]  ;;  %v17638_v36 = vld [vmem:[#allocation26_spill] sm:$0xff] }
0x1104   :  { %v7359_v35 = vadd.f32 %v17625_v7, %v7086_v4  ;;  %v7362_v28 = vadd.f32 %v17626_v16, %v7089_v42  ;;  %v7361_v1 = vadd.f32 %v17627_v0, %v7088_v29  ;;  %v7388_v46 = vadd.f32 %v17628_v13, %v7115_v11  ;;  %v17636_v11 = vld [vmem:[#allocation22_spill] sm:$0xff]  ;;  %v17637_v3 = vld [vmem:[#allocation705_spill] sm:$0xff]  ;;  %v17639_v24 = vld [vmem:[#allocation27_spill] sm:$0xff] }
0x1105   :  { %v7387_v57 = vadd.f32 %v17629_v17, %v7114_v10  ;;  %v7364_v18 = vadd.f32 %v17630_v53, %v7091_v50  ;;  %v7363_v34 = vadd.f32 %v17631_v54, %v7090_v30  ;;  %v7366_v61 = vadd.f32 %v17632_v2, %v7093_v38  ;;  %v17641_v16 = vld [vmem:[#allocation29_spill] sm:$0xff]  ;;  %v17643_v13 = vld [vmem:[#allocation31_spill] sm:$0xff]  ;;  %v17648_v54 = vld [vmem:[#allocation36_spill] sm:$0xff] }
0x1106   :  { %v7365_v56 = vadd.f32 %v17633_v55, %v7092_v62  ;;  %v7368_v4 = vadd.f32 %v17634_v33, %v7095_v47  ;;  %v7367_v42 = vadd.f32 %v17635_v9, %v7094_v6  ;;  %v15413_v25 = vadd.f32 %v7597_v20, %v7388_v46  ;;  %v17640_v62 = vld [vmem:[#allocation28_spill] sm:$0xff]  ;;  %v17642_v6 = vld [vmem:[#allocation30_spill] sm:$0xff]  ;;  %v17652_v33 = vld [vmem:[#allocation43_spill] sm:$0xff] }
0x1107   :  { %v15415_v29 = vadd.f32 %v7595_v5, %v7387_v57  ;;  %v7370_v10 = vadd.f32 %v17636_v11, %v7097_v22  ;;  %v7369_v50 = vadd.f32 %v17637_v3, %v7096_v52  ;;  %v7372_v30 = vadd.f32 %v17638_v36, %v7099_v27  ;;  %v17644_v22 = vld [vmem:[#allocation33_spill] sm:$0xff]  ;;  %v17645_v52 = vld [vmem:[#allocation32_spill] sm:$0xff]  ;;  %v17649_v2 = vld [vmem:[#allocation706_spill] sm:$0xff] }
0x1108   :  { %v7371_v38 = vadd.f32 %v17639_v24, %v7098_v26  ;;  %v7374_v7 = vadd.f32 %v17640_v62, %v15339_v31  ;;  %v7373_v47 = vadd.f32 %v17641_v16, %v15341_v49  ;;  %v7376_v0 = vadd.f32 %v17642_v6, %v15343_v32  ;;  %v17646_v26 = vld [vmem:[#allocation35_spill] sm:$0xff]  ;;  %v17647_v31 = vld [vmem:[#allocation34_spill] sm:$0xff]  ;;  %v17650_v32 = vld [vmem:[#allocation41_spill] sm:$0xff] }
0x1109   :  { %v7375_v46 = vadd.f32 %v17643_v13, %v15345_v40  ;;  %v7378_v17 = vadd.f32 %v17644_v22, %v15351_v48  ;;  %v7377_v27 = vadd.f32 %v17645_v52, %v15353_v14  ;;  %v7380_v57 = vadd.f32 %v17646_v26, %v15355_v63  ;;  %v17651_v5 = vld [vmem:[#allocation40_spill] sm:$0xff]  ;;  %v17653_v48 = vld [vmem:[#allocation42_spill] sm:$0xff]  ;;  %v17657_v16 = vld [vmem:[#allocation51_spill] sm:$0xff] }
0x110a   :  { %v7379_v53 = vadd.f32 %v17647_v31, %v15357_v23  ;;  %v7382_v49 = vadd.f32 %v17648_v54, %v7109_v8  ;;  %v7381_v55 = vadd.f32 %v17649_v2, %v7108_v41  ;;  %v7384_v20 = vadd.f32 %v17650_v32, %v7111_v43  ;;  %v17654_v3 = vld [vmem:[#allocation48_spill] sm:$0xff]  ;;  %v17658_v6 = vld [vmem:[#allocation711_spill] sm:$0xff]  ;;  %v17659_v13 = vld [vmem:[#allocation54_spill] sm:$0xff] }
0x110b   :  { %v7383_v40 = vadd.f32 %v17651_v5, %v7110_v45  ;;  %v7386_v9 = vadd.f32 %v17652_v33, %v7113_v37  ;;  %v7385_v11 = vadd.f32 %v17653_v48, %v7112_v15  ;;  %v7631_v14 = vadd.f32 %v17654_v3, %v7358_v51  ;;  %v17655_v36 = vld [vmem:[#allocation52_spill] sm:$0xff]  ;;  %v17660_v22 = vld [vmem:[#allocation57_spill] sm:$0xff]  ;;  %v17661_v52 = vld [vmem:[#allocation58_spill] sm:$0xff] }
0x110c   :  { %v7630_v24 = vadd.f32 %v17655_v36, %v7357_v60  ;;  %v17656_v63 = vld [vmem:[#allocation708_spill] sm:$0xff]  ;;  %v7632_v23 = vadd.f32 %v17657_v16, %v7359_v35  ;;  %v7635_v8 = vadd.f32 %v17658_v6, %v7362_v28  ;;  %v7634_v41 = vadd.f32 %v17659_v13, %v7361_v1  ;;  %v17662_v26 = vld [vmem:[#allocation59_spill] sm:$0xff]  ;;  %v17664_v51 = vld [vmem:[#allocation61_spill] sm:$0xff] }
0x110d   :  { %v7633_v62 = vadd.f32 %v17656_v63, %v7360_v58  ;;  %v7637_v43 = vadd.f32 %v17660_v22, %v7364_v18  ;;  %v7636_v45 = vadd.f32 %v17661_v52, %v7363_v34  ;;  %v15452_v37 = vadd.f32 %v17662_v26, %v7366_v61  ;;  %v17663_v15 = vld [vmem:[#allocation60_spill] sm:$0xff]  ;;  %v17665_v58 = vld [vmem:[#allocation62_spill] sm:$0xff]  ;;  %v17666_v35 = vld [vmem:[#allocation63_spill] sm:$0xff] }
0x110e   :  { %v15455_v31 = vadd.f32 %v17663_v15, %v7365_v56  ;;  %v15458_v60 = vadd.f32 %v17664_v51, %v7368_v4  ;;  %v15461_v54 = vadd.f32 %v17665_v58, %v7367_v42  ;;  %v15464_v28 = vadd.f32 %v17666_v35, %v7370_v10  ;;  %v17667_v1 = vld [vmem:[#allocation64_spill] sm:$0xff]  ;;  %v17668_v18 = vld [vmem:[#allocation65_spill] sm:$0xff]  ;;  %v17669_v61 = vld [vmem:[#allocation66_spill] sm:$0xff] }
0x110f   :  { %v15467_v2 = vadd.f32 %v17667_v1, %v7369_v50  ;;  %v15470_v34 = vadd.f32 %v17668_v18, %v7372_v30  ;;  %v15473_v32 = vadd.f32 %v17669_v61, %v7371_v38  ;;  %v17670_v56 = vld [vmem:[#allocation67_spill] sm:$0xff]  ;;  %v17671_v33 = vld [vmem:[#allocation68_spill] sm:$0xff]  ;;  %v17672_v48 = vld [vmem:[#allocation69_spill] sm:$0xff]  ;;  %v7657_v22 = vadd.f32 %v15371_v12, %v7384_v20 }
0x1110   :  { %v7647_v5 = vadd.f32 %v17670_v56, %v7374_v7  ;;  %v7646_v4 = vadd.f32 %v17671_v33, %v7373_v47  ;;  %v7649_v3 = vadd.f32 %v17672_v48, %v7376_v0  ;;  %v17673_v42 = vld [vmem:[#allocation70_spill] sm:$0xff]  ;;  %v17674_v63 = vld [vmem:[#allocation71_spill] sm:$0xff]  ;;  %v17675_v16 = vld [vmem:[#allocation72_spill] sm:$0xff] }
0x1111   :  { %v7648_v36 = vadd.f32 %v17673_v42, %v7375_v46  ;;  %v7651_v10 = vadd.f32 %v17674_v63, %v7378_v17  ;;  %v7650_v6 = vadd.f32 %v17675_v16, %v7377_v27  ;;  %v15484_v50 = vld [vmem:[%s16010_s2 + $0x4a] sm:$0xff]  ;;  %v15489_v30 = vld [vmem:[%s16010_s2 + $0x52] sm:$0xff]  ;;  %v7655_v46 = vadd.f32 %v15347_v59, %v7382_v49  ;;  %v7717_v49 = vpop.permute.xlu0 %7716 }
0x1112   :  { %v17676_v38 = vld [vmem:[#allocation76_spill] sm:$0xff]  ;;  %v17677_v47 = vld [vmem:[#allocation78_spill] sm:$0xff]  ;;  %v7654_v17 = vadd.f32 %v15349_v39, %v7381_v55  ;;  %v15511_v59 = vadd.f32 %v15393_v19, %v7385_v11  ;;  %v7721_v39 = vpop.permute.xlu1 %7720  ;;  %v7748_v55 = vmul.f32 %v15489_v30, %v7717_v49  ;;  %v7747_v52 = vmul.f32 %v15484_v50, %v7717_v49 }
0x1113   :  { %v7653_v7 = vadd.f32 %v17676_v38, %v7380_v57  ;;  %v7652_v0 = vadd.f32 %v17677_v47, %v7379_v53  ;;  %v15498_v27 = vld [vmem:[%s16010_s2 + $0xaa] sm:$0xff]  ;;  %v15503_v13 = vld [vmem:[%s16010_s2 + $0xb2] sm:$0xff]  ;;  %v7656_v57 = vadd.f32 %v15373_v21, %v7383_v40  ;;  %v15508_v53 = vadd.f32 %v15391_v44, %v7386_v9 }
0x1114   :  { %v7750_v26 = vmul.f32 %v15489_v30, %v7721_v39  ;;  %v7749_v15 = vmul.f32 %v15484_v50, %v7721_v39  ;;  %v7764_v12 = vmul.f32 %v15503_v13, %v7717_v49  ;;  %v7763_v21 = vmul.f32 %v15498_v27, %v7717_v49 }
0x1115   :  { %v7766_v44 = vmul.f32 %v15503_v13, %v7721_v39  ;;  %v7765_v20 = vmul.f32 %v15498_v27, %v7721_v39  ;;  %v15521_v19 = vadd.f32 %v7748_v55, %v7631_v14  ;;  %v15523_v40 = vadd.f32 %v7747_v52, %v7630_v24  ;;  %v7725_v58 = vpop.permute.xlu0 %7724 }
0x1116   :  { %v15525_v9 = vadd.f32 %v7750_v26, %v7633_v62  ;;  %v15527_v11 = vadd.f32 %v7749_v15, %v7632_v23  ;;  %v7729_v51 = vpop.permute.xlu1 %7728  ;;  %v15529_v35 = vadd.f32 %v7764_v12, %v7647_v5  ;;  %v15531_v1 = vadd.f32 %v7763_v21, %v7646_v4 }
0x1117   :  { %v15533_v18 = vadd.f32 %v7766_v44, %v7649_v3  ;;  %v15535_v61 = vadd.f32 %v7765_v20, %v7648_v36  ;;  %v7752_v56 = vmul.f32 %v15489_v30, %v7725_v58  ;;  %v7751_v14 = vmul.f32 %v15484_v50, %v7725_v58 }
0x1118   :  { %v7754_v24 = vmul.f32 %v15489_v30, %v7729_v51  ;;  %v7753_v62 = vmul.f32 %v15484_v50, %v7729_v51  ;;  %v7768_v23 = vmul.f32 %v15503_v13, %v7725_v58  ;;  %v7767_v33 = vmul.f32 %v15498_v27, %v7725_v58 }
0x1119   :  { %v7770_v5 = vmul.f32 %v15503_v13, %v7729_v51  ;;  %v7769_v4 = vmul.f32 %v15498_v27, %v7729_v51  ;;  %v15545_v48 = vadd.f32 %v7752_v56, %v7635_v8  ;;  %v15547_v3 = vadd.f32 %v7751_v14, %v7634_v41  ;;  %v7733_v16 = vpop.permute.xlu0 %7732 }
0x111a   :  { %v15549_v42 = vadd.f32 %v7754_v24, %v7637_v43  ;;  %v15551_v36 = vadd.f32 %v7753_v62, %v7636_v45  ;;  %v7737_v63 = vpop.permute.xlu1 %7736  ;;  %v15553_v38 = vadd.f32 %v7768_v23, %v7651_v10  ;;  %v15555_v47 = vadd.f32 %v7767_v33, %v7650_v6 }
0x111b   :  { %v15557_v39 = vadd.f32 %v7770_v5, %v7653_v7  ;;  %v15559_v49 = vadd.f32 %v7769_v4, %v7652_v0  ;;  %v7756_v55 = vmul.f32 %v15489_v30, %v7733_v16  ;;  %v7755_v8 = vmul.f32 %v15484_v50, %v7733_v16 }
0x111c   :  { %v7758_v41 = vmul.f32 %v15489_v30, %v7737_v63  ;;  %v7757_v43 = vmul.f32 %v15484_v50, %v7737_v63  ;;  %v7772_v45 = vmul.f32 %v15503_v13, %v7733_v16  ;;  %v7771_v52 = vmul.f32 %v15498_v27, %v7733_v16 }
0x111d   :  { %v7774_v10 = vmul.f32 %v15503_v13, %v7737_v63  ;;  %v7773_v6 = vmul.f32 %v15498_v27, %v7737_v63  ;;  %v15570_v7 = vadd.f32 %v7756_v55, %v15452_v37  ;;  %v15573_v0 = vadd.f32 %v7755_v8, %v15455_v31  ;;  %v7741_v21 = vpop.permute.xlu0 %7740 }
0x111e   :  { %v15576_v26 = vadd.f32 %v7758_v41, %v15458_v60  ;;  %v15579_v15 = vadd.f32 %v7757_v43, %v15461_v54  ;;  %v7745_v12 = vpop.permute.xlu1 %7744  ;;  %v15581_v44 = vadd.f32 %v7772_v45, %v7655_v46  ;;  %v15583_v20 = vadd.f32 %v7771_v52, %v7654_v17 }
0x111f   :  { %v15585_v51 = vadd.f32 %v7774_v10, %v7657_v22  ;;  %v15587_v58 = vadd.f32 %v7773_v6, %v7656_v57  ;;  %v7760_v37 = vmul.f32 %v15489_v30, %v7741_v21  ;;  %v7759_v31 = vmul.f32 %v15484_v50, %v7741_v21 }
0x1120   :  { %v7762_v60 = vmul.f32 %v15489_v30, %v7745_v12  ;;  %v7761_v56 = vmul.f32 %v15484_v50, %v7745_v12  ;;  %v7776_v54 = vmul.f32 %v15503_v13, %v7741_v21  ;;  %v7775_v14 = vmul.f32 %v15498_v27, %v7741_v21 }
0x1121   :  { %v7777_v46 = vmul.f32 %v15498_v27, %v7745_v12  ;;  %v7778_v17 = vmul.f32 %v15503_v13, %v7745_v12  ;;  %v15598_v22 = vadd.f32 %v7760_v37, %v15464_v28  ;;  %v15601_v57 = vadd.f32 %v7759_v31, %v15467_v2  ;;  %v7862_v23 = vpop.permute.xlu0 %7861 }
0x1122   :  { %v15604_v24 = vadd.f32 %v7762_v60, %v15470_v34  ;;  %v15607_v62 = vadd.f32 %v7761_v56, %v15473_v32  ;;  %v15610_v33 = vadd.f32 %v7776_v54, %v15508_v53  ;;  %v15613_v5 = vadd.f32 %v7775_v14, %v15511_v59  ;;  %v7866_v63 = vpop.permute.xlu1 %7865 }
0x1123   :  { %v15616_v4 = vadd.f32 %v7777_v46, %v15415_v29  ;;  %v15619_v28 = vadd.f32 %v7778_v17, %v15413_v25  ;;  %v7892_v2 = vmul.f32 %v15484_v50, %v7862_v23  ;;  %v7893_v34 = vmul.f32 %v15489_v30, %v7862_v23 }
0x1124   :  { %v7894_v32 = vmul.f32 %v15484_v50, %v7866_v63  ;;  %v7895_v53 = vmul.f32 %v15489_v30, %v7866_v63  ;;  %v7908_v54 = vmul.f32 %v15498_v27, %v7862_v23  ;;  %v7909_v14 = vmul.f32 %v15503_v13, %v7862_v23 }
0x1125   :  { %7958 = vrot.lane.b32.xlu1 %v7893_v34, %s9241_s10  ;;  %7956 = vrot.lane.b32.xlu0 %v7892_v2, %s9241_s10  ;;  %v7870_v59 = vpop.permute.xlu0 %7869  ;;  %v7910_v46 = vmul.f32 %v15498_v27, %v7866_v63  ;;  %v7911_v17 = vmul.f32 %v15503_v13, %v7866_v63 }
0x1126   :  { %v7896_v25 = vmul.f32 %v15484_v50, %v7870_v59  ;;  %v7897_v29 = vmul.f32 %v15489_v30, %v7870_v59  ;;  %v7874_v16 = vpop.permute.xlu1 %7873  ;;  %v7912_v2 = vmul.f32 %v15498_v27, %v7870_v59  ;;  %v7913_v34 = vmul.f32 %v15503_v13, %v7870_v59 }
0x1127   :  { %v7898_v55 = vmul.f32 %v15484_v50, %v7874_v16  ;;  %v7899_v8 = vmul.f32 %v15489_v30, %v7874_v16  ;;  %v7914_v23 = vmul.f32 %v15498_v27, %v7874_v16 }
0x1129   :  { %7962 = vrot.lane.b32.xlu1 %v7895_v53, %s9241_s10  ;;  %7960 = vrot.lane.b32.xlu0 %v7894_v32, %s9241_s10  ;;  %v7878_v41 = vpop.permute.xlu0 %7877  ;;  %v7915_v32 = vmul.f32 %v15503_v13, %v7874_v16 }
0x112a   :  { %v7900_v43 = vmul.f32 %v15484_v50, %v7878_v41  ;;  %v7901_v45 = vmul.f32 %v15489_v30, %v7878_v41  ;;  %v7882_v52 = vpop.permute.xlu1 %7881  ;;  %v7916_v63 = vmul.f32 %v15498_v27, %v7878_v41  ;;  %v7917_v53 = vmul.f32 %v15503_v13, %v7878_v41  ;;  %v9148_v41 = vld [vmem:[%s16008_s0 + $0x11a] ss:$0 sm:$0xff] }
0x112b   :  { %v7902_v10 = vmul.f32 %v15484_v50, %v7882_v52  ;;  %v7903_v6 = vmul.f32 %v15489_v30, %v7882_v52  ;;  %v7918_v59 = vmul.f32 %v15498_v27, %v7882_v52 }
0x112d   :  { %7966 = vrot.lane.b32.xlu1 %v7897_v29, %s9241_s10  ;;  %7964 = vrot.lane.b32.xlu0 %v7896_v25, %s9241_s10  ;;  %v7886_v12 = vpop.permute.xlu0 %7885  ;;  %v7919_v25 = vmul.f32 %v15503_v13, %v7882_v52  ;;  %v9149_v52 = vld [vmem:[%s16008_s0 + $0x11b] ss:$0 sm:$0xff] }
0x112e   :  { %v7904_v21 = vmul.f32 %v15484_v50, %v7886_v12  ;;  %v7905_v37 = vmul.f32 %v15489_v30, %v7886_v12  ;;  %v7890_v31 = vpop.permute.xlu1 %7889  ;;  %v7920_v29 = vmul.f32 %v15498_v27, %v7886_v12  ;;  %v7921_v16 = vmul.f32 %v15503_v13, %v7886_v12  ;;  %v9153_v12 = vld [vmem:[%s16008_s0 + $0x11f] ss:$0 sm:$0xff] }
0x112f   :  { %v7906_v60 = vmul.f32 %v15484_v50, %v7890_v31  ;;  %v7907_v56 = vmul.f32 %v15489_v30, %v7890_v31 }
0x1131   :  { %7970 = vrot.lane.b32.xlu1 %v7899_v8, %s9241_s10  ;;  %7968 = vrot.lane.b32.xlu0 %v7898_v55, %s9241_s10  ;;  %v9146_v55 = vld [vmem:[%s16008_s0 + $0x118] ss:$0 sm:$0xff]  ;;  %v7922_v8 = vmul.f32 %v15498_v27, %v7890_v31 }
0x1135   :  { %7974 = vrot.lane.b32.xlu1 %v7901_v45, %s9241_s10  ;;  %7972 = vrot.lane.b32.xlu0 %v7900_v43, %s9241_s10  ;;  %v9147_v43 = vld [vmem:[%s16008_s0 + $0x119] ss:$0 sm:$0xff]  ;;  %v9150_v45 = vld [vmem:[%s16008_s0 + $0x11c] ss:$0 sm:$0xff] }
0x1139   :  { %7978 = vrot.lane.b32.xlu1 %v7903_v6, %s9241_s10  ;;  %7976 = vrot.lane.b32.xlu0 %v7902_v10, %s9241_s10  ;;  %v9152_v10 = vld [vmem:[%s16008_s0 + $0x11e] ss:$0 sm:$0xff]  ;;  %v9151_v6 = vld [vmem:[%s16008_s0 + $0x11d] ss:$0 sm:$0xff] }
0x113d   :  { %7982 = vrot.lane.b32.xlu1 %v7905_v37, %s9241_s10  ;;  %7980 = vrot.lane.b32.xlu0 %v7904_v21, %s9241_s10  ;;  %v7923_v21 = vmul.f32 %v15503_v13, %v7890_v31 }
0x1141   :  { %7986 = vrot.lane.b32.xlu1 %v7907_v56, %s9241_s10  ;;  %7984 = vrot.lane.b32.xlu0 %v7906_v60, %s9241_s10 }
0x1145   :  { %7990 = vrot.lane.b32.xlu1 %v7909_v14, %s9241_s10  ;;  %7988 = vrot.lane.b32.xlu0 %v7908_v54, %s9241_s10 }
0x1149   :  { %7994 = vrot.lane.b32.xlu1 %v7911_v17, %s9241_s10  ;;  %7992 = vrot.lane.b32.xlu0 %v7910_v46, %s9241_s10 }
0x114d   :  { %7998 = vrot.lane.b32.xlu1 %v7913_v34, %s9241_s10  ;;  %7996 = vrot.lane.b32.xlu0 %v7912_v2, %s9241_s10 }
0x1151   :  { %8002 = vrot.lane.b32.xlu1 %v7915_v32, %s9241_s10  ;;  %8000 = vrot.lane.b32.xlu0 %v7914_v23, %s9241_s10 }
0x1155   :  { %8006 = vrot.lane.b32.xlu1 %v7917_v53, %s9241_s10  ;;  %8004 = vrot.lane.b32.xlu0 %v7916_v63, %s9241_s10 }
0x1159   :  { %8010 = vrot.lane.b32.xlu1 %v7919_v25, %s9241_s10  ;;  %8008 = vrot.lane.b32.xlu0 %v7918_v59, %s9241_s10 }
0x115d   :  { %8014 = vrot.lane.b32.xlu1 %v7921_v16, %s9241_s10  ;;  %8012 = vrot.lane.b32.xlu0 %v7920_v29, %s9241_s10 }
0x1161   :  { %8134 = vperm.xlu1 %9169, %v9146_v55   ;;  %8016 = vrot.lane.b32.xlu0 %v7922_v8, %s9241_s10 }
0x1165   :  { %8142 = vperm.xlu1 %9169, %v9148_v41   ;;  %8138 = vperm.xlu0 %9168, %v9147_v43  }
0x1169   :  { %8150 = vperm.xlu1 %9169, %v9150_v45   ;;  %8146 = vperm.xlu0 %9168, %v9149_v52  }
0x116d   :  { %8158 = vperm.xlu1 %9169, %v9152_v10   ;;  %8154 = vperm.xlu0 %9168, %v9151_v6  }
0x1171   :  { %8018 = vrot.lane.b32.xlu1 %v7923_v21, %s9241_s10  ;;  %8162 = vperm.xlu0 %9168, %v9153_v12  }
0x1197   :  { %v7959_v37 = vpop.permute.xlu1 %7958  ;;  %v7957_v60 = vpop.permute.xlu0 %7956 }
0x1198   :  { %v15710_v56 = vadd.f32 %v7959_v37, %v15521_v19  ;;  %v15713_v54 = vadd.f32 %v7957_v60, %v15523_v40 }
0x119b   :  { %v7963_v14 = vpop.permute.xlu1 %7962  ;;  %v7961_v46 = vpop.permute.xlu0 %7960 }
0x119c   :  { %v15716_v17 = vadd.f32 %v7963_v14, %v15525_v9  ;;  %v15719_v2 = vadd.f32 %v7961_v46, %v15527_v11 }
0x119f   :  { %v7967_v31 = vpop.permute.xlu1 %7966  ;;  %v7965_v34 = vpop.permute.xlu0 %7964 }
0x11a0   :  { %v15722_v23 = vadd.f32 %v7967_v31, %v15545_v48  ;;  %v15725_v32 = vadd.f32 %v7965_v34, %v15547_v3 }
0x11a3   :  { %v7971_v19 = vpop.permute.xlu1 %7970  ;;  %v7969_v63 = vpop.permute.xlu0 %7968 }
0x11a4   :  { %v15728_v40 = vadd.f32 %v7971_v19, %v15549_v42  ;;  %v15731_v53 = vadd.f32 %v7969_v63, %v15551_v36 }
0x11a7   :  { %v7975_v9 = vpop.permute.xlu1 %7974  ;;  %v7973_v59 = vpop.permute.xlu0 %7972 }
0x11a8   :  { %v15734_v11 = vadd.f32 %v7975_v9, %v15570_v7  ;;  %v15737_v25 = vadd.f32 %v7973_v59, %v15573_v0 }
0x11ab   :  { %v7979_v48 = vpop.permute.xlu1 %7978  ;;  %v7977_v29 = vpop.permute.xlu0 %7976 }
0x11ac   :  { %v15740_v3 = vadd.f32 %v7979_v48, %v15576_v26  ;;  %v15743_v16 = vadd.f32 %v7977_v29, %v15579_v15 }
0x11af   :  { %v7983_v42 = vpop.permute.xlu1 %7982  ;;  %v7981_v55 = vpop.permute.xlu0 %7980 }
0x11b0   :  { %v15746_v36 = vadd.f32 %v7983_v42, %v15598_v22  ;;  %v15749_v8 = vadd.f32 %v7981_v55, %v15601_v57 }
0x11b3   :  { %v7987_v7 = vpop.permute.xlu1 %7986  ;;  %v7985_v41 = vpop.permute.xlu0 %7984 }
0x11b4   :  { %v15752_v0 = vadd.f32 %v7987_v7, %v15604_v24  ;;  %v15755_v43 = vadd.f32 %v7985_v41, %v15607_v62 }
0x11b7   :  { %v7991_v26 = vpop.permute.xlu1 %7990  ;;  %v7989_v45 = vpop.permute.xlu0 %7988 }
0x11b8   :  { %v15758_v15 = vadd.f32 %v7991_v26, %v15529_v35  ;;  %v15761_v52 = vadd.f32 %v7989_v45, %v15531_v1 }
0x11bb   :  { %v7995_v22 = vpop.permute.xlu1 %7994  ;;  %v7993_v10 = vpop.permute.xlu0 %7992 }
0x11bc   :  { %v15764_v57 = vadd.f32 %v7995_v22, %v15533_v18  ;;  %v15767_v6 = vadd.f32 %v7993_v10, %v15535_v61 }
0x11bf   :  { %v7999_v24 = vpop.permute.xlu1 %7998  ;;  %v7997_v12 = vpop.permute.xlu0 %7996 }
0x11c0   :  { %v15770_v62 = vadd.f32 %v7999_v24, %v15553_v38  ;;  %v15773_v21 = vadd.f32 %v7997_v12, %v15555_v47 }
0x11c3   :  { %v8003_v35 = vpop.permute.xlu1 %8002  ;;  %v8001_v37 = vpop.permute.xlu0 %8000 }
0x11c4   :  { %v15776_v1 = vadd.f32 %v8003_v35, %v15557_v39  ;;  %v15779_v60 = vadd.f32 %v8001_v37, %v15559_v49 }
0x11c7   :  { %v8007_v18 = vpop.permute.xlu1 %8006  ;;  %v8005_v14 = vpop.permute.xlu0 %8004 }
0x11c8   :  { %v15782_v61 = vadd.f32 %v8007_v18, %v15581_v44  ;;  %v15785_v46 = vadd.f32 %v8005_v14, %v15583_v20  ;;  %v9155_v18 = vld [vmem:[%s16009_s1 + $0x1] ss:$0 sm:$0xff]  ;;  %v9154_v14 = vld [vmem:[%s16009_s1] ss:$0 sm:$0xff] }
0x11cb   :  { %v8011_v38 = vpop.permute.xlu1 %8010  ;;  %v8009_v31 = vpop.permute.xlu0 %8008 }
0x11cc   :  { %v15788_v47 = vadd.f32 %v8011_v38, %v15585_v51  ;;  %v15791_v34 = vadd.f32 %v8009_v31, %v15587_v58  ;;  %v9157_v38 = vld [vmem:[%s16009_s1 + $0x3] ss:$0 sm:$0xff]  ;;  %v9156_v31 = vld [vmem:[%s16009_s1 + $0x2] ss:$0 sm:$0xff] }
0x11cf   :  { %v8015_v39 = vpop.permute.xlu1 %8014  ;;  %v8013_v19 = vpop.permute.xlu0 %8012 }
0x11d0   :  { %v15794_v49 = vadd.f32 %v8015_v39, %v15610_v33  ;;  %v15797_v63 = vadd.f32 %v8013_v19, %v15613_v5  ;;  %v9159_v39 = vld [vmem:[%s16009_s1 + $0x5] ss:$0 sm:$0xff]  ;;  %v9158_v19 = vld [vmem:[%s16009_s1 + $0x4] ss:$0 sm:$0xff] }
0x11d3   :  { %v8017_v44 = vpop.permute.xlu0 %8016 }
0x11d4   :  { %v15800_v20 = vadd.f32 %v8017_v44, %v15616_v4  ;;  %v9161_v44 = vld [vmem:[%s16009_s1 + $0x7] ss:$0 sm:$0xff] }
0x11dc   :  { %v8135_v9 = vpop.permute.xlu1 %8134 }
0x11dd   :  { %v8165_v59 = vmul.f32 %v15484_v50, %v8135_v9  ;;  %v8166_v51 = vmul.f32 %v15489_v30, %v8135_v9 }
0x11df   :  { %8231 = vrot.lane.b32.xlu1 %v8166_v51, %s9242_s15  ;;  %8229 = vrot.lane.b32.xlu0 %v8165_v59, %s9242_s15  ;;  %v9160_v59 = vld [vmem:[%s16009_s1 + $0x6] ss:$0 sm:$0xff]  ;;  %s9243_s1 = smov [#allocation2]  }
0x11e0   :  { %v8139_v58 = vpop.permute.xlu0 %8138  ;;  %v8143_v5 = vpop.permute.xlu1 %8142 }
0x11e1   :  { %v8167_v33 = vmul.f32 %v15484_v50, %v8139_v58  ;;  %v8168_v48 = vmul.f32 %v15489_v30, %v8139_v58  ;;  %v8169_v4 = vmul.f32 %v15484_v50, %v8143_v5  ;;  %v8170_v29 = vmul.f32 %v15489_v30, %v8143_v5 }
0x11e3   :  { %8235 = vrot.lane.b32.xlu1 %v8168_v48, %s9242_s15  ;;  %8233 = vrot.lane.b32.xlu0 %v8167_v33, %s9242_s15 }
0x11e4   :  { %v8147_v42 = vpop.permute.xlu0 %8146  ;;  %v8151_v41 = vpop.permute.xlu1 %8150 }
0x11e5   :  { %v8171_v55 = vmul.f32 %v15484_v50, %v8147_v42  ;;  %v8172_v7 = vmul.f32 %v15489_v30, %v8147_v42  ;;  %v8173_v26 = vmul.f32 %v15484_v50, %v8151_v41  ;;  %v8174_v45 = vmul.f32 %v15489_v30, %v8151_v41 }
0x11e7   :  { %8239 = vrot.lane.b32.xlu1 %v8170_v29, %s9242_s15  ;;  %8237 = vrot.lane.b32.xlu0 %v8169_v4, %s9242_s15  ;;  %v8181_v4 = vmul.f32 %v15498_v27, %v8135_v9  ;;  %v8182_v29 = vmul.f32 %v15503_v13, %v8135_v9  ;;  %v8187_v9 = vmul.f32 %v15498_v27, %v8147_v42 }
0x11e8   :  { %v8155_v22 = vpop.permute.xlu0 %8154  ;;  %v8159_v12 = vpop.permute.xlu1 %8158 }
0x11e9   :  { %v8175_v10 = vmul.f32 %v15484_v50, %v8155_v22  ;;  %v8176_v24 = vmul.f32 %v15489_v30, %v8155_v22  ;;  %v8177_v35 = vmul.f32 %v15484_v50, %v8159_v12  ;;  %v8178_v37 = vmul.f32 %v15489_v30, %v8159_v12 }
0x11eb   :  { %8243 = vrot.lane.b32.xlu1 %v8172_v7, %s9242_s15  ;;  %8241 = vrot.lane.b32.xlu0 %v8171_v55, %s9242_s15  ;;  %v8183_v55 = vmul.f32 %v15498_v27, %v8139_v58  ;;  %v8184_v7 = vmul.f32 %v15503_v13, %v8139_v58  ;;  %v8189_v58 = vmul.f32 %v15498_v27, %v8151_v41 }
0x11ec   :  { %v8163_v51 = vpop.permute.xlu0 %8162 }
0x11ed   :  { %v8179_v33 = vmul.f32 %v15484_v50, %v8163_v51  ;;  %v8180_v48 = vmul.f32 %v15489_v30, %v8163_v51  ;;  %v8185_v50 = vmul.f32 %v15498_v27, %v8143_v5  ;;  %v8186_v30 = vmul.f32 %v15503_v13, %v8143_v5 }
0x11ee   :  { %v8191_v5 = vmul.f32 %v15498_v27, %v8155_v22 }
0x11ef   :  { %8247 = vrot.lane.b32.xlu1 %v8174_v45, %s9242_s15  ;;  %8245 = vrot.lane.b32.xlu0 %v8173_v26, %s9242_s15  ;;  %v8188_v26 = vmul.f32 %v15503_v13, %v8147_v42  ;;  %v8190_v45 = vmul.f32 %v15503_v13, %v8151_v41  ;;  %v8193_v42 = vmul.f32 %v15498_v27, %v8159_v12 }
0x11f0   :  { %v8195_v41 = vmul.f32 %v15498_v27, %v8163_v51 }
0x11f3   :  { %8251 = vrot.lane.b32.xlu1 %v8176_v24, %s9242_s15  ;;  %8249 = vrot.lane.b32.xlu0 %v8175_v10, %s9242_s15  ;;  %v8192_v10 = vmul.f32 %v15503_v13, %v8155_v22  ;;  %v8194_v24 = vmul.f32 %v15503_v13, %v8159_v12  ;;  %v15890_v22 = vpop.permute.xlu1 %8018 }
0x11f7   :  { %8255 = vrot.lane.b32.xlu1 %v8178_v37, %s9242_s15  ;;  %8253 = vrot.lane.b32.xlu0 %v8177_v35, %s9242_s15  ;;  %v8196_v35 = vmul.f32 %v15503_v13, %v8163_v51 }
0x11fb   :  { %8410 = vperm.xlu1 %9169, %v9155_v18   ;;  %8406 = vperm.xlu0 %9168, %v9154_v14  }
0x11ff   :  { %8418 = vperm.xlu1 %9169, %v9157_v38   ;;  %8414 = vperm.xlu0 %9168, %v9156_v31  }
0x1203   :  { %8426 = vperm.xlu1 %9169, %v9159_v39   ;;  %8422 = vperm.xlu0 %9168, %v9158_v19  }
0x1207   :  { %8434 = vperm.xlu1 %9169, %v9161_v44   ;;  %8430 = vperm.xlu0 %9168, %v9160_v59  }
0x120b   :  { %8259 = vrot.lane.b32.xlu1 %v8180_v48, %s9242_s15  ;;  %8257 = vrot.lane.b32.xlu0 %v8179_v33, %s9242_s15 }
0x120f   :  { %8263 = vrot.lane.b32.xlu1 %v8182_v29, %s9242_s15  ;;  %8261 = vrot.lane.b32.xlu0 %v8181_v4, %s9242_s15 }
0x1213   :  { %8267 = vrot.lane.b32.xlu1 %v8184_v7, %s9242_s15  ;;  %8265 = vrot.lane.b32.xlu0 %v8183_v55, %s9242_s15 }
0x1217   :  { %8271 = vrot.lane.b32.xlu1 %v8186_v30, %s9242_s15  ;;  %8269 = vrot.lane.b32.xlu0 %v8185_v50, %s9242_s15 }
0x121b   :  { %8275 = vrot.lane.b32.xlu1 %v8188_v26, %s9242_s15  ;;  %8273 = vrot.lane.b32.xlu0 %v8187_v9, %s9242_s15 }
0x121f   :  { %8279 = vrot.lane.b32.xlu1 %v8190_v45, %s9242_s15  ;;  %8277 = vrot.lane.b32.xlu0 %v8189_v58, %s9242_s15 }
0x1223   :  { %8283 = vrot.lane.b32.xlu1 %v8192_v10, %s9242_s15  ;;  %8281 = vrot.lane.b32.xlu0 %v8191_v5, %s9242_s15 }
0x1227   :  { %8287 = vrot.lane.b32.xlu1 %v8194_v24, %s9242_s15  ;;  %8285 = vrot.lane.b32.xlu0 %v8193_v42, %s9242_s15 }
0x122b   :  { %8291 = vrot.lane.b32.xlu1 %v8196_v35, %s9242_s15  ;;  %8289 = vrot.lane.b32.xlu0 %v8195_v41, %s9242_s15  ;;  %s8539_s15 = sshll.u32 %s9243_s1, 4  ;;  %s8540_s15 = int_to_ptr.vmem [resolvable:$true] %s8539_s15 }
0x122c   :  { %s9218_s14 = scalar_lea.vmem %s8540_s15, 4096  ;;  %p9223_p1 = scmp.lt.s32.totalorder %s8540_s15, %s8540_s15 }
0x122d   :  { %p9219_p0 = scmp.ne.s32.totalorder %s8540_s15, %s9218_s14  ;;  %p9224_p2 = scmp.lt.s32.totalorder %s9218_s14, %s9218_s14 }
0x122f   :  { %p9225_p3 = por %p9224_p2, %p9223_p1 }
0x1231   :  { %p9226_p4 = pnand %p9225_p3, %p9219_p0 }
0x1251   :  { %v8232_v37 = vpop.permute.xlu1 %8231  ;;  %v8230_v18 = vpop.permute.xlu0 %8229 }
0x1252   :  { %v8326_v51 = vadd.f32 %v8232_v37, %v15710_v56  ;;  %v8325_v4 = vadd.f32 %v8230_v18, %v15713_v54 }
0x1255   :  { %v8236_v14 = vpop.permute.xlu1 %8235  ;;  %v8234_v38 = vpop.permute.xlu0 %8233 }
0x1256   :  { %v8328_v29 = vadd.f32 %v8236_v14, %v15716_v17  ;;  %v8327_v55 = vadd.f32 %v8234_v38, %v15719_v2 }
0x1259   :  { %v8240_v31 = vpop.permute.xlu1 %8239  ;;  %v8238_v12 = vpop.permute.xlu0 %8237 }
0x125a   :  { %v8330_v56 = vadd.f32 %v8240_v31, %v15722_v23  ;;  %v8329_v54 = vadd.f32 %v8238_v12, %v15725_v32 }
0x125d   :  { %v8244_v39 = vpop.permute.xlu1 %8243  ;;  %v8242_v19 = vpop.permute.xlu0 %8241 }
0x125e   :  { %v8332_v17 = vadd.f32 %v8244_v39, %v15728_v40  ;;  %v8331_v2 = vadd.f32 %v8242_v19, %v15731_v53 }
0x1261   :  { %v8248_v44 = vpop.permute.xlu1 %8247  ;;  %v8246_v59 = vpop.permute.xlu0 %8245 }
0x1262   :  { %v8334_v35 = vadd.f32 %v8248_v44, %v15734_v11  ;;  %v8333_v37 = vadd.f32 %v8246_v59, %v15737_v25 }
0x1265   :  { %v8252_v33 = vpop.permute.xlu1 %8251  ;;  %v8250_v27 = vpop.permute.xlu0 %8249 }
0x1266   :  { %v8336_v18 = vadd.f32 %v8252_v33, %v15740_v3  ;;  %v8335_v14 = vadd.f32 %v8250_v27, %v15743_v16 }
0x1269   :  { %v8256_v48 = vpop.permute.xlu1 %8255  ;;  %v8254_v13 = vpop.permute.xlu0 %8253 }
0x126a   :  { %v8338_v44 = vadd.f32 %v8256_v48, %v15746_v36  ;;  %v8337_v59 = vadd.f32 %v8254_v13, %v15749_v8 }
0x1276   :  { %v15896_v7 = vpop.permute.xlu1 %8410  ;;  %v15898_v50 = vpop.permute.xlu0 %8406 }
0x1277   :  { %v8439_v30 = vadd.f32 %v15896_v7, %v8327_v55  ;;  %v8440_v9 = vadd.f32 %v15896_v7, %v8328_v29  ;;  %v8437_v26 = vadd.f32 %v15898_v50, %v8325_v4  ;;  %v8438_v58 = vadd.f32 %v15898_v50, %v8326_v51 }
0x1279   :  { %v8471_v45 = vmul.f32 0.23570226, %v8439_v30  ;;  %v8472_v5 = vmul.f32 0.23570226, %v8440_v9  ;;  %v8469_v10 = vmul.f32 0.23570226, %v8437_v26 }
0x127a   :  { %v8470_v42 = vmul.f32 0.23570226, %v8438_v58  ;;  %v15908_v24 = vpop.permute.xlu1 %8418  ;;  %v15910_v41 = vpop.permute.xlu0 %8414 }
0x127b   :  { %8504 = vst.msk [vmem:[#allocation2 + $0x10] sm:$0xff] %vm8501_vm0, %v8471_v45  ;;  %8505 = vst.msk [vmem:[#allocation2 + $0x18] sm:$0xff] %vm8501_vm0, %v8472_v5  ;;  %v8443_v23 = vadd.f32 %v15908_v24, %v8331_v2  ;;  %v8444_v32 = vadd.f32 %v15908_v24, %v8332_v17  ;;  %v8441_v40 = vadd.f32 %v15910_v41, %v8329_v54 }
0x127c   :  { %8502 = vst.msk [vmem:[#allocation2] sm:$0xff] %vm8501_vm0, %v8469_v10  ;;  %v8442_v53 = vadd.f32 %v15910_v41, %v8330_v56  ;;  %8503 = vst.msk [vmem:[#allocation2 + $0x8] sm:$0xff] %vm8501_vm0, %v8470_v42 }
0x127d   :  { %v8475_v38 = vmul.f32 0.23570226, %v8443_v23  ;;  %v8476_v31 = vmul.f32 0.23570226, %v8444_v32  ;;  %v8473_v12 = vmul.f32 0.23570226, %v8441_v40 }
0x127e   :  { %v8474_v39 = vmul.f32 0.23570226, %v8442_v53  ;;  %v15924_v19 = vpop.permute.xlu1 %8426  ;;  %v15926_v51 = vpop.permute.xlu0 %8422 }
0x127f   :  { %8508 = vst.msk [vmem:[#allocation2 + $0x30] sm:$0xff] %vm8501_vm0, %v8475_v38  ;;  %8509 = vst.msk [vmem:[#allocation2 + $0x38] sm:$0xff] %vm8501_vm0, %v8476_v31  ;;  %v8447_v11 = vadd.f32 %v15924_v19, %v8335_v14  ;;  %v8448_v25 = vadd.f32 %v15924_v19, %v8336_v18  ;;  %v8445_v3 = vadd.f32 %v15926_v51, %v8333_v37 }
0x1280   :  { %8506 = vst.msk [vmem:[#allocation2 + $0x20] sm:$0xff] %vm8501_vm0, %v8473_v12  ;;  %v8446_v16 = vadd.f32 %v15926_v51, %v8334_v35  ;;  %8507 = vst.msk [vmem:[#allocation2 + $0x28] sm:$0xff] %vm8501_vm0, %v8474_v39 }
0x1281   :  { %v8479_v33 = vmul.f32 0.23570226, %v8447_v11  ;;  %v8480_v27 = vmul.f32 0.23570226, %v8448_v25  ;;  %v8477_v4 = vmul.f32 0.23570226, %v8445_v3 }
0x1282   :  { %v8478_v29 = vmul.f32 0.23570226, %v8446_v16  ;;  %v15938_v55 = vpop.permute.xlu1 %8434  ;;  %v15940_v30 = vpop.permute.xlu0 %8430 }
0x1283   :  { %8512 = vst.msk [vmem:[#allocation2 + $0x50] sm:$0xff] %vm8501_vm0, %v8479_v33  ;;  %8513 = vst.msk [vmem:[#allocation2 + $0x58] sm:$0xff] %vm8501_vm0, %v8480_v27  ;;  %v8449_v36 = vadd.f32 %v15940_v30, %v8337_v59  ;;  %v8450_v48 = vadd.f32 %v15940_v30, %v8338_v44 }
0x1284   :  { %8510 = vst.msk [vmem:[#allocation2 + $0x40] sm:$0xff] %vm8501_vm0, %v8477_v4  ;;  %8511 = vst.msk [vmem:[#allocation2 + $0x48] sm:$0xff] %vm8501_vm0, %v8478_v29 }
0x1285   :  { %v8481_v8 = vmul.f32 0.23570226, %v8449_v36  ;;  %v8482_v13 = vmul.f32 0.23570226, %v8450_v48 }
0x1286   :  { %v8260_v9 = vpop.permute.xlu1 %8259  ;;  %v8258_v26 = vpop.permute.xlu0 %8257 }
0x1287   :  { %8514 = vst.msk [vmem:[#allocation2 + $0x60] sm:$0xff] %vm8501_vm0, %v8481_v8  ;;  %8515 = vst.msk [vmem:[#allocation2 + $0x68] sm:$0xff] %vm8501_vm0, %v8482_v13  ;;  %v8340_v58 = vadd.f32 %v8260_v9, %v15752_v0  ;;  %v8339_v56 = vadd.f32 %v8258_v26, %v15755_v43 }
0x1289   :  { %v8452_v54 = vadd.f32 %v15938_v55, %v8340_v58  ;;  %v8451_v17 = vadd.f32 %v15938_v55, %v8339_v56 }
0x128a   :  { %v8264_v2 = vpop.permute.xlu1 %8263  ;;  %v8262_v45 = vpop.permute.xlu0 %8261 }
0x128b   :  { %v8484_v5 = vmul.f32 0.23570226, %v8452_v54  ;;  %v8483_v10 = vmul.f32 0.23570226, %v8451_v17  ;;  %v8342_v42 = vadd.f32 %v8264_v2, %v15758_v15  ;;  %v8341_v23 = vadd.f32 %v8262_v45, %v15761_v52 }
0x128d   :  { %8517 = vst.msk [vmem:[#allocation2 + $0x78] sm:$0xff] %vm8501_vm0, %v8484_v5  ;;  %8516 = vst.msk [vmem:[#allocation2 + $0x70] sm:$0xff] %vm8501_vm0, %v8483_v10  ;;  %v8454_v0 = vadd.f32 %v15898_v50, %v8342_v42  ;;  %v8453_v43 = vadd.f32 %v15898_v50, %v8341_v23 }
0x128e   :  { %v8268_v32 = vpop.permute.xlu1 %8267  ;;  %v8266_v40 = vpop.permute.xlu0 %8265 }
0x128f   :  { %v8486_v53 = vmul.f32 0.23570226, %v8454_v0  ;;  %v8485_v35 = vmul.f32 0.23570226, %v8453_v43  ;;  %v8344_v37 = vadd.f32 %v8268_v32, %v15764_v57  ;;  %v8343_v18 = vadd.f32 %v8266_v40, %v15767_v6 }
0x1291   :  { %8519 = vst.msk [vmem:[#allocation2 + $0x88] sm:$0xff] %vm8501_vm0, %v8486_v53  ;;  %8518 = vst.msk [vmem:[#allocation2 + $0x80] sm:$0xff] %vm8501_vm0, %v8485_v35  ;;  %v8456_v15 = vadd.f32 %v15896_v7, %v8344_v37  ;;  %v8455_v52 = vadd.f32 %v15896_v7, %v8343_v18 }
0x1292   :  { %v8272_v14 = vpop.permute.xlu1 %8271  ;;  %v8270_v38 = vpop.permute.xlu0 %8269 }
0x1293   :  { %v8488_v31 = vmul.f32 0.23570226, %v8456_v15  ;;  %v8487_v50 = vmul.f32 0.23570226, %v8455_v52  ;;  %v8346_v12 = vadd.f32 %v8272_v14, %v15770_v62  ;;  %v8345_v39 = vadd.f32 %v8270_v38, %v15773_v21 }
0x1295   :  { %8521 = vst.msk [vmem:[#allocation2 + $0x98] sm:$0xff] %vm8501_vm0, %v8488_v31  ;;  %8520 = vst.msk [vmem:[#allocation2 + $0x90] sm:$0xff] %vm8501_vm0, %v8487_v50  ;;  %v8458_v57 = vadd.f32 %v15910_v41, %v8346_v12  ;;  %v8457_v6 = vadd.f32 %v15910_v41, %v8345_v39 }
0x1296   :  { %v8276_v11 = vpop.permute.xlu1 %8275  ;;  %v8274_v25 = vpop.permute.xlu0 %8273 }
0x1297   :  { %v8490_v3 = vmul.f32 0.23570226, %v8458_v57  ;;  %v8489_v7 = vmul.f32 0.23570226, %v8457_v6  ;;  %v8348_v16 = vadd.f32 %v8276_v11, %v15776_v1  ;;  %v8347_v44 = vadd.f32 %v8274_v25, %v15779_v60 }
0x1299   :  { %8523 = vst.msk [vmem:[#allocation2 + $0xa8] sm:$0xff] %vm8501_vm0, %v8490_v3  ;;  %8522 = vst.msk [vmem:[#allocation2 + $0xa0] sm:$0xff] %vm8501_vm0, %v8489_v7  ;;  %v8460_v62 = vadd.f32 %v15908_v24, %v8348_v16  ;;  %v8459_v21 = vadd.f32 %v15908_v24, %v8347_v44 }
0x129a   :  { %v8280_v59 = vpop.permute.xlu1 %8279  ;;  %v8278_v33 = vpop.permute.xlu0 %8277 }
0x129b   :  { %v8492_v27 = vmul.f32 0.23570226, %v8460_v62  ;;  %v8491_v41 = vmul.f32 0.23570226, %v8459_v21  ;;  %v8350_v4 = vadd.f32 %v8280_v59, %v15782_v61  ;;  %v8349_v29 = vadd.f32 %v8278_v33, %v15785_v46 }
0x129d   :  { %8525 = vst.msk [vmem:[#allocation2 + $0xb8] sm:$0xff] %vm8501_vm0, %v8492_v27  ;;  %8524 = vst.msk [vmem:[#allocation2 + $0xb0] sm:$0xff] %vm8501_vm0, %v8491_v41  ;;  %v8462_v1 = vadd.f32 %v15926_v51, %v8350_v4  ;;  %v8461_v60 = vadd.f32 %v15926_v51, %v8349_v29 }
0x129e   :  { %v8284_v36 = vpop.permute.xlu1 %8283  ;;  %v8282_v48 = vpop.permute.xlu0 %8281 }
0x129f   :  { %v8494_v8 = vmul.f32 0.23570226, %v8462_v1  ;;  %v8493_v24 = vmul.f32 0.23570226, %v8461_v60  ;;  %v8352_v13 = vadd.f32 %v8284_v36, %v15788_v47  ;;  %v8351_v9 = vadd.f32 %v8282_v48, %v15791_v34 }
0x12a0   :  { %v8083_v47 = vadd.f32 %v15890_v22, %v15619_v28 }
0x12a1   :  { %8527 = vst.msk [vmem:[#allocation2 + $0xc8] sm:$0xff] %vm8501_vm0, %v8494_v8  ;;  %8526 = vst.msk [vmem:[#allocation2 + $0xc0] sm:$0xff] %vm8501_vm0, %v8493_v24  ;;  %v8464_v61 = vadd.f32 %v15924_v19, %v8352_v13  ;;  %v8463_v46 = vadd.f32 %v15924_v19, %v8351_v9 }
0x12a2   :  { %v8288_v26 = vpop.permute.xlu1 %8287  ;;  %v8286_v58 = vpop.permute.xlu0 %8285 }
0x12a3   :  { %v8496_v56 = vmul.f32 0.23570226, %v8464_v61  ;;  %v8495_v51 = vmul.f32 0.23570226, %v8463_v46  ;;  %v8354_v54 = vadd.f32 %v8288_v26, %v15794_v49  ;;  %v8353_v17 = vadd.f32 %v8286_v58, %v15797_v63 }
0x12a5   :  { %8529 = vst.msk [vmem:[#allocation2 + $0xd8] sm:$0xff] %vm8501_vm0, %v8496_v56  ;;  %8528 = vst.msk [vmem:[#allocation2 + $0xd0] sm:$0xff] %vm8501_vm0, %v8495_v51  ;;  %v8466_v34 = vadd.f32 %v15940_v30, %v8354_v54  ;;  %v8465_v2 = vadd.f32 %v15940_v30, %v8353_v17 }
0x12a6   :  { %v8292_v19 = vpop.permute.xlu1 %8291  ;;  %v8290_v45 = vpop.permute.xlu0 %8289 }
0x12a7   :  { %v8498_v5 = vmul.f32 0.23570226, %v8466_v34  ;;  %v8497_v10 = vmul.f32 0.23570226, %v8465_v2  ;;  %v8356_v42 = vadd.f32 %v8292_v19, %v8083_v47  ;;  %v8355_v49 = vadd.f32 %v8290_v45, %v15800_v20 }
0x12a9   :  { %8531 = vst.msk [vmem:[#allocation2 + $0xe8] sm:$0xff] %vm8501_vm0, %v8498_v5  ;;  %8530 = vst.msk [vmem:[#allocation2 + $0xe0] sm:$0xff] %vm8501_vm0, %v8497_v10  ;;  %v8468_v28 = vadd.f32 %v15938_v55, %v8356_v42  ;;  %v8467_v63 = vadd.f32 %v15938_v55, %v8355_v49 }
0x12ab   :  { %v8500_v22 = vmul.f32 0.23570226, %v8468_v28  ;;  %v8499_v23 = vmul.f32 0.23570226, %v8467_v63 }
0x12ad   :  { %8533 = vst.msk [vmem:[#allocation2 + $0xf8] sm:$0xff] %vm8501_vm0, %v8500_v22  ;;  %8532 = vst.msk [vmem:[#allocation2 + $0xf0] sm:$0xff] %vm8501_vm0, %v8499_v23 }
0x12ae   :  { %9229 = shalt.err (!%p9226_p4)
}
0x12af   :  { %s9244_s16 = smov 128   ;;  %s9245_s17 = smov 8  }
0x12b0   :  { %8545 = dma.vmem_to_hbm [thread:$0]  %s8540_s15, 4096, %s16011_s3, [#allocation3], %s9244_s16, %s9244_s16, %s9245_s17  }
0x12b1   :  { %9238 = dma.done.wait [#allocation3], 4096  }
0x12b2   :  { %9239 = vsyncadd [#allocation3], 4294963200 }
0x12b3   :  { %8549 = vsyncpa [#allocation3], 1 }

</bundles_post_ra>
